<compile_context>
chip_gen: v7x
topology: tpu7x:2x2x1
jax: 0.10.0
libtpu: 0.0.40
codegen_flags: <defaults>
</compile_context>

<pallas_src>
import functools

import numpy as np

import jax
import jax.numpy as jnp
from jax.experimental import pallas as pl
from jax.experimental.pallas import tpu as pltpu

DROPOUT = 0.2
N_EMBD = 384  # matches the PyTorch module


def _ffwd_kernel(x_ref, w1_ref, b1_ref, w2_ref, b2_ref, *rest,
                 keep_threshold, keep_scale, apply_dropout):
    # x_ref: (TM, C); w1_ref: (C, 4C); b1_ref: (1, 4C); w2_ref: (4C, C); b2_ref: (1, C)
    if apply_dropout:
        bits_ref, o_ref = rest
    else:
        (o_ref,) = rest

    x = x_ref[...]

    # Linear 1 (MXU, f32 accumulation) + bias, then ReLU on the VPU.
    h = jnp.dot(x, w1_ref[...], preferred_element_type=jnp.float32) + b1_ref[...]
    h = jnp.maximum(h, 0.0)
    # Cast the hidden activation back to the weight dtype so the second matmul
    # runs at full MXU rate when params are bf16 (no-op for f32).
    h = h.astype(w2_ref.dtype)

    # Linear 2 (MXU, f32 accumulation) + bias.
    y = jnp.dot(h, w2_ref[...], preferred_element_type=jnp.float32) + b2_ref[...]

    if apply_dropout:
        # Inverted dropout: keep iff bits < (1-p)*2^32.  One compare + one
        # select + one constant vmul; no float conversion of the random bits.
        keep = bits_ref[...] < keep_threshold
        y = jnp.where(keep, y, 0.0) * keep_scale

    o_ref[...] = y.astype(o_ref.dtype)


def feed_forward(x, w1, b1, w2, b2, *, key=None, dropout_p=DROPOUT,
                 training=True, tile_m=256):
    """x: (..., C). Returns same shape/dtype as x.

    w1: (C, 4C), b1: (4C,), w2: (4C, C), b2: (C,).  Params may be f32 or bf16.
    """
    orig_shape = x.shape
    c = orig_shape[-1]
    hid = w1.shape[1]
    assert c % 128 == 0 and hid % 128 == 0, (
        "n_embd and 4*n_embd must be multiples of 128 for TPU lane tiling")

    x2 = x.reshape(-1, c)
    rows = x2.shape[0]

    # For tiny inputs, don't use a tile bigger than needed (but keep >= 128
    # rows for MXU / sublane alignment).  Pad rows to a multiple of tile_m so
    # the out_spec stays lane-dense and block shapes divide evenly.
    tile_m = min(tile_m, max(128, ((rows + 127) // 128) * 128))
    rows_padded = ((rows + tile_m - 1) // tile_m) * tile_m
    if rows_padded != rows:
        x2 = jnp.pad(x2, ((0, rows_padded - rows), (0, 0)))

    apply_dropout = bool(training) and dropout_p > 0.0

    b1_2d = b1.reshape(1, hid)
    b2_2d = b2.reshape(1, c)

    row_spec = pl.BlockSpec((tile_m, c), lambda i: (i, 0))
    in_specs = [
        row_spec,                                   # x tile
        pl.BlockSpec((c, hid), lambda i: (0, 0)),   # W1 (resident)
        pl.BlockSpec((1, hid), lambda i: (0, 0)),   # b1
        pl.BlockSpec((hid, c), lambda i: (0, 0)),   # W2 (resident)
        pl.BlockSpec((1, c),   lambda i: (0, 0)),   # b2
    ]
    args = [x2, w1, b1_2d, w2, b2_2d]

    keep_threshold = np.uint32(min(int((1.0 - dropout_p) * 2**32), 2**32 - 1))
    keep_scale = float(1.0 / (1.0 - dropout_p)) if apply_dropout else 1.0

    if apply_dropout:
        if key is None:
            key = jax.random.PRNGKey(0)
        bits = jax.random.bits(key, (rows_padded, c), dtype=jnp.uint32)
        in_specs.append(row_spec)                   # dropout bits tile
        args.append(bits)

    # Advisory cost estimate for XLA scheduling around the custom call.
    flops = 2 * rows_padded * c * hid * 2           # two GEMMs
    bytes_accessed = (
        x2.size * x2.dtype.itemsize
        + w1.size * w1.dtype.itemsize + w2.size * w2.dtype.itemsize
        + b1.size * b1.dtype.itemsize + b2.size * b2.dtype.itemsize
        + rows_padded * c * x.dtype.itemsize        # output
        + (rows_padded * c * 4 if apply_dropout else 0))

    kernel = functools.partial(
        _ffwd_kernel,
        keep_threshold=keep_threshold,
        keep_scale=keep_scale,
        apply_dropout=apply_dropout,
    )

    out = pl.pallas_call(
        kernel,
        out_shape=jax.ShapeDtypeStruct((rows_padded, c), x.dtype),
        grid_spec=pltpu.PrefetchScalarGridSpec(
            num_scalar_prefetch=0,
            grid=(rows_padded // tile_m,),
            in_specs=in_specs,
            out_specs=row_spec,
        ),
        compiler_params=pltpu.CompilerParams(
            # Row tiles are independent -> let Mosaic shard across both v7x TCs.
            dimension_semantics=("parallel",),
            # Explicit budget; fits comfortably within v7x's 64 MiB VMEM for
            # this C (weights double-buffered + row tiles << 48 MiB).
            vmem_limit_bytes=48 * 1024 * 1024,
        ),
        cost_estimate=pl.CostEstimate(
            flops=flops, transcendentals=0, bytes_accessed=bytes_accessed),
    )(*args)

    if rows_padded != rows:
        out = out[:rows]
    return out.reshape(orig_shape)


def init_params(key, n_embd, dtype=jnp.float32):
    """PyTorch nn.Linear-style uniform(-1/sqrt(fan_in), 1/sqrt(fan_in)) init."""
    hid = 4 * n_embd
    k1, k2, k3, k4 = jax.random.split(key, 4)
    lim1 = 1.0 / (n_embd ** 0.5)
    lim2 = 1.0 / (hid ** 0.5)
    w1 = jax.random.uniform(k1, (n_embd, hid), dtype, -lim1, lim1)
    b1 = jax.random.uniform(k2, (hid,), dtype, -lim1, lim1)
    w2 = jax.random.uniform(k3, (hid, n_embd), dtype, -lim2, lim2)
    b2 = jax.random.uniform(k4, (n_embd,), dtype, -lim2, lim2)
    return w1, b1, w2, b2


if __name__ == "__main__":
    # Small shapes consistent with the module: batch=2, seq=8, n_embd=384 (hidden=1536).
    B, T, C = 2, 8, N_EMBD
    key = jax.random.PRNGKey(0)
    kx, kp, kd = jax.random.split(key, 3)
    x = jax.random.normal(kx, (B, T, C), dtype=jnp.float32)
    w1, b1, w2, b2 = init_params(kp, C)

    # Eval path (dropout off): validate the matmul/ReLU path against pure JAX.
    y_eval = jax.block_until_ready(feed_forward(x, w1, b1, w2, b2, training=False))
    ref = jnp.maximum(x.reshape(-1, C) @ w1 + b1, 0.0) @ w2 + b2
    assert jnp.allclose(y_eval.reshape(-1, C), ref, atol=2e-2, rtol=2e-2), "mismatch"

    # Training path (inverted dropout with jax.random-generated mask bits).
    y_train = jax.block_until_ready(
        feed_forward(x, w1, b1, w2, b2, key=kd, training=True))
    assert y_train.shape == x.shape and y_train.dtype == x.dtype

    print("KERNEL_OK")
</pallas_src>

<mosaic_0001>
module attributes {stable_mosaic.version = 11 : i64} {
  func.func @_ffwd_kernel(%arg0: i32, %arg1: memref<128x384xf32, #tpu.memory_space<vmem>>, %arg2: memref<384x1536xf32, #tpu.memory_space<vmem>>, %arg3: memref<1x1536xf32, #tpu.memory_space<vmem>>, %arg4: memref<1536x384xf32, #tpu.memory_space<vmem>>, %arg5: memref<1x384xf32, #tpu.memory_space<vmem>>, %arg6: memref<128x384xf32, #tpu.memory_space<vmem>>) attributes {dimension_semantics = [#tpu.dimension_semantics<parallel>], iteration_bounds = array<i64: 1>, scalar_prefetch = 0 : i64, scratch_operands = 0 : i64, tpu.core_type = #tpu.core_type<tc>, window_params = [{transform_indices = @transform_0, window_bounds = array<i64: 128, 384>}, {pipeline_mode = #tpu.pipeline_mode<synchronous>, transform_indices = @transform_1, window_bounds = array<i64: 384, 1536>}, {pipeline_mode = #tpu.pipeline_mode<synchronous>, transform_indices = @transform_2, window_bounds = array<i64: 1, 1536>}, {pipeline_mode = #tpu.pipeline_mode<synchronous>, transform_indices = @transform_3, window_bounds = array<i64: 1536, 384>}, {pipeline_mode = #tpu.pipeline_mode<synchronous>, transform_indices = @transform_4, window_bounds = array<i64: 1, 384>}, {transform_indices = @transform_5, window_bounds = array<i64: 128, 384>}]} {
    %c0 = arith.constant 0 : index
    %c0_0 = arith.constant 0 : index
    %0 = vector.load %arg1[%c0, %c0_0] : memref<128x384xf32, #tpu.memory_space<vmem>>, vector<128x384xf32>
    %c0_1 = arith.constant 0 : index
    %c0_2 = arith.constant 0 : index
    %1 = vector.load %arg2[%c0_1, %c0_2] : memref<384x1536xf32, #tpu.memory_space<vmem>>, vector<384x1536xf32>
    %cst = arith.constant dense<0.000000e+00> : vector<128x1536xf32>
    %2 = tpu.matmul %0, %1, %cst {dimension_numbers = #tpu.dot_dimension_numbers<[1], [0], [0], [1], [0, 0, 1, 1], [], []>} : vector<128x384xf32>, vector<384x1536xf32>, vector<128x1536xf32> -> vector<128x1536xf32>
    %c0_3 = arith.constant 0 : index
    %c0_4 = arith.constant 0 : index
    %3 = vector.load %arg3[%c0_3, %c0_4] : memref<1x1536xf32, #tpu.memory_space<vmem>>, vector<1x1536xf32>
    %4 = vector.broadcast %3 : vector<1x1536xf32> to vector<128x1536xf32>
    %5 = arith.addf %2, %4 : vector<128x1536xf32>
    %cst_5 = arith.constant 0.000000e+00 : f32
    %6 = vector.broadcast %cst_5 : f32 to vector<128x1536xf32>
    %7 = arith.maximumf %5, %6 : vector<128x1536xf32>
    %c0_6 = arith.constant 0 : index
    %c0_7 = arith.constant 0 : index
    %8 = vector.load %arg4[%c0_6, %c0_7] : memref<1536x384xf32, #tpu.memory_space<vmem>>, vector<1536x384xf32>
    %cst_8 = arith.constant dense<0.000000e+00> : vector<128x384xf32>
    %9 = tpu.matmul %7, %8, %cst_8 {dimension_numbers = #tpu.dot_dimension_numbers<[1], [0], [0], [1], [0, 0, 1, 1], [], []>} : vector<128x1536xf32>, vector<1536x384xf32>, vector<128x384xf32> -> vector<128x384xf32>
    %c0_9 = arith.constant 0 : index
    %c0_10 = arith.constant 0 : index
    %10 = vector.load %arg5[%c0_9, %c0_10] : memref<1x384xf32, #tpu.memory_space<vmem>>, vector<1x384xf32>
    %11 = vector.broadcast %10 : vector<1x384xf32> to vector<128x384xf32>
    %12 = arith.addf %9, %11 : vector<128x384xf32>
    %c0_11 = arith.constant 0 : index
    %c0_12 = arith.constant 0 : index
    %13 = vector.load %arg6[%c0_11, %c0_12] : memref<128x384xf32, #tpu.memory_space<vmem>>, vector<128x384xf32>
    tpu.vector_store %arg6[%c0_11, %c0_12], %12 {strides = array<i32>} : memref<128x384xf32, #tpu.memory_space<vmem>>, vector<128x384xf32>,
    return
  }
  func.func @transform_0(%arg0: i32) -> (i32, i32) {
    %c0_i32 = arith.constant 0 : i32
    %c0_i32_0 = arith.constant 0 : i32
    return %arg0, %c0_i32 : i32, i32
  }
  func.func @transform_1(%arg0: i32) -> (i32, i32) {
    %c0_i32 = arith.constant 0 : i32
    %c0_i32_0 = arith.constant 0 : i32
    %c0_i32_1 = arith.constant 0 : i32
    return %c0_i32, %c0_i32_0 : i32, i32
  }
  func.func @transform_2(%arg0: i32) -> (i32, i32) {
    %c0_i32 = arith.constant 0 : i32
    %c0_i32_0 = arith.constant 0 : i32
    %c0_i32_1 = arith.constant 0 : i32
    return %c0_i32, %c0_i32_0 : i32, i32
  }
  func.func @transform_3(%arg0: i32) -> (i32, i32) {
    %c0_i32 = arith.constant 0 : i32
    %c0_i32_0 = arith.constant 0 : i32
    %c0_i32_1 = arith.constant 0 : i32
    return %c0_i32, %c0_i32_0 : i32, i32
  }
  func.func @transform_4(%arg0: i32) -> (i32, i32) {
    %c0_i32 = arith.constant 0 : i32
    %c0_i32_0 = arith.constant 0 : i32
    %c0_i32_1 = arith.constant 0 : i32
    return %c0_i32, %c0_i32_0 : i32, i32
  }
  func.func @transform_5(%arg0: i32) -> (i32, i32) {
    %c0_i32 = arith.constant 0 : i32
    %c0_i32_0 = arith.constant 0 : i32
    return %arg0, %c0_i32 : i32, i32
  }
}

</mosaic_0001>

<bundles_post_ra>
// kernel: tpu_custom_call.1
= control target key start
LH: loop header
LB: loop body
LE: loop exit
PB: predicated region body
PF: predicated region fallthrough
CT: control target
= control target key end

     0   :  { %10 = vsyncpa [#allocation3], 0  ;;  %s9196_s0 = inlined_call_operand.hbm [shape: f32[128,384], index: 0, kind: input, shape index: {}]   ;;  %s9197_s1 = inlined_call_operand.hbm [shape: f32[384,1536], index: 1, kind: input, shape index: {}]   ;;  %s9198_s2 = inlined_call_operand.hbm [shape: f32[1,1536], index: 2, kind: input, shape index: {}]   ;;  %s9199_s3 = inlined_call_operand.hbm [shape: f32[1536,384], index: 3, kind: input, shape index: {}]   ;;  %s9200_s4 = inlined_call_operand.hbm [shape: f32[1,384], index: 4, kind: input, shape index: {}]   ;;  %s9201_s5 = inlined_call_operand.hbm [shape: f32[128,384], index: 5, kind: output, shape index: {}]  }
   0x1   :  { %11 = vsyncpa [#allocation6], 0 }
   0x2   :  { %12 = vsyncpa [#allocation9], 0 }
   0x3   :  { %13 = vsyncpa [#allocation4], 0  ;;  %s7851_s18 = smov [#allocation5]   ;;  %s7711_s22 = scalar_lea.hbm %s9197_s1, 73728 }
   0x4   :  { %s31_s19 = sshll.u32 %s7851_s18, 4  ;;  %p7712_p0 = scmp.ne.s32.totalorder %s9197_s1, %s7711_s22  ;;  %s32_s19 = int_to_ptr.vmem [resolvable:$true] %s31_s19 }
   0x5   :  { %p7715_p1 = scmp.lt.u32.totalorder %s7711_s22, %s9197_s1 }
   0x7   :  { %p7717_p2 = pnand %p7715_p1, %p7712_p0 }
   0x9   :  { %7720 = shalt.err (!%p7717_p2)
}
   0xa   :  { %s7721_s27 = scalar_lea.vmem %s32_s19, 73728  ;;  %p7726_p4 = scmp.lt.s32.totalorder %s32_s19, %s32_s19 }
   0xb   :  { %p7722_p3 = scmp.ne.s32.totalorder %s32_s19, %s7721_s27  ;;  %p7727_p5 = scmp.lt.s32.totalorder %s7721_s27, %s7721_s27 }
   0xd   :  { %p7728_p6 = por %p7727_p5, %p7726_p4 }
   0xf   :  { %p7729_p7 = pnand %p7728_p6, %p7722_p3 }
  0x11   :  { %7732 = shalt.err (!%p7729_p7)
}
  0x12   :  { %s7852_s28 = smov 1536   ;;  %s7853_s29 = smov 96  }
  0x13   :  { %37 = dma.hbm_to_vmem [thread:$0]  %s9197_s1, 73728, %s32_s19, [#allocation6], %s7852_s28, %s7852_s28, %s7853_s29  }
  0x14   :  { %s7854_s7 = smov [#allocation8]   ;;  %s7855_s9 = smov [#allocation2]  }
  0x15   :  { %s53_s8 = sshll.u32 %s7854_s7, 4  ;;  %s19_s10 = sshll.u32 %s7855_s9, 4  ;;  %s54_s8 = int_to_ptr.vmem [resolvable:$true] %s53_s8  ;;  %s20_s10 = int_to_ptr.vmem [resolvable:$true] %s19_s10 }
  0x16   :  { %s7733_s13 = scalar_lea.hbm %s9199_s3, 73728 }
  0x17   :  { %p7734_p8 = scmp.ne.s32.totalorder %s9199_s3, %s7733_s13  ;;  %p7737_p9 = scmp.lt.u32.totalorder %s7733_s13, %s9199_s3 }
  0x19   :  { %p7739_p10 = pnand %p7737_p9, %p7734_p8 }
  0x1b   :  { %7742 = shalt.err (!%p7739_p10)
}
  0x1c   :  { %s7743_s1 = scalar_lea.vmem %s54_s8, 73728  ;;  %p7748_p12 = scmp.lt.s32.totalorder %s54_s8, %s54_s8 }
  0x1d   :  { %p7744_p11 = scmp.ne.s32.totalorder %s54_s8, %s7743_s1  ;;  %p7749_p13 = scmp.lt.s32.totalorder %s7743_s1, %s7743_s1 }
  0x1f   :  { %p7750_p0 = por %p7749_p13, %p7748_p12 }
  0x21   :  { %p7751_p1 = pnand %p7750_p0, %p7744_p11 }
  0x23   :  { %7754 = shalt.err (!%p7751_p1)
}
  0x24   :  { %s7856_s18 = smov 384   ;;  %s7857_s19 = smov 24  }
  0x25   :  { %59 = dma.hbm_to_vmem [thread:$0]  %s9199_s3, 73728, %s54_s8, [#allocation9], %s7856_s18, %s7856_s18, %s7857_s19  }
  0x26   :  { %s7755_s24 = scalar_lea.hbm %s9196_s0, 6144 }
  0x27   :  { %p7756_p2 = scmp.ne.s32.totalorder %s9196_s0, %s7755_s24  ;;  %p7759_p3 = scmp.lt.u32.totalorder %s7755_s24, %s9196_s0 }
  0x29   :  { %p7761_p4 = pnand %p7759_p3, %p7756_p2 }
  0x2b   :  { %7764 = shalt.err (!%p7761_p4)
}
  0x2c   :  { %s7765_s29 = scalar_lea.vmem %s20_s10, 6144  ;;  %p7770_p6 = scmp.lt.s32.totalorder %s20_s10, %s20_s10 }
  0x2d   :  { %p7766_p5 = scmp.ne.s32.totalorder %s20_s10, %s7765_s29  ;;  %p7771_p7 = scmp.lt.s32.totalorder %s7765_s29, %s7765_s29 }
  0x2f   :  { %p7772_p8 = por %p7771_p7, %p7770_p6 }
  0x31   :  { %p7773_p9 = pnand %p7772_p8, %p7766_p5 }
  0x33   :  { %7776 = shalt.err (!%p7773_p9)
}
  0x34   :  { %25 = dma.hbm_to_vmem [thread:$0]  %s9196_s0, 6144, %s20_s10, [#allocation3], %s7856_s18, %s7856_s18, %s7857_s19  }
  0x35   :  { %s7858_s6 = smov [#allocation7]   ;;  %s7859_s8 = smov [#allocation10]  }
  0x36   :  { %s44_s7 = sshll.u32 %s7858_s6, 4  ;;  %s66_s9 = sshll.u32 %s7859_s8, 4  ;;  %s45_s7 = int_to_ptr.vmem [resolvable:$true] %s44_s7  ;;  %s67_s9 = int_to_ptr.vmem [resolvable:$true] %s66_s9 }
  0x37   :  { %s7777_s13 = scalar_lea.hbm %s9198_s2, 192 }
  0x38   :  { %p7778_p10 = scmp.ne.s32.totalorder %s9198_s2, %s7777_s13  ;;  %p7781_p11 = scmp.lt.u32.totalorder %s7777_s13, %s9198_s2 }
  0x3a   :  { %p7783_p12 = pnand %p7781_p11, %p7778_p10 }
  0x3c   :  { %7786 = shalt.err (!%p7783_p12)
}
  0x3d   :  { %s7787_s0 = scalar_lea.vmem %s45_s7, 192  ;;  %p7792_p0 = scmp.lt.s32.totalorder %s45_s7, %s45_s7 }
  0x3e   :  { %p7788_p13 = scmp.ne.s32.totalorder %s45_s7, %s7787_s0  ;;  %p7793_p1 = scmp.lt.s32.totalorder %s7787_s0, %s7787_s0 }
  0x40   :  { %p7794_p2 = por %p7793_p1, %p7792_p0 }
  0x42   :  { %p7795_p3 = pnand %p7794_p2, %p7788_p13 }
  0x44   :  { %7798 = shalt.err (!%p7795_p3)
}
  0x45   :  { %47 = dma.hbm_to_vmem [thread:$0]  %s9198_s2, 192, %s45_s7, [#allocation6]  }
  0x46   :  { %s7799_s22 = scalar_lea.hbm %s9200_s4, 48 }
  0x47   :  { %p7800_p4 = scmp.ne.s32.totalorder %s9200_s4, %s7799_s22  ;;  %p7803_p5 = scmp.lt.u32.totalorder %s7799_s22, %s9200_s4 }
  0x49   :  { %p7805_p6 = pnand %p7803_p5, %p7800_p4 }
  0x4b   :  { %7808 = shalt.err (!%p7805_p6)
}
  0x4c   :  { %s7809_s27 = scalar_lea.vmem %s67_s9, 48  ;;  %s7813_s28 = scalar_lea.vmem %s67_s9, 64 }
  0x4d   :  { %p7810_p7 = scmp.ne.s32.totalorder %s67_s9, %s7809_s27  ;;  %p7814_p8 = scmp.lt.s32.totalorder %s67_s9, %s67_s9 }
  0x4e   :  { %p7815_p9 = scmp.lt.s32.totalorder %s7813_s28, %s7809_s27 }
  0x50   :  { %p7816_p10 = por %p7815_p9, %p7814_p8 }
  0x52   :  { %p7817_p11 = pnand %p7816_p10, %p7810_p7 }
  0x54   :  { %7820 = shalt.err (!%p7817_p11)
}
  0x55   :  { %69 = dma.hbm_to_vmem [thread:$0]  %s9200_s4, 48, %s67_s9, [#allocation9]  }
  0x56   :  { %7843 = dma.done.wait [#allocation3], 6144  }
  0x57   :  { %7844 = vsyncadd [#allocation3], 4294961152 }
  0x58   :  { %7845 = dma.done.wait [#allocation6], 73920  }
  0x59   :  { %7846 = vsyncadd [#allocation6], 4294893376 }
  0x5a   :  { %7847 = dma.done.wait [#allocation9], 73776  }
  0x5b   :  { %7848 = vsyncadd [#allocation9], 4294893520  ;;  %v134_v0 = vld [vmem:[#allocation5 + $0x8] sm:$0xff]  ;;  %v136_v2 = vld [vmem:[#allocation5 + $0x18] sm:$0xff]  ;;  %s7861_s4 = smov [#allocation11]  }
  0x5c   :  { %v146_v1 = vld [vmem:[#allocation5 + $0x68] sm:$0xff]  ;;  %v148_v4 = vld [vmem:[#allocation5 + $0x78] sm:$0xff]  ;;  %v133_v5 = vld [vmem:[#allocation5] sm:$0xff]  ;;  %s5379_s3 = sshll.u32 %s7861_s4, 4  ;;  %s5380_s3 = int_to_ptr.vmem [resolvable:$true] %s5379_s3 }
  0x5d   :  { %v5873_v3 = vpack.c.bf16 %v146_v1, %v134_v0  ;;  %v145_v6 = vld [vmem:[#allocation5 + $0x60] sm:$0xff]  ;;  %v5969_v7 = vpack.c.bf16 %v148_v4, %v136_v2  ;;  %v135_v9 = vld [vmem:[#allocation5 + $0x10] sm:$0xff]  ;;  %v158_v11 = vld [vmem:[#allocation5 + $0xc8] sm:$0xff]  ;;  %s7821_s30 = scalar_lea.vmem %s5380_s3, 6144  ;;  %p7826_p13 = scmp.lt.s32.totalorder %s5380_s3, %s5380_s3 }
  0x5e   :  { %v5875_v8 = vpack.c.bf16 %v145_v6, %v133_v5  ;;  %v147_v10 = vld [vmem:[#allocation5 + $0x70] sm:$0xff]  ;;  %v170_v13 = vld [vmem:[#allocation5 + $0x128] sm:$0xff]  ;;  %v160_v14 = vld [vmem:[#allocation5 + $0xd8] sm:$0xff]  ;;  %p7822_p12 = scmp.ne.s32.totalorder %s5380_s3, %s7821_s30  ;;  %p7827_p0 = scmp.lt.s32.totalorder %s7821_s30, %s7821_s30 }
  0x5f   :  { %5874 = vmatprep.subr.bf16.mxu0 %v5873_v3  ;;  %v5971_v12 = vpack.c.bf16 %v147_v10, %v135_v9  ;;  %v172_v15 = vld [vmem:[#allocation5 + $0x138] sm:$0xff]  ;;  %5970 = vmatprep.subr.bf16.mxu1 %v5969_v7  ;;  %v5877_v16 = vpack.c.bf16 %v170_v13, %v158_v11  ;;  %v157_v18 = vld [vmem:[#allocation5 + $0xc0] sm:$0xff]  ;;  %v159_v20 = vld [vmem:[#allocation5 + $0xd0] sm:$0xff] }
  0x60   :  { %5876 = vmatpush1.bf16.msra.mxu0 %v5875_v8  ;;  %v5973_v17 = vpack.c.bf16 %v172_v15, %v160_v14  ;;  %v169_v19 = vld [vmem:[#allocation5 + $0x120] sm:$0xff]  ;;  %v171_v22 = vld [vmem:[#allocation5 + $0x130] sm:$0xff]  ;;  %v182_v23 = vld [vmem:[#allocation5 + $0x188] sm:$0xff]  ;;  %p7828_p1 = por %p7827_p0, %p7826_p13 }
  0x61   :  { %5972 = vmatpush1.bf16.msra.mxu1 %v5971_v12  ;;  %v5879_v21 = vpack.c.bf16 %v169_v19, %v157_v18  ;;  %v194_v24 = vld [vmem:[#allocation5 + $0x1e8] sm:$0xff]  ;;  %5878 = vmatprep.subr.bf16.mxu0 %v5877_v16  ;;  %v5975_v25 = vpack.c.bf16 %v171_v22, %v159_v20  ;;  %v184_v27 = vld [vmem:[#allocation5 + $0x198] sm:$0xff]  ;;  %v181_v29 = vld [vmem:[#allocation5 + $0x180] sm:$0xff] }
  0x62   :  { %5974 = vmatprep.subr.bf16.mxu1 %v5973_v17  ;;  %v5881_v26 = vpack.c.bf16 %v194_v24, %v182_v23  ;;  %v196_v28 = vld [vmem:[#allocation5 + $0x1f8] sm:$0xff]  ;;  %v193_v31 = vld [vmem:[#allocation5 + $0x1e0] sm:$0xff]  ;;  %v183_v32 = vld [vmem:[#allocation5 + $0x190] sm:$0xff]  ;;  %p7829_p2 = pnand %p7828_p1, %p7822_p12 }
  0x63   :  { %v5977_v30 = vpack.c.bf16 %v196_v28, %v184_v27  ;;  %v195_v33 = vld [vmem:[#allocation5 + $0x1f0] sm:$0xff]  ;;  %v5883_v34 = vpack.c.bf16 %v193_v31, %v181_v29  ;;  %v206_v35 = vld [vmem:[#allocation5 + $0x248] sm:$0xff]  ;;  %v208_v37 = vld [vmem:[#allocation5 + $0x258] sm:$0xff] }
  0x64   :  { %5880 = vmatpush1.bf16.msra.mxu0 %v5879_v21  ;;  %v218_v36 = vld [vmem:[#allocation5 + $0x2a8] sm:$0xff]  ;;  %v5979_v38 = vpack.c.bf16 %v195_v33, %v183_v32  ;;  %v220_v40 = vld [vmem:[#allocation5 + $0x2b8] sm:$0xff]  ;;  %v205_v41 = vld [vmem:[#allocation5 + $0x240] sm:$0xff] }
  0x65   :  { %5976 = vmatpush1.bf16.msra.mxu1 %v5975_v25  ;;  %5882 = vmatprep.subr.bf16.mxu0 %v5881_v26  ;;  %v5885_v39 = vpack.c.bf16 %v218_v36, %v206_v35  ;;  %v217_v42 = vld [vmem:[#allocation5 + $0x2a0] sm:$0xff]  ;;  %v5981_v43 = vpack.c.bf16 %v220_v40, %v208_v37  ;;  %v207_v44 = vld [vmem:[#allocation5 + $0x250] sm:$0xff]  ;;  %v230_v46 = vld [vmem:[#allocation5 + $0x308] sm:$0xff] }
  0x66   :  { %5978 = vmatprep.subr.bf16.mxu1 %v5977_v30  ;;  %v219_v45 = vld [vmem:[#allocation5 + $0x2b0] sm:$0xff]  ;;  %v242_v47 = vld [vmem:[#allocation5 + $0x368] sm:$0xff]  ;;  %v232_v48 = vld [vmem:[#allocation5 + $0x318] sm:$0xff]  ;;  %v5887_v50 = vpack.c.bf16 %v217_v42, %v205_v41 }
  0x67   :  { %v244_v49 = vld [vmem:[#allocation5 + $0x378] sm:$0xff]  ;;  %v5983_v51 = vpack.c.bf16 %v219_v45, %v207_v44  ;;  %v5889_v52 = vpack.c.bf16 %v242_v47, %v230_v46  ;;  %v229_v53 = vld [vmem:[#allocation5 + $0x300] sm:$0xff]  ;;  %v231_v55 = vld [vmem:[#allocation5 + $0x310] sm:$0xff] }
  0x68   :  { %5884 = vmatpush1.bf16.msra.mxu0 %v5883_v34  ;;  %v241_v54 = vld [vmem:[#allocation5 + $0x360] sm:$0xff]  ;;  %v5985_v56 = vpack.c.bf16 %v244_v49, %v232_v48  ;;  %v243_v57 = vld [vmem:[#allocation5 + $0x370] sm:$0xff]  ;;  %v254_v58 = vld [vmem:[#allocation5 + $0x3c8] sm:$0xff] }
  0x69   :  { %5980 = vmatpush1.bf16.msra.mxu1 %v5979_v38  ;;  %5886 = vmatprep.subr.bf16.mxu0 %v5885_v39  ;;  %v266_v59 = vld [vmem:[#allocation5 + $0x428] sm:$0xff]  ;;  %v256_v60 = vld [vmem:[#allocation5 + $0x3d8] sm:$0xff]  ;;  %v5891_v62 = vpack.c.bf16 %v241_v54, %v229_v53  ;;  %v5987_v63 = vpack.c.bf16 %v243_v57, %v231_v55  ;;  %v253_v1 = vld [vmem:[#allocation5 + $0x3c0] sm:$0xff] }
  0x6a   :  { %5982 = vmatprep.subr.bf16.mxu1 %v5981_v43  ;;  %v268_v61 = vld [vmem:[#allocation5 + $0x438] sm:$0xff]  ;;  %v5893_v0 = vpack.c.bf16 %v266_v59, %v254_v58  ;;  %v265_v2 = vld [vmem:[#allocation5 + $0x420] sm:$0xff]  ;;  %v255_v3 = vld [vmem:[#allocation5 + $0x3d0] sm:$0xff] }
  0x6b   :  { %v5989_v4 = vpack.c.bf16 %v268_v61, %v256_v60  ;;  %v267_v5 = vld [vmem:[#allocation5 + $0x430] sm:$0xff]  ;;  %v278_v6 = vld [vmem:[#allocation5 + $0x488] sm:$0xff]  ;;  %v280_v8 = vld [vmem:[#allocation5 + $0x498] sm:$0xff]  ;;  %v5895_v10 = vpack.c.bf16 %v265_v2, %v253_v1 }
  0x6c   :  { %5888 = vmatpush1.bf16.msra.mxu0 %v5887_v50  ;;  %v290_v7 = vld [vmem:[#allocation5 + $0x4e8] sm:$0xff]  ;;  %v292_v9 = vld [vmem:[#allocation5 + $0x4f8] sm:$0xff]  ;;  %v5991_v11 = vpack.c.bf16 %v267_v5, %v255_v3  ;;  %v277_v13 = vld [vmem:[#allocation5 + $0x480] sm:$0xff] }
  0x6d   :  { %5984 = vmatpush1.bf16.msra.mxu1 %v5983_v51  ;;  %5890 = vmatprep.subr.bf16.mxu0 %v5889_v52  ;;  %v5897_v12 = vpack.c.bf16 %v290_v7, %v278_v6  ;;  %v289_v14 = vld [vmem:[#allocation5 + $0x4e0] sm:$0xff]  ;;  %v279_v15 = vld [vmem:[#allocation5 + $0x490] sm:$0xff]  ;;  %v5993_v16 = vpack.c.bf16 %v292_v9, %v280_v8  ;;  %v302_v18 = vld [vmem:[#allocation5 + $0x548] sm:$0xff] }
  0x6e   :  { %5986 = vmatprep.subr.bf16.mxu1 %v5985_v56  ;;  %v291_v17 = vld [vmem:[#allocation5 + $0x4f0] sm:$0xff]  ;;  %v314_v19 = vld [vmem:[#allocation5 + $0x5a8] sm:$0xff]  ;;  %v304_v20 = vld [vmem:[#allocation5 + $0x558] sm:$0xff]  ;;  %v5899_v22 = vpack.c.bf16 %v289_v14, %v277_v13 }
  0x6f   :  { %v316_v21 = vld [vmem:[#allocation5 + $0x5b8] sm:$0xff]  ;;  %v5995_v23 = vpack.c.bf16 %v291_v17, %v279_v15  ;;  %v5901_v24 = vpack.c.bf16 %v314_v19, %v302_v18  ;;  %v301_v25 = vld [vmem:[#allocation5 + $0x540] sm:$0xff]  ;;  %v303_v27 = vld [vmem:[#allocation5 + $0x550] sm:$0xff] }
  0x70   :  { %5892 = vmatpush1.bf16.msra.mxu0 %v5891_v62  ;;  %v313_v26 = vld [vmem:[#allocation5 + $0x5a0] sm:$0xff]  ;;  %v5997_v28 = vpack.c.bf16 %v316_v21, %v304_v20  ;;  %v315_v29 = vld [vmem:[#allocation5 + $0x5b0] sm:$0xff]  ;;  %v326_v30 = vld [vmem:[#allocation5 + $0x608] sm:$0xff] }
  0x71   :  { %5988 = vmatpush1.bf16.msra.mxu1 %v5987_v63  ;;  %5894 = vmatprep.subr.bf16.mxu0 %v5893_v0  ;;  %v338_v31 = vld [vmem:[#allocation5 + $0x668] sm:$0xff]  ;;  %v328_v32 = vld [vmem:[#allocation5 + $0x618] sm:$0xff]  ;;  %v5903_v34 = vpack.c.bf16 %v313_v26, %v301_v25  ;;  %v5999_v35 = vpack.c.bf16 %v315_v29, %v303_v27  ;;  %v325_v37 = vld [vmem:[#allocation5 + $0x600] sm:$0xff] }
  0x72   :  { %5990 = vmatprep.subr.bf16.mxu1 %v5989_v4  ;;  %v340_v33 = vld [vmem:[#allocation5 + $0x678] sm:$0xff]  ;;  %v5905_v36 = vpack.c.bf16 %v338_v31, %v326_v30  ;;  %v337_v38 = vld [vmem:[#allocation5 + $0x660] sm:$0xff]  ;;  %v327_v39 = vld [vmem:[#allocation5 + $0x610] sm:$0xff] }
  0x73   :  { %v6001_v40 = vpack.c.bf16 %v340_v33, %v328_v32  ;;  %v339_v41 = vld [vmem:[#allocation5 + $0x670] sm:$0xff]  ;;  %v350_v42 = vld [vmem:[#allocation5 + $0x6c8] sm:$0xff]  ;;  %v352_v44 = vld [vmem:[#allocation5 + $0x6d8] sm:$0xff]  ;;  %v5907_v46 = vpack.c.bf16 %v337_v38, %v325_v37 }
  0x74   :  { %5896 = vmatpush1.bf16.msra.mxu0 %v5895_v10  ;;  %v362_v43 = vld [vmem:[#allocation5 + $0x728] sm:$0xff]  ;;  %v364_v45 = vld [vmem:[#allocation5 + $0x738] sm:$0xff]  ;;  %v6003_v47 = vpack.c.bf16 %v339_v41, %v327_v39  ;;  %v349_v49 = vld [vmem:[#allocation5 + $0x6c0] sm:$0xff] }
  0x75   :  { %5992 = vmatpush1.bf16.msra.mxu1 %v5991_v11  ;;  %5898 = vmatprep.subr.bf16.mxu0 %v5897_v12  ;;  %v5909_v48 = vpack.c.bf16 %v362_v43, %v350_v42  ;;  %v361_v50 = vld [vmem:[#allocation5 + $0x720] sm:$0xff]  ;;  %v351_v51 = vld [vmem:[#allocation5 + $0x6d0] sm:$0xff]  ;;  %v6005_v52 = vpack.c.bf16 %v364_v45, %v352_v44  ;;  %v374_v54 = vld [vmem:[#allocation5 + $0x788] sm:$0xff] }
  0x76   :  { %5994 = vmatprep.subr.bf16.mxu1 %v5993_v16  ;;  %v363_v53 = vld [vmem:[#allocation5 + $0x730] sm:$0xff]  ;;  %v386_v55 = vld [vmem:[#allocation5 + $0x7e8] sm:$0xff]  ;;  %v376_v56 = vld [vmem:[#allocation5 + $0x798] sm:$0xff]  ;;  %v5911_v58 = vpack.c.bf16 %v361_v50, %v349_v49 }
  0x77   :  { %v388_v57 = vld [vmem:[#allocation5 + $0x7f8] sm:$0xff]  ;;  %v6007_v59 = vpack.c.bf16 %v363_v53, %v351_v51  ;;  %v5913_v60 = vpack.c.bf16 %v386_v55, %v374_v54  ;;  %v373_v61 = vld [vmem:[#allocation5 + $0x780] sm:$0xff]  ;;  %v375_v63 = vld [vmem:[#allocation5 + $0x790] sm:$0xff] }
  0x78   :  { %5900 = vmatpush1.bf16.msra.mxu0 %v5899_v22  ;;  %v385_v62 = vld [vmem:[#allocation5 + $0x7e0] sm:$0xff]  ;;  %v6009_v0 = vpack.c.bf16 %v388_v57, %v376_v56  ;;  %v387_v1 = vld [vmem:[#allocation5 + $0x7f0] sm:$0xff]  ;;  %v398_v2 = vld [vmem:[#allocation5 + $0x848] sm:$0xff] }
  0x79   :  { %5996 = vmatpush1.bf16.msra.mxu1 %v5995_v23  ;;  %5902 = vmatprep.subr.bf16.mxu0 %v5901_v24  ;;  %v410_v3 = vld [vmem:[#allocation5 + $0x8a8] sm:$0xff]  ;;  %v400_v4 = vld [vmem:[#allocation5 + $0x858] sm:$0xff]  ;;  %v5915_v6 = vpack.c.bf16 %v385_v62, %v373_v61  ;;  %v397_v7 = vld [vmem:[#allocation5 + $0x840] sm:$0xff]  ;;  %v6011_v8 = vpack.c.bf16 %v387_v1, %v375_v63 }
  0x7a   :  { %5998 = vmatprep.subr.bf16.mxu1 %v5997_v28  ;;  %v412_v5 = vld [vmem:[#allocation5 + $0x8b8] sm:$0xff]  ;;  %v5917_v9 = vpack.c.bf16 %v410_v3, %v398_v2  ;;  %v409_v10 = vld [vmem:[#allocation5 + $0x8a0] sm:$0xff]  ;;  %v399_v11 = vld [vmem:[#allocation5 + $0x850] sm:$0xff] }
  0x7b   :  { %v411_v12 = vld [vmem:[#allocation5 + $0x8b0] sm:$0xff]  ;;  %v6013_v13 = vpack.c.bf16 %v412_v5, %v400_v4  ;;  %v422_v14 = vld [vmem:[#allocation5 + $0x908] sm:$0xff]  ;;  %v424_v17 = vld [vmem:[#allocation5 + $0x918] sm:$0xff]  ;;  %v5919_v19 = vpack.c.bf16 %v409_v10, %v397_v7 }
  0x7c   :  { %5904 = vmatpush1.bf16.msra.mxu0 %v5903_v34  ;;  %v434_v15 = vld [vmem:[#allocation5 + $0x968] sm:$0xff]  ;;  %v436_v18 = vld [vmem:[#allocation5 + $0x978] sm:$0xff]  ;;  %v6015_v20 = vpack.c.bf16 %v411_v12, %v399_v11  ;;  %v421_v22 = vld [vmem:[#allocation5 + $0x900] sm:$0xff] }
  0x7d   :  { %6000 = vmatpush1.bf16.msra.mxu1 %v5999_v35  ;;  %5906 = vmatprep.subr.bf16.mxu0 %v5905_v36  ;;  %v86_v16 = vld [vmem:[#allocation2 + $0x8] sm:$0xff]  ;;  %v5921_v21 = vpack.c.bf16 %v434_v15, %v422_v14  ;;  %v433_v23 = vld [vmem:[#allocation5 + $0x960] sm:$0xff]  ;;  %v423_v24 = vld [vmem:[#allocation5 + $0x910] sm:$0xff]  ;;  %v6017_v25 = vpack.c.bf16 %v436_v18, %v424_v17 }
  0x7e   :  { %6002 = vmatprep.subr.bf16.mxu1 %v6001_v40  ;;  %837 = vmatprep.mubr.f32.mxu0 %v86_v16  ;;  %v435_v26 = vld [vmem:[#allocation5 + $0x970] sm:$0xff]  ;;  %v446_v27 = vld [vmem:[#allocation5 + $0x9c8] sm:$0xff]  ;;  %v448_v29 = vld [vmem:[#allocation5 + $0x9d8] sm:$0xff]  ;;  %v5923_v31 = vpack.c.bf16 %v433_v23, %v421_v22 }
  0x7f   :  { %1159 = vmatprep.mubr.f32.mxu1 %v86_v16  ;;  %v458_v28 = vld [vmem:[#allocation5 + $0xa28] sm:$0xff]  ;;  %v460_v30 = vld [vmem:[#allocation5 + $0xa38] sm:$0xff]  ;;  %v6019_v32 = vpack.c.bf16 %v435_v26, %v423_v24  ;;  %v445_v34 = vld [vmem:[#allocation5 + $0x9c0] sm:$0xff] }
  0x80   :  { %5908 = vmatpush1.bf16.msra.mxu0 %v5907_v46  ;;  %v5925_v33 = vpack.c.bf16 %v458_v28, %v446_v27  ;;  %v457_v35 = vld [vmem:[#allocation5 + $0xa20] sm:$0xff]  ;;  %v447_v36 = vld [vmem:[#allocation5 + $0x9d0] sm:$0xff]  ;;  %v6021_v37 = vpack.c.bf16 %v460_v30, %v448_v29  ;;  %v470_v39 = vld [vmem:[#allocation5 + $0xa88] sm:$0xff] }
  0x81   :  { %6004 = vmatpush1.bf16.msra.mxu1 %v6003_v47  ;;  %5910 = vmatprep.subr.bf16.mxu0 %v5909_v48  ;;  %v459_v38 = vld [vmem:[#allocation5 + $0xa30] sm:$0xff]  ;;  %v482_v40 = vld [vmem:[#allocation5 + $0xae8] sm:$0xff]  ;;  %v472_v41 = vld [vmem:[#allocation5 + $0xa98] sm:$0xff]  ;;  %v5927_v43 = vpack.c.bf16 %v457_v35, %v445_v34 }
  0x82   :  { %6006 = vmatprep.subr.bf16.mxu1 %v6005_v52  ;;  %v484_v42 = vld [vmem:[#allocation5 + $0xaf8] sm:$0xff]  ;;  %v6023_v44 = vpack.c.bf16 %v459_v38, %v447_v36  ;;  %v5929_v45 = vpack.c.bf16 %v482_v40, %v470_v39  ;;  %v469_v46 = vld [vmem:[#allocation5 + $0xa80] sm:$0xff]  ;;  %v471_v48 = vld [vmem:[#allocation5 + $0xa90] sm:$0xff] }
  0x83   :  { %v481_v47 = vld [vmem:[#allocation5 + $0xae0] sm:$0xff]  ;;  %v6025_v49 = vpack.c.bf16 %v484_v42, %v472_v41  ;;  %v483_v50 = vld [vmem:[#allocation5 + $0xaf0] sm:$0xff]  ;;  %v494_v51 = vld [vmem:[#allocation5 + $0xb48] sm:$0xff] }
  0x84   :  { %5912 = vmatpush1.bf16.msra.mxu0 %v5911_v58  ;;  %v506_v52 = vld [vmem:[#allocation5 + $0xba8] sm:$0xff]  ;;  %v496_v53 = vld [vmem:[#allocation5 + $0xb58] sm:$0xff]  ;;  %v5931_v55 = vpack.c.bf16 %v481_v47, %v469_v46  ;;  %v6027_v56 = vpack.c.bf16 %v483_v50, %v471_v48  ;;  %v493_v58 = vld [vmem:[#allocation5 + $0xb40] sm:$0xff] }
  0x85   :  { %6008 = vmatpush1.bf16.msra.mxu1 %v6007_v59  ;;  %5914 = vmatprep.subr.bf16.mxu0 %v5913_v60  ;;  %v508_v54 = vld [vmem:[#allocation5 + $0xbb8] sm:$0xff]  ;;  %v5933_v57 = vpack.c.bf16 %v506_v52, %v494_v51  ;;  %v505_v59 = vld [vmem:[#allocation5 + $0xba0] sm:$0xff]  ;;  %v495_v60 = vld [vmem:[#allocation5 + $0xb50] sm:$0xff] }
  0x86   :  { %6010 = vmatprep.subr.bf16.mxu1 %v6009_v0  ;;  %v6029_v61 = vpack.c.bf16 %v508_v54, %v496_v53  ;;  %v507_v62 = vld [vmem:[#allocation5 + $0xbb0] sm:$0xff]  ;;  %v518_v63 = vld [vmem:[#allocation5 + $0xc08] sm:$0xff]  ;;  %v520_v1 = vld [vmem:[#allocation5 + $0xc18] sm:$0xff]  ;;  %v5935_v3 = vpack.c.bf16 %v505_v59, %v493_v58 }
  0x87   :  { %v530_v0 = vld [vmem:[#allocation5 + $0xc68] sm:$0xff]  ;;  %v532_v2 = vld [vmem:[#allocation5 + $0xc78] sm:$0xff]  ;;  %v6031_v4 = vpack.c.bf16 %v507_v62, %v495_v60  ;;  %v519_v5 = vld [vmem:[#allocation5 + $0xc10] sm:$0xff] }
  0x88   :  { %5916 = vmatpush1.bf16.msra.mxu0 %v5915_v6  ;;  %v5937_v6 = vpack.c.bf16 %v530_v0, %v518_v63  ;;  %v6033_v7 = vpack.c.bf16 %v532_v2, %v520_v1  ;;  %v529_v10 = vld [vmem:[#allocation5 + $0xc60] sm:$0xff]  ;;  %v544_v11 = vld [vmem:[#allocation5 + $0xcd8] sm:$0xff]  ;;  %v542_v14 = vld [vmem:[#allocation5 + $0xcc8] sm:$0xff] }
  0x89   :  { %6012 = vmatpush1.bf16.msra.mxu1 %v6011_v8  ;;  %5918 = vmatprep.subr.bf16.mxu0 %v5917_v9  ;;  %v531_v8 = vld [vmem:[#allocation5 + $0xc70] sm:$0xff]  ;;  %v517_v9 = vld [vmem:[#allocation5 + $0xc00] sm:$0xff]  ;;  %v556_v12 = vld [vmem:[#allocation5 + $0xd38] sm:$0xff] }
  0x8a   :  { %6014 = vmatprep.subr.bf16.mxu1 %v6013_v13  ;;  %v85_v13 = vld [vmem:[#allocation2] sm:$0xff]  ;;  %v554_v15 = vld [vmem:[#allocation5 + $0xd28] sm:$0xff]  ;;  %v6035_v16 = vpack.c.bf16 %v531_v8, %v519_v5  ;;  %v5939_v18 = vpack.c.bf16 %v529_v10, %v517_v9  ;;  %v580_v26 = vld [vmem:[#allocation5 + $0xdf8] sm:$0xff] }
  0x8b   :  { %v89_v17 = vld [vmem:[#allocation2 + $0x20] sm:$0xff]  ;;  %v5941_v23 = vpack.c.bf16 %v554_v15, %v542_v14  ;;  %v88_v27 = vld [vmem:[#allocation2 + $0x18] sm:$0xff]  ;;  %v566_v28 = vld [vmem:[#allocation5 + $0xd88] sm:$0xff] }
  0x8c   :  { %5920 = vmatpush1.bf16.msra.mxu0 %v5919_v19  ;;  %v6037_v19 = vpack.c.bf16 %v556_v12, %v544_v11  ;;  %v541_v22 = vld [vmem:[#allocation5 + $0xcc0] sm:$0xff]  ;;  %v578_v29 = vld [vmem:[#allocation5 + $0xde8] sm:$0xff]  ;;  %v92_v30 = vld [vmem:[#allocation2 + $0x38] sm:$0xff] }
  0x8d   :  { %6016 = vmatpush1.bf16.msra.mxu1 %v6015_v20  ;;  %5922 = vmatprep.subr.bf16.mxu0 %v5921_v21  ;;  %v543_v20 = vld [vmem:[#allocation5 + $0xcd0] sm:$0xff]  ;;  %v553_v24 = vld [vmem:[#allocation5 + $0xd20] sm:$0xff]  ;;  %v592_v39 = vld [vmem:[#allocation5 + $0xe58] sm:$0xff] }
  0x8e   :  { %6018 = vmatprep.subr.bf16.mxu1 %v6017_v25  ;;  %v555_v21 = vld [vmem:[#allocation5 + $0xd30] sm:$0xff]  ;;  %v568_v25 = vld [vmem:[#allocation5 + $0xd98] sm:$0xff]  ;;  %v565_v36 = vld [vmem:[#allocation5 + $0xd80] sm:$0xff] }
  0x8f   :  { %v567_v34 = vld [vmem:[#allocation5 + $0xd90] sm:$0xff]  ;;  %v577_v38 = vld [vmem:[#allocation5 + $0xde0] sm:$0xff]  ;;  %v604_v40 = vld [vmem:[#allocation5 + $0xeb8] sm:$0xff] }
  0x90   :  { %5924 = vmatpush1.bf16.msra.mxu0 %v5923_v31  ;;  %v6039_v31 = vpack.c.bf16 %v555_v21, %v543_v20  ;;  %v579_v35 = vld [vmem:[#allocation5 + $0xdf0] sm:$0xff]  ;;  %v590_v42 = vld [vmem:[#allocation5 + $0xe48] sm:$0xff]  ;;  %v5947_v46 = vpack.c.bf16 %v577_v38, %v565_v36  ;;  %v6045_v47 = vpack.c.bf16 %v604_v40, %v592_v39  ;;  %v589_v50 = vld [vmem:[#allocation5 + $0xe40] sm:$0xff] }
  0x91   :  { %6020 = vmatpush1.bf16.msra.mxu1 %v6019_v32  ;;  %5926 = vmatprep.subr.bf16.mxu0 %v5925_v33  ;;  %v5943_v32 = vpack.c.bf16 %v553_v24, %v541_v22  ;;  %v6041_v33 = vpack.c.bf16 %v580_v26, %v568_v25  ;;  %v91_v41 = vld [vmem:[#allocation2 + $0x30] sm:$0xff]  ;;  %v601_v52 = vld [vmem:[#allocation5 + $0xea0] sm:$0xff]  ;;  %v616_v53 = vld [vmem:[#allocation5 + $0xf18] sm:$0xff] }
  0x92   :  { %6022 = vmatprep.subr.bf16.mxu1 %v6021_v37  ;;  %v5945_v37 = vpack.c.bf16 %v578_v29, %v566_v28  ;;  %v591_v48 = vld [vmem:[#allocation5 + $0xe50] sm:$0xff]  ;;  %v628_v54 = vld [vmem:[#allocation5 + $0xf78] sm:$0xff]  ;;  %v98_v58 = vld [vmem:[#allocation2 + $0x68] sm:$0xff]  ;;  %v5951_v60 = vpack.c.bf16 %v601_v52, %v589_v50 }
  0x93   :  { %v615_v62 = vld [vmem:[#allocation5 + $0xf10] sm:$0xff]  ;;  %v613_v0 = vld [vmem:[#allocation5 + $0xf00] sm:$0xff]  ;;  %v662_v20 = vld [vmem:[#allocation5 + $0x1088] sm:$0xff] }
  0x94   :  { %5928 = vmatpush1.bf16.msra.mxu0 %v5927_v43  ;;  %v602_v43 = vld [vmem:[#allocation5 + $0xea8] sm:$0xff]  ;;  %v627_v63 = vld [vmem:[#allocation5 + $0xf70] sm:$0xff]  ;;  %v625_v2 = vld [vmem:[#allocation5 + $0xf60] sm:$0xff] }
  0x95   :  { %6024 = vmatpush1.bf16.msra.mxu1 %v6023_v44  ;;  %5930 = vmatprep.subr.bf16.mxu0 %v5929_v45  ;;  %v95_v44 = vld [vmem:[#allocation2 + $0x50] sm:$0xff]  ;;  %v6043_v45 = vpack.c.bf16 %v579_v35, %v567_v34  ;;  %v5949_v51 = vpack.c.bf16 %v602_v43, %v590_v42  ;;  %v97_v5 = vld [vmem:[#allocation2 + $0x60] sm:$0xff]  ;;  %v6051_v9 = vpack.c.bf16 %v627_v63, %v615_v62  ;;  %v674_v21 = vld [vmem:[#allocation5 + $0x10e8] sm:$0xff] }
  0x96   :  { %6026 = vmatprep.subr.bf16.mxu1 %v6025_v49  ;;  %v603_v49 = vld [vmem:[#allocation5 + $0xeb0] sm:$0xff]  ;;  %v101_v8 = vld [vmem:[#allocation2 + $0x80] sm:$0xff]  ;;  %v5955_v10 = vpack.c.bf16 %v625_v2, %v613_v0  ;;  %v104_v22 = vld [vmem:[#allocation2 + $0x98] sm:$0xff]  ;;  %v5961_v29 = vpack.c.bf16 %v674_v21, %v662_v20 }
  0x97   :  { %v6047_v59 = vpack.c.bf16 %v603_v49, %v591_v48  ;;  %v639_v12 = vld [vmem:[#allocation5 + $0xfd0] sm:$0xff]  ;;  %v637_v14 = vld [vmem:[#allocation5 + $0xfc0] sm:$0xff]  ;;  %v686_v34 = vld [vmem:[#allocation5 + $0x1148] sm:$0xff] }
  0x98   :  { %5932 = vmatpush1.bf16.msra.mxu0 %v5931_v55  ;;  %v94_v55 = vld [vmem:[#allocation2 + $0x48] sm:$0xff]  ;;  %v663_v26 = vld [vmem:[#allocation5 + $0x1090] sm:$0xff]  ;;  %v661_v28 = vld [vmem:[#allocation5 + $0x1080] sm:$0xff] }
  0x99   :  { %6028 = vmatpush1.bf16.msra.mxu1 %v6027_v56  ;;  %5934 = vmatprep.subr.bf16.mxu0 %v5933_v57  ;;  %v614_v56 = vld [vmem:[#allocation5 + $0xf08] sm:$0xff]  ;;  %v107_v36 = vld [vmem:[#allocation2 + $0xb0] sm:$0xff]  ;;  %v685_v42 = vld [vmem:[#allocation5 + $0x1140] sm:$0xff] }
  0x9a   :  { %6030 = vmatprep.subr.bf16.mxu1 %v6029_v61  ;;  %v626_v57 = vld [vmem:[#allocation5 + $0xf68] sm:$0xff]  ;;  %v6049_v61 = vpack.c.bf16 %v628_v54, %v616_v53  ;;  %v687_v40 = vld [vmem:[#allocation5 + $0x1150] sm:$0xff]  ;;  %v121_v63 = vld [vmem:[#allocation2 + $0x120] sm:$0xff] }
  0x9b   :  { %v5953_v1 = vpack.c.bf16 %v626_v57, %v614_v56  ;;  %v698_v35 = vld [vmem:[#allocation5 + $0x11a8] sm:$0xff]  ;;  %v113_v56 = vld [vmem:[#allocation2 + $0xe0] sm:$0xff]  ;;  %v112_v57 = vld [vmem:[#allocation2 + $0xd8] sm:$0xff] }
  0x9c   :  { %5936 = vmatpush1.bf16.msra.mxu0 %v5935_v3  ;;  %v640_v3 = vld [vmem:[#allocation5 + $0xfd8] sm:$0xff]  ;;  %v5965_v43 = vpack.c.bf16 %v698_v35, %v686_v34  ;;  %v138_v48 = vld [vmem:[#allocation5 + $0x28] sm:$0xff]  ;;  %v125_v0 = vld [vmem:[#allocation2 + $0x140] sm:$0xff] }
  0x9d   :  { %6032 = vmatpush1.bf16.msra.mxu1 %v6031_v4  ;;  %5938 = vmatprep.subr.bf16.mxu0 %v5937_v6  ;;  %v652_v4 = vld [vmem:[#allocation5 + $0x1038] sm:$0xff]  ;;  %v638_v6 = vld [vmem:[#allocation5 + $0xfc8] sm:$0xff]  ;;  %v163_v21 = vld [vmem:[#allocation5 + $0xf0] sm:$0xff] }
  0x9e   :  { %6034 = vmatprep.subr.bf16.mxu1 %v6033_v7  ;;  %v650_v7 = vld [vmem:[#allocation5 + $0x1028] sm:$0xff]  ;;  %v6053_v11 = vpack.c.bf16 %v652_v4, %v640_v3  ;;  %v128_v2 = vld [vmem:[#allocation2 + $0x158] sm:$0xff]  ;;  %v127_v3 = vld [vmem:[#allocation2 + $0x150] sm:$0xff] }
  0x9f   :  { %838 = vmatmul.mubr.f32.vlgmr.msra.gmra.mrb[0].mxu0 %v85_v13  ;;  %v5957_v15 = vpack.c.bf16 %v650_v7, %v638_v6  ;;  %v150_v49 = vld [vmem:[#allocation5 + $0x88] sm:$0xff]  ;;  %v131_v4 = vld [vmem:[#allocation2 + $0x170] sm:$0xff]  ;;  %v137_v6 = vld [vmem:[#allocation5 + $0x20] sm:$0xff] }
  0xa0   :  { %1160 = vmatmul.mubr.f32.vlgmr.msra.gmra.mrb[0].mxu1 %v85_v13  ;;  %843 = vmatprep.mubr.f32.mxu0 %v89_v17  ;;  %v651_v13 = vld [vmem:[#allocation5 + $0x1030] sm:$0xff]  ;;  %v110_v50 = vld [vmem:[#allocation2 + $0xc8] sm:$0xff]  ;;  %v6065_v54 = vpack.c.bf16 %v150_v49, %v138_v48  ;;  %v149_v7 = vld [vmem:[#allocation5 + $0x80] sm:$0xff] }
  0xa1   :  { %6036 = vmatpush1.bf16.msra.mxu1 %v6035_v16  ;;  %5940 = vmatpush1.bf16.msra.mxu0 %v5939_v18  ;;  %v649_v16 = vld [vmem:[#allocation5 + $0x1020] sm:$0xff]  ;;  %v676_v18 = vld [vmem:[#allocation5 + $0x10f8] sm:$0xff]  ;;  %v122_v62 = vld [vmem:[#allocation2 + $0x128] sm:$0xff] }
  0xa2   :  { %1165 = vmatprep.mubr.f32.mxu1 %v89_v17  ;;  %6038 = vmatprep.subr.bf16.mxu1 %v6037_v19  ;;  %v664_v17 = vld [vmem:[#allocation5 + $0x1098] sm:$0xff]  ;;  %v5959_v24 = vpack.c.bf16 %v649_v16, %v637_v14  ;;  %v6067_v14 = vpack.c.bf16 %v149_v7, %v137_v6  ;;  %v187_v34 = vld [vmem:[#allocation5 + $0x1b0] sm:$0xff]  ;;  %v257_v6 = vld [vmem:[#allocation5 + $0x3e0] sm:$0xff] }
  0xa3   :  { %844 = vmatmul.mubr.f32.gmra.mrb[2].mxu0 %v88_v27  ;;  %5942 = vmatprep.subr.bf16.mxu0 %v5941_v23  ;;  %v100_v19 = vld [vmem:[#allocation2 + $0x78] sm:$0xff]  ;;  %v6055_v23 = vpack.c.bf16 %v651_v13, %v639_v12  ;;  %v6057_v25 = vpack.c.bf16 %v676_v18, %v664_v17  ;;  %v9202_v12 = vmov 0.0   ;;  %v87_v13 = vld [vmem:[#allocation2 + $0x10] sm:$0xff]  ;;  %v161_v18 = vld [vmem:[#allocation5 + $0xe0] sm:$0xff] }
  0xa4   :  { %1166 = vmatmul.mubr.f32.gmra.mrb[2].mxu1 %v88_v27  ;;  %849 = vmatprep.mubr.f32.mxu0 %v92_v30  ;;  %v675_v27 = vld [vmem:[#allocation5 + $0x10f0] sm:$0xff]  ;;  %v176_v16 = vld [vmem:[#allocation5 + $0x158] sm:$0xff]  ;;  %v269_v7 = vld [vmem:[#allocation5 + $0x440] sm:$0xff] }
  0xa5   :  { %1171 = vmatprep.mubr.f32.mxu1 %v92_v30  ;;  %6040 = vmatpush1.bf16.msra.mxu1 %v6039_v31  ;;  %v673_v30 = vld [vmem:[#allocation5 + $0x10e0] sm:$0xff]  ;;  %v688_v31 = vld [vmem:[#allocation5 + $0x1158] sm:$0xff]  ;;  %v199_v35 = vld [vmem:[#allocation5 + $0x210] sm:$0xff] }
  0xa6   :  { %5944 = vmatpush1.bf16.msra.mxu0 %v5943_v32  ;;  %6042 = vmatprep.subr.bf16.mxu1 %v6041_v33  ;;  %v700_v32 = vld [vmem:[#allocation5 + $0x11b8] sm:$0xff]  ;;  %v103_v33 = vld [vmem:[#allocation2 + $0x90] sm:$0xff]  ;;  %v5963_v38 = vpack.c.bf16 %v673_v30, %v661_v28 }
  0xa7   :  { %850 = vmatmul.mubr.f32.gmra.mrb[4].mxu0 %v91_v41  ;;  %5946 = vmatprep.subr.bf16.mxu0 %v5945_v37  ;;  %v6059_v37 = vpack.c.bf16 %v675_v27, %v663_v26  ;;  %v6061_v39 = vpack.c.bf16 %v700_v32, %v688_v31  ;;  %v90_v26 = vld [vmem:[#allocation2 + $0x28] sm:$0xff]  ;;  %v188_v28 = vld [vmem:[#allocation5 + $0x1b8] sm:$0xff]  ;;  %v185_v31 = vld [vmem:[#allocation5 + $0x1a0] sm:$0xff] }
  0xa8   :  { %1172 = vmatmul.mubr.f32.gmra.mrb[4].mxu1 %v91_v41  ;;  %855 = vmatprep.mubr.f32.mxu0 %v95_v44  ;;  %v699_v41 = vld [vmem:[#allocation5 + $0x11b0] sm:$0xff]  ;;  %v197_v32 = vld [vmem:[#allocation5 + $0x200] sm:$0xff] }
  0xa9   :  { %1177 = vmatprep.mubr.f32.mxu1 %v95_v44  ;;  %6044 = vmatpush1.bf16.msra.mxu1 %v6043_v45  ;;  %v697_v44 = vld [vmem:[#allocation5 + $0x11a0] sm:$0xff]  ;;  %v140_v45 = vld [vmem:[#allocation5 + $0x38] sm:$0xff]  ;;  %v223_v48 = vld [vmem:[#allocation5 + $0x2d0] sm:$0xff] }
  0xaa   :  { %5948 = vmatpush1.bf16.msra.mxu0 %v5947_v46  ;;  %6046 = vmatprep.subr.bf16.mxu1 %v6045_v47  ;;  %v152_v46 = vld [vmem:[#allocation5 + $0x98] sm:$0xff]  ;;  %v106_v47 = vld [vmem:[#allocation2 + $0xa8] sm:$0xff]  ;;  %v5967_v52 = vpack.c.bf16 %v697_v44, %v685_v42  ;;  %v209_v44 = vld [vmem:[#allocation5 + $0x260] sm:$0xff] }
  0xab   :  { %856 = vmatmul.mubr.f32.gmra.mrb[6].mxu0 %v94_v55  ;;  %5950 = vmatprep.subr.bf16.mxu0 %v5949_v51  ;;  %v6063_v51 = vpack.c.bf16 %v699_v41, %v687_v40  ;;  %v6161_v53 = vpack.c.bf16 %v152_v46, %v140_v45  ;;  %v6075_v40 = vpack.c.bf16 %v197_v32, %v185_v31  ;;  %v212_v41 = vld [vmem:[#allocation5 + $0x278] sm:$0xff]  ;;  %v221_v45 = vld [vmem:[#allocation5 + $0x2c0] sm:$0xff] }
  0xac   :  { %1178 = vmatmul.mubr.f32.gmra.mrb[6].mxu1 %v94_v55  ;;  %861 = vmatprep.mubr.f32.mxu0 %v98_v58  ;;  %v109_v55 = vld [vmem:[#allocation2 + $0xc0] sm:$0xff]  ;;  %v224_v42 = vld [vmem:[#allocation5 + $0x2d8] sm:$0xff] }
  0xad   :  { %1183 = vmatprep.mubr.f32.mxu1 %v98_v58  ;;  %6048 = vmatpush1.bf16.msra.mxu1 %v6047_v59  ;;  %v116_v58 = vld [vmem:[#allocation2 + $0xf8] sm:$0xff]  ;;  %v115_v59 = vld [vmem:[#allocation2 + $0xf0] sm:$0xff]  ;;  %v6173_v49 = vpack.c.bf16 %v224_v42, %v212_v41 }
  0xae   :  { %5952 = vmatpush1.bf16.msra.mxu0 %v5951_v60  ;;  %6050 = vmatprep.subr.bf16.mxu1 %v6049_v61  ;;  %v119_v60 = vld [vmem:[#allocation2 + $0x110] sm:$0xff]  ;;  %v118_v61 = vld [vmem:[#allocation2 + $0x108] sm:$0xff]  ;;  %v320_v31 = vld [vmem:[#allocation5 + $0x5d8] sm:$0xff] }
  0xaf   :  { %862 = vmatmul.mubr.f32.gmra.mrb[8].mxu0 %v97_v5  ;;  %5954 = vmatprep.subr.bf16.mxu0 %v5953_v1  ;;  %v124_v1 = vld [vmem:[#allocation2 + $0x138] sm:$0xff] }
  0xb0   :  { %1184 = vmatmul.mubr.f32.gmra.mrb[8].mxu1 %v97_v5  ;;  %867 = vmatprep.mubr.f32.mxu0 %v101_v8  ;;  %v130_v5 = vld [vmem:[#allocation2 + $0x168] sm:$0xff]  ;;  %v108_v41 = vld [vmem:[#allocation2 + $0xb8] sm:$0xff] }
  0xb1   :  { %1189 = vmatprep.mubr.f32.mxu1 %v101_v8  ;;  %6052 = vmatpush1.bf16.msra.mxu1 %v6051_v9  ;;  %v139_v8 = vld [vmem:[#allocation5 + $0x30] sm:$0xff] }
  0xb2   :  { %5956 = vmatpush1.bf16.msra.mxu0 %v5955_v10  ;;  %6054 = vmatprep.subr.bf16.mxu1 %v6053_v11  ;;  %v151_v9 = vld [vmem:[#allocation5 + $0x90] sm:$0xff]  ;;  %v162_v10 = vld [vmem:[#allocation5 + $0xe8] sm:$0xff] }
  0xb3   :  { %868 = vmatmul.mubr.f32.gmra.mrb[10].mxu0 %v100_v19  ;;  %5958 = vmatprep.subr.bf16.mxu0 %v5957_v15  ;;  %v174_v11 = vld [vmem:[#allocation5 + $0x148] sm:$0xff]  ;;  %v164_v15 = vld [vmem:[#allocation5 + $0xf8] sm:$0xff]  ;;  %v6163_v17 = vpack.c.bf16 %v151_v9, %v139_v8  ;;  %v259_v9 = vld [vmem:[#allocation5 + $0x3f0] sm:$0xff] }
  0xb4   :  { %1190 = vmatmul.mubr.f32.gmra.mrb[10].mxu1 %v100_v19  ;;  %873 = vmatprep.mubr.f32.mxu0 %v104_v22  ;;  %v173_v19 = vld [vmem:[#allocation5 + $0x140] sm:$0xff]  ;;  %v6069_v20 = vpack.c.bf16 %v174_v11, %v162_v10  ;;  %v271_v10 = vld [vmem:[#allocation5 + $0x450] sm:$0xff] }
  0xb5   :  { %1195 = vmatprep.mubr.f32.mxu1 %v104_v22  ;;  %6056 = vmatpush1.bf16.msra.mxu1 %v6055_v23  ;;  %v175_v22 = vld [vmem:[#allocation5 + $0x150] sm:$0xff]  ;;  %v6165_v23 = vpack.c.bf16 %v176_v16, %v164_v15  ;;  %v6071_v27 = vpack.c.bf16 %v173_v19, %v161_v18  ;;  %v102_v15 = vld [vmem:[#allocation2 + $0x88] sm:$0xff]  ;;  %v6087_v16 = vpack.c.bf16 %v269_v7, %v257_v6  ;;  %v296_v18 = vld [vmem:[#allocation5 + $0x518] sm:$0xff] }
  0xb6   :  { %5960 = vmatpush1.bf16.msra.mxu0 %v5959_v24  ;;  %6058 = vmatprep.subr.bf16.mxu1 %v6057_v25  ;;  %v186_v24 = vld [vmem:[#allocation5 + $0x1a8] sm:$0xff]  ;;  %v6167_v30 = vpack.c.bf16 %v175_v22, %v163_v21  ;;  %v6183_v19 = vpack.c.bf16 %v271_v10, %v259_v9  ;;  %v293_v21 = vld [vmem:[#allocation5 + $0x500] sm:$0xff]  ;;  %v392_v6 = vld [vmem:[#allocation5 + $0x818] sm:$0xff] }
  0xb7   :  { %874 = vmatmul.mubr.f32.gmra.mrb[12].mxu0 %v103_v33  ;;  %5962 = vmatprep.subr.bf16.mxu0 %v5961_v29  ;;  %v198_v25 = vld [vmem:[#allocation5 + $0x208] sm:$0xff]  ;;  %v200_v29 = vld [vmem:[#allocation5 + $0x218] sm:$0xff]  ;;  %v389_v9 = vld [vmem:[#allocation5 + $0x800] sm:$0xff] }
  0xb8   :  { %1196 = vmatmul.mubr.f32.gmra.mrb[12].mxu1 %v103_v33  ;;  %879 = vmatprep.mubr.f32.mxu0 %v107_v36  ;;  %v6073_v33 = vpack.c.bf16 %v198_v25, %v186_v24  ;;  %v295_v24 = vld [vmem:[#allocation5 + $0x510] sm:$0xff] }
  0xb9   :  { %1201 = vmatprep.mubr.f32.mxu1 %v107_v36  ;;  %6060 = vmatpush1.bf16.msra.mxu1 %v6059_v37  ;;  %v6169_v36 = vpack.c.bf16 %v200_v29, %v188_v28  ;;  %v210_v37 = vld [vmem:[#allocation5 + $0x268] sm:$0xff]  ;;  %v105_v28 = vld [vmem:[#allocation2 + $0xa0] sm:$0xff] }
  0xba   :  { %5964 = vmatpush1.bf16.msra.mxu0 %v5963_v38  ;;  %6062 = vmatprep.subr.bf16.mxu1 %v6061_v39  ;;  %v222_v38 = vld [vmem:[#allocation5 + $0x2c8] sm:$0xff]  ;;  %v93_v39 = vld [vmem:[#allocation2 + $0x40] sm:$0xff] }
  0xbb   :  { %880 = vmatmul.mubr.f32.gmra.mrb[14].mxu0 %v106_v47  ;;  %5966 = vmatprep.subr.bf16.mxu0 %v5965_v43  ;;  %v6171_v43 = vpack.c.bf16 %v199_v35, %v187_v34  ;;  %v6077_v46 = vpack.c.bf16 %v222_v38, %v210_v37  ;;  %v317_v34 = vld [vmem:[#allocation5 + $0x5c0] sm:$0xff]  ;;  %v319_v37 = vld [vmem:[#allocation5 + $0x5d0] sm:$0xff] }
  0xbc   :  { %1202 = vmatmul.mubr.f32.gmra.mrb[14].mxu1 %v106_v47  ;;  %885 = vmatprep.mubr.f32.mxu0 %v110_v50  ;;  %v211_v47 = vld [vmem:[#allocation5 + $0x270] sm:$0xff] }
  0xbd   :  { %1207 = vmatprep.mubr.f32.mxu1 %v110_v50  ;;  %6064 = vmatpush1.bf16.msra.mxu1 %v6063_v51  ;;  %v234_v50 = vld [vmem:[#allocation5 + $0x328] sm:$0xff] }
  0xbe   :  { %5968 = vmatpush1.bf16.msra.mxu0 %v5967_v52  ;;  %6162 = vmatprep.subr.bf16.mxu1 %v6161_v53  ;;  %v246_v51 = vld [vmem:[#allocation5 + $0x388] sm:$0xff]  ;;  %v96_v52 = vld [vmem:[#allocation2 + $0x58] sm:$0xff]  ;;  %v6079_v53 = vpack.c.bf16 %v221_v45, %v209_v44 }
  0xbf   :  { %886 = vmatmul.mubr.f32.gmra.mrb[16].mxu0 %v109_v55  ;;  %6066 = vmatprep.subr.bf16.mxu0 %v6065_v54  ;;  %v236_v54 = vld [vmem:[#allocation5 + $0x338] sm:$0xff] }
  0xc0   :  { %1208 = vmatmul.mubr.f32.gmra.mrb[16].mxu1 %v109_v55  ;;  %891 = vmatprep.mubr.f32.mxu0 %v113_v56  ;;  %v248_v55 = vld [vmem:[#allocation5 + $0x398] sm:$0xff] }
  0xc1   :  { %1213 = vmatprep.mubr.f32.mxu1 %v113_v56  ;;  %v6175_v56 = vpack.c.bf16 %v223_v48, %v211_v47  ;;  %v344_v44 = vld [vmem:[#allocation5 + $0x698] sm:$0xff]  ;;  %v341_v47 = vld [vmem:[#allocation5 + $0x680] sm:$0xff] }
  0xc3   :  { %892 = vmatmul.mubr.f32.gmra.mrb[18].mxu0 %v112_v57 }
  0xc4   :  { %1214 = vmatmul.mubr.f32.gmra.mrb[18].mxu1 %v112_v57  ;;  %897 = vmatprep.mubr.f32.mxu0 %v116_v58  ;;  %v233_v57 = vld [vmem:[#allocation5 + $0x320] sm:$0xff] }
  0xc5   :  { %1219 = vmatprep.mubr.f32.mxu1 %v116_v58  ;;  %v245_v58 = vld [vmem:[#allocation5 + $0x380] sm:$0xff] }
  0xc7   :  { %898 = vmatmul.mubr.f32.gmra.mrb[20].mxu0 %v115_v59 }
  0xc8   :  { %1220 = vmatmul.mubr.f32.gmra.mrb[20].mxu1 %v115_v59  ;;  %903 = vmatprep.mubr.f32.mxu0 %v119_v60  ;;  %v6081_v59 = vpack.c.bf16 %v246_v51, %v234_v50  ;;  %v343_v50 = vld [vmem:[#allocation5 + $0x690] sm:$0xff] }
  0xc9   :  { %1225 = vmatprep.mubr.f32.mxu1 %v119_v60  ;;  %v235_v60 = vld [vmem:[#allocation5 + $0x330] sm:$0xff] }
  0xcb   :  { %904 = vmatmul.mubr.f32.gmra.mrb[22].mxu0 %v118_v61 }
  0xcc   :  { %1226 = vmatmul.mubr.f32.gmra.mrb[22].mxu1 %v118_v61  ;;  %909 = vmatprep.mubr.f32.mxu0 %v122_v62  ;;  %v247_v61 = vld [vmem:[#allocation5 + $0x390] sm:$0xff] }
  0xcd   :  { %1231 = vmatprep.mubr.f32.mxu1 %v122_v62  ;;  %v6177_v62 = vpack.c.bf16 %v248_v55, %v236_v54  ;;  %v111_v54 = vld [vmem:[#allocation2 + $0xd0] sm:$0xff] }
  0xcf   :  { %910 = vmatmul.mubr.f32.gmra.mrb[24].mxu0 %v121_v63 }
  0xd0   :  { %1232 = vmatmul.mubr.f32.gmra.mrb[24].mxu1 %v121_v63  ;;  %915 = vmatprep.mubr.f32.mxu0 %v125_v0  ;;  %v258_v63 = vld [vmem:[#allocation5 + $0x3e8] sm:$0xff] }
  0xd1   :  { %1237 = vmatprep.mubr.f32.mxu1 %v125_v0  ;;  %v270_v0 = vld [vmem:[#allocation5 + $0x448] sm:$0xff] }
  0xd2   :  { %v6085_v8 = vpack.c.bf16 %v270_v0, %v258_v63  ;;  %v367_v63 = vld [vmem:[#allocation5 + $0x750] sm:$0xff] }
  0xd3   :  { %916 = vmatmul.mubr.f32.gmra.mrb[26].mxu0 %v124_v1 }
  0xd4   :  { %1238 = vmatmul.mubr.f32.gmra.mrb[26].mxu1 %v124_v1  ;;  %921 = vmatprep.mubr.f32.mxu0 %v128_v2  ;;  %v99_v1 = vld [vmem:[#allocation2 + $0x70] sm:$0xff] }
  0xd5   :  { %1243 = vmatprep.mubr.f32.mxu1 %v128_v2  ;;  %v6083_v2 = vpack.c.bf16 %v245_v58, %v233_v57  ;;  %v368_v57 = vld [vmem:[#allocation5 + $0x758] sm:$0xff] }
  0xd7   :  { %922 = vmatmul.mubr.f32.gmra.mrb[28].mxu0 %v127_v3 }
  0xd8   :  { %1244 = vmatmul.mubr.f32.gmra.mrb[28].mxu1 %v127_v3  ;;  %927 = vmatprep.mubr.f32.mxu0 %v131_v4  ;;  %v260_v3 = vld [vmem:[#allocation5 + $0x3f8] sm:$0xff] }
  0xd9   :  { %1249 = vmatprep.mubr.f32.mxu1 %v131_v4  ;;  %v272_v4 = vld [vmem:[#allocation5 + $0x458] sm:$0xff] }
  0xda   :  { %v6181_v11 = vpack.c.bf16 %v272_v4, %v260_v3  ;;  %v114_v3 = vld [vmem:[#allocation2 + $0xe8] sm:$0xff] }
  0xdb   :  { %928 = vmatmul.mubr.f32.gmra.mrb[30].mxu0 %v130_v5 }
  0xdc   :  { %1250 = vmatmul.mubr.f32.gmra.mrb[30].mxu1 %v130_v5  ;;  %998 = vmatprep.mubr.f32.mxu0 %v9202_v12  ;;  %v6179_v5 = vpack.c.bf16 %v247_v61, %v235_v60  ;;  %v365_v60 = vld [vmem:[#allocation5 + $0x740] sm:$0xff] }
  0xdd   :  { %1320 = vmatprep.mubr.f32.mxu1 %v9202_v12 }
  0xdf   :  { %999 = vmatmul.mubr.f32.vlgmr.msra.gmra.mrb[0].mxu0 %v87_v13 }
  0xe0   :  { %1321 = vmatmul.mubr.f32.vlgmr.msra.gmra.mrb[0].mxu1 %v87_v13  ;;  %6068 = vmatpush1.bf16.msra.mxu0 %v6067_v14  ;;  %v282_v13 = vld [vmem:[#allocation5 + $0x4a8] sm:$0xff] }
  0xe1   :  { %6164 = vmatpush1.bf16.msra.mxu1 %v6163_v17  ;;  %1004 = vmatprep.mubr.f32.mxu0 %v9202_v12  ;;  %v294_v14 = vld [vmem:[#allocation5 + $0x508] sm:$0xff]  ;;  %v284_v17 = vld [vmem:[#allocation5 + $0x4b8] sm:$0xff] }
  0xe2   :  { %1326 = vmatprep.mubr.f32.mxu1 %v9202_v12  ;;  %6070 = vmatprep.subr.bf16.mxu0 %v6069_v20  ;;  %v281_v20 = vld [vmem:[#allocation5 + $0x4a0] sm:$0xff]  ;;  %v6089_v22 = vpack.c.bf16 %v294_v14, %v282_v13  ;;  %v6185_v25 = vpack.c.bf16 %v296_v18, %v284_v17  ;;  %v391_v13 = vld [vmem:[#allocation5 + $0x810] sm:$0xff] }
  0xe3   :  { %1005 = vmatmul.mubr.f32.gmra.mrb[2].mxu0 %v90_v26  ;;  %6166 = vmatprep.subr.bf16.mxu1 %v6165_v23  ;;  %v283_v23 = vld [vmem:[#allocation5 + $0x4b0] sm:$0xff]  ;;  %v6091_v29 = vpack.c.bf16 %v293_v21, %v281_v20  ;;  %v117_v17 = vld [vmem:[#allocation2 + $0x100] sm:$0xff]  ;;  %v416_v20 = vld [vmem:[#allocation5 + $0x8d8] sm:$0xff] }
  0xe4   :  { %1327 = vmatmul.mubr.f32.gmra.mrb[2].mxu1 %v90_v26  ;;  %6072 = vmatpush1.bf16.msra.mxu0 %v6071_v27  ;;  %v306_v26 = vld [vmem:[#allocation5 + $0x568] sm:$0xff]  ;;  %v6187_v32 = vpack.c.bf16 %v295_v24, %v283_v23  ;;  %v413_v23 = vld [vmem:[#allocation5 + $0x8c0] sm:$0xff] }
  0xe5   :  { %6168 = vmatpush1.bf16.msra.mxu1 %v6167_v30  ;;  %1010 = vmatprep.mubr.f32.mxu0 %v9202_v12  ;;  %v318_v27 = vld [vmem:[#allocation5 + $0x5c8] sm:$0xff]  ;;  %v308_v30 = vld [vmem:[#allocation5 + $0x578] sm:$0xff] }
  0xe6   :  { %1332 = vmatprep.mubr.f32.mxu1 %v9202_v12  ;;  %6074 = vmatprep.subr.bf16.mxu0 %v6073_v33  ;;  %v305_v33 = vld [vmem:[#allocation5 + $0x560] sm:$0xff]  ;;  %v6093_v35 = vpack.c.bf16 %v318_v27, %v306_v26  ;;  %v6189_v38 = vpack.c.bf16 %v320_v31, %v308_v30  ;;  %v415_v26 = vld [vmem:[#allocation5 + $0x8d0] sm:$0xff]  ;;  %v120_v30 = vld [vmem:[#allocation2 + $0x118] sm:$0xff] }
  0xe7   :  { %1011 = vmatmul.mubr.f32.gmra.mrb[4].mxu0 %v93_v39  ;;  %6170 = vmatprep.subr.bf16.mxu1 %v6169_v36  ;;  %v307_v36 = vld [vmem:[#allocation5 + $0x570] sm:$0xff]  ;;  %v6095_v42 = vpack.c.bf16 %v317_v34, %v305_v33  ;;  %v440_v33 = vld [vmem:[#allocation5 + $0x998] sm:$0xff] }
  0xe8   :  { %1333 = vmatmul.mubr.f32.gmra.mrb[4].mxu1 %v93_v39  ;;  %6076 = vmatpush1.bf16.msra.mxu0 %v6075_v40  ;;  %v330_v39 = vld [vmem:[#allocation5 + $0x628] sm:$0xff]  ;;  %v6191_v45 = vpack.c.bf16 %v319_v37, %v307_v36  ;;  %v437_v36 = vld [vmem:[#allocation5 + $0x980] sm:$0xff] }
  0xe9   :  { %6172 = vmatpush1.bf16.msra.mxu1 %v6171_v43  ;;  %1016 = vmatprep.mubr.f32.mxu0 %v9202_v12  ;;  %v342_v40 = vld [vmem:[#allocation5 + $0x688] sm:$0xff]  ;;  %v332_v43 = vld [vmem:[#allocation5 + $0x638] sm:$0xff] }
  0xea   :  { %1338 = vmatprep.mubr.f32.mxu1 %v9202_v12  ;;  %6078 = vmatprep.subr.bf16.mxu0 %v6077_v46  ;;  %v329_v46 = vld [vmem:[#allocation5 + $0x620] sm:$0xff]  ;;  %v6097_v48 = vpack.c.bf16 %v342_v40, %v330_v39  ;;  %v6193_v51 = vpack.c.bf16 %v344_v44, %v332_v43  ;;  %v439_v39 = vld [vmem:[#allocation5 + $0x990] sm:$0xff] }
  0xeb   :  { %1017 = vmatmul.mubr.f32.gmra.mrb[6].mxu0 %v96_v52  ;;  %6174 = vmatprep.subr.bf16.mxu1 %v6173_v49  ;;  %v331_v49 = vld [vmem:[#allocation5 + $0x630] sm:$0xff]  ;;  %v6099_v55 = vpack.c.bf16 %v341_v47, %v329_v46  ;;  %v464_v46 = vld [vmem:[#allocation5 + $0xa58] sm:$0xff] }
  0xec   :  { %1339 = vmatmul.mubr.f32.gmra.mrb[6].mxu1 %v96_v52  ;;  %6080 = vmatpush1.bf16.msra.mxu0 %v6079_v53  ;;  %v354_v52 = vld [vmem:[#allocation5 + $0x6e8] sm:$0xff]  ;;  %v6195_v58 = vpack.c.bf16 %v343_v50, %v331_v49  ;;  %v123_v43 = vld [vmem:[#allocation2 + $0x130] sm:$0xff]  ;;  %v461_v49 = vld [vmem:[#allocation5 + $0xa40] sm:$0xff] }
  0xed   :  { %6176 = vmatpush1.bf16.msra.mxu1 %v6175_v56  ;;  %1022 = vmatprep.mubr.f32.mxu0 %v9202_v12  ;;  %v366_v53 = vld [vmem:[#allocation5 + $0x748] sm:$0xff]  ;;  %v356_v56 = vld [vmem:[#allocation5 + $0x6f8] sm:$0xff] }
  0xee   :  { %1344 = vmatprep.mubr.f32.mxu1 %v9202_v12  ;;  %6082 = vmatprep.subr.bf16.mxu0 %v6081_v59  ;;  %v353_v59 = vld [vmem:[#allocation5 + $0x6e0] sm:$0xff]  ;;  %v6101_v61 = vpack.c.bf16 %v366_v53, %v354_v52  ;;  %v6197_v0 = vpack.c.bf16 %v368_v57, %v356_v56  ;;  %v463_v52 = vld [vmem:[#allocation5 + $0xa50] sm:$0xff]  ;;  %v126_v56 = vld [vmem:[#allocation2 + $0x148] sm:$0xff] }
  0xef   :  { %1023 = vmatmul.mubr.f32.gmra.mrb[8].mxu0 %v99_v1  ;;  %6178 = vmatprep.subr.bf16.mxu1 %v6177_v62  ;;  %v355_v62 = vld [vmem:[#allocation5 + $0x6f0] sm:$0xff]  ;;  %v6103_v4 = vpack.c.bf16 %v365_v60, %v353_v59  ;;  %v488_v59 = vld [vmem:[#allocation5 + $0xb18] sm:$0xff] }
  0xf0   :  { %1345 = vmatmul.mubr.f32.gmra.mrb[8].mxu1 %v99_v1  ;;  %6084 = vmatpush1.bf16.msra.mxu0 %v6083_v2  ;;  %v378_v1 = vld [vmem:[#allocation5 + $0x7a8] sm:$0xff]  ;;  %v6199_v7 = vpack.c.bf16 %v367_v63, %v355_v62  ;;  %v485_v62 = vld [vmem:[#allocation5 + $0xb00] sm:$0xff] }
  0xf1   :  { %6180 = vmatpush1.bf16.msra.mxu1 %v6179_v5  ;;  %1028 = vmatprep.mubr.f32.mxu0 %v9202_v12  ;;  %v390_v2 = vld [vmem:[#allocation5 + $0x808] sm:$0xff]  ;;  %v380_v5 = vld [vmem:[#allocation5 + $0x7b8] sm:$0xff] }
  0xf2   :  { %1350 = vmatprep.mubr.f32.mxu1 %v9202_v12  ;;  %6086 = vmatprep.subr.bf16.mxu0 %v6085_v8  ;;  %v377_v8 = vld [vmem:[#allocation5 + $0x7a0] sm:$0xff]  ;;  %v6105_v10 = vpack.c.bf16 %v390_v2, %v378_v1  ;;  %v6201_v14 = vpack.c.bf16 %v392_v6, %v380_v5  ;;  %v487_v1 = vld [vmem:[#allocation5 + $0xb10] sm:$0xff] }
  0xf3   :  { %1029 = vmatmul.mubr.f32.gmra.mrb[10].mxu0 %v102_v15  ;;  %6182 = vmatprep.subr.bf16.mxu1 %v6181_v11  ;;  %v379_v11 = vld [vmem:[#allocation5 + $0x7b0] sm:$0xff]  ;;  %v6107_v18 = vpack.c.bf16 %v389_v9, %v377_v8  ;;  %v129_v5 = vld [vmem:[#allocation2 + $0x160] sm:$0xff]  ;;  %v512_v8 = vld [vmem:[#allocation5 + $0xbd8] sm:$0xff] }
  0xf4   :  { %1351 = vmatmul.mubr.f32.gmra.mrb[10].mxu1 %v102_v15  ;;  %6088 = vmatpush1.bf16.msra.mxu0 %v6087_v16  ;;  %v402_v15 = vld [vmem:[#allocation5 + $0x868] sm:$0xff]  ;;  %v6203_v21 = vpack.c.bf16 %v391_v13, %v379_v11  ;;  %v509_v11 = vld [vmem:[#allocation5 + $0xbc0] sm:$0xff] }
  0xf5   :  { %6184 = vmatpush1.bf16.msra.mxu1 %v6183_v19  ;;  %1034 = vmatprep.mubr.f32.mxu0 %v9202_v12  ;;  %v414_v16 = vld [vmem:[#allocation5 + $0x8c8] sm:$0xff]  ;;  %v404_v19 = vld [vmem:[#allocation5 + $0x878] sm:$0xff] }
  0xf6   :  { %1356 = vmatprep.mubr.f32.mxu1 %v9202_v12  ;;  %6090 = vmatprep.subr.bf16.mxu0 %v6089_v22  ;;  %v401_v22 = vld [vmem:[#allocation5 + $0x860] sm:$0xff]  ;;  %v6109_v24 = vpack.c.bf16 %v414_v16, %v402_v15  ;;  %v6205_v27 = vpack.c.bf16 %v416_v20, %v404_v19  ;;  %v511_v15 = vld [vmem:[#allocation5 + $0xbd0] sm:$0xff]  ;;  %v132_v19 = vld [vmem:[#allocation2 + $0x178] sm:$0xff] }
  0xf7   :  { %1035 = vmatmul.mubr.f32.gmra.mrb[12].mxu0 %v105_v28  ;;  %6186 = vmatprep.subr.bf16.mxu1 %v6185_v25  ;;  %v403_v25 = vld [vmem:[#allocation5 + $0x870] sm:$0xff]  ;;  %v6111_v31 = vpack.c.bf16 %v413_v23, %v401_v22  ;;  %v534_v22 = vld [vmem:[#allocation5 + $0xc88] sm:$0xff] }
  0xf8   :  { %1357 = vmatmul.mubr.f32.gmra.mrb[12].mxu1 %v105_v28  ;;  %6092 = vmatpush1.bf16.msra.mxu0 %v6091_v29  ;;  %v426_v28 = vld [vmem:[#allocation5 + $0x928] sm:$0xff]  ;;  %v6207_v34 = vpack.c.bf16 %v415_v26, %v403_v25  ;;  %v535_v26 = vld [vmem:[#allocation5 + $0xc90] sm:$0xff] }
  0xf9   :  { %6188 = vmatpush1.bf16.msra.mxu1 %v6187_v32  ;;  %1040 = vmatprep.mubr.f32.mxu0 %v9202_v12  ;;  %v438_v29 = vld [vmem:[#allocation5 + $0x988] sm:$0xff]  ;;  %v428_v32 = vld [vmem:[#allocation5 + $0x938] sm:$0xff] }
  0xfa   :  { %1362 = vmatprep.mubr.f32.mxu1 %v9202_v12  ;;  %6094 = vmatprep.subr.bf16.mxu0 %v6093_v35  ;;  %v425_v35 = vld [vmem:[#allocation5 + $0x920] sm:$0xff]  ;;  %v6113_v37 = vpack.c.bf16 %v438_v29, %v426_v28  ;;  %v6209_v40 = vpack.c.bf16 %v440_v33, %v428_v32  ;;  %v546_v32 = vld [vmem:[#allocation5 + $0xce8] sm:$0xff] }
  0xfb   :  { %1041 = vmatmul.mubr.f32.gmra.mrb[14].mxu0 %v108_v41  ;;  %6190 = vmatprep.subr.bf16.mxu1 %v6189_v38  ;;  %v427_v38 = vld [vmem:[#allocation5 + $0x930] sm:$0xff]  ;;  %v6115_v44 = vpack.c.bf16 %v437_v36, %v425_v35  ;;  %v533_v28 = vld [vmem:[#allocation5 + $0xc80] sm:$0xff]  ;;  %v558_v33 = vld [vmem:[#allocation5 + $0xd48] sm:$0xff] }
  0xfc   :  { %1363 = vmatmul.mubr.f32.gmra.mrb[14].mxu1 %v108_v41  ;;  %6096 = vmatpush1.bf16.msra.mxu0 %v6095_v42  ;;  %v450_v41 = vld [vmem:[#allocation5 + $0x9e8] sm:$0xff]  ;;  %v6211_v47 = vpack.c.bf16 %v439_v39, %v427_v38  ;;  %v547_v38 = vld [vmem:[#allocation5 + $0xcf0] sm:$0xff] }
  0xfd   :  { %6192 = vmatpush1.bf16.msra.mxu1 %v6191_v45  ;;  %1046 = vmatprep.mubr.f32.mxu0 %v9202_v12  ;;  %v462_v42 = vld [vmem:[#allocation5 + $0xa48] sm:$0xff]  ;;  %v452_v45 = vld [vmem:[#allocation5 + $0x9f8] sm:$0xff]  ;;  %v559_v39 = vld [vmem:[#allocation5 + $0xd50] sm:$0xff] }
  0xfe   :  { %1368 = vmatprep.mubr.f32.mxu1 %v9202_v12  ;;  %6098 = vmatprep.subr.bf16.mxu0 %v6097_v48  ;;  %v449_v48 = vld [vmem:[#allocation5 + $0x9e0] sm:$0xff]  ;;  %v6117_v50 = vpack.c.bf16 %v462_v42, %v450_v41  ;;  %v6213_v53 = vpack.c.bf16 %v464_v46, %v452_v45  ;;  %v6133_v42 = vpack.c.bf16 %v558_v33, %v546_v32  ;;  %v584_v45 = vld [vmem:[#allocation5 + $0xe18] sm:$0xff]  ;;  %v655_v32 = vld [vmem:[#allocation5 + $0x1050] sm:$0xff] }
  0xff   :  { %1047 = vmatmul.mubr.f32.gmra.mrb[16].mxu0 %v111_v54  ;;  %6194 = vmatprep.subr.bf16.mxu1 %v6193_v51  ;;  %v451_v51 = vld [vmem:[#allocation5 + $0x9f0] sm:$0xff]  ;;  %v6119_v57 = vpack.c.bf16 %v461_v49, %v449_v48  ;;  %v7613_v41 = vld [vmem:[#allocation2] sm:$0xff]  ;;  %v582_v48 = vld [vmem:[#allocation5 + $0xe08] sm:$0xff]  ;;  %v6231_v49 = vpack.c.bf16 %v559_v39, %v547_v38 }
 0x100   :  { %1369 = vmatmul.mubr.f32.gmra.mrb[16].mxu1 %v111_v54  ;;  %6100 = vmatpush1.bf16.msra.mxu0 %v6099_v55  ;;  %v474_v54 = vld [vmem:[#allocation5 + $0xaa8] sm:$0xff]  ;;  %v6215_v60 = vpack.c.bf16 %v463_v52, %v451_v51  ;;  %v7614_v46 = vld [vmem:[#allocation2 + $0x20] sm:$0xff]  ;;  %v571_v52 = vld [vmem:[#allocation5 + $0xdb0] sm:$0xff] }
 0x101   :  { %6196 = vmatpush1.bf16.msra.mxu1 %v6195_v58  ;;  %1052 = vmatprep.mubr.f32.mxu0 %v9202_v12  ;;  %v486_v55 = vld [vmem:[#allocation5 + $0xb08] sm:$0xff]  ;;  %v476_v58 = vld [vmem:[#allocation5 + $0xab8] sm:$0xff]  ;;  %v641_v33 = vld [vmem:[#allocation5 + $0xfe0] sm:$0xff] }
 0x102   :  { %1374 = vmatprep.mubr.f32.mxu1 %v9202_v12  ;;  %6102 = vmatprep.subr.bf16.mxu0 %v6101_v61  ;;  %v473_v61 = vld [vmem:[#allocation5 + $0xaa0] sm:$0xff]  ;;  %v6121_v63 = vpack.c.bf16 %v486_v55, %v474_v54  ;;  %v6217_v2 = vpack.c.bf16 %v488_v59, %v476_v58  ;;  %v7615_v55 = vld [vmem:[#allocation2 + $0x18] sm:$0xff] }
 0x103   :  { %1053 = vmatmul.mubr.f32.gmra.mrb[18].mxu0 %v114_v3  ;;  %6198 = vmatprep.subr.bf16.mxu1 %v6197_v0  ;;  %v475_v0 = vld [vmem:[#allocation5 + $0xab0] sm:$0xff]  ;;  %v6123_v6 = vpack.c.bf16 %v485_v62, %v473_v61  ;;  %v569_v54 = vld [vmem:[#allocation5 + $0xda0] sm:$0xff]  ;;  %v596_v58 = vld [vmem:[#allocation5 + $0xe78] sm:$0xff] }
 0x104   :  { %1375 = vmatmul.mubr.f32.gmra.mrb[18].mxu1 %v114_v3  ;;  %6104 = vmatpush1.bf16.msra.mxu0 %v6103_v4  ;;  %v498_v3 = vld [vmem:[#allocation5 + $0xb68] sm:$0xff]  ;;  %v6219_v9 = vpack.c.bf16 %v487_v1, %v475_v0  ;;  %v608_v59 = vld [vmem:[#allocation5 + $0xed8] sm:$0xff]  ;;  %v7622_v39 = vld [vmem:[#allocation2 + $0x80] sm:$0xff] }
 0x105   :  { %6200 = vmatpush1.bf16.msra.mxu1 %v6199_v7  ;;  %1058 = vmatprep.mubr.f32.mxu0 %v9202_v12  ;;  %v510_v4 = vld [vmem:[#allocation5 + $0xbc8] sm:$0xff]  ;;  %v500_v7 = vld [vmem:[#allocation5 + $0xb78] sm:$0xff]  ;;  %v6237_v1 = vpack.c.bf16 %v608_v59, %v596_v58  ;;  %v691_v59 = vld [vmem:[#allocation5 + $0x1170] sm:$0xff] }
 0x106   :  { %1380 = vmatprep.mubr.f32.mxu1 %v9202_v12  ;;  %6106 = vmatprep.subr.bf16.mxu0 %v6105_v10  ;;  %v497_v10 = vld [vmem:[#allocation5 + $0xb60] sm:$0xff]  ;;  %v6125_v13 = vpack.c.bf16 %v510_v4, %v498_v3  ;;  %v6221_v16 = vpack.c.bf16 %v512_v8, %v500_v7  ;;  %v594_v61 = vld [vmem:[#allocation5 + $0xe68] sm:$0xff]  ;;  %v607_v3 = vld [vmem:[#allocation5 + $0xed0] sm:$0xff] }
 0x107   :  { %1059 = vmatmul.mubr.f32.gmra.mrb[20].mxu0 %v117_v17  ;;  %6202 = vmatprep.subr.bf16.mxu1 %v6201_v14  ;;  %v499_v14 = vld [vmem:[#allocation5 + $0xb70] sm:$0xff]  ;;  %v6127_v20 = vpack.c.bf16 %v509_v11, %v497_v10  ;;  %v606_v62 = vld [vmem:[#allocation5 + $0xec8] sm:$0xff]  ;;  %v593_v4 = vld [vmem:[#allocation5 + $0xe60] sm:$0xff] }
 0x108   :  { %1381 = vmatmul.mubr.f32.gmra.mrb[20].mxu1 %v117_v17  ;;  %6108 = vmatpush1.bf16.msra.mxu0 %v6107_v18  ;;  %v524_v17 = vld [vmem:[#allocation5 + $0xc38] sm:$0xff]  ;;  %v6223_v23 = vpack.c.bf16 %v511_v15, %v499_v14  ;;  %v605_v7 = vld [vmem:[#allocation5 + $0xec0] sm:$0xff]  ;;  %v7618_v10 = vld [vmem:[#allocation2 + $0x50] sm:$0xff] }
 0x109   :  { %6204 = vmatpush1.bf16.msra.mxu1 %v6203_v21  ;;  %1064 = vmatprep.mubr.f32.mxu0 %v9202_v12  ;;  %v536_v18 = vld [vmem:[#allocation5 + $0xc98] sm:$0xff]  ;;  %v522_v21 = vld [vmem:[#allocation5 + $0xc28] sm:$0xff]  ;;  %v6143_v15 = vpack.c.bf16 %v605_v7, %v593_v4 }
 0x10a   :  { %1386 = vmatprep.mubr.f32.mxu1 %v9202_v12  ;;  %6110 = vmatprep.subr.bf16.mxu0 %v6109_v24  ;;  %v523_v24 = vld [vmem:[#allocation5 + $0xc30] sm:$0xff]  ;;  %v6225_v25 = vpack.c.bf16 %v536_v18, %v524_v17  ;;  %v6129_v29 = vpack.c.bf16 %v534_v22, %v522_v21  ;;  %v620_v8 = vld [vmem:[#allocation5 + $0xf38] sm:$0xff]  ;;  %v618_v11 = vld [vmem:[#allocation5 + $0xf28] sm:$0xff] }
 0x10b   :  { %1065 = vmatmul.mubr.f32.gmra.mrb[22].mxu0 %v120_v30  ;;  %6206 = vmatprep.subr.bf16.mxu1 %v6205_v27  ;;  %v521_v27 = vld [vmem:[#allocation5 + $0xc20] sm:$0xff]  ;;  %v6227_v35 = vpack.c.bf16 %v535_v26, %v523_v24  ;;  %v619_v17 = vld [vmem:[#allocation5 + $0xf30] sm:$0xff]  ;;  %v656_v24 = vld [vmem:[#allocation5 + $0x1058] sm:$0xff] }
 0x10c   :  { %1387 = vmatmul.mubr.f32.gmra.mrb[22].mxu1 %v120_v30  ;;  %6112 = vmatpush1.bf16.msra.mxu0 %v6111_v31  ;;  %v548_v30 = vld [vmem:[#allocation5 + $0xcf8] sm:$0xff]  ;;  %v6131_v36 = vpack.c.bf16 %v533_v28, %v521_v27  ;;  %v631_v18 = vld [vmem:[#allocation5 + $0xf90] sm:$0xff]  ;;  %v629_v22 = vld [vmem:[#allocation5 + $0xf80] sm:$0xff] }
 0x10d   :  { %6208 = vmatpush1.bf16.msra.mxu1 %v6207_v34  ;;  %1070 = vmatprep.mubr.f32.mxu0 %v9202_v12  ;;  %v560_v31 = vld [vmem:[#allocation5 + $0xd58] sm:$0xff]  ;;  %v7612_v34 = vld [vmem:[#allocation2 + $0x8] sm:$0xff]  ;;  %v6243_v28 = vpack.c.bf16 %v631_v18, %v619_v17  ;;  %v7633_v17 = vld [vmem:[#allocation2 + $0xf0] sm:$0xff] }
 0x10e   :  { %1392 = vmatprep.mubr.f32.mxu1 %v9202_v12  ;;  %6114 = vmatprep.subr.bf16.mxu0 %v6113_v37  ;;  %v6229_v37 = vpack.c.bf16 %v560_v31, %v548_v30  ;;  %v642_v26 = vld [vmem:[#allocation5 + $0xfe8] sm:$0xff]  ;;  %v643_v31 = vld [vmem:[#allocation5 + $0xff0] sm:$0xff]  ;;  %v680_v38 = vld [vmem:[#allocation5 + $0x1118] sm:$0xff] }
 0x10f   :  { %1071 = vmatmul.mubr.f32.gmra.mrb[24].mxu0 %v123_v43  ;;  %6210 = vmatprep.subr.bf16.mxu1 %v6209_v40  ;;  %v545_v40 = vld [vmem:[#allocation5 + $0xce0] sm:$0xff]  ;;  %v654_v27 = vld [vmem:[#allocation5 + $0x1048] sm:$0xff]  ;;  %v7634_v18 = vld [vmem:[#allocation2 + $0x110] sm:$0xff] }
 0x110   :  { %1393 = vmatmul.mubr.f32.gmra.mrb[24].mxu1 %v123_v43  ;;  %6116 = vmatpush1.bf16.msra.mxu0 %v6115_v44  ;;  %v557_v43 = vld [vmem:[#allocation5 + $0xd40] sm:$0xff]  ;;  %v572_v44 = vld [vmem:[#allocation5 + $0xdb8] sm:$0xff]  ;;  %v142_v4 = vld [vmem:[#allocation5 + $0x48] sm:$0xff] }
 0x111   :  { %6212 = vmatpush1.bf16.msra.mxu1 %v6211_v47  ;;  %1076 = vmatprep.mubr.f32.mxu0 %v9202_v12  ;;  %v570_v47 = vld [vmem:[#allocation5 + $0xda8] sm:$0xff]  ;;  %v6233_v51 = vpack.c.bf16 %v584_v45, %v572_v44  ;;  %v667_v45 = vld [vmem:[#allocation5 + $0x10b0] sm:$0xff] }
 0x112   :  { %1398 = vmatprep.mubr.f32.mxu1 %v9202_v12  ;;  %6118 = vmatprep.subr.bf16.mxu0 %v6117_v50  ;;  %v6135_v50 = vpack.c.bf16 %v557_v43, %v545_v40  ;;  %v666_v40 = vld [vmem:[#allocation5 + $0x10a8] sm:$0xff] }
 0x113   :  { %1077 = vmatmul.mubr.f32.gmra.mrb[26].mxu0 %v126_v56  ;;  %6214 = vmatprep.subr.bf16.mxu1 %v6213_v53  ;;  %v583_v53 = vld [vmem:[#allocation5 + $0xe10] sm:$0xff] }
 0x114   :  { %1399 = vmatmul.mubr.f32.gmra.mrb[26].mxu1 %v126_v56  ;;  %6120 = vmatpush1.bf16.msra.mxu0 %v6119_v57  ;;  %v6137_v56 = vpack.c.bf16 %v582_v48, %v570_v47  ;;  %v581_v57 = vld [vmem:[#allocation5 + $0xe00] sm:$0xff]  ;;  %v7623_v48 = vld [vmem:[#allocation2 + $0x78] sm:$0xff] }
 0x115   :  { %6216 = vmatpush1.bf16.msra.mxu1 %v6215_v60  ;;  %1082 = vmatprep.mubr.f32.mxu0 %v9202_v12  ;;  %v7616_v60 = vld [vmem:[#allocation2 + $0x38] sm:$0xff]  ;;  %v6139_v0 = vpack.c.bf16 %v581_v57, %v569_v54  ;;  %v665_v47 = vld [vmem:[#allocation5 + $0x10a0] sm:$0xff]  ;;  %v690_v54 = vld [vmem:[#allocation5 + $0x1168] sm:$0xff] }
 0x116   :  { %1404 = vmatprep.mubr.f32.mxu1 %v9202_v12  ;;  %6122 = vmatprep.subr.bf16.mxu0 %v6121_v63  ;;  %v6235_v63 = vpack.c.bf16 %v583_v53, %v571_v52  ;;  %v704_v52 = vld [vmem:[#allocation5 + $0x11d8] sm:$0xff] }
 0x117   :  { %1083 = vmatmul.mubr.f32.gmra.mrb[28].mxu0 %v129_v5  ;;  %6218 = vmatprep.subr.bf16.mxu1 %v6217_v2  ;;  %v595_v2 = vld [vmem:[#allocation5 + $0xe70] sm:$0xff]  ;;  %v7624_v53 = vld [vmem:[#allocation2 + $0x98] sm:$0xff] }
 0x118   :  { %1405 = vmatmul.mubr.f32.gmra.mrb[28].mxu1 %v129_v5  ;;  %6124 = vmatpush1.bf16.msra.mxu0 %v6123_v6  ;;  %v7617_v5 = vld [vmem:[#allocation2 + $0x30] sm:$0xff]  ;;  %v6141_v6 = vpack.c.bf16 %v606_v62, %v594_v61  ;;  %v6239_v14 = vpack.c.bf16 %v607_v3, %v595_v2  ;;  %v689_v61 = vld [vmem:[#allocation5 + $0x1160] sm:$0xff]  ;;  %v156_v2 = vld [vmem:[#allocation5 + $0xb8] sm:$0xff] }
 0x119   :  { %6220 = vmatpush1.bf16.msra.mxu1 %v6219_v9  ;;  %1088 = vmatprep.mubr.f32.mxu0 %v9202_v12  ;;  %v632_v9 = vld [vmem:[#allocation5 + $0xf98] sm:$0xff]  ;;  %v7625_v62 = vld [vmem:[#allocation2 + $0x90] sm:$0xff] }
 0x11a   :  { %1410 = vmatprep.mubr.f32.mxu1 %v9202_v12  ;;  %6126 = vmatprep.subr.bf16.mxu0 %v6125_v13  ;;  %v630_v13 = vld [vmem:[#allocation5 + $0xf88] sm:$0xff]  ;;  %v7626_v3 = vld [vmem:[#allocation2 + $0xb0] sm:$0xff] }
 0x11b   :  { %1089 = vmatmul.mubr.f32.gmra.mrb[30].mxu0 %v132_v19  ;;  %6222 = vmatprep.subr.bf16.mxu1 %v6221_v16  ;;  %v6241_v16 = vpack.c.bf16 %v632_v9, %v620_v8  ;;  %v6145_v21 = vpack.c.bf16 %v630_v13, %v618_v11  ;;  %v7627_v9 = vld [vmem:[#allocation2 + $0xa8] sm:$0xff]  ;;  %v7629_v13 = vld [vmem:[#allocation2 + $0xc0] sm:$0xff] }
 0x11c   :  { %1411 = vmatmul.mubr.f32.gmra.mrb[30].mxu1 %v132_v19  ;;  %6128 = vmatpush1.bf16.msra.mxu0 %v6127_v20  ;;  %v617_v19 = vld [vmem:[#allocation5 + $0xf20] sm:$0xff]  ;;  %v7619_v20 = vld [vmem:[#allocation2 + $0x48] sm:$0xff] }
 0x11d   :  { %6224 = vmatpush1.bf16.msra.mxu1 %v6223_v23  ;;  %1481 = vmatprep.mubr.f32.mxu0 %v7612_v34  ;;  %v644_v23 = vld [vmem:[#allocation5 + $0xff8] sm:$0xff]  ;;  %v7628_v11 = vld [vmem:[#allocation2 + $0xc8] sm:$0xff] }
 0x11e   :  { %1803 = vmatprep.mubr.f32.mxu1 %v7612_v34  ;;  %6226 = vmatprep.subr.bf16.mxu1 %v6225_v25  ;;  %v7620_v25 = vld [vmem:[#allocation2 + $0x68] sm:$0xff]  ;;  %v6245_v30 = vpack.c.bf16 %v656_v24, %v644_v23  ;;  %v7621_v34 = vld [vmem:[#allocation2 + $0x60] sm:$0xff]  ;;  %v7639_v23 = vld [vmem:[#allocation2 + $0x138] sm:$0xff] }
 0x11f   :  { %1482 = vmatmul.mubr.f32.vlgmr.msra.gmra.mrb[32].mxu0 %v7613_v41  ;;  %6130 = vmatprep.subr.bf16.mxu0 %v6129_v29  ;;  %v6147_v29 = vpack.c.bf16 %v629_v22, %v617_v19  ;;  %v7635_v19 = vld [vmem:[#allocation2 + $0x108] sm:$0xff]  ;;  %v7638_v22 = vld [vmem:[#allocation2 + $0x140] sm:$0xff]  ;;  %v7640_v24 = vld [vmem:[#allocation2 + $0x158] sm:$0xff] }
 0x120   :  { %1804 = vmatmul.mubr.f32.vlgmr.msra.gmra.mrb[32].mxu1 %v7613_v41  ;;  %1487 = vmatprep.mubr.f32.mxu0 %v7614_v46  ;;  %v678_v41 = vld [vmem:[#allocation5 + $0x1108] sm:$0xff] }
 0x121   :  { %6228 = vmatpush1.bf16.msra.mxu1 %v6227_v35  ;;  %6132 = vmatpush1.bf16.msra.mxu0 %v6131_v36  ;;  %v6149_v35 = vpack.c.bf16 %v654_v27, %v642_v26  ;;  %v653_v36 = vld [vmem:[#allocation5 + $0x1040] sm:$0xff]  ;;  %v7642_v26 = vld [vmem:[#allocation2 + $0x170] sm:$0xff] }
 0x122   :  { %1809 = vmatprep.mubr.f32.mxu1 %v7614_v46  ;;  %6230 = vmatprep.subr.bf16.mxu1 %v6229_v37  ;;  %v668_v37 = vld [vmem:[#allocation5 + $0x10b8] sm:$0xff]  ;;  %v6151_v43 = vpack.c.bf16 %v653_v36, %v641_v33  ;;  %v679_v46 = vld [vmem:[#allocation5 + $0x1110] sm:$0xff]  ;;  %v141_v27 = vld [vmem:[#allocation5 + $0x40] sm:$0xff] }
 0x123   :  { %1488 = vmatmul.mubr.f32.gmra.mrb[34].mxu0 %v7615_v55  ;;  %6134 = vmatprep.subr.bf16.mxu0 %v6133_v42  ;;  %v6247_v42 = vpack.c.bf16 %v655_v32, %v643_v31  ;;  %v6249_v44 = vpack.c.bf16 %v680_v38, %v668_v37  ;;  %v7643_v31 = vld [vmem:[#allocation2 + $0x168] sm:$0xff]  ;;  %v180_v36 = vld [vmem:[#allocation5 + $0x178] sm:$0xff]  ;;  %v165_v38 = vld [vmem:[#allocation5 + $0x100] sm:$0xff] }
 0x124   :  { %1810 = vmatmul.mubr.f32.gmra.mrb[34].mxu1 %v7615_v55  ;;  %1493 = vmatprep.mubr.f32.mxu0 %v7616_v60  ;;  %v702_v55 = vld [vmem:[#allocation5 + $0x11c8] sm:$0xff] }
 0x125   :  { %1815 = vmatprep.mubr.f32.mxu1 %v7616_v60  ;;  %6232 = vmatpush1.bf16.msra.mxu1 %v6231_v49  ;;  %v6153_v49 = vpack.c.bf16 %v678_v41, %v666_v40  ;;  %v703_v60 = vld [vmem:[#allocation5 + $0x11d0] sm:$0xff]  ;;  %v166_v32 = vld [vmem:[#allocation5 + $0x108] sm:$0xff] }
 0x126   :  { %6136 = vmatpush1.bf16.msra.mxu0 %v6135_v50  ;;  %6234 = vmatprep.subr.bf16.mxu1 %v6233_v51  ;;  %v677_v50 = vld [vmem:[#allocation5 + $0x1100] sm:$0xff]  ;;  %v692_v51 = vld [vmem:[#allocation5 + $0x1178] sm:$0xff]  ;;  %v178_v33 = vld [vmem:[#allocation5 + $0x168] sm:$0xff] }
 0x127   :  { %1494 = vmatmul.mubr.f32.gmra.mrb[36].mxu0 %v7617_v5  ;;  %6138 = vmatprep.subr.bf16.mxu0 %v6137_v56  ;;  %v6251_v56 = vpack.c.bf16 %v679_v46, %v667_v45  ;;  %v6155_v57 = vpack.c.bf16 %v677_v50, %v665_v47  ;;  %v6253_v58 = vpack.c.bf16 %v704_v52, %v692_v51  ;;  %v167_v41 = vld [vmem:[#allocation5 + $0x110] sm:$0xff]  ;;  %v190_v45 = vld [vmem:[#allocation5 + $0x1c8] sm:$0xff]  ;;  %v189_v51 = vld [vmem:[#allocation5 + $0x1c0] sm:$0xff] }
 0x128   :  { %1816 = vmatmul.mubr.f32.gmra.mrb[36].mxu1 %v7617_v5  ;;  %1499 = vmatprep.mubr.f32.mxu0 %v7618_v10  ;;  %v154_v5 = vld [vmem:[#allocation5 + $0xa8] sm:$0xff]  ;;  %v6261_v40 = vpack.c.bf16 %v178_v33, %v166_v32  ;;  %v201_v52 = vld [vmem:[#allocation5 + $0x220] sm:$0xff]  ;;  %v7648_v32 = vld [vmem:[#allocation2 + $0x70] sm:$0xff] }
 0x129   :  { %1821 = vmatprep.mubr.f32.mxu1 %v7618_v10  ;;  %6236 = vmatpush1.bf16.msra.mxu1 %v6235_v63  ;;  %v6157_v63 = vpack.c.bf16 %v702_v55, %v690_v54  ;;  %v6257_v10 = vpack.c.bf16 %v154_v5, %v142_v4  ;;  %v202_v46 = vld [vmem:[#allocation5 + $0x228] sm:$0xff]  ;;  %v191_v54 = vld [vmem:[#allocation5 + $0x1d0] sm:$0xff]  ;;  %v7646_v5 = vld [vmem:[#allocation2 + $0x40] sm:$0xff] }
 0x12a   :  { %6140 = vmatpush1.bf16.msra.mxu0 %v6139_v0  ;;  %6238 = vmatprep.subr.bf16.mxu1 %v6237_v1  ;;  %v701_v0 = vld [vmem:[#allocation5 + $0x11c0] sm:$0xff]  ;;  %v144_v1 = vld [vmem:[#allocation5 + $0x58] sm:$0xff]  ;;  %v203_v55 = vld [vmem:[#allocation5 + $0x230] sm:$0xff] }
 0x12b   :  { %1500 = vmatmul.mubr.f32.gmra.mrb[38].mxu0 %v7619_v20  ;;  %6142 = vmatprep.subr.bf16.mxu0 %v6141_v6  ;;  %v6255_v6 = vpack.c.bf16 %v703_v60, %v691_v59  ;;  %v6159_v7 = vpack.c.bf16 %v701_v0, %v689_v61  ;;  %v6353_v8 = vpack.c.bf16 %v156_v2, %v144_v1  ;;  %v226_v59 = vld [vmem:[#allocation5 + $0x2e8] sm:$0xff]  ;;  %v216_v61 = vld [vmem:[#allocation5 + $0x298] sm:$0xff]  ;;  %v213_v0 = vld [vmem:[#allocation5 + $0x280] sm:$0xff] }
 0x12c   :  { %1822 = vmatmul.mubr.f32.gmra.mrb[38].mxu1 %v7619_v20  ;;  %1505 = vmatprep.mubr.f32.mxu0 %v7620_v25  ;;  %v7636_v20 = vld [vmem:[#allocation2 + $0x128] sm:$0xff]  ;;  %v6267_v60 = vpack.c.bf16 %v201_v52, %v189_v51  ;;  %v225_v1 = vld [vmem:[#allocation5 + $0x2e0] sm:$0xff]  ;;  %v227_v4 = vld [vmem:[#allocation5 + $0x2f0] sm:$0xff] }
 0x12d   :  { %1827 = vmatprep.mubr.f32.mxu1 %v7620_v25  ;;  %6240 = vmatpush1.bf16.msra.mxu1 %v6239_v14  ;;  %v7630_v14 = vld [vmem:[#allocation2 + $0xe0] sm:$0xff]  ;;  %v7641_v25 = vld [vmem:[#allocation2 + $0x150] sm:$0xff]  ;;  %v324_v51 = vld [vmem:[#allocation5 + $0x5f8] sm:$0xff] }
 0x12e   :  { %6144 = vmatpush1.bf16.msra.mxu0 %v6143_v15  ;;  %6242 = vmatprep.subr.bf16.mxu1 %v6241_v16  ;;  %v7631_v15 = vld [vmem:[#allocation2 + $0xd8] sm:$0xff] }
 0x12f   :  { %1506 = vmatmul.mubr.f32.gmra.mrb[40].mxu0 %v7621_v34  ;;  %6146 = vmatprep.subr.bf16.mxu0 %v6145_v21  ;;  %v7632_v16 = vld [vmem:[#allocation2 + $0xf8] sm:$0xff]  ;;  %v7637_v21 = vld [vmem:[#allocation2 + $0x120] sm:$0xff] }
 0x130   :  { %1828 = vmatmul.mubr.f32.gmra.mrb[40].mxu1 %v7621_v34  ;;  %1511 = vmatprep.mubr.f32.mxu0 %v7622_v39 }
 0x131   :  { %1833 = vmatprep.mubr.f32.mxu1 %v7622_v39  ;;  %6244 = vmatpush1.bf16.msra.mxu1 %v6243_v28  ;;  %v153_v28 = vld [vmem:[#allocation5 + $0xa0] sm:$0xff] }
 0x132   :  { %6148 = vmatpush1.bf16.msra.mxu0 %v6147_v29  ;;  %6246 = vmatprep.subr.bf16.mxu1 %v6245_v30  ;;  %v143_v29 = vld [vmem:[#allocation5 + $0x50] sm:$0xff]  ;;  %v6259_v34 = vpack.c.bf16 %v153_v28, %v141_v27  ;;  %v177_v39 = vld [vmem:[#allocation5 + $0x160] sm:$0xff] }
 0x133   :  { %1512 = vmatmul.mubr.f32.gmra.mrb[42].mxu0 %v7623_v48  ;;  %6150 = vmatprep.subr.bf16.mxu0 %v6149_v35  ;;  %v155_v30 = vld [vmem:[#allocation5 + $0xb0] sm:$0xff]  ;;  %v168_v35 = vld [vmem:[#allocation5 + $0x118] sm:$0xff]  ;;  %v6263_v47 = vpack.c.bf16 %v177_v39, %v165_v38  ;;  %v261_v27 = vld [vmem:[#allocation5 + $0x400] sm:$0xff] }
 0x134   :  { %1834 = vmatmul.mubr.f32.gmra.mrb[42].mxu1 %v7623_v48  ;;  %1517 = vmatprep.mubr.f32.mxu0 %v7624_v53  ;;  %v6355_v37 = vpack.c.bf16 %v155_v30, %v143_v29  ;;  %v192_v48 = vld [vmem:[#allocation5 + $0x1d8] sm:$0xff]  ;;  %v273_v28 = vld [vmem:[#allocation5 + $0x460] sm:$0xff]  ;;  %v263_v30 = vld [vmem:[#allocation5 + $0x410] sm:$0xff] }
 0x135   :  { %1839 = vmatprep.mubr.f32.mxu1 %v7624_v53  ;;  %6248 = vmatpush1.bf16.msra.mxu1 %v6247_v42  ;;  %v179_v42 = vld [vmem:[#allocation5 + $0x170] sm:$0xff]  ;;  %v6265_v53 = vpack.c.bf16 %v202_v46, %v190_v45  ;;  %v300_v38 = vld [vmem:[#allocation5 + $0x538] sm:$0xff]  ;;  %v7649_v45 = vld [vmem:[#allocation2 + $0x88] sm:$0xff] }
 0x136   :  { %6152 = vmatpush1.bf16.msra.mxu0 %v6151_v43  ;;  %6250 = vmatprep.subr.bf16.mxu1 %v6249_v44  ;;  %v7644_v43 = vld [vmem:[#allocation2 + $0x10] sm:$0xff]  ;;  %v6357_v44 = vpack.c.bf16 %v180_v36, %v168_v35  ;;  %v6359_v50 = vpack.c.bf16 %v179_v42, %v167_v41  ;;  %v298_v35 = vld [vmem:[#allocation5 + $0x528] sm:$0xff]  ;;  %v6279_v36 = vpack.c.bf16 %v273_v28, %v261_v27  ;;  %v297_v41 = vld [vmem:[#allocation5 + $0x520] sm:$0xff] }
 0x137   :  { %1518 = vmatmul.mubr.f32.gmra.mrb[44].mxu0 %v7625_v62  ;;  %6154 = vmatprep.subr.bf16.mxu0 %v6153_v49  ;;  %v204_v49 = vld [vmem:[#allocation5 + $0x238] sm:$0xff] }
 0x138   :  { %1840 = vmatmul.mubr.f32.gmra.mrb[44].mxu1 %v7625_v62  ;;  %1523 = vmatprep.mubr.f32.mxu0 %v7626_v3  ;;  %v228_v62 = vld [vmem:[#allocation5 + $0x2f8] sm:$0xff] }
 0x139   :  { %1845 = vmatprep.mubr.f32.mxu1 %v7626_v3  ;;  %6252 = vmatpush1.bf16.msra.mxu1 %v6251_v56  ;;  %v7645_v56 = vld [vmem:[#allocation2 + $0x28] sm:$0xff]  ;;  %v215_v3 = vld [vmem:[#allocation5 + $0x290] sm:$0xff]  ;;  %v396_v27 = vld [vmem:[#allocation5 + $0x838] sm:$0xff] }
 0x13a   :  { %6156 = vmatpush1.bf16.msra.mxu0 %v6155_v57  ;;  %6254 = vmatprep.subr.bf16.mxu1 %v6253_v58  ;;  %v6361_v57 = vpack.c.bf16 %v204_v49, %v192_v48  ;;  %v214_v58 = vld [vmem:[#allocation5 + $0x288] sm:$0xff] }
 0x13b   :  { %1524 = vmatmul.mubr.f32.gmra.mrb[46].mxu0 %v7627_v9  ;;  %6158 = vmatprep.subr.bf16.mxu0 %v6157_v63  ;;  %v6363_v63 = vpack.c.bf16 %v203_v55, %v191_v54  ;;  %v6269_v2 = vpack.c.bf16 %v226_v59, %v214_v58  ;;  %v322_v48 = vld [vmem:[#allocation5 + $0x5e8] sm:$0xff]  ;;  %v321_v54 = vld [vmem:[#allocation5 + $0x5e0] sm:$0xff] }
 0x13c   :  { %1846 = vmatmul.mubr.f32.gmra.mrb[46].mxu1 %v7627_v9  ;;  %1529 = vmatprep.mubr.f32.mxu0 %v7628_v11  ;;  %v6271_v9 = vpack.c.bf16 %v225_v1, %v213_v0  ;;  %v7650_v58 = vld [vmem:[#allocation2 + $0xa0] sm:$0xff]  ;;  %v348_v0 = vld [vmem:[#allocation5 + $0x6b8] sm:$0xff] }
 0x13d   :  { %1851 = vmatprep.mubr.f32.mxu1 %v7628_v11  ;;  %6256 = vmatpush1.bf16.msra.mxu1 %v6255_v6  ;;  %v6365_v6 = vpack.c.bf16 %v228_v62, %v216_v61  ;;  %v252_v11 = vld [vmem:[#allocation5 + $0x3b8] sm:$0xff]  ;;  %v346_v61 = vld [vmem:[#allocation5 + $0x6a8] sm:$0xff] }
 0x13e   :  { %6160 = vmatpush1.bf16.msra.mxu0 %v6159_v7  ;;  %6354 = vmatprep.subr.bf16.mxu1 %v6353_v8  ;;  %v238_v7 = vld [vmem:[#allocation5 + $0x348] sm:$0xff] }
 0x13f   :  { %1530 = vmatmul.mubr.f32.gmra.mrb[48].mxu0 %v7629_v13  ;;  %6258 = vmatprep.subr.bf16.mxu0 %v6257_v10  ;;  %v250_v8 = vld [vmem:[#allocation5 + $0x3a8] sm:$0xff]  ;;  %v240_v10 = vld [vmem:[#allocation5 + $0x358] sm:$0xff] }
 0x140   :  { %1852 = vmatmul.mubr.f32.gmra.mrb[48].mxu1 %v7629_v13  ;;  %1535 = vmatprep.mubr.f32.mxu0 %v7630_v14  ;;  %v6367_v13 = vpack.c.bf16 %v227_v4, %v215_v3  ;;  %v345_v3 = vld [vmem:[#allocation5 + $0x6a0] sm:$0xff] }
 0x141   :  { %1857 = vmatprep.mubr.f32.mxu1 %v7630_v14  ;;  %v237_v14 = vld [vmem:[#allocation5 + $0x340] sm:$0xff] }
 0x143   :  { %1536 = vmatmul.mubr.f32.gmra.mrb[50].mxu0 %v7631_v15 }
 0x144   :  { %1858 = vmatmul.mubr.f32.gmra.mrb[50].mxu1 %v7631_v15  ;;  %1541 = vmatprep.mubr.f32.mxu0 %v7632_v16  ;;  %v249_v15 = vld [vmem:[#allocation5 + $0x3a0] sm:$0xff] }
 0x145   :  { %1863 = vmatprep.mubr.f32.mxu1 %v7632_v16  ;;  %v6273_v16 = vpack.c.bf16 %v250_v8, %v238_v7  ;;  %v7651_v7 = vld [vmem:[#allocation2 + $0xb8] sm:$0xff] }
 0x147   :  { %1542 = vmatmul.mubr.f32.gmra.mrb[52].mxu0 %v7633_v17 }
 0x148   :  { %1864 = vmatmul.mubr.f32.gmra.mrb[52].mxu1 %v7633_v17  ;;  %1547 = vmatprep.mubr.f32.mxu0 %v7634_v18  ;;  %v239_v17 = vld [vmem:[#allocation5 + $0x350] sm:$0xff] }
 0x149   :  { %1869 = vmatprep.mubr.f32.mxu1 %v7634_v18  ;;  %v251_v18 = vld [vmem:[#allocation5 + $0x3b0] sm:$0xff] }
 0x14b   :  { %1548 = vmatmul.mubr.f32.gmra.mrb[54].mxu0 %v7635_v19 }
 0x14c   :  { %1870 = vmatmul.mubr.f32.gmra.mrb[54].mxu1 %v7635_v19  ;;  %1553 = vmatprep.mubr.f32.mxu0 %v7636_v20  ;;  %v7647_v19 = vld [vmem:[#allocation2 + $0x58] sm:$0xff] }
 0x14d   :  { %1875 = vmatprep.mubr.f32.mxu1 %v7636_v20  ;;  %v6369_v20 = vpack.c.bf16 %v252_v11, %v240_v10  ;;  %v370_v10 = vld [vmem:[#allocation5 + $0x768] sm:$0xff] }
 0x14f   :  { %1554 = vmatmul.mubr.f32.gmra.mrb[56].mxu0 %v7637_v21 }
 0x150   :  { %1876 = vmatmul.mubr.f32.gmra.mrb[56].mxu1 %v7637_v21  ;;  %1559 = vmatprep.mubr.f32.mxu0 %v7638_v22  ;;  %v262_v21 = vld [vmem:[#allocation5 + $0x408] sm:$0xff] }
 0x151   :  { %1881 = vmatprep.mubr.f32.mxu1 %v7638_v22  ;;  %v274_v22 = vld [vmem:[#allocation5 + $0x468] sm:$0xff] }
 0x152   :  { %v6277_v29 = vpack.c.bf16 %v274_v22, %v262_v21  ;;  %v7652_v21 = vld [vmem:[#allocation2 + $0xd0] sm:$0xff] }
 0x153   :  { %1560 = vmatmul.mubr.f32.gmra.mrb[58].mxu0 %v7639_v23 }
 0x154   :  { %1882 = vmatmul.mubr.f32.gmra.mrb[58].mxu1 %v7639_v23  ;;  %1565 = vmatprep.mubr.f32.mxu0 %v7640_v24  ;;  %v6275_v23 = vpack.c.bf16 %v249_v15, %v237_v14  ;;  %v372_v14 = vld [vmem:[#allocation5 + $0x778] sm:$0xff] }
 0x155   :  { %1887 = vmatprep.mubr.f32.mxu1 %v7640_v24  ;;  %v264_v24 = vld [vmem:[#allocation5 + $0x418] sm:$0xff] }
 0x157   :  { %1566 = vmatmul.mubr.f32.gmra.mrb[60].mxu0 %v7641_v25 }
 0x158   :  { %1888 = vmatmul.mubr.f32.gmra.mrb[60].mxu1 %v7641_v25  ;;  %1571 = vmatprep.mubr.f32.mxu0 %v7642_v26  ;;  %v276_v25 = vld [vmem:[#allocation5 + $0x478] sm:$0xff] }
 0x159   :  { %1893 = vmatprep.mubr.f32.mxu1 %v7642_v26  ;;  %v6371_v26 = vpack.c.bf16 %v251_v18, %v239_v17  ;;  %v6373_v33 = vpack.c.bf16 %v276_v25, %v264_v24  ;;  %v369_v17 = vld [vmem:[#allocation5 + $0x760] sm:$0xff]  ;;  %v394_v24 = vld [vmem:[#allocation5 + $0x828] sm:$0xff] }
 0x15b   :  { %1572 = vmatmul.mubr.f32.gmra.mrb[62].mxu0 %v7643_v31 }
 0x15c   :  { %1894 = vmatmul.mubr.f32.gmra.mrb[62].mxu1 %v7643_v31  ;;  %1642 = vmatprep.mubr.f32.mxu0 %v9202_v12  ;;  %v275_v31 = vld [vmem:[#allocation5 + $0x470] sm:$0xff] }
 0x15d   :  { %1964 = vmatprep.mubr.f32.mxu1 %v9202_v12  ;;  %v6375_v39 = vpack.c.bf16 %v275_v31, %v263_v30  ;;  %v393_v30 = vld [vmem:[#allocation5 + $0x820] sm:$0xff] }
 0x15f   :  { %1643 = vmatmul.mubr.f32.vlgmr.msra.gmra.mrb[32].mxu0 %v7644_v43 }
 0x160   :  { %1965 = vmatmul.mubr.f32.vlgmr.msra.gmra.mrb[32].mxu1 %v7644_v43  ;;  %6260 = vmatpush1.bf16.msra.mxu0 %v6259_v34  ;;  %v286_v34 = vld [vmem:[#allocation5 + $0x4c8] sm:$0xff]  ;;  %v287_v43 = vld [vmem:[#allocation5 + $0x4d0] sm:$0xff] }
 0x161   :  { %6356 = vmatpush1.bf16.msra.mxu1 %v6355_v37  ;;  %1648 = vmatprep.mubr.f32.mxu0 %v9202_v12  ;;  %v288_v37 = vld [vmem:[#allocation5 + $0x4d8] sm:$0xff]  ;;  %v6281_v42 = vpack.c.bf16 %v298_v35, %v286_v34  ;;  %v7653_v34 = vld [vmem:[#allocation2 + $0xe8] sm:$0xff] }
 0x162   :  { %1970 = vmatprep.mubr.f32.mxu1 %v9202_v12  ;;  %6262 = vmatprep.subr.bf16.mxu0 %v6261_v40  ;;  %v285_v40 = vld [vmem:[#allocation5 + $0x4c0] sm:$0xff]  ;;  %v6377_v46 = vpack.c.bf16 %v300_v38, %v288_v37  ;;  %v418_v37 = vld [vmem:[#allocation5 + $0x8e8] sm:$0xff] }
 0x163   :  { %1649 = vmatmul.mubr.f32.gmra.mrb[34].mxu0 %v7645_v56  ;;  %6358 = vmatprep.subr.bf16.mxu1 %v6357_v44  ;;  %v299_v44 = vld [vmem:[#allocation5 + $0x530] sm:$0xff]  ;;  %v6283_v49 = vpack.c.bf16 %v297_v41, %v285_v40  ;;  %v420_v40 = vld [vmem:[#allocation5 + $0x8f8] sm:$0xff] }
 0x164   :  { %1971 = vmatmul.mubr.f32.gmra.mrb[34].mxu1 %v7645_v56  ;;  %6264 = vmatpush1.bf16.msra.mxu0 %v6263_v47  ;;  %v310_v47 = vld [vmem:[#allocation5 + $0x588] sm:$0xff]  ;;  %v6379_v52 = vpack.c.bf16 %v299_v44, %v287_v43  ;;  %v311_v56 = vld [vmem:[#allocation5 + $0x590] sm:$0xff]  ;;  %v417_v43 = vld [vmem:[#allocation5 + $0x8e0] sm:$0xff] }
 0x165   :  { %6360 = vmatpush1.bf16.msra.mxu1 %v6359_v50  ;;  %1654 = vmatprep.mubr.f32.mxu0 %v9202_v12  ;;  %v312_v50 = vld [vmem:[#allocation5 + $0x598] sm:$0xff]  ;;  %v6285_v55 = vpack.c.bf16 %v322_v48, %v310_v47  ;;  %v7654_v47 = vld [vmem:[#allocation2 + $0x100] sm:$0xff] }
 0x166   :  { %1976 = vmatprep.mubr.f32.mxu1 %v9202_v12  ;;  %6266 = vmatprep.subr.bf16.mxu0 %v6265_v53  ;;  %v309_v53 = vld [vmem:[#allocation5 + $0x580] sm:$0xff]  ;;  %v6381_v59 = vpack.c.bf16 %v324_v51, %v312_v50  ;;  %v442_v50 = vld [vmem:[#allocation5 + $0x9a8] sm:$0xff] }
 0x167   :  { %1655 = vmatmul.mubr.f32.gmra.mrb[36].mxu0 %v7646_v5  ;;  %6362 = vmatprep.subr.bf16.mxu1 %v6361_v57  ;;  %v323_v57 = vld [vmem:[#allocation5 + $0x5f0] sm:$0xff]  ;;  %v6287_v62 = vpack.c.bf16 %v321_v54, %v309_v53  ;;  %v444_v53 = vld [vmem:[#allocation5 + $0x9b8] sm:$0xff] }
 0x168   :  { %1977 = vmatmul.mubr.f32.gmra.mrb[36].mxu1 %v7646_v5  ;;  %6268 = vmatpush1.bf16.msra.mxu0 %v6267_v60  ;;  %v334_v60 = vld [vmem:[#allocation5 + $0x648] sm:$0xff]  ;;  %v6383_v1 = vpack.c.bf16 %v323_v57, %v311_v56  ;;  %v335_v5 = vld [vmem:[#allocation5 + $0x650] sm:$0xff]  ;;  %v441_v56 = vld [vmem:[#allocation5 + $0x9a0] sm:$0xff] }
 0x169   :  { %6364 = vmatpush1.bf16.msra.mxu1 %v6363_v63  ;;  %1660 = vmatprep.mubr.f32.mxu0 %v9202_v12  ;;  %v336_v63 = vld [vmem:[#allocation5 + $0x658] sm:$0xff]  ;;  %v6289_v4 = vpack.c.bf16 %v346_v61, %v334_v60 }
 0x16a   :  { %1982 = vmatprep.mubr.f32.mxu1 %v9202_v12  ;;  %6270 = vmatprep.subr.bf16.mxu0 %v6269_v2  ;;  %v333_v2 = vld [vmem:[#allocation5 + $0x640] sm:$0xff]  ;;  %v6385_v8 = vpack.c.bf16 %v348_v0, %v336_v63  ;;  %v7655_v60 = vld [vmem:[#allocation2 + $0x118] sm:$0xff]  ;;  %v466_v63 = vld [vmem:[#allocation5 + $0xa68] sm:$0xff] }
 0x16b   :  { %1661 = vmatmul.mubr.f32.gmra.mrb[38].mxu0 %v7647_v19  ;;  %6366 = vmatprep.subr.bf16.mxu1 %v6365_v6  ;;  %v347_v6 = vld [vmem:[#allocation5 + $0x6b0] sm:$0xff]  ;;  %v6291_v11 = vpack.c.bf16 %v345_v3, %v333_v2  ;;  %v468_v2 = vld [vmem:[#allocation5 + $0xa78] sm:$0xff] }
 0x16c   :  { %1983 = vmatmul.mubr.f32.gmra.mrb[38].mxu1 %v7647_v19  ;;  %6272 = vmatpush1.bf16.msra.mxu0 %v6271_v9  ;;  %v358_v9 = vld [vmem:[#allocation5 + $0x708] sm:$0xff]  ;;  %v6387_v15 = vpack.c.bf16 %v347_v6, %v335_v5  ;;  %v359_v19 = vld [vmem:[#allocation5 + $0x710] sm:$0xff]  ;;  %v465_v5 = vld [vmem:[#allocation5 + $0xa60] sm:$0xff] }
 0x16d   :  { %6368 = vmatpush1.bf16.msra.mxu1 %v6367_v13  ;;  %1666 = vmatprep.mubr.f32.mxu0 %v9202_v12  ;;  %v360_v13 = vld [vmem:[#allocation5 + $0x718] sm:$0xff]  ;;  %v6293_v18 = vpack.c.bf16 %v370_v10, %v358_v9  ;;  %v7656_v9 = vld [vmem:[#allocation2 + $0x130] sm:$0xff] }
 0x16e   :  { %1988 = vmatprep.mubr.f32.mxu1 %v9202_v12  ;;  %6274 = vmatprep.subr.bf16.mxu0 %v6273_v16  ;;  %v357_v16 = vld [vmem:[#allocation5 + $0x700] sm:$0xff]  ;;  %v6389_v22 = vpack.c.bf16 %v372_v14, %v360_v13  ;;  %v490_v13 = vld [vmem:[#allocation5 + $0xb28] sm:$0xff] }
 0x16f   :  { %1667 = vmatmul.mubr.f32.gmra.mrb[40].mxu0 %v7648_v32  ;;  %6370 = vmatprep.subr.bf16.mxu1 %v6369_v20  ;;  %v371_v20 = vld [vmem:[#allocation5 + $0x770] sm:$0xff]  ;;  %v6295_v25 = vpack.c.bf16 %v369_v17, %v357_v16  ;;  %v492_v16 = vld [vmem:[#allocation5 + $0xb38] sm:$0xff] }
 0x170   :  { %1989 = vmatmul.mubr.f32.gmra.mrb[40].mxu1 %v7648_v32  ;;  %6276 = vmatpush1.bf16.msra.mxu0 %v6275_v23  ;;  %v382_v23 = vld [vmem:[#allocation5 + $0x7c8] sm:$0xff]  ;;  %v6391_v28 = vpack.c.bf16 %v371_v20, %v359_v19  ;;  %v383_v32 = vld [vmem:[#allocation5 + $0x7d0] sm:$0xff]  ;;  %v489_v19 = vld [vmem:[#allocation5 + $0xb20] sm:$0xff] }
 0x171   :  { %6372 = vmatpush1.bf16.msra.mxu1 %v6371_v26  ;;  %1672 = vmatprep.mubr.f32.mxu0 %v9202_v12  ;;  %v384_v26 = vld [vmem:[#allocation5 + $0x7d8] sm:$0xff]  ;;  %v6297_v31 = vpack.c.bf16 %v394_v24, %v382_v23  ;;  %v7657_v23 = vld [vmem:[#allocation2 + $0x148] sm:$0xff] }
 0x172   :  { %1994 = vmatprep.mubr.f32.mxu1 %v9202_v12  ;;  %6278 = vmatprep.subr.bf16.mxu0 %v6277_v29  ;;  %v381_v29 = vld [vmem:[#allocation5 + $0x7c0] sm:$0xff]  ;;  %v6393_v35 = vpack.c.bf16 %v396_v27, %v384_v26  ;;  %v514_v26 = vld [vmem:[#allocation5 + $0xbe8] sm:$0xff] }
 0x173   :  { %1673 = vmatmul.mubr.f32.gmra.mrb[42].mxu0 %v7649_v45  ;;  %6374 = vmatprep.subr.bf16.mxu1 %v6373_v33  ;;  %v395_v33 = vld [vmem:[#allocation5 + $0x830] sm:$0xff]  ;;  %v6299_v38 = vpack.c.bf16 %v393_v30, %v381_v29  ;;  %v516_v29 = vld [vmem:[#allocation5 + $0xbf8] sm:$0xff] }
 0x174   :  { %1995 = vmatmul.mubr.f32.gmra.mrb[42].mxu1 %v7649_v45  ;;  %6280 = vmatpush1.bf16.msra.mxu0 %v6279_v36  ;;  %v406_v36 = vld [vmem:[#allocation5 + $0x888] sm:$0xff]  ;;  %v6395_v41 = vpack.c.bf16 %v395_v33, %v383_v32  ;;  %v407_v45 = vld [vmem:[#allocation5 + $0x890] sm:$0xff]  ;;  %v513_v32 = vld [vmem:[#allocation5 + $0xbe0] sm:$0xff] }
 0x175   :  { %6376 = vmatpush1.bf16.msra.mxu1 %v6375_v39  ;;  %1678 = vmatprep.mubr.f32.mxu0 %v9202_v12  ;;  %v408_v39 = vld [vmem:[#allocation5 + $0x898] sm:$0xff]  ;;  %v6301_v44 = vpack.c.bf16 %v418_v37, %v406_v36  ;;  %v7658_v36 = vld [vmem:[#allocation2 + $0x160] sm:$0xff] }
 0x176   :  { %2000 = vmatprep.mubr.f32.mxu1 %v9202_v12  ;;  %6282 = vmatprep.subr.bf16.mxu0 %v6281_v42  ;;  %v405_v42 = vld [vmem:[#allocation5 + $0x880] sm:$0xff]  ;;  %v6397_v48 = vpack.c.bf16 %v420_v40, %v408_v39  ;;  %v540_v39 = vld [vmem:[#allocation5 + $0xcb8] sm:$0xff] }
 0x177   :  { %1679 = vmatmul.mubr.f32.gmra.mrb[44].mxu0 %v7650_v58  ;;  %6378 = vmatprep.subr.bf16.mxu1 %v6377_v46  ;;  %v419_v46 = vld [vmem:[#allocation5 + $0x8f0] sm:$0xff]  ;;  %v6303_v51 = vpack.c.bf16 %v417_v43, %v405_v42  ;;  %v538_v42 = vld [vmem:[#allocation5 + $0xca8] sm:$0xff] }
 0x178   :  { %2001 = vmatmul.mubr.f32.gmra.mrb[44].mxu1 %v7650_v58  ;;  %6284 = vmatpush1.bf16.msra.mxu0 %v6283_v49  ;;  %v430_v49 = vld [vmem:[#allocation5 + $0x948] sm:$0xff]  ;;  %v6399_v54 = vpack.c.bf16 %v419_v46, %v407_v45  ;;  %v431_v58 = vld [vmem:[#allocation5 + $0x950] sm:$0xff] }
 0x179   :  { %6380 = vmatpush1.bf16.msra.mxu1 %v6379_v52  ;;  %1684 = vmatprep.mubr.f32.mxu0 %v9202_v12  ;;  %v432_v52 = vld [vmem:[#allocation5 + $0x958] sm:$0xff]  ;;  %v6305_v57 = vpack.c.bf16 %v442_v50, %v430_v49  ;;  %v539_v46 = vld [vmem:[#allocation5 + $0xcb0] sm:$0xff] }
 0x17a   :  { %2006 = vmatprep.mubr.f32.mxu1 %v9202_v12  ;;  %6286 = vmatprep.subr.bf16.mxu0 %v6285_v55  ;;  %v429_v55 = vld [vmem:[#allocation5 + $0x940] sm:$0xff]  ;;  %v6401_v61 = vpack.c.bf16 %v444_v53, %v432_v52  ;;  %v7659_v49 = vld [vmem:[#allocation2 + $0x178] sm:$0xff]  ;;  %v550_v53 = vld [vmem:[#allocation5 + $0xd08] sm:$0xff] }
 0x17b   :  { %1685 = vmatmul.mubr.f32.gmra.mrb[46].mxu0 %v7651_v7  ;;  %6382 = vmatprep.subr.bf16.mxu1 %v6381_v59  ;;  %v443_v59 = vld [vmem:[#allocation5 + $0x9b0] sm:$0xff]  ;;  %v6307_v0 = vpack.c.bf16 %v441_v56, %v429_v55  ;;  %v564_v52 = vld [vmem:[#allocation5 + $0xd78] sm:$0xff]  ;;  %v7660_v55 = vld [vmem:[#allocation2 + $0x8] sm:$0xff] }
 0x17c   :  { %2007 = vmatmul.mubr.f32.gmra.mrb[46].mxu1 %v7651_v7  ;;  %6288 = vmatpush1.bf16.msra.mxu0 %v6287_v62  ;;  %v454_v62 = vld [vmem:[#allocation5 + $0xa08] sm:$0xff]  ;;  %v6403_v3 = vpack.c.bf16 %v443_v59, %v431_v58  ;;  %v455_v7 = vld [vmem:[#allocation5 + $0xa10] sm:$0xff] }
 0x17d   :  { %6384 = vmatpush1.bf16.msra.mxu1 %v6383_v1  ;;  %1690 = vmatprep.mubr.f32.mxu0 %v9202_v12  ;;  %v456_v1 = vld [vmem:[#allocation5 + $0xa18] sm:$0xff]  ;;  %v6309_v6 = vpack.c.bf16 %v466_v63, %v454_v62  ;;  %v551_v59 = vld [vmem:[#allocation5 + $0xd10] sm:$0xff]  ;;  %v7661_v62 = vld [vmem:[#allocation2] sm:$0xff] }
 0x17e   :  { %2012 = vmatprep.mubr.f32.mxu1 %v9202_v12  ;;  %6290 = vmatprep.subr.bf16.mxu0 %v6289_v4  ;;  %v453_v4 = vld [vmem:[#allocation5 + $0xa00] sm:$0xff]  ;;  %v6405_v10 = vpack.c.bf16 %v468_v2, %v456_v1  ;;  %v576_v1 = vld [vmem:[#allocation5 + $0xdd8] sm:$0xff] }
 0x17f   :  { %1691 = vmatmul.mubr.f32.gmra.mrb[48].mxu0 %v7652_v21  ;;  %6386 = vmatprep.subr.bf16.mxu1 %v6385_v8  ;;  %v467_v8 = vld [vmem:[#allocation5 + $0xa70] sm:$0xff]  ;;  %v6311_v14 = vpack.c.bf16 %v465_v5, %v453_v4  ;;  %v588_v2 = vld [vmem:[#allocation5 + $0xe38] sm:$0xff]  ;;  %v574_v4 = vld [vmem:[#allocation5 + $0xdc8] sm:$0xff] }
 0x180   :  { %2013 = vmatmul.mubr.f32.gmra.mrb[48].mxu1 %v7652_v21  ;;  %6292 = vmatpush1.bf16.msra.mxu0 %v6291_v11  ;;  %v478_v11 = vld [vmem:[#allocation5 + $0xac8] sm:$0xff]  ;;  %v6407_v17 = vpack.c.bf16 %v467_v8, %v455_v7  ;;  %v479_v21 = vld [vmem:[#allocation5 + $0xad0] sm:$0xff]  ;;  %v6425_v8 = vpack.c.bf16 %v588_v2, %v576_v1 }
 0x181   :  { %6388 = vmatpush1.bf16.msra.mxu1 %v6387_v15  ;;  %1696 = vmatprep.mubr.f32.mxu0 %v9202_v12  ;;  %v480_v15 = vld [vmem:[#allocation5 + $0xad8] sm:$0xff]  ;;  %v6313_v20 = vpack.c.bf16 %v490_v13, %v478_v11  ;;  %v586_v5 = vld [vmem:[#allocation5 + $0xe28] sm:$0xff]  ;;  %v573_v11 = vld [vmem:[#allocation5 + $0xdc0] sm:$0xff] }
 0x182   :  { %2018 = vmatprep.mubr.f32.mxu1 %v9202_v12  ;;  %6294 = vmatprep.subr.bf16.mxu0 %v6293_v18  ;;  %v477_v18 = vld [vmem:[#allocation5 + $0xac0] sm:$0xff]  ;;  %v6409_v24 = vpack.c.bf16 %v492_v16, %v480_v15  ;;  %v7663_v13 = vld [vmem:[#allocation2 + $0x18] sm:$0xff] }
 0x183   :  { %1697 = vmatmul.mubr.f32.gmra.mrb[50].mxu0 %v7653_v34  ;;  %6390 = vmatprep.subr.bf16.mxu1 %v6389_v22  ;;  %v491_v22 = vld [vmem:[#allocation5 + $0xb30] sm:$0xff]  ;;  %v6315_v27 = vpack.c.bf16 %v489_v19, %v477_v18  ;;  %v585_v15 = vld [vmem:[#allocation5 + $0xe20] sm:$0xff]  ;;  %v600_v16 = vld [vmem:[#allocation5 + $0xe98] sm:$0xff] }
 0x184   :  { %2019 = vmatmul.mubr.f32.gmra.mrb[50].mxu1 %v7653_v34  ;;  %6296 = vmatpush1.bf16.msra.mxu0 %v6295_v25  ;;  %v502_v25 = vld [vmem:[#allocation5 + $0xb88] sm:$0xff]  ;;  %v6411_v30 = vpack.c.bf16 %v491_v22, %v479_v21  ;;  %v503_v34 = vld [vmem:[#allocation5 + $0xb90] sm:$0xff]  ;;  %v7664_v18 = vld [vmem:[#allocation2 + $0x38] sm:$0xff]  ;;  %v6331_v22 = vpack.c.bf16 %v585_v15, %v573_v11 }
 0x185   :  { %6392 = vmatpush1.bf16.msra.mxu1 %v6391_v28  ;;  %1702 = vmatprep.mubr.f32.mxu0 %v9202_v12  ;;  %v504_v28 = vld [vmem:[#allocation5 + $0xb98] sm:$0xff]  ;;  %v6317_v33 = vpack.c.bf16 %v514_v26, %v502_v25  ;;  %v598_v19 = vld [vmem:[#allocation5 + $0xe88] sm:$0xff]  ;;  %v611_v25 = vld [vmem:[#allocation5 + $0xef0] sm:$0xff] }
 0x186   :  { %2024 = vmatprep.mubr.f32.mxu1 %v9202_v12  ;;  %6298 = vmatprep.subr.bf16.mxu0 %v6297_v31  ;;  %v501_v31 = vld [vmem:[#allocation5 + $0xb80] sm:$0xff]  ;;  %v6413_v37 = vpack.c.bf16 %v516_v29, %v504_v28  ;;  %v696_v11 = vld [vmem:[#allocation5 + $0x1198] sm:$0xff] }
 0x187   :  { %1703 = vmatmul.mubr.f32.gmra.mrb[52].mxu0 %v7654_v47  ;;  %6394 = vmatprep.subr.bf16.mxu1 %v6393_v35  ;;  %v515_v35 = vld [vmem:[#allocation5 + $0xbf0] sm:$0xff]  ;;  %v6319_v40 = vpack.c.bf16 %v513_v32, %v501_v31  ;;  %v597_v26 = vld [vmem:[#allocation5 + $0xe80] sm:$0xff]  ;;  %v636_v31 = vld [vmem:[#allocation5 + $0xfb8] sm:$0xff] }
 0x188   :  { %2025 = vmatmul.mubr.f32.gmra.mrb[52].mxu1 %v7654_v47  ;;  %6300 = vmatpush1.bf16.msra.mxu0 %v6299_v38  ;;  %v528_v38 = vld [vmem:[#allocation5 + $0xc58] sm:$0xff]  ;;  %v6415_v43 = vpack.c.bf16 %v515_v35, %v503_v34  ;;  %v525_v47 = vld [vmem:[#allocation5 + $0xc40] sm:$0xff]  ;;  %v7666_v32 = vld [vmem:[#allocation2 + $0x50] sm:$0xff] }
 0x189   :  { %6396 = vmatpush1.bf16.msra.mxu1 %v6395_v41  ;;  %1708 = vmatprep.mubr.f32.mxu0 %v9202_v12  ;;  %v526_v41 = vld [vmem:[#allocation5 + $0xc48] sm:$0xff]  ;;  %v6417_v45 = vpack.c.bf16 %v540_v39, %v528_v38  ;;  %v609_v29 = vld [vmem:[#allocation5 + $0xee0] sm:$0xff]  ;;  %v623_v38 = vld [vmem:[#allocation5 + $0xf50] sm:$0xff] }
 0x18a   :  { %2030 = vmatprep.mubr.f32.mxu1 %v9202_v12  ;;  %6302 = vmatprep.subr.bf16.mxu0 %v6301_v44  ;;  %v527_v44 = vld [vmem:[#allocation5 + $0xc50] sm:$0xff]  ;;  %v6321_v50 = vpack.c.bf16 %v538_v42, %v526_v41  ;;  %v634_v34 = vld [vmem:[#allocation5 + $0xfa8] sm:$0xff]  ;;  %v7672_v15 = vld [vmem:[#allocation2 + $0x98] sm:$0xff] }
 0x18b   :  { %1709 = vmatmul.mubr.f32.gmra.mrb[54].mxu0 %v7655_v60  ;;  %6398 = vmatprep.subr.bf16.mxu1 %v6397_v48  ;;  %v537_v48 = vld [vmem:[#allocation5 + $0xca0] sm:$0xff]  ;;  %v6419_v56 = vpack.c.bf16 %v539_v46, %v527_v44  ;;  %v635_v39 = vld [vmem:[#allocation5 + $0xfb0] sm:$0xff]  ;;  %v7667_v41 = vld [vmem:[#allocation2 + $0x48] sm:$0xff] }
 0x18c   :  { %2031 = vmatmul.mubr.f32.gmra.mrb[54].mxu1 %v7655_v60  ;;  %6304 = vmatpush1.bf16.msra.mxu0 %v6303_v51  ;;  %v552_v51 = vld [vmem:[#allocation5 + $0xd18] sm:$0xff]  ;;  %v563_v60 = vld [vmem:[#allocation5 + $0xd70] sm:$0xff]  ;;  %v7668_v46 = vld [vmem:[#allocation2 + $0x68] sm:$0xff] }
 0x18d   :  { %6400 = vmatpush1.bf16.msra.mxu1 %v6399_v54  ;;  %1714 = vmatprep.mubr.f32.mxu0 %v9202_v12  ;;  %v562_v54 = vld [vmem:[#allocation5 + $0xd68] sm:$0xff]  ;;  %v6421_v58 = vpack.c.bf16 %v564_v52, %v552_v51  ;;  %v648_v44 = vld [vmem:[#allocation5 + $0x1018] sm:$0xff]  ;;  %v647_v52 = vld [vmem:[#allocation5 + $0x1010] sm:$0xff] }
 0x18e   :  { %2036 = vmatprep.mubr.f32.mxu1 %v9202_v12  ;;  %6306 = vmatprep.subr.bf16.mxu0 %v6305_v57  ;;  %v6323_v57 = vpack.c.bf16 %v537_v48, %v525_v47  ;;  %v6325_v63 = vpack.c.bf16 %v562_v54, %v550_v53  ;;  %v646_v47 = vld [vmem:[#allocation5 + $0x1008] sm:$0xff]  ;;  %v659_v53 = vld [vmem:[#allocation5 + $0x1070] sm:$0xff]  ;;  %v645_v54 = vld [vmem:[#allocation5 + $0x1000] sm:$0xff] }
 0x18f   :  { %1715 = vmatmul.mubr.f32.gmra.mrb[56].mxu0 %v7656_v9  ;;  %6402 = vmatprep.subr.bf16.mxu1 %v6401_v61  ;;  %v549_v61 = vld [vmem:[#allocation5 + $0xd00] sm:$0xff]  ;;  %v658_v48 = vld [vmem:[#allocation5 + $0x1068] sm:$0xff] }
 0x190   :  { %2037 = vmatmul.mubr.f32.gmra.mrb[56].mxu1 %v7656_v9  ;;  %6308 = vmatpush1.bf16.msra.mxu0 %v6307_v0  ;;  %v561_v0 = vld [vmem:[#allocation5 + $0xd60] sm:$0xff]  ;;  %v575_v9 = vld [vmem:[#allocation5 + $0xdd0] sm:$0xff] }
 0x191   :  { %6404 = vmatpush1.bf16.msra.mxu1 %v6403_v3  ;;  %1720 = vmatprep.mubr.f32.mxu0 %v9202_v12  ;;  %v7662_v3 = vld [vmem:[#allocation2 + $0x20] sm:$0xff]  ;;  %v6327_v7 = vpack.c.bf16 %v561_v0, %v549_v61  ;;  %v670_v61 = vld [vmem:[#allocation5 + $0x10c8] sm:$0xff] }
 0x192   :  { %2042 = vmatprep.mubr.f32.mxu1 %v9202_v12  ;;  %6310 = vmatprep.subr.bf16.mxu0 %v6309_v6  ;;  %v6423_v6 = vpack.c.bf16 %v563_v60, %v551_v59  ;;  %v684_v59 = vld [vmem:[#allocation5 + $0x1138] sm:$0xff]  ;;  %v7670_v60 = vld [vmem:[#allocation2 + $0x80] sm:$0xff] }
 0x193   :  { %1721 = vmatmul.mubr.f32.gmra.mrb[58].mxu0 %v7657_v23  ;;  %6406 = vmatprep.subr.bf16.mxu1 %v6405_v10  ;;  %v587_v10 = vld [vmem:[#allocation5 + $0xe30] sm:$0xff] }
 0x194   :  { %2043 = vmatmul.mubr.f32.gmra.mrb[58].mxu1 %v7657_v23  ;;  %6312 = vmatpush1.bf16.msra.mxu0 %v6311_v14  ;;  %v6329_v14 = vpack.c.bf16 %v586_v5, %v574_v4  ;;  %v6427_v21 = vpack.c.bf16 %v587_v10, %v575_v9  ;;  %v683_v4 = vld [vmem:[#allocation5 + $0x1130] sm:$0xff]  ;;  %v669_v5 = vld [vmem:[#allocation5 + $0x10c0] sm:$0xff] }
 0x195   :  { %6408 = vmatpush1.bf16.msra.mxu1 %v6407_v17  ;;  %1726 = vmatprep.mubr.f32.mxu0 %v9202_v12  ;;  %v612_v17 = vld [vmem:[#allocation5 + $0xef8] sm:$0xff]  ;;  %v681_v10 = vld [vmem:[#allocation5 + $0x1120] sm:$0xff] }
 0x196   :  { %2048 = vmatprep.mubr.f32.mxu1 %v9202_v12  ;;  %6314 = vmatprep.subr.bf16.mxu0 %v6313_v20  ;;  %v610_v20 = vld [vmem:[#allocation5 + $0xee8] sm:$0xff]  ;;  %v6429_v23 = vpack.c.bf16 %v612_v17, %v600_v16 }
 0x197   :  { %1727 = vmatmul.mubr.f32.gmra.mrb[60].mxu0 %v7658_v36  ;;  %6410 = vmatprep.subr.bf16.mxu1 %v6409_v24  ;;  %v599_v24 = vld [vmem:[#allocation5 + $0xe90] sm:$0xff]  ;;  %v6333_v28 = vpack.c.bf16 %v610_v20, %v598_v19  ;;  %v694_v16 = vld [vmem:[#allocation5 + $0x1188] sm:$0xff]  ;;  %v6347_v20 = vpack.c.bf16 %v681_v10, %v669_v5 }
 0x198   :  { %2049 = vmatmul.mubr.f32.gmra.mrb[60].mxu1 %v7658_v36  ;;  %6316 = vmatpush1.bf16.msra.mxu0 %v6315_v27  ;;  %v7665_v27 = vld [vmem:[#allocation2 + $0x30] sm:$0xff]  ;;  %v6431_v35 = vpack.c.bf16 %v611_v25, %v599_v24  ;;  %v6335_v36 = vpack.c.bf16 %v609_v29, %v597_v26  ;;  %v706_v17 = vld [vmem:[#allocation5 + $0x11e8] sm:$0xff]  ;;  %v693_v24 = vld [vmem:[#allocation5 + $0x1180] sm:$0xff] }
 0x199   :  { %6412 = vmatpush1.bf16.msra.mxu1 %v6411_v30  ;;  %1732 = vmatprep.mubr.f32.mxu0 %v9202_v12  ;;  %v624_v30 = vld [vmem:[#allocation5 + $0xf58] sm:$0xff]  ;;  %v705_v29 = vld [vmem:[#allocation5 + $0x11e0] sm:$0xff] }
 0x19a   :  { %2054 = vmatprep.mubr.f32.mxu1 %v9202_v12  ;;  %6318 = vmatprep.subr.bf16.mxu0 %v6317_v33  ;;  %v622_v33 = vld [vmem:[#allocation5 + $0xf48] sm:$0xff] }
 0x19b   :  { %1733 = vmatmul.mubr.f32.gmra.mrb[62].mxu0 %v7659_v49  ;;  %6414 = vmatprep.subr.bf16.mxu1 %v6413_v37  ;;  %v6433_v37 = vpack.c.bf16 %v636_v31, %v624_v30  ;;  %v6337_v42 = vpack.c.bf16 %v634_v34, %v622_v33  ;;  %v2947_v30 = vld [vmem:[#allocation8 + $0x190] sm:$0xff]  ;;  %v2950_v31 = vld [vmem:[#allocation8 + $0x1a8] sm:$0xff] }
 0x19c   :  { %2055 = vmatmul.mubr.f32.gmra.mrb[62].mxu1 %v7659_v49  ;;  %6320 = vmatpush1.bf16.msra.mxu0 %v6319_v40  ;;  %v621_v40 = vld [vmem:[#allocation5 + $0xf40] sm:$0xff]  ;;  %v6435_v49 = vpack.c.bf16 %v635_v39, %v623_v38  ;;  %v7674_v33 = vld [vmem:[#allocation2 + $0xb0] sm:$0xff]  ;;  %v6351_v38 = vpack.c.bf16 %v705_v29, %v693_v24  ;;  %v6833_v39 = vpack.c.bf16 %v2950_v31, %v2947_v30 }
 0x19d   :  { %6416 = vmatpush1.bf16.msra.mxu1 %v6415_v43  ;;  %2125 = vmatprep.mubr.f32.mxu0 %v7660_v55  ;;  %v633_v43 = vld [vmem:[#allocation5 + $0xfa0] sm:$0xff]  ;;  %v2898_v34 = vld [vmem:[#allocation8 + $0x8] sm:$0xff] }
 0x19e   :  { %2447 = vmatprep.mubr.f32.mxu1 %v7660_v55  ;;  %6418 = vmatprep.subr.bf16.mxu1 %v6417_v45  ;;  %v660_v45 = vld [vmem:[#allocation5 + $0x1078] sm:$0xff]  ;;  %v7669_v55 = vld [vmem:[#allocation2 + $0x60] sm:$0xff]  ;;  %v7689_v29 = vld [vmem:[#allocation2 + $0x150] sm:$0xff] }
 0x19f   :  { %2126 = vmatmul.mubr.f32.vlgmr.msra.gmra.mrb[64].mxu0 %v7661_v62  ;;  %6322 = vmatprep.subr.bf16.mxu0 %v6321_v50  ;;  %v6339_v50 = vpack.c.bf16 %v633_v43, %v621_v40  ;;  %v6437_v51 = vpack.c.bf16 %v660_v45, %v648_v44  ;;  %v7676_v45 = vld [vmem:[#allocation2 + $0xc8] sm:$0xff]  ;;  %v7690_v31 = vld [vmem:[#allocation2 + $0x170] sm:$0xff] }
 0x1a0   :  { %2448 = vmatmul.mubr.f32.vlgmr.msra.gmra.mrb[64].mxu1 %v7661_v62  ;;  %2131 = vmatprep.mubr.f32.mxu0 %v7662_v3  ;;  %v682_v62 = vld [vmem:[#allocation5 + $0x1128] sm:$0xff] }
 0x1a1   :  { %6420 = vmatpush1.bf16.msra.mxu1 %v6419_v56  ;;  %6324 = vmatpush1.bf16.msra.mxu0 %v6323_v57  ;;  %v6341_v56 = vpack.c.bf16 %v658_v48, %v646_v47  ;;  %v657_v57 = vld [vmem:[#allocation5 + $0x1060] sm:$0xff]  ;;  %v6345_v9 = vpack.c.bf16 %v682_v62, %v670_v61  ;;  %v7681_v61 = vld [vmem:[#allocation2 + $0xf0] sm:$0xff] }
 0x1a2   :  { %2453 = vmatprep.mubr.f32.mxu1 %v7662_v3  ;;  %6422 = vmatprep.subr.bf16.mxu1 %v6421_v58  ;;  %v672_v58 = vld [vmem:[#allocation5 + $0x10d8] sm:$0xff]  ;;  %v6343_v1 = vpack.c.bf16 %v657_v57, %v645_v54  ;;  %v671_v3 = vld [vmem:[#allocation5 + $0x10d0] sm:$0xff] }
 0x1a3   :  { %2132 = vmatmul.mubr.f32.gmra.mrb[66].mxu0 %v7663_v13  ;;  %6326 = vmatprep.subr.bf16.mxu0 %v6325_v63  ;;  %v6439_v63 = vpack.c.bf16 %v659_v53, %v647_v52  ;;  %v6441_v2 = vpack.c.bf16 %v684_v59, %v672_v58  ;;  %v7680_v57 = vld [vmem:[#allocation2 + $0xf8] sm:$0xff] }
 0x1a4   :  { %2454 = vmatmul.mubr.f32.gmra.mrb[66].mxu1 %v7663_v13  ;;  %2137 = vmatprep.mubr.f32.mxu0 %v7664_v18  ;;  %v708_v13 = vld [vmem:[#allocation5 + $0x11f8] sm:$0xff] }
 0x1a5   :  { %2459 = vmatprep.mubr.f32.mxu1 %v7664_v18  ;;  %6424 = vmatpush1.bf16.msra.mxu1 %v6423_v6  ;;  %v6443_v18 = vpack.c.bf16 %v683_v4, %v671_v3  ;;  %v7683_v4 = vld [vmem:[#allocation2 + $0x108] sm:$0xff] }
 0x1a6   :  { %6328 = vmatpush1.bf16.msra.mxu0 %v6327_v7  ;;  %6426 = vmatprep.subr.bf16.mxu1 %v6425_v8  ;;  %v7671_v8 = vld [vmem:[#allocation2 + $0x78] sm:$0xff] }
 0x1a7   :  { %2138 = vmatmul.mubr.f32.gmra.mrb[68].mxu0 %v7665_v27  ;;  %6330 = vmatprep.subr.bf16.mxu0 %v6329_v14 }
 0x1a8   :  { %2460 = vmatmul.mubr.f32.gmra.mrb[68].mxu1 %v7665_v27  ;;  %2143 = vmatprep.mubr.f32.mxu0 %v7666_v32  ;;  %v7673_v27 = vld [vmem:[#allocation2 + $0x90] sm:$0xff] }
 0x1a9   :  { %2465 = vmatprep.mubr.f32.mxu1 %v7666_v32  ;;  %6428 = vmatpush1.bf16.msra.mxu1 %v6427_v21  ;;  %v6445_v21 = vpack.c.bf16 %v708_v13, %v696_v11  ;;  %v7685_v13 = vld [vmem:[#allocation2 + $0x120] sm:$0xff] }
 0x1aa   :  { %6332 = vmatpush1.bf16.msra.mxu0 %v6331_v22  ;;  %6430 = vmatprep.subr.bf16.mxu1 %v6429_v23  ;;  %v695_v22 = vld [vmem:[#allocation5 + $0x1190] sm:$0xff] }
 0x1ab   :  { %2144 = vmatmul.mubr.f32.gmra.mrb[70].mxu0 %v7667_v41  ;;  %6334 = vmatprep.subr.bf16.mxu0 %v6333_v28  ;;  %v707_v23 = vld [vmem:[#allocation5 + $0x11f0] sm:$0xff]  ;;  %v6349_v28 = vpack.c.bf16 %v706_v17, %v694_v16  ;;  %v7686_v16 = vld [vmem:[#allocation2 + $0x140] sm:$0xff] }
 0x1ac   :  { %2466 = vmatmul.mubr.f32.gmra.mrb[70].mxu1 %v7667_v41  ;;  %2149 = vmatprep.mubr.f32.mxu0 %v7668_v46 }
 0x1ad   :  { %2471 = vmatprep.mubr.f32.mxu1 %v7668_v46  ;;  %6432 = vmatpush1.bf16.msra.mxu1 %v6431_v35  ;;  %v2901_v35 = vld [vmem:[#allocation8 + $0x20] sm:$0xff] }
 0x1ae   :  { %6336 = vmatpush1.bf16.msra.mxu0 %v6335_v36  ;;  %6434 = vmatprep.subr.bf16.mxu1 %v6433_v37  ;;  %v6447_v36 = vpack.c.bf16 %v707_v23, %v695_v22  ;;  %v6449_v43 = vpack.c.bf16 %v2901_v35, %v2898_v34  ;;  %v7688_v23 = vld [vmem:[#allocation2 + $0x158] sm:$0xff]  ;;  %v2900_v34 = vld [vmem:[#allocation8 + $0x18] sm:$0xff] }
 0x1af   :  { %2150 = vmatmul.mubr.f32.gmra.mrb[72].mxu0 %v7669_v55  ;;  %6338 = vmatprep.subr.bf16.mxu0 %v6337_v42  ;;  %v7675_v42 = vld [vmem:[#allocation2 + $0xa8] sm:$0xff] }
 0x1b0   :  { %2472 = vmatmul.mubr.f32.gmra.mrb[72].mxu1 %v7669_v55  ;;  %2155 = vmatprep.mubr.f32.mxu0 %v7670_v60  ;;  %v7679_v55 = vld [vmem:[#allocation2 + $0xd8] sm:$0xff] }
 0x1b1   :  { %2477 = vmatprep.mubr.f32.mxu1 %v7670_v60  ;;  %6436 = vmatpush1.bf16.msra.mxu1 %v6435_v49  ;;  %v7677_v49 = vld [vmem:[#allocation2 + $0xc0] sm:$0xff] }
 0x1b2   :  { %v8022_v0 = vpop.f32.mrb[0].mxu0  ;;  %6340 = vmatpush1.bf16.msra.mxu0 %v6339_v50  ;;  %6438 = vmatprep.subr.bf16.mxu1 %v6437_v51  ;;  %v7678_v51 = vld [vmem:[#allocation2 + $0xe0] sm:$0xff] }
 0x1b3   :  { %v8024_v6 = vpop.f32.mrb[0].mxu1  ;;  %v8026_v7 = vpop.f32.mrb[1].mxu0  ;;  %2156 = vmatmul.mubr.f32.gmra.mrb[74].mxu0 %v7671_v8  ;;  %6342 = vmatprep.subr.bf16.mxu0 %v6341_v56 }
 0x1b4   :  { %v8028_v14 = vpop.f32.mrb[1].mxu1  ;;  %2478 = vmatmul.mubr.f32.gmra.mrb[74].mxu1 %v7671_v8  ;;  %2161 = vmatprep.mubr.f32.mxu0 %v7672_v15  ;;  %v7684_v8 = vld [vmem:[#allocation2 + $0x128] sm:$0xff] }
 0x1b5   :  { %2483 = vmatprep.mubr.f32.mxu1 %v7672_v15  ;;  %6440 = vmatpush1.bf16.msra.mxu1 %v6439_v63  ;;  %v7682_v63 = vld [vmem:[#allocation2 + $0x110] sm:$0xff] }
 0x1b6   :  { %v8030_v19 = vpop.f32.mrb[2].mxu0  ;;  %6344 = vmatpush1.bf16.msra.mxu0 %v6343_v1  ;;  %6442 = vmatprep.subr.bf16.mxu1 %v6441_v2 }
 0x1b7   :  { %v8032_v25 = vpop.f32.mrb[2].mxu1  ;;  %v8034_v26 = vpop.f32.mrb[3].mxu0  ;;  %2162 = vmatmul.mubr.f32.gmra.mrb[76].mxu0 %v7673_v27  ;;  %6346 = vmatprep.subr.bf16.mxu0 %v6345_v9 }
 0x1b8   :  { %v8036_v32 = vpop.f32.mrb[3].mxu1  ;;  %2484 = vmatmul.mubr.f32.gmra.mrb[76].mxu1 %v7673_v27  ;;  %2167 = vmatprep.mubr.f32.mxu0 %v7674_v33 }
 0x1b9   :  { %2489 = vmatprep.mubr.f32.mxu1 %v7674_v33  ;;  %6444 = vmatpush1.bf16.msra.mxu1 %v6443_v18  ;;  %v2897_v33 = vld [vmem:[#allocation8] sm:$0xff] }
 0x1ba   :  { %v8038_v37 = vpop.f32.mrb[4].mxu0  ;;  %6348 = vmatpush1.bf16.msra.mxu0 %v6347_v20  ;;  %6446 = vmatprep.subr.bf16.mxu1 %v6445_v21  ;;  %v7687_v21 = vld [vmem:[#allocation2 + $0x138] sm:$0xff] }
 0x1bb   :  { %v8040_v40 = vpop.f32.mrb[4].mxu1  ;;  %v8042_v41 = vpop.f32.mrb[5].mxu0  ;;  %2168 = vmatmul.mubr.f32.gmra.mrb[78].mxu0 %v7675_v42  ;;  %6350 = vmatprep.subr.bf16.mxu0 %v6349_v28 }
 0x1bc   :  { %v8044_v44 = vpop.f32.mrb[5].mxu1  ;;  %2490 = vmatmul.mubr.f32.gmra.mrb[78].mxu1 %v7675_v42  ;;  %2173 = vmatprep.mubr.f32.mxu0 %v7676_v45 }
 0x1bd   :  { %2495 = vmatprep.mubr.f32.mxu1 %v7676_v45  ;;  %6448 = vmatpush1.bf16.msra.mxu1 %v6447_v36  ;;  %v2899_v36 = vld [vmem:[#allocation8 + $0x10] sm:$0xff]  ;;  %v2904_v45 = vld [vmem:[#allocation8 + $0x38] sm:$0xff] }
 0x1be   :  { %v8046_v46 = vpop.f32.mrb[6].mxu0  ;;  %6352 = vmatpush1.bf16.msra.mxu0 %v6351_v38  ;;  %6834 = vmatprep.subr.bf16.mxu1 %v6833_v39  ;;  %v2902_v38 = vld [vmem:[#allocation8 + $0x28] sm:$0xff] }
 0x1bf   :  { %v8048_v47 = vpop.f32.mrb[6].mxu1  ;;  %v8050_v48 = vpop.f32.mrb[7].mxu0  ;;  %2174 = vmatmul.mubr.f32.gmra.mrb[80].mxu0 %v7677_v49  ;;  %6450 = vmatprep.subr.bf16.mxu0 %v6449_v43  ;;  %v7691_v43 = vld [vmem:[#allocation2 + $0x168] sm:$0xff] }
 0x1c0   :  { %9209 = vst [vmem:[#allocation16_spill] sm:$0xff] %v8048_v47  ;;  %v8052_v50 = vpop.f32.mrb[7].mxu1  ;;  %2496 = vmatmul.mubr.f32.gmra.mrb[80].mxu1 %v7677_v49  ;;  %2179 = vmatprep.mubr.f32.mxu0 %v7678_v51  ;;  %v2907_v49 = vld [vmem:[#allocation8 + $0x50] sm:$0xff] }
 0x1c1   :  { %9210 = vst [vmem:[#allocation17_spill] sm:$0xff] %v8052_v50  ;;  %2501 = vmatprep.mubr.f32.mxu1 %v7678_v51  ;;  %v3004_v50 = vld [vmem:[#allocation8 + $0x358] sm:$0xff] }
 0x1c2   :  { %v8054_v52 = vpop.f32.mrb[8].mxu0 }
 0x1c3   :  { %v8056_v53 = vpop.f32.mrb[8].mxu1  ;;  %v8058_v54 = vpop.f32.mrb[9].mxu0  ;;  %2180 = vmatmul.mubr.f32.gmra.mrb[82].mxu0 %v7679_v55 }
 0x1c4   :  { %9211 = vst [vmem:[#allocation18_spill] sm:$0xff] %v8056_v53  ;;  %v8060_v56 = vpop.f32.mrb[9].mxu1  ;;  %2502 = vmatmul.mubr.f32.gmra.mrb[82].mxu1 %v7679_v55  ;;  %2185 = vmatprep.mubr.f32.mxu0 %v7680_v57  ;;  %v6451_v55 = vpack.c.bf16 %v2900_v34, %v2897_v33  ;;  %v2905_v33 = vld [vmem:[#allocation8 + $0x40] sm:$0xff]  ;;  %v2908_v34 = vld [vmem:[#allocation8 + $0x58] sm:$0xff] }
 0x1c5   :  { %9212 = vst [vmem:[#allocation19_spill] sm:$0xff] %v8060_v56  ;;  %2507 = vmatprep.mubr.f32.mxu1 %v7680_v57  ;;  %v2953_v57 = vld [vmem:[#allocation8 + $0x1c0] sm:$0xff]  ;;  %v2992_v56 = vld [vmem:[#allocation8 + $0x2f8] sm:$0xff] }
 0x1c6   :  { %v8062_v58 = vpop.f32.mrb[10].mxu0 }
 0x1c7   :  { %v8064_v59 = vpop.f32.mrb[10].mxu1  ;;  %v8066_v60 = vpop.f32.mrb[11].mxu0  ;;  %2186 = vmatmul.mubr.f32.gmra.mrb[84].mxu0 %v7681_v61 }
 0x1c8   :  { %9213 = vst [vmem:[#allocation20_spill] sm:$0xff] %v8064_v59  ;;  %v8068_v62 = vpop.f32.mrb[11].mxu1  ;;  %2508 = vmatmul.mubr.f32.gmra.mrb[84].mxu1 %v7681_v61  ;;  %2191 = vmatprep.mubr.f32.mxu0 %v7682_v63  ;;  %v2956_v61 = vld [vmem:[#allocation8 + $0x1d8] sm:$0xff] }
 0x1c9   :  { %9214 = vst [vmem:[#allocation21_spill] sm:$0xff] %v8068_v62  ;;  %2513 = vmatprep.mubr.f32.mxu1 %v7682_v63  ;;  %v6835_v63 = vpack.c.bf16 %v2902_v38, %v2899_v36  ;;  %v2959_v38 = vld [vmem:[#allocation8 + $0x1f0] sm:$0xff]  ;;  %v2932_v62 = vld [vmem:[#allocation8 + $0x118] sm:$0xff] }
 0x1ca   :  { %v8070_v1 = vpop.f32.mrb[12].mxu0 }
 0x1cb   :  { %v8072_v2 = vpop.f32.mrb[12].mxu1  ;;  %v8074_v3 = vpop.f32.mrb[13].mxu0  ;;  %2192 = vmatmul.mubr.f32.gmra.mrb[86].mxu0 %v7683_v4 }
 0x1cc   :  { %9215 = vst [vmem:[#allocation22_spill] sm:$0xff] %v8072_v2  ;;  %v8076_v5 = vpop.f32.mrb[13].mxu1  ;;  %2514 = vmatmul.mubr.f32.gmra.mrb[86].mxu1 %v7683_v4  ;;  %2197 = vmatprep.mubr.f32.mxu0 %v7684_v8  ;;  %v2903_v4 = vld [vmem:[#allocation8 + $0x30] sm:$0xff] }
 0x1cd   :  { %9216 = vst [vmem:[#allocation23_spill] sm:$0xff] %v8076_v5  ;;  %2519 = vmatprep.mubr.f32.mxu1 %v7684_v8  ;;  %v2906_v8 = vld [vmem:[#allocation8 + $0x48] sm:$0xff] }
 0x1ce   :  { %v8078_v9 = vpop.f32.mrb[14].mxu0  ;;  %v6455_v36 = vpack.c.bf16 %v2906_v8, %v2903_v4  ;;  %v2911_v8 = vld [vmem:[#allocation8 + $0x70] sm:$0xff]  ;;  %v2926_v5 = vld [vmem:[#allocation8 + $0xe8] sm:$0xff] }
 0x1cf   :  { %v8080_v10 = vpop.f32.mrb[14].mxu1  ;;  %v8082_v11 = vpop.f32.mrb[15].mxu0  ;;  %2198 = vmatmul.mubr.f32.gmra.mrb[88].mxu0 %v7685_v13 }
 0x1d0   :  { %9217 = vst [vmem:[#allocation24_spill] sm:$0xff] %v8080_v10  ;;  %v8084_v15 = vpop.f32.mrb[15].mxu1  ;;  %2520 = vmatmul.mubr.f32.gmra.mrb[88].mxu1 %v7685_v13  ;;  %2203 = vmatprep.mubr.f32.mxu0 %v7686_v16 }
 0x1d1   :  { %9218 = vst [vmem:[#allocation25_spill] sm:$0xff] %v8084_v15  ;;  %2525 = vmatprep.mubr.f32.mxu1 %v7686_v16  ;;  %v6453_v16 = vpack.c.bf16 %v2907_v49, %v2904_v45  ;;  %v9227_v45 = vmov 0.0   ;;  %v2909_v49 = vld [vmem:[#allocation8 + $0x60] sm:$0xff]  ;;  %v2920_v15 = vld [vmem:[#allocation8 + $0xb8] sm:$0xff] }
 0x1d2   :  { %v8086_v17 = vpop.f32.mrb[16].mxu0 }
 0x1d3   :  { %v8088_v18 = vpop.f32.mrb[16].mxu1  ;;  %v8090_v20 = vpop.f32.mrb[17].mxu0  ;;  %2204 = vmatmul.mubr.f32.gmra.mrb[90].mxu0 %v7687_v21 }
 0x1d4   :  { %9219 = vst [vmem:[#allocation26_spill] sm:$0xff] %v8088_v18  ;;  %v8092_v22 = vpop.f32.mrb[17].mxu1  ;;  %2526 = vmatmul.mubr.f32.gmra.mrb[90].mxu1 %v7687_v21  ;;  %2209 = vmatprep.mubr.f32.mxu0 %v7688_v23  ;;  %v2910_v21 = vld [vmem:[#allocation8 + $0x68] sm:$0xff] }
 0x1d5   :  { %9220 = vst [vmem:[#allocation27_spill] sm:$0xff] %v8092_v22  ;;  %2531 = vmatprep.mubr.f32.mxu1 %v7688_v23 }
 0x1d6   :  { %v8094_v24 = vpop.f32.mrb[18].mxu0 }
 0x1d7   :  { %v8096_v27 = vpop.f32.mrb[18].mxu1  ;;  %v8098_v28 = vpop.f32.mrb[19].mxu0  ;;  %2210 = vmatmul.mubr.f32.gmra.mrb[92].mxu0 %v7689_v29 }
 0x1d8   :  { %9221 = vst [vmem:[#allocation28_spill] sm:$0xff] %v8096_v27  ;;  %v8100_v30 = vpop.f32.mrb[19].mxu1  ;;  %2532 = vmatmul.mubr.f32.gmra.mrb[92].mxu1 %v7689_v29  ;;  %2215 = vmatprep.mubr.f32.mxu0 %v7690_v31 }
 0x1d9   :  { %9222 = vst [vmem:[#allocation29_spill] sm:$0xff] %v8100_v30  ;;  %2537 = vmatprep.mubr.f32.mxu1 %v7690_v31  ;;  %v7692_v31 = vld [vmem:[#allocation2 + $0x10] sm:$0xff]  ;;  %v2916_v30 = vld [vmem:[#allocation8 + $0x98] sm:$0xff] }
 0x1da   :  { %v8102_v35 = vpop.f32.mrb[20].mxu0 }
 0x1db   :  { %v8104_v39 = vpop.f32.mrb[20].mxu1  ;;  %v8106_v42 = vpop.f32.mrb[21].mxu0  ;;  %2216 = vmatmul.mubr.f32.gmra.mrb[94].mxu0 %v7691_v43 }
 0x1dc   :  { %9223 = vst [vmem:[#allocation30_spill] sm:$0xff] %v8104_v39  ;;  %v8108_v51 = vpop.f32.mrb[21].mxu1  ;;  %2538 = vmatmul.mubr.f32.gmra.mrb[94].mxu1 %v7691_v43  ;;  %2286 = vmatprep.mubr.f32.mxu0 %v9202_v12  ;;  %v2913_v43 = vld [vmem:[#allocation8 + $0x80] sm:$0xff]  ;;  %v6837_v39 = vpack.c.bf16 %v2956_v61, %v2953_v57  ;;  %v6839_v61 = vpack.c.bf16 %v2908_v34, %v2905_v33  ;;  %v2918_v33 = vld [vmem:[#allocation8 + $0xa8] sm:$0xff] }
 0x1dd   :  { %9224 = vst [vmem:[#allocation31_spill] sm:$0xff] %v8108_v51  ;;  %2608 = vmatprep.mubr.f32.mxu1 %v9202_v12  ;;  %v2962_v12 = vld [vmem:[#allocation8 + $0x208] sm:$0xff]  ;;  %v6457_v57 = vpack.c.bf16 %v2913_v43, %v2910_v21  ;;  %v2968_v21 = vld [vmem:[#allocation8 + $0x238] sm:$0xff]  ;;  %v2915_v43 = vld [vmem:[#allocation8 + $0x90] sm:$0xff] }
 0x1de   :  { %v8112_v13 = vpop.f32.mrb[22].mxu0  ;;  %v6841_v4 = vpack.c.bf16 %v2962_v12, %v2959_v38 }
 0x1df   :  { %v8114_v23 = vpop.f32.mrb[22].mxu1  ;;  %v8116_v29 = vpop.f32.mrb[23].mxu0  ;;  %2287 = vmatmul.mubr.f32.vlgmr.msra.gmra.mrb[64].mxu0 %v7692_v31 }
 0x1e0   :  { %9225 = vst [vmem:[#allocation32_spill] sm:$0xff] %v8114_v23  ;;  %v8118_v51 = vpop.f32.mrb[23].mxu1  ;;  %2609 = vmatmul.mubr.f32.vlgmr.msra.gmra.mrb[64].mxu1 %v7692_v31  ;;  %6452 = vmatpush1.bf16.msra.mxu0 %v6451_v55  ;;  %v2912_v23 = vld [vmem:[#allocation8 + $0x78] sm:$0xff] }
 0x1e1   :  { %9226 = vst [vmem:[#allocation33_spill] sm:$0xff] %v8118_v51  ;;  %6836 = vmatpush3.bf16.msra.mxu1 %v6835_v63  ;;  %2292 = vmatprep.mubr.f32.mxu0 %v9227_v45  ;;  %v7693_v55 = vld [vmem:[#allocation2 + $0x28] sm:$0xff]  ;;  %v2919_v63 = vld [vmem:[#allocation8 + $0xb0] sm:$0xff]  ;;  %v2914_v51 = vld [vmem:[#allocation8 + $0x88] sm:$0xff]  ;;  %v6459_v10 = vpack.c.bf16 %v2912_v23, %v2909_v49 }
 0x1e2   :  { %v8121_v27 = vpop.f32.mrb[24].mxu0  ;;  %2614 = vmatprep.mubr.f32.mxu1 %v9227_v45  ;;  %6454 = vmatprep.subr.bf16.mxu0 %v6453_v16  ;;  %v2965_v16 = vld [vmem:[#allocation8 + $0x220] sm:$0xff]  ;;  %v6461_v12 = vpack.c.bf16 %v2919_v63, %v2916_v30  ;;  %v6843_v38 = vpack.c.bf16 %v2914_v51, %v2911_v8  ;;  %v7694_v23 = vld [vmem:[#allocation2 + $0x40] sm:$0xff]  ;;  %v2974_v30 = vld [vmem:[#allocation8 + $0x268] sm:$0xff] }
 0x1e3   :  { %v8124_v18 = vpop.f32.mrb[24].mxu1  ;;  %v8126_v31 = vpop.f32.mrb[25].mxu0  ;;  %2293 = vmatmul.mubr.f32.gmra.mrb[66].mxu0 %v7693_v55  ;;  %6838 = vmatprep.subr.bf16.mxu1 %v6837_v39  ;;  %v2922_v39 = vld [vmem:[#allocation8 + $0xc8] sm:$0xff]  ;;  %v6845_v49 = vpack.c.bf16 %v2968_v21, %v2965_v16  ;;  %v2921_v51 = vld [vmem:[#allocation8 + $0xc0] sm:$0xff]  ;;  %v2924_v63 = vld [vmem:[#allocation8 + $0xd8] sm:$0xff] }
 0x1e4   :  { %9228 = vst [vmem:[#allocation34_spill] sm:$0xff] %v8124_v18  ;;  %v8128_v22 = vpop.f32.mrb[25].mxu1  ;;  %2615 = vmatmul.mubr.f32.gmra.mrb[66].mxu1 %v7693_v55  ;;  %6456 = vmatpush1.bf16.msra.mxu0 %v6455_v36  ;;  %v2925_v36 = vld [vmem:[#allocation8 + $0xe0] sm:$0xff]  ;;  %v2928_v16 = vld [vmem:[#allocation8 + $0xf8] sm:$0xff] }
 0x1e5   :  { %9229 = vst [vmem:[#allocation35_spill] sm:$0xff] %v8128_v22  ;;  %2298 = vmatprep.mubr.f32.mxu0 %v9227_v45  ;;  %2620 = vmatprep.mubr.f32.mxu1 %v9227_v45  ;;  %v2917_v22 = vld [vmem:[#allocation8 + $0xa0] sm:$0xff] }
 0x1e6   :  { %v8132_v34 = vpop.f32.mrb[26].mxu0  ;;  %6458 = vmatprep.subr.bf16.mxu0 %v6457_v57  ;;  %6840 = vmatpush3.bf16.msra.mxu1 %v6839_v61  ;;  %v6463_v57 = vpack.c.bf16 %v2918_v33, %v2915_v43  ;;  %v2971_v61 = vld [vmem:[#allocation8 + $0x250] sm:$0xff]  ;;  %v6847_v21 = vpack.c.bf16 %v2920_v15, %v2917_v22  ;;  %v2930_v22 = vld [vmem:[#allocation8 + $0x108] sm:$0xff] }
 0x1e7   :  { %v8134_v18 = vpop.f32.mrb[26].mxu1  ;;  %v8136_v55 = vpop.f32.mrb[27].mxu0  ;;  %2299 = vmatmul.mubr.f32.gmra.mrb[68].mxu0 %v7694_v23  ;;  %6842 = vmatprep.subr.bf16.mxu1 %v6841_v4  ;;  %v6465_v4 = vpack.c.bf16 %v2925_v36, %v2922_v39  ;;  %v2931_v43 = vld [vmem:[#allocation8 + $0x110] sm:$0xff]  ;;  %v6849_v33 = vpack.c.bf16 %v2974_v30, %v2971_v61  ;;  %v2977_v39 = vld [vmem:[#allocation8 + $0x280] sm:$0xff]  ;;  %v2934_v61 = vld [vmem:[#allocation8 + $0x128] sm:$0xff] }
 0x1e8   :  { %9230 = vst [vmem:[#allocation36_spill] sm:$0xff] %v8134_v18  ;;  %v8138_v2 = vpop.f32.mrb[27].mxu1  ;;  %2621 = vmatmul.mubr.f32.gmra.mrb[68].mxu1 %v7694_v23  ;;  %6460 = vmatpush1.bf16.msra.mxu0 %v6459_v10  ;;  %v7695_v10 = vld [vmem:[#allocation2 + $0x58] sm:$0xff] }
 0x1e9   :  { %9231 = vst [vmem:[#allocation37_spill] sm:$0xff] %v8138_v2  ;;  %2304 = vmatprep.mubr.f32.mxu0 %v9227_v45  ;;  %2626 = vmatprep.mubr.f32.mxu1 %v9227_v45  ;;  %v2923_v2 = vld [vmem:[#allocation8 + $0xd0] sm:$0xff] }
 0x1ea   :  { %v8142_v8 = vpop.f32.mrb[28].mxu0  ;;  %6462 = vmatprep.subr.bf16.mxu0 %v6461_v12  ;;  %6844 = vmatpush3.bf16.msra.mxu1 %v6843_v38  ;;  %v6467_v12 = vpack.c.bf16 %v2924_v63, %v2921_v51  ;;  %v2980_v38 = vld [vmem:[#allocation8 + $0x298] sm:$0xff]  ;;  %v2927_v15 = vld [vmem:[#allocation8 + $0xf0] sm:$0xff]  ;;  %v6851_v30 = vpack.c.bf16 %v2926_v5, %v2923_v2  ;;  %v2937_v51 = vld [vmem:[#allocation8 + $0x140] sm:$0xff] }
 0x1eb   :  { %v8144_v18 = vpop.f32.mrb[28].mxu1  ;;  %v8146_v23 = vpop.f32.mrb[29].mxu0  ;;  %2305 = vmatmul.mubr.f32.gmra.mrb[70].mxu0 %v7695_v10  ;;  %6846 = vmatprep.subr.bf16.mxu1 %v6845_v49  ;;  %v6469_v49 = vpack.c.bf16 %v2931_v43, %v2928_v16  ;;  %v6853_v63 = vpack.c.bf16 %v2980_v38, %v2977_v39  ;;  %v2983_v16 = vld [vmem:[#allocation8 + $0x2b0] sm:$0xff]  ;;  %v2986_v43 = vld [vmem:[#allocation8 + $0x2c8] sm:$0xff]  ;;  %v2933_v2 = vld [vmem:[#allocation8 + $0x120] sm:$0xff] }
 0x1ec   :  { %9232 = vst [vmem:[#allocation38_spill] sm:$0xff] %v8144_v18  ;;  %v8148_v59 = vpop.f32.mrb[29].mxu1  ;;  %2627 = vmatmul.mubr.f32.gmra.mrb[70].mxu1 %v7695_v10  ;;  %6464 = vmatpush1.bf16.msra.mxu0 %v6463_v57  ;;  %v7696_v57 = vld [vmem:[#allocation2 + $0x70] sm:$0xff]  ;;  %v2936_v5 = vld [vmem:[#allocation8 + $0x138] sm:$0xff]  ;;  %v2943_v38 = vld [vmem:[#allocation8 + $0x170] sm:$0xff] }
 0x1ed   :  { %9233 = vst [vmem:[#allocation39_spill] sm:$0xff] %v8148_v59  ;;  %2310 = vmatprep.mubr.f32.mxu0 %v9227_v45  ;;  %2632 = vmatprep.mubr.f32.mxu1 %v9227_v45  ;;  %v2929_v59 = vld [vmem:[#allocation8 + $0x100] sm:$0xff] }
 0x1ee   :  { %v8152_v36 = vpop.f32.mrb[30].mxu0  ;;  %6466 = vmatprep.subr.bf16.mxu0 %v6465_v4  ;;  %6848 = vmatpush3.bf16.msra.mxu1 %v6847_v21  ;;  %v6471_v4 = vpack.c.bf16 %v2930_v22, %v2927_v15  ;;  %v6473_v21 = vpack.c.bf16 %v2937_v51, %v2934_v61  ;;  %v7697_v39 = vld [vmem:[#allocation2 + $0x88] sm:$0xff]  ;;  %v2938_v15 = vld [vmem:[#allocation8 + $0x148] sm:$0xff]  ;;  %v6475_v22 = vpack.c.bf16 %v2936_v5, %v2933_v2  ;;  %v7698_v51 = vld [vmem:[#allocation2 + $0xa0] sm:$0xff] }
 0x1ef   :  { %v8154_v18 = vpop.f32.mrb[30].mxu1  ;;  %v8156_v10 = vpop.f32.mrb[31].mxu0  ;;  %2311 = vmatmul.mubr.f32.gmra.mrb[72].mxu0 %v7696_v57  ;;  %6850 = vmatprep.subr.bf16.mxu1 %v6849_v33  ;;  %v6855_v33 = vpack.c.bf16 %v2932_v62, %v2929_v59  ;;  %v2942_v61 = vld [vmem:[#allocation8 + $0x168] sm:$0xff]  ;;  %v3043_v5 = vld [vmem:[#allocation8 + $0x490] sm:$0xff] }
 0x1f0   :  { %9234 = vst [vmem:[#allocation40_spill] sm:$0xff] %v8154_v18  ;;  %v8158_v53 = vpop.f32.mrb[31].mxu1  ;;  %2633 = vmatmul.mubr.f32.gmra.mrb[72].mxu1 %v7696_v57  ;;  %6468 = vmatpush1.bf16.msra.mxu0 %v6467_v12  ;;  %v2940_v18 = vld [vmem:[#allocation8 + $0x158] sm:$0xff]  ;;  %v6857_v57 = vpack.c.bf16 %v2986_v43, %v2983_v16  ;;  %v2935_v12 = vld [vmem:[#allocation8 + $0x130] sm:$0xff]  ;;  %v2946_v62 = vld [vmem:[#allocation8 + $0x188] sm:$0xff] }
 0x1f1   :  { %9235 = vst [vmem:[#allocation41_spill] sm:$0xff] %v8158_v53  ;;  %2316 = vmatprep.mubr.f32.mxu0 %v9227_v45  ;;  %2638 = vmatprep.mubr.f32.mxu1 %v9227_v45  ;;  %v2989_v53 = vld [vmem:[#allocation8 + $0x2e0] sm:$0xff]  ;;  %v6477_v59 = vpack.c.bf16 %v2943_v38, %v2940_v18  ;;  %v2944_v43 = vld [vmem:[#allocation8 + $0x178] sm:$0xff] }
 0x1f2   :  { %6470 = vmatprep.subr.bf16.mxu0 %v6469_v49  ;;  %6852 = vmatpush3.bf16.msra.mxu1 %v6851_v30  ;;  %v2939_v49 = vld [vmem:[#allocation8 + $0x150] sm:$0xff]  ;;  %v6859_v30 = vpack.c.bf16 %v2938_v15, %v2935_v12  ;;  %v6861_v16 = vpack.c.bf16 %v2992_v56, %v2989_v53  ;;  %v2945_v18 = vld [vmem:[#allocation8 + $0x180] sm:$0xff]  ;;  %v2952_v53 = vld [vmem:[#allocation8 + $0x1b8] sm:$0xff] }
 0x1f3   :  { %2317 = vmatmul.mubr.f32.gmra.mrb[74].mxu0 %v7697_v39  ;;  %6854 = vmatprep.subr.bf16.mxu1 %v6853_v63  ;;  %v2949_v63 = vld [vmem:[#allocation8 + $0x1a0] sm:$0xff]  ;;  %v6479_v2 = vpack.c.bf16 %v2942_v61, %v2939_v49  ;;  %v7699_v12 = vld [vmem:[#allocation2 + $0xb8] sm:$0xff] }
 0x1f4   :  { %2639 = vmatmul.mubr.f32.gmra.mrb[74].mxu1 %v7697_v39  ;;  %6472 = vmatpush1.bf16.msra.mxu0 %v6471_v4  ;;  %v2941_v4 = vld [vmem:[#allocation8 + $0x160] sm:$0xff]  ;;  %v3046_v39 = vld [vmem:[#allocation8 + $0x4a8] sm:$0xff]  ;;  %v2955_v56 = vld [vmem:[#allocation8 + $0x1d0] sm:$0xff] }
 0x1f5   :  { %2322 = vmatprep.mubr.f32.mxu0 %v9227_v45  ;;  %2644 = vmatprep.mubr.f32.mxu1 %v9227_v45  ;;  %v6863_v38 = vpack.c.bf16 %v2944_v43, %v2941_v4  ;;  %v2954_v49 = vld [vmem:[#allocation8 + $0x1c8] sm:$0xff]  ;;  %v6485_v61 = vpack.c.bf16 %v2955_v56, %v2952_v53  ;;  %v7701_v43 = vld [vmem:[#allocation2 + $0xe8] sm:$0xff] }
 0x1f6   :  { %6474 = vmatprep.subr.bf16.mxu0 %v6473_v21  ;;  %6856 = vmatpush3.bf16.msra.mxu1 %v6855_v33  ;;  %v2948_v21 = vld [vmem:[#allocation8 + $0x198] sm:$0xff]  ;;  %v6481_v33 = vpack.c.bf16 %v2949_v63, %v2946_v62  ;;  %v2958_v62 = vld [vmem:[#allocation8 + $0x1e8] sm:$0xff]  ;;  %v2957_v63 = vld [vmem:[#allocation8 + $0x1e0] sm:$0xff] }
 0x1f7   :  { %2323 = vmatmul.mubr.f32.gmra.mrb[76].mxu0 %v7698_v51  ;;  %6858 = vmatprep.subr.bf16.mxu1 %v6857_v57  ;;  %v6865_v57 = vpack.c.bf16 %v3046_v39, %v3043_v5  ;;  %v6483_v15 = vpack.c.bf16 %v2948_v21, %v2945_v18  ;;  %v2967_v5 = vld [vmem:[#allocation8 + $0x230] sm:$0xff]  ;;  %v2966_v21 = vld [vmem:[#allocation8 + $0x228] sm:$0xff]  ;;  %v2973_v56 = vld [vmem:[#allocation8 + $0x260] sm:$0xff] }
 0x1f8   :  { %2645 = vmatmul.mubr.f32.gmra.mrb[76].mxu1 %v7698_v51  ;;  %6476 = vmatpush1.bf16.msra.mxu0 %v6475_v22  ;;  %v2951_v22 = vld [vmem:[#allocation8 + $0x1b0] sm:$0xff]  ;;  %v2970_v53 = vld [vmem:[#allocation8 + $0x248] sm:$0xff] }
 0x1f9   :  { %2328 = vmatprep.mubr.f32.mxu0 %v9227_v45  ;;  %2650 = vmatprep.mubr.f32.mxu1 %v9227_v45  ;;  %v6487_v51 = vpack.c.bf16 %v2954_v49, %v2951_v22  ;;  %v2963_v18 = vld [vmem:[#allocation8 + $0x210] sm:$0xff]  ;;  %v2972_v22 = vld [vmem:[#allocation8 + $0x258] sm:$0xff]  ;;  %v6497_v49 = vpack.c.bf16 %v2973_v56, %v2970_v53 }
 0x1fa   :  { %6478 = vmatprep.subr.bf16.mxu0 %v6477_v59  ;;  %6860 = vmatpush3.bf16.msra.mxu1 %v6859_v30  ;;  %v7700_v59 = vld [vmem:[#allocation2 + $0xd0] sm:$0xff] }
 0x1fb   :  { %2329 = vmatmul.mubr.f32.gmra.mrb[78].mxu0 %v7699_v12  ;;  %6862 = vmatprep.subr.bf16.mxu1 %v6861_v16  ;;  %v2961_v30 = vld [vmem:[#allocation8 + $0x200] sm:$0xff]  ;;  %v2960_v16 = vld [vmem:[#allocation8 + $0x1f8] sm:$0xff] }
 0x1fc   :  { %2651 = vmatmul.mubr.f32.gmra.mrb[78].mxu1 %v7699_v12  ;;  %6480 = vmatpush1.bf16.msra.mxu0 %v6479_v2  ;;  %v6489_v4 = vpack.c.bf16 %v2961_v30, %v2958_v62  ;;  %v2964_v2 = vld [vmem:[#allocation8 + $0x218] sm:$0xff]  ;;  %v6491_v39 = vpack.c.bf16 %v2960_v16, %v2957_v63  ;;  %v2979_v30 = vld [vmem:[#allocation8 + $0x290] sm:$0xff]  ;;  %v2978_v16 = vld [vmem:[#allocation8 + $0x288] sm:$0xff] }
 0x1fd   :  { %2334 = vmatprep.mubr.f32.mxu0 %v9227_v45  ;;  %2656 = vmatprep.mubr.f32.mxu1 %v9227_v45  ;;  %v7702_v12 = vld [vmem:[#allocation2 + $0x100] sm:$0xff] }
 0x1fe   :  { %6482 = vmatprep.subr.bf16.mxu0 %v6481_v33  ;;  %6864 = vmatpush3.bf16.msra.mxu1 %v6863_v38  ;;  %v6493_v33 = vpack.c.bf16 %v2967_v5, %v2964_v2  ;;  %v713_v38 = vlaneseq  ;;  %v2976_v62 = vld [vmem:[#allocation8 + $0x278] sm:$0xff]  ;;  %v2975_v63 = vld [vmem:[#allocation8 + $0x270] sm:$0xff]  ;;  %v7704_v2 = vld [vmem:[#allocation2 + $0x130] sm:$0xff] }
 0x1ff   :  { %2335 = vmatmul.mubr.f32.gmra.mrb[80].mxu0 %v7700_v59  ;;  %6866 = vmatprep.subr.bf16.mxu1 %v6865_v57  ;;  %v6495_v57 = vpack.c.bf16 %v2966_v21, %v2963_v18  ;;  %v2982_v5 = vld [vmem:[#allocation8 + $0x2a8] sm:$0xff]  ;;  %v8181_v18 = vld [vmem:[#allocation7] sm:$0xff]  ;;  %v6503_v21 = vpack.c.bf16 %v2978_v16, %v2975_v63 }
 0x200   :  { %2657 = vmatmul.mubr.f32.gmra.mrb[80].mxu1 %v7700_v59  ;;  %6484 = vmatpush1.bf16.msra.mxu0 %v6483_v15  ;;  %v2969_v15 = vld [vmem:[#allocation8 + $0x240] sm:$0xff]  ;;  %v7703_v59 = vld [vmem:[#allocation2 + $0x118] sm:$0xff]  ;;  %v7706_v16 = vld [vmem:[#allocation2 + $0x160] sm:$0xff] }
 0x201   :  { %2340 = vmatprep.mubr.f32.mxu0 %v9227_v45  ;;  %2662 = vmatprep.mubr.f32.mxu1 %v9227_v45 }
 0x202   :  { %6486 = vmatprep.subr.bf16.mxu0 %v6485_v61  ;;  %v8174_v61 = vshrl.u32 %v713_v38, 7  ;;  %v2981_v38 = vld [vmem:[#allocation8 + $0x2a0] sm:$0xff] }
 0x203   :  { %2341 = vmatmul.mubr.f32.gmra.mrb[82].mxu0 %v7701_v43 }
 0x204   :  { %2663 = vmatmul.mubr.f32.gmra.mrb[82].mxu1 %v7701_v43  ;;  %6488 = vmatpush1.bf16.msra.mxu0 %v6487_v51  ;;  %v6499_v51 = vpack.c.bf16 %v2972_v22, %v2969_v15  ;;  %v8179_v43 = vsub.s32 1, %v8174_v61  ;;  %v2988_v15 = vld [vmem:[#allocation8 + $0x2d8] sm:$0xff]  ;;  %v2991_v22 = vld [vmem:[#allocation8 + $0x2f0] sm:$0xff] }
 0x205   :  { %2346 = vmatprep.mubr.f32.mxu0 %v9227_v45  ;;  %2668 = vmatprep.mubr.f32.mxu1 %v9227_v45 }
 0x206   :  { %6490 = vmatprep.subr.bf16.mxu0 %v6489_v4  ;;  %v6501_v4 = vpack.c.bf16 %v2979_v30, %v2976_v62  ;;  %9236 = vst [vmem:[#allocation42_spill] sm:$0xff] %v8179_v43  ;;  %v8190_v56 = vrot.slane %v8181_v18, %v8179_v43  ;;  %v2987_v62 = vld [vmem:[#allocation8 + $0x2d0] sm:$0xff]  ;;  %v2990_v30 = vld [vmem:[#allocation8 + $0x2e8] sm:$0xff] }
 0x207   :  { %2347 = vmatmul.mubr.f32.gmra.mrb[84].mxu0 %v7702_v12  ;;  %v3002_v43 = vld [vmem:[#allocation8 + $0x348] sm:$0xff] }
 0x208   :  { %2669 = vmatmul.mubr.f32.gmra.mrb[84].mxu1 %v7702_v12  ;;  %6492 = vmatpush1.bf16.msra.mxu0 %v6491_v39  ;;  %v2985_v39 = vld [vmem:[#allocation8 + $0x2c0] sm:$0xff]  ;;  %v2984_v12 = vld [vmem:[#allocation8 + $0x2b8] sm:$0xff]  ;;  %v7026_v63 = vadd.f32 %v8026_v7, %v8190_v56 }
 0x209   :  { %2352 = vmatprep.mubr.f32.mxu0 %v9227_v45  ;;  %2674 = vmatprep.mubr.f32.mxu1 %v9227_v45  ;;  %v6505_v53 = vpack.c.bf16 %v2985_v39, %v2982_v5  ;;  %v6511_v5 = vpack.c.bf16 %v2990_v30, %v2987_v62  ;;  %v2993_v7 = vld [vmem:[#allocation8 + $0x300] sm:$0xff]  ;;  %v3003_v62 = vld [vmem:[#allocation8 + $0x350] sm:$0xff]  ;;  %v3052_v30 = vld [vmem:[#allocation8 + $0x4d8] sm:$0xff] }
 0x20a   :  { %6494 = vmatprep.subr.bf16.mxu0 %v6493_v33  ;;  %v8184_v33 = vsub.s32 0, %v8174_v61 }
 0x20b   :  { %2353 = vmatmul.mubr.f32.gmra.mrb[86].mxu0 %v7703_v59 }
 0x20c   :  { %2675 = vmatmul.mubr.f32.gmra.mrb[86].mxu1 %v7703_v59  ;;  %6496 = vmatpush1.bf16.msra.mxu0 %v6495_v57  ;;  %9237 = vst [vmem:[#allocation43_spill] sm:$0xff] %v8184_v33  ;;  %v7705_v57 = vld [vmem:[#allocation2 + $0x148] sm:$0xff]  ;;  %v8194_v59 = vrot.slane %v8181_v18, %v8184_v33  ;;  %v2999_v33 = vld [vmem:[#allocation8 + $0x330] sm:$0xff] }
 0x20d   :  { %2358 = vmatprep.mubr.f32.mxu0 %v9227_v45  ;;  %2680 = vmatprep.mubr.f32.mxu1 %v9227_v45 }
 0x20e   :  { %6498 = vmatprep.subr.bf16.mxu0 %v6497_v49  ;;  %v6507_v49 = vpack.c.bf16 %v2984_v12, %v2981_v38  ;;  %v7025_v39 = vadd.f32 %v8022_v0, %v8194_v59  ;;  %v2996_v12 = vld [vmem:[#allocation8 + $0x318] sm:$0xff]  ;;  %v3049_v0 = vld [vmem:[#allocation8 + $0x4c0] sm:$0xff] }
 0x20f   :  { %2359 = vmatmul.mubr.f32.gmra.mrb[88].mxu0 %v7704_v2  ;;  %v6869_v47 = vpack.c.bf16 %v3052_v30, %v3049_v0  ;;  %v3012_v0 = vld [vmem:[#allocation8 + $0x398] sm:$0xff]  ;;  %v3015_v30 = vld [vmem:[#allocation8 + $0x3b0] sm:$0xff] }
 0x210   :  { %2681 = vmatmul.mubr.f32.gmra.mrb[88].mxu1 %v7704_v2  ;;  %6500 = vmatpush1.bf16.msra.mxu0 %v6499_v51  ;;  %v6509_v51 = vpack.c.bf16 %v2991_v22, %v2988_v15  ;;  %v2997_v2 = vld [vmem:[#allocation8 + $0x320] sm:$0xff]  ;;  %v7707_v15 = vld [vmem:[#allocation2 + $0x178] sm:$0xff] }
 0x211   :  { %2364 = vmatprep.mubr.f32.mxu0 %v9227_v45  ;;  %2686 = vmatprep.mubr.f32.mxu1 %v9227_v45  ;;  %v2998_v22 = vld [vmem:[#allocation8 + $0x328] sm:$0xff] }
 0x212   :  { %6502 = vmatprep.subr.bf16.mxu0 %v6501_v4  ;;  %v2994_v4 = vld [vmem:[#allocation8 + $0x308] sm:$0xff] }
 0x213   :  { %2365 = vmatmul.mubr.f32.gmra.mrb[90].mxu0 %v7705_v57  ;;  %v6513_v38 = vpack.c.bf16 %v2997_v2, %v2994_v4 }
 0x214   :  { %2687 = vmatmul.mubr.f32.gmra.mrb[90].mxu1 %v7705_v57  ;;  %6504 = vmatpush1.bf16.msra.mxu0 %v6503_v21  ;;  %v7028_v21 = vadd.f32 %v8034_v26, %v8190_v56  ;;  %v2706_v57 = vmax.f32 %v7026_v63, 0.0  ;;  %v6515_v26 = vpack.c.bf16 %v2996_v12, %v2993_v7  ;;  %v7030_v63 = vadd.f32 %v8042_v41, %v8190_v56 }
 0x215   :  { %2370 = vmatprep.mubr.f32.mxu0 %v9227_v45  ;;  %2692 = vmatprep.mubr.f32.mxu1 %v9227_v45  ;;  %v6519_v41 = vpack.c.bf16 %v3002_v43, %v2999_v33  ;;  %v7032_v12 = vadd.f32 %v8050_v48, %v8190_v56  ;;  %v3061_v43 = vld [vmem:[#allocation8 + $0x520] sm:$0xff]  ;;  %v3064_v33 = vld [vmem:[#allocation8 + $0x538] sm:$0xff]  ;;  %v7031_v48 = vadd.f32 %v8046_v46, %v8194_v59 }
 0x216   :  { %6506 = vmatprep.subr.bf16.mxu0 %v6505_v53  ;;  %v2995_v53 = vld [vmem:[#allocation8 + $0x310] sm:$0xff]  ;;  %v3016_v46 = vld [vmem:[#allocation8 + $0x3b8] sm:$0xff] }
 0x217   :  { %2371 = vmatmul.mubr.f32.gmra.mrb[92].mxu0 %v7706_v16  ;;  %v6867_v4 = vpack.c.bf16 %v2998_v22, %v2995_v53  ;;  %v3005_v22 = vld [vmem:[#allocation8 + $0x360] sm:$0xff] }
 0x218   :  { %2693 = vmatmul.mubr.f32.gmra.mrb[92].mxu1 %v7706_v16  ;;  %6508 = vmatpush1.bf16.msra.mxu0 %v6507_v49  ;;  %v3000_v49 = vld [vmem:[#allocation8 + $0x338] sm:$0xff]  ;;  %v2705_v16 = vmax.f32 %v7025_v39, 0.0  ;;  %v3001_v39 = vld [vmem:[#allocation8 + $0x340] sm:$0xff] }
 0x219   :  { %2376 = vmatprep.mubr.f32.mxu0 %v9227_v45  ;;  %2698 = vmatprep.mubr.f32.mxu1 %v9227_v45  ;;  %v7027_v45 = vadd.f32 %v8030_v19, %v8194_v59  ;;  %v6517_v2 = vpack.c.bf16 %v3003_v62, %v3000_v49  ;;  %v3055_v19 = vld [vmem:[#allocation8 + $0x4f0] sm:$0xff]  ;;  %v3008_v49 = vld [vmem:[#allocation8 + $0x378] sm:$0xff]  ;;  %v6871_v62 = vpack.c.bf16 %v3004_v50, %v3001_v39  ;;  %v3021_v39 = vld [vmem:[#allocation8 + $0x3e0] sm:$0xff] }
 0x21a   :  { %6510 = vmatprep.subr.bf16.mxu0 %v6509_v51  ;;  %v2718_v51 = vmax.f32 %v7028_v21, 0.0  ;;  %v7029_v21 = vadd.f32 %v8038_v37, %v8194_v59  ;;  %v3010_v37 = vld [vmem:[#allocation8 + $0x388] sm:$0xff]  ;;  %v7034_v50 = vadd.f32 %v8058_v54, %v8190_v56  ;;  %v7033_v54 = vadd.f32 %v8054_v52, %v8194_v59 }
 0x21b   :  { %2377 = vmatmul.mubr.f32.gmra.mrb[94].mxu0 %v7707_v15  ;;  %v2717_v7 = vmax.f32 %v7027_v45, 0.0  ;;  %v3007_v45 = vld [vmem:[#allocation8 + $0x370] sm:$0xff]  ;;  %v3022_v52 = vld [vmem:[#allocation8 + $0x3e8] sm:$0xff] }
 0x21c   :  { %2699 = vmatmul.mubr.f32.gmra.mrb[94].mxu1 %v7707_v15  ;;  %6512 = vmatpush1.bf16.msra.mxu0 %v6511_v5  ;;  %v3006_v15 = vld [vmem:[#allocation8 + $0x368] sm:$0xff]  ;;  %v3009_v5 = vld [vmem:[#allocation8 + $0x380] sm:$0xff] }
 0x21d   :  { %3554 = vmatprep.mubr.f32.mxu0 %v2706_v57  ;;  %4520 = vmatprep.mubr.f32.mxu1 %v2706_v57  ;;  %v3058_v57 = vld [vmem:[#allocation8 + $0x508] sm:$0xff]  ;;  %v6521_v53 = vpack.c.bf16 %v3009_v5, %v3006_v15  ;;  %v6875_v5 = vpack.c.bf16 %v3010_v37, %v3007_v45  ;;  %v3019_v37 = vld [vmem:[#allocation8 + $0x3d0] sm:$0xff] }
 0x21e   :  { %6514 = vmatprep.subr.bf16.mxu0 %v6513_v38  ;;  %v2730_v38 = vmax.f32 %v7030_v63, 0.0  ;;  %v2742_v63 = vmax.f32 %v7032_v12, 0.0  ;;  %v3018_v15 = vld [vmem:[#allocation8 + $0x3c8] sm:$0xff]  ;;  %v2754_v12 = vmax.f32 %v7034_v50, 0.0 }
 0x21f   :  { %3555 = vmatmul.mubr.f32.vlgmr.msra.gmra.mrb[96].mxu0 %v2705_v16 }
 0x220   :  { %4521 = vmatmul.mubr.f32.vlgmr.msra.gmra.mrb[96].mxu1 %v2705_v16  ;;  %3560 = vmatprep.mubr.f32.mxu0 %v2718_v51  ;;  %v6873_v16 = vpack.c.bf16 %v3058_v57, %v3055_v19  ;;  %v6877_v19 = vpack.c.bf16 %v3064_v33, %v3061_v43  ;;  %v3013_v57 = vld [vmem:[#allocation8 + $0x3a0] sm:$0xff]  ;;  %v3076_v33 = vld [vmem:[#allocation8 + $0x598] sm:$0xff] }
 0x221   :  { %6516 = vmatpush1.bf16.msra.mxu0 %v6515_v26  ;;  %4525 = vmatprep.mubr.f32.mxu1 %v2718_v51  ;;  %v2729_v26 = vmax.f32 %v7029_v21, 0.0  ;;  %v6523_v51 = vpack.c.bf16 %v3008_v49, %v3005_v22  ;;  %v3070_v21 = vld [vmem:[#allocation8 + $0x568] sm:$0xff]  ;;  %v6529_v22 = vpack.c.bf16 %v3021_v39, %v3018_v15  ;;  %v3017_v49 = vld [vmem:[#allocation8 + $0x3c0] sm:$0xff]  ;;  %v6883_v15 = vpack.c.bf16 %v3022_v52, %v3019_v37 }
 0x222   :  { %6868 = vmatpush3.bf16.msra.mxu1 %v6867_v4  ;;  %6518 = vmatprep.subr.bf16.mxu0 %v6517_v2  ;;  %v3011_v4 = vld [vmem:[#allocation8 + $0x390] sm:$0xff]  ;;  %v3014_v2 = vld [vmem:[#allocation8 + $0x3a8] sm:$0xff]  ;;  %v3073_v43 = vld [vmem:[#allocation8 + $0x580] sm:$0xff] }
 0x223   :  { %3561 = vmatmul.mubr.f32.gmra.mrb[98].mxu0 %v2717_v7  ;;  %6870 = vmatprep.subr.bf16.mxu1 %v6869_v47  ;;  %v6525_v47 = vpack.c.bf16 %v3015_v30, %v3012_v0  ;;  %v3024_v0 = vld [vmem:[#allocation8 + $0x3f8] sm:$0xff]  ;;  %v6879_v30 = vpack.c.bf16 %v3016_v46, %v3013_v57  ;;  %v6885_v39 = vpack.c.bf16 %v3076_v33, %v3073_v43  ;;  %v3079_v57 = vld [vmem:[#allocation8 + $0x5b0] sm:$0xff]  ;;  %v3082_v46 = vld [vmem:[#allocation8 + $0x5c8] sm:$0xff] }
 0x224   :  { %4526 = vmatmul.mubr.f32.gmra.mrb[98].mxu1 %v2717_v7  ;;  %3566 = vmatprep.mubr.f32.mxu0 %v2730_v38  ;;  %v3067_v7 = vld [vmem:[#allocation8 + $0x550] sm:$0xff]  ;;  %v3034_v37 = vld [vmem:[#allocation8 + $0x448] sm:$0xff]  ;;  %v3085_v52 = vld [vmem:[#allocation8 + $0x5e0] sm:$0xff] }
 0x225   :  { %6520 = vmatpush1.bf16.msra.mxu0 %v6519_v41  ;;  %4530 = vmatprep.mubr.f32.mxu1 %v2730_v38  ;;  %v2741_v41 = vmax.f32 %v7031_v48, 0.0  ;;  %v6527_v38 = vpack.c.bf16 %v3014_v2, %v3011_v4  ;;  %v6881_v45 = vpack.c.bf16 %v3070_v21, %v3067_v7  ;;  %v3026_v4 = vld [vmem:[#allocation8 + $0x408] sm:$0xff]  ;;  %v3088_v43 = vld [vmem:[#allocation8 + $0x5f8] sm:$0xff] }
 0x226   :  { %6522 = vmatprep.subr.bf16.mxu0 %v6521_v53  ;;  %6872 = vmatpush3.bf16.msra.mxu1 %v6871_v62  ;;  %v7036_v53 = vadd.f32 %v8066_v60, %v8190_v56  ;;  %v3020_v62 = vld [vmem:[#allocation8 + $0x3d8] sm:$0xff]  ;;  %v7035_v60 = vadd.f32 %v8062_v58, %v8194_v59  ;;  %v3030_v2 = vld [vmem:[#allocation8 + $0x428] sm:$0xff] }
 0x227   :  { %3567 = vmatmul.mubr.f32.gmra.mrb[100].mxu0 %v2729_v26  ;;  %6874 = vmatprep.subr.bf16.mxu1 %v6873_v16  ;;  %v3027_v16 = vld [vmem:[#allocation8 + $0x410] sm:$0xff]  ;;  %v6531_v48 = vpack.c.bf16 %v3020_v62, %v3017_v49  ;;  %v3028_v58 = vld [vmem:[#allocation8 + $0x418] sm:$0xff] }
 0x228   :  { %4531 = vmatmul.mubr.f32.gmra.mrb[100].mxu1 %v2729_v26  ;;  %3572 = vmatprep.mubr.f32.mxu0 %v2742_v63  ;;  %v2753_v26 = vmax.f32 %v7033_v54, 0.0  ;;  %v6533_v50 = vpack.c.bf16 %v3027_v16, %v3024_v0  ;;  %v2765_v7 = vmax.f32 %v7035_v60, 0.0  ;;  %v7040_v54 = vadd.f32 %v8082_v11, %v8190_v56  ;;  %v3036_v49 = vld [vmem:[#allocation8 + $0x458] sm:$0xff] }
 0x229   :  { %6524 = vmatpush1.bf16.msra.mxu0 %v6523_v51  ;;  %4535 = vmatprep.mubr.f32.mxu1 %v2742_v63  ;;  %v2766_v51 = vmax.f32 %v7036_v53, 0.0  ;;  %v7038_v63 = vadd.f32 %v8074_v3, %v8190_v56  ;;  %v7037_v3 = vadd.f32 %v8070_v1, %v8194_v59  ;;  %v3029_v53 = vld [vmem:[#allocation8 + $0x420] sm:$0xff]  ;;  %v3039_v1 = vld [vmem:[#allocation8 + $0x470] sm:$0xff]  ;;  %v6889_v16 = vpack.c.bf16 %v3082_v46, %v3079_v57  ;;  %v3040_v57 = vld [vmem:[#allocation8 + $0x478] sm:$0xff] }
 0x22a   :  { %6526 = vmatprep.subr.bf16.mxu0 %v6525_v47  ;;  %6876 = vmatpush3.bf16.msra.mxu1 %v6875_v5  ;;  %v3023_v47 = vld [vmem:[#allocation8 + $0x3f0] sm:$0xff]  ;;  %v3033_v5 = vld [vmem:[#allocation8 + $0x440] sm:$0xff] }
 0x22b   :  { %3573 = vmatmul.mubr.f32.gmra.mrb[102].mxu0 %v2741_v41  ;;  %6878 = vmatprep.subr.bf16.mxu1 %v6877_v19  ;;  %v3025_v19 = vld [vmem:[#allocation8 + $0x400] sm:$0xff]  ;;  %v6535_v21 = vpack.c.bf16 %v3026_v4, %v3023_v47  ;;  %v2777_v33 = vmax.f32 %v7037_v3, 0.0  ;;  %v3035_v47 = vld [vmem:[#allocation8 + $0x450] sm:$0xff]  ;;  %v3038_v4 = vld [vmem:[#allocation8 + $0x468] sm:$0xff] }
 0x22c   :  { %4536 = vmatmul.mubr.f32.gmra.mrb[102].mxu1 %v2741_v41  ;;  %3578 = vmatprep.mubr.f32.mxu0 %v2754_v12  ;;  %v2778_v41 = vmax.f32 %v7038_v63, 0.0  ;;  %v6887_v62 = vpack.c.bf16 %v3028_v58, %v3025_v19  ;;  %v6893_v19 = vpack.c.bf16 %v3088_v43, %v3085_v52  ;;  %v3037_v58 = vld [vmem:[#allocation8 + $0x460] sm:$0xff]  ;;  %v3139_v46 = vld [vmem:[#allocation8 + $0x790] sm:$0xff] }
 0x22d   :  { %6528 = vmatpush1.bf16.msra.mxu0 %v6527_v38  ;;  %4540 = vmatprep.mubr.f32.mxu1 %v2754_v12  ;;  %v6537_v12 = vpack.c.bf16 %v3033_v5, %v3030_v2  ;;  %v3042_v2 = vld [vmem:[#allocation8 + $0x488] sm:$0xff] }
 0x22e   :  { %6530 = vmatprep.subr.bf16.mxu0 %v6529_v22  ;;  %6880 = vmatpush3.bf16.msra.mxu1 %v6879_v30  ;;  %v3032_v22 = vld [vmem:[#allocation8 + $0x438] sm:$0xff] }
 0x22f   :  { %3579 = vmatmul.mubr.f32.gmra.mrb[104].mxu0 %v2753_v26  ;;  %6882 = vmatprep.subr.bf16.mxu1 %v6881_v45  ;;  %v3031_v45 = vld [vmem:[#allocation8 + $0x430] sm:$0xff]  ;;  %v6539_v60 = vpack.c.bf16 %v3032_v22, %v3029_v53 }
 0x230   :  { %4541 = vmatmul.mubr.f32.gmra.mrb[104].mxu1 %v2753_v26  ;;  %3584 = vmatprep.mubr.f32.mxu0 %v2766_v51  ;;  %v7039_v26 = vadd.f32 %v8078_v9, %v8194_v59  ;;  %v3045_v9 = vld [vmem:[#allocation8 + $0x4a0] sm:$0xff] }
 0x231   :  { %6532 = vmatpush1.bf16.msra.mxu0 %v6531_v48  ;;  %4545 = vmatprep.mubr.f32.mxu1 %v2766_v51  ;;  %v2790_v48 = vmax.f32 %v7040_v54, 0.0  ;;  %v7042_v51 = vadd.f32 %v8090_v20, %v8190_v56  ;;  %v6545_v22 = vpack.c.bf16 %v3045_v9, %v3042_v2  ;;  %v3057_v9 = vld [vmem:[#allocation8 + $0x500] sm:$0xff] }
 0x232   :  { %v8230_v38 = vpop.f32.mrb[32].mxu0  ;;  %6534 = vmatprep.subr.bf16.mxu0 %v6533_v50  ;;  %6884 = vmatpush3.bf16.msra.mxu1 %v6883_v15  ;;  %v6541_v50 = vpack.c.bf16 %v3039_v1, %v3036_v49  ;;  %v6891_v15 = vpack.c.bf16 %v3034_v37, %v3031_v45  ;;  %v2789_v3 = vmax.f32 %v7039_v26, 0.0  ;;  %v3041_v49 = vld [vmem:[#allocation8 + $0x480] sm:$0xff]  ;;  %v6895_v1 = vpack.c.bf16 %v3040_v57, %v3037_v58  ;;  %v3051_v37 = vld [vmem:[#allocation8 + $0x4d0] sm:$0xff] }
 0x233   :  { %v8232_v0 = vpop.f32.mrb[32].mxu1  ;;  %v8234_v30 = vpop.f32.mrb[33].mxu0  ;;  %3585 = vmatmul.mubr.f32.gmra.mrb[106].mxu0 %v2765_v7  ;;  %6886 = vmatprep.subr.bf16.mxu1 %v6885_v39  ;;  %v2802_v54 = vmax.f32 %v7042_v51, 0.0  ;;  %v7045_v58 = vadd.f32 %v8102_v35, %v8194_v59  ;;  %v3063_v35 = vld [vmem:[#allocation8 + $0x530] sm:$0xff] }
 0x234   :  { %v8236_v11 = vpop.f32.mrb[33].mxu1  ;;  %4546 = vmatmul.mubr.f32.gmra.mrb[106].mxu1 %v2765_v7  ;;  %3590 = vmatprep.mubr.f32.mxu0 %v2778_v41  ;;  %v3142_v7 = vld [vmem:[#allocation8 + $0x7a8] sm:$0xff] }
 0x235   :  { %6536 = vmatpush1.bf16.msra.mxu0 %v6535_v21  ;;  %4550 = vmatprep.mubr.f32.mxu1 %v2778_v41  ;;  %v7041_v21 = vadd.f32 %v8086_v17, %v8194_v59  ;;  %v6543_v41 = vpack.c.bf16 %v3038_v4, %v3035_v47  ;;  %v3048_v17 = vld [vmem:[#allocation8 + $0x4b8] sm:$0xff]  ;;  %v6897_v52 = vpack.c.bf16 %v3142_v7, %v3139_v46  ;;  %v3047_v47 = vld [vmem:[#allocation8 + $0x4b0] sm:$0xff]  ;;  %v3050_v4 = vld [vmem:[#allocation8 + $0x4c8] sm:$0xff] }
 0x236   :  { %v8242_v63 = vpop.f32.mrb[34].mxu0  ;;  %6538 = vmatprep.subr.bf16.mxu0 %v6537_v12  ;;  %6888 = vmatpush3.bf16.msra.mxu1 %v6887_v62  ;;  %v7044_v12 = vadd.f32 %v8098_v28, %v8190_v56  ;;  %v3044_v62 = vld [vmem:[#allocation8 + $0x498] sm:$0xff]  ;;  %v6551_v57 = vpack.c.bf16 %v3050_v4, %v3047_v47  ;;  %v7048_v7 = vadd.f32 %v8116_v29, %v8190_v56  ;;  %v3066_v47 = vld [vmem:[#allocation8 + $0x548] sm:$0xff] }
 0x237   :  { %v8244_v5 = vpop.f32.mrb[34].mxu1  ;;  %v8246_v39 = vpop.f32.mrb[35].mxu0  ;;  %3591 = vmatmul.mubr.f32.gmra.mrb[108].mxu0 %v2777_v33  ;;  %6890 = vmatprep.subr.bf16.mxu1 %v6889_v16  ;;  %v2801_v28 = vmax.f32 %v7041_v21, 0.0  ;;  %v6547_v26 = vpack.c.bf16 %v3044_v62, %v3041_v49  ;;  %v3060_v49 = vld [vmem:[#allocation8 + $0x518] sm:$0xff]  ;;  %v7047_v29 = vadd.f32 %v8112_v13, %v8194_v59  ;;  %v3069_v13 = vld [vmem:[#allocation8 + $0x560] sm:$0xff] }
 0x238   :  { %9238 = vst [vmem:[#allocation44_spill] sm:$0xff] %v8244_v5  ;;  %v8248_v20 = vpop.f32.mrb[35].mxu1  ;;  %4551 = vmatmul.mubr.f32.gmra.mrb[108].mxu1 %v2777_v33  ;;  %3596 = vmatprep.mubr.f32.mxu0 %v2790_v48  ;;  %v7043_v33 = vadd.f32 %v8094_v24, %v8194_v59  ;;  %v3054_v24 = vld [vmem:[#allocation8 + $0x4e8] sm:$0xff]  ;;  %v3135_v5 = vld [vmem:[#allocation8 + $0x770] sm:$0xff] }
 0x239   :  { %6540 = vmatpush1.bf16.msra.mxu0 %v6539_v60  ;;  %4555 = vmatprep.mubr.f32.mxu1 %v2790_v48  ;;  %v2814_v60 = vmax.f32 %v7044_v12, 0.0  ;;  %v7046_v48 = vadd.f32 %v8106_v42, %v8190_v56  ;;  %v6553_v21 = vpack.c.bf16 %v3057_v9, %v3054_v24  ;;  %v2837_v24 = vmax.f32 %v7047_v29, 0.0 }
 0x23a   :  { %v8254_v53 = vpop.f32.mrb[36].mxu0  ;;  %6542 = vmatprep.subr.bf16.mxu0 %v6541_v50  ;;  %6892 = vmatpush3.bf16.msra.mxu1 %v6891_v15  ;;  %v6549_v50 = vpack.c.bf16 %v3051_v37, %v3048_v17  ;;  %v2813_v42 = vmax.f32 %v7043_v33, 0.0  ;;  %v2838_v37 = vmax.f32 %v7048_v7, 0.0  ;;  %v6557_v33 = vpack.c.bf16 %v3063_v35, %v3060_v49  ;;  %v3065_v7 = vld [vmem:[#allocation8 + $0x540] sm:$0xff]  ;;  %v3072_v49 = vld [vmem:[#allocation8 + $0x578] sm:$0xff] }
 0x23b   :  { %v8256_v16 = vpop.f32.mrb[36].mxu1  ;;  %v8258_v45 = vpop.f32.mrb[37].mxu0  ;;  %3597 = vmatmul.mubr.f32.gmra.mrb[110].mxu0 %v2789_v3  ;;  %6894 = vmatprep.subr.bf16.mxu1 %v6893_v19  ;;  %v2826_v46 = vmax.f32 %v7046_v48, 0.0 }
 0x23c   :  { %9239 = vst [vmem:[#allocation45_spill] sm:$0xff] %v8256_v16  ;;  %v8260_v43 = vpop.f32.mrb[37].mxu1  ;;  %4556 = vmatmul.mubr.f32.gmra.mrb[110].mxu1 %v2789_v3  ;;  %3602 = vmatprep.mubr.f32.mxu0 %v2802_v54  ;;  %v3128_v16 = vld [vmem:[#allocation8 + $0x738] sm:$0xff] }
 0x23d   :  { %9240 = vst [vmem:[#allocation46_spill] sm:$0xff] %v8260_v43  ;;  %6544 = vmatpush1.bf16.msra.mxu0 %v6543_v41  ;;  %4560 = vmatprep.mubr.f32.mxu1 %v2802_v54  ;;  %v3053_v41 = vld [vmem:[#allocation8 + $0x4e0] sm:$0xff]  ;;  %v3056_v54 = vld [vmem:[#allocation8 + $0x4f8] sm:$0xff] }
 0x23e   :  { %v8266_v51 = vpop.f32.mrb[38].mxu0  ;;  %6546 = vmatprep.subr.bf16.mxu0 %v6545_v22  ;;  %6896 = vmatpush3.bf16.msra.mxu1 %v6895_v1  ;;  %v2825_v1 = vmax.f32 %v7045_v58, 0.0  ;;  %v6555_v17 = vpack.c.bf16 %v3056_v54, %v3053_v41  ;;  %v7052_v58 = vadd.f32 %v8136_v55, %v8190_v56  ;;  %v7051_v55 = vadd.f32 %v8132_v34, %v8194_v59  ;;  %v3078_v34 = vld [vmem:[#allocation8 + $0x5a8] sm:$0xff]  ;;  %v3132_v43 = vld [vmem:[#allocation8 + $0x758] sm:$0xff] }
 0x23f   :  { %v8268_v2 = vpop.f32.mrb[38].mxu1  ;;  %v8270_v15 = vpop.f32.mrb[39].mxu0  ;;  %3603 = vmatmul.mubr.f32.gmra.mrb[112].mxu0 %v2801_v28  ;;  %6898 = vmatprep.subr.bf16.mxu1 %v6897_v52  ;;  %v7050_v52 = vadd.f32 %v8126_v31, %v8190_v56  ;;  %v7049_v31 = vadd.f32 %v8121_v27, %v8194_v59  ;;  %v3075_v27 = vld [vmem:[#allocation8 + $0x590] sm:$0xff] }
 0x240   :  { %9241 = vst [vmem:[#allocation47_spill] sm:$0xff] %v8268_v2  ;;  %v8272_v19 = vpop.f32.mrb[39].mxu1  ;;  %4561 = vmatmul.mubr.f32.gmra.mrb[112].mxu1 %v2801_v28  ;;  %3608 = vmatprep.mubr.f32.mxu0 %v2814_v60 }
 0x241   :  { %9242 = vst [vmem:[#allocation48_spill] sm:$0xff] %v8272_v19  ;;  %6548 = vmatpush1.bf16.msra.mxu0 %v6547_v26  ;;  %4565 = vmatprep.mubr.f32.mxu1 %v2814_v60  ;;  %v3059_v26 = vld [vmem:[#allocation8 + $0x510] sm:$0xff]  ;;  %v3062_v60 = vld [vmem:[#allocation8 + $0x528] sm:$0xff] }
 0x242   :  { %v8278_v3 = vpop.f32.mrb[40].mxu0  ;;  %6550 = vmatprep.subr.bf16.mxu0 %v6549_v50  ;;  %v6559_v9 = vpack.c.bf16 %v3062_v60, %v3059_v26  ;;  %v6565_v26 = vpack.c.bf16 %v3075_v27, %v3072_v49  ;;  %v3071_v60 = vld [vmem:[#allocation8 + $0x570] sm:$0xff]  ;;  %v7056_v49 = vadd.f32 %v8156_v10, %v8190_v56  ;;  %v7055_v10 = vadd.f32 %v8152_v36, %v8194_v59 }
 0x243   :  { %v8280_v12 = vpop.f32.mrb[40].mxu1  ;;  %v8282_v22 = vpop.f32.mrb[41].mxu0  ;;  %3609 = vmatmul.mubr.f32.gmra.mrb[114].mxu0 %v2813_v42 }
 0x244   :  { %9243 = vst [vmem:[#allocation49_spill] sm:$0xff] %v8280_v12  ;;  %v8284_v62 = vpop.f32.mrb[41].mxu1  ;;  %4566 = vmatmul.mubr.f32.gmra.mrb[114].mxu1 %v2813_v42  ;;  %3614 = vmatprep.mubr.f32.mxu0 %v2826_v46  ;;  %v2850_v42 = vmax.f32 %v7050_v52, 0.0  ;;  %v7054_v52 = vadd.f32 %v8146_v23, %v8190_v56  ;;  %v2861_v23 = vmax.f32 %v7051_v55, 0.0  ;;  %v3077_v55 = vld [vmem:[#allocation8 + $0x5a0] sm:$0xff] }
 0x245   :  { %9244 = vst [vmem:[#allocation50_spill] sm:$0xff] %v8284_v62  ;;  %6552 = vmatpush1.bf16.msra.mxu0 %v6551_v57  ;;  %4570 = vmatprep.mubr.f32.mxu1 %v2826_v46  ;;  %v6561_v46 = vpack.c.bf16 %v3069_v13, %v3066_v47  ;;  %v3074_v47 = vld [vmem:[#allocation8 + $0x588] sm:$0xff]  ;;  %v3113_v12 = vld [vmem:[#allocation8 + $0x6c0] sm:$0xff] }
 0x246   :  { %v8290_v28 = vpop.f32.mrb[42].mxu0  ;;  %6554 = vmatprep.subr.bf16.mxu0 %v6553_v21  ;;  %v3068_v21 = vld [vmem:[#allocation8 + $0x558] sm:$0xff] }
 0x247   :  { %v8292_v48 = vpop.f32.mrb[42].mxu1  ;;  %v8294_v50 = vpop.f32.mrb[43].mxu0  ;;  %3615 = vmatmul.mubr.f32.gmra.mrb[116].mxu0 %v2825_v1  ;;  %v6563_v29 = vpack.c.bf16 %v3068_v21, %v3065_v7  ;;  %v2874_v21 = vmax.f32 %v7054_v52, 0.0 }
 0x248   :  { %9245 = vst [vmem:[#allocation51_spill] sm:$0xff] %v8292_v48  ;;  %v8296_v4 = vpop.f32.mrb[43].mxu1  ;;  %4571 = vmatmul.mubr.f32.gmra.mrb[116].mxu1 %v2825_v1  ;;  %3620 = vmatprep.mubr.f32.mxu0 %v2838_v37  ;;  %v2849_v1 = vmax.f32 %v7049_v31, 0.0  ;;  %v3081_v31 = vld [vmem:[#allocation8 + $0x5c0] sm:$0xff] }
 0x249   :  { %9246 = vst [vmem:[#allocation52_spill] sm:$0xff] %v8296_v4  ;;  %6556 = vmatpush1.bf16.msra.mxu0 %v6555_v17  ;;  %4575 = vmatprep.mubr.f32.mxu1 %v2838_v37  ;;  %v9208_v17 = vsub.s32 3, %v8174_v61  ;;  %v2862_v37 = vmax.f32 %v7052_v58, 0.0  ;;  %v7053_v58 = vadd.f32 %v8142_v8, %v8194_v59  ;;  %v3090_v59 = vld [vmem:[#allocation8 + $0x608] sm:$0xff] }
 0x24a   :  { %v8302_v57 = vpop.f32.mrb[44].mxu0  ;;  %6558 = vmatprep.subr.bf16.mxu0 %v6557_v33 }
 0x24b   :  { %v8304_v41 = vpop.f32.mrb[44].mxu1  ;;  %v8306_v54 = vpop.f32.mrb[45].mxu0  ;;  %3621 = vmatmul.mubr.f32.gmra.mrb[118].mxu0 %v2837_v24  ;;  %v8331_v7 = vrot.slane %v8181_v18, %v9208_v17  ;;  %v2873_v52 = vmax.f32 %v7053_v58, 0.0  ;;  %v3083_v17 = vld [vmem:[#allocation8 + $0x5d0] sm:$0xff]  ;;  %v3086_v58 = vld [vmem:[#allocation8 + $0x5e8] sm:$0xff] }
 0x24c   :  { %9247 = vst [vmem:[#allocation53_spill] sm:$0xff] %v8304_v41  ;;  %v8308_v35 = vpop.f32.mrb[45].mxu1  ;;  %4576 = vmatmul.mubr.f32.gmra.mrb[118].mxu1 %v2837_v24  ;;  %3626 = vmatprep.mubr.f32.mxu0 %v2850_v42  ;;  %v3098_v41 = vld [vmem:[#allocation8 + $0x648] sm:$0xff] }
 0x24d   :  { %9248 = vst [vmem:[#allocation54_spill] sm:$0xff] %v8308_v35  ;;  %6560 = vmatpush1.bf16.msra.mxu0 %v6559_v9  ;;  %4580 = vmatprep.mubr.f32.mxu1 %v2850_v42  ;;  %v8324_v42 = vsub.s32 2, %v8174_v61 }
 0x24e   :  { %v8315_v33 = vpop.f32.mrb[46].mxu0  ;;  %6562 = vmatprep.subr.bf16.mxu0 %v6561_v46  ;;  %v6567_v46 = vpack.c.bf16 %v3074_v47, %v3071_v60  ;;  %v7058_v47 = vadd.f32 %v8028_v14, %v8331_v7  ;;  %v6575_v14 = vpack.c.bf16 %v3086_v58, %v3083_v17  ;;  %v3094_v17 = vld [vmem:[#allocation8 + $0x628] sm:$0xff] }
 0x24f   :  { %v8317_v13 = vpop.f32.mrb[46].mxu1  ;;  %v8319_v24 = vpop.f32.mrb[47].mxu0  ;;  %3627 = vmatmul.mubr.f32.gmra.mrb[120].mxu0 %v2849_v1 }
 0x250   :  { %9249 = vst [vmem:[#allocation55_spill] sm:$0xff] %v8317_v13  ;;  %v8321_v9 = vpop.f32.mrb[47].mxu1  ;;  %4581 = vmatmul.mubr.f32.gmra.mrb[120].mxu1 %v2849_v1  ;;  %3632 = vmatprep.mubr.f32.mxu0 %v2862_v37  ;;  %v6569_v1 = vpack.c.bf16 %v3081_v31, %v3078_v34  ;;  %v3080_v13 = vld [vmem:[#allocation8 + $0x5b8] sm:$0xff]  ;;  %v2886_v34 = vmax.f32 %v7056_v49, 0.0 }
 0x251   :  { %9250 = vst [vmem:[#allocation56_spill] sm:$0xff] %v8321_v9  ;;  %6564 = vmatpush1.bf16.msra.mxu0 %v6563_v29  ;;  %4585 = vmatprep.mubr.f32.mxu1 %v2862_v37  ;;  %v3084_v29 = vld [vmem:[#allocation8 + $0x5d8] sm:$0xff]  ;;  %v3087_v37 = vld [vmem:[#allocation8 + $0x5f0] sm:$0xff]  ;;  %v6571_v56 = vpack.c.bf16 %v3080_v13, %v3077_v55  ;;  %v3093_v13 = vld [vmem:[#allocation8 + $0x620] sm:$0xff] }
 0x252   :  { %v8335_v27 = vpop.f32.mrb[48].mxu0  ;;  %6566 = vmatprep.subr.bf16.mxu0 %v6565_v26  ;;  %v8347_v26 = vrot.slane %v8181_v18, %v8324_v42  ;;  %v2885_v18 = vmax.f32 %v7055_v10, 0.0  ;;  %v6577_v55 = vpack.c.bf16 %v3093_v13, %v3090_v59  ;;  %v3091_v10 = vld [vmem:[#allocation8 + $0x610] sm:$0xff] }
 0x253   :  { %v8337_v9 = vpop.f32.mrb[48].mxu1  ;;  %v8339_v8 = vpop.f32.mrb[49].mxu0  ;;  %3633 = vmatmul.mubr.f32.gmra.mrb[122].mxu0 %v2861_v23 }
 0x254   :  { %9251 = vst [vmem:[#allocation57_spill] sm:$0xff] %v8337_v9  ;;  %v8341_v60 = vpop.f32.mrb[49].mxu1  ;;  %4586 = vmatmul.mubr.f32.gmra.mrb[122].mxu1 %v2861_v23  ;;  %3638 = vmatprep.mubr.f32.mxu0 %v2874_v21  ;;  %v6573_v23 = vpack.c.bf16 %v3087_v37, %v3084_v29  ;;  %v3089_v29 = vld [vmem:[#allocation8 + $0x600] sm:$0xff]  ;;  %v3092_v37 = vld [vmem:[#allocation8 + $0x618] sm:$0xff] }
 0x255   :  { %9252 = vst [vmem:[#allocation58_spill] sm:$0xff] %v8341_v60  ;;  %6568 = vmatpush1.bf16.msra.mxu0 %v6567_v46  ;;  %4590 = vmatprep.mubr.f32.mxu1 %v2874_v21  ;;  %v7057_v21 = vadd.f32 %v8024_v6, %v8347_v26  ;;  %v3099_v6 = vld [vmem:[#allocation8 + $0x650] sm:$0xff]  ;;  %v6579_v58 = vpack.c.bf16 %v3092_v37, %v3089_v29  ;;  %v3102_v29 = vld [vmem:[#allocation8 + $0x668] sm:$0xff] }
 0x256   :  { %v8351_v31 = vpop.f32.mrb[50].mxu0  ;;  %6570 = vmatprep.subr.bf16.mxu0 %v6569_v1  ;;  %v2708_v1 = vmax.f32 %v7058_v47, 0.0  ;;  %v3145_v47 = vld [vmem:[#allocation8 + $0x7c0] sm:$0xff]  ;;  %v3095_v60 = vld [vmem:[#allocation8 + $0x630] sm:$0xff] }
 0x257   :  { %v8353_v9 = vpop.f32.mrb[50].mxu1  ;;  %v8355_v36 = vpop.f32.mrb[51].mxu0  ;;  %3639 = vmatmul.mubr.f32.gmra.mrb[124].mxu0 %v2873_v52  ;;  %v2707_v59 = vmax.f32 %v7057_v21, 0.0  ;;  %v3105_v21 = vld [vmem:[#allocation8 + $0x680] sm:$0xff] }
 0x258   :  { %9253 = vst [vmem:[#allocation59_spill] sm:$0xff] %v8353_v9  ;;  %v8357_v46 = vpop.f32.mrb[51].mxu1  ;;  %4591 = vmatmul.mubr.f32.gmra.mrb[124].mxu1 %v2873_v52  ;;  %3644 = vmatprep.mubr.f32.mxu0 %v2886_v34  ;;  %v7060_v9 = vadd.f32 %v8036_v32, %v8331_v7  ;;  %v7059_v32 = vadd.f32 %v8032_v25, %v8347_v26  ;;  %v3097_v25 = vld [vmem:[#allocation8 + $0x640] sm:$0xff] }
 0x259   :  { %9254 = vst [vmem:[#allocation60_spill] sm:$0xff] %v8357_v46  ;;  %6572 = vmatpush1.bf16.msra.mxu0 %v6571_v56  ;;  %4595 = vmatprep.mubr.f32.mxu1 %v2886_v34  ;;  %v3096_v56 = vld [vmem:[#allocation8 + $0x638] sm:$0xff] }
 0x25a   :  { %v8361_v49 = vpop.f32.mrb[52].mxu0  ;;  %6574 = vmatprep.subr.bf16.mxu0 %v6573_v23  ;;  %v3148_v23 = vld [vmem:[#allocation8 + $0x7d8] sm:$0xff] }
 0x25b   :  { %v8365_v46 = vpop.f32.mrb[52].mxu1  ;;  %v8367_v52 = vpop.f32.mrb[53].mxu0  ;;  %3645 = vmatmul.mubr.f32.gmra.mrb[126].mxu0 %v2885_v18  ;;  %v6901_v37 = vpack.c.bf16 %v3148_v23, %v3145_v47  ;;  %v3104_v47 = vld [vmem:[#allocation8 + $0x678] sm:$0xff]  ;;  %v9259_v23 = vld [vmem:[#allocation17_spill] sm:$0xff] }
 0x25c   :  { %9255 = vst [vmem:[#allocation61_spill] sm:$0xff] %v8365_v46  ;;  %v8369_v34 = vpop.f32.mrb[53].mxu1  ;;  %4596 = vmatmul.mubr.f32.gmra.mrb[126].mxu1 %v2885_v18  ;;  %3715 = vmatprep.mubr.f32.mxu0 %v2708_v1  ;;  %v6899_v46 = vpack.c.bf16 %v3094_v17, %v3091_v10  ;;  %v7062_v18 = vadd.f32 %v8044_v44, %v8331_v7 }
 0x25d   :  { %9256 = vst [vmem:[#allocation62_spill] sm:$0xff] %v8369_v34  ;;  %6576 = vmatpush1.bf16.msra.mxu0 %v6575_v14  ;;  %4665 = vmatprep.mubr.f32.mxu1 %v2708_v1  ;;  %v2720_v14 = vmax.f32 %v7060_v9, 0.0  ;;  %v6581_v1 = vpack.c.bf16 %v3099_v6, %v3096_v56  ;;  %v6583_v10 = vpack.c.bf16 %v3098_v41, %v3095_v60  ;;  %v2719_v9 = vmax.f32 %v7059_v32, 0.0  ;;  %v3101_v6 = vld [vmem:[#allocation8 + $0x660] sm:$0xff]  ;;  %v3151_v32 = vld [vmem:[#allocation8 + $0x7f0] sm:$0xff] }
 0x25e   :  { %v8373_v13 = vpop.f32.mrb[54].mxu0  ;;  %6578 = vmatprep.subr.bf16.mxu0 %v6577_v55  ;;  %v3100_v55 = vld [vmem:[#allocation8 + $0x658] sm:$0xff]  ;;  %v7061_v44 = vadd.f32 %v8040_v40, %v8347_v26  ;;  %v6585_v56 = vpack.c.bf16 %v3105_v21, %v3102_v29  ;;  %v2732_v41 = vmax.f32 %v7062_v18, 0.0  ;;  %v6587_v29 = vpack.c.bf16 %v3104_v47, %v3101_v6  ;;  %v9262_v21 = vld [vmem:[#allocation16_spill] sm:$0xff] }
 0x25f   :  { %v8377_v34 = vpop.f32.mrb[54].mxu1  ;;  %v8379_v35 = vpop.f32.mrb[55].mxu0  ;;  %v6903_v60 = vpack.c.bf16 %v3100_v55, %v3097_v25  ;;  %v3108_v40 = vld [vmem:[#allocation8 + $0x698] sm:$0xff]  ;;  %v3110_v25 = vld [vmem:[#allocation8 + $0x6a8] sm:$0xff]  ;;  %v3117_v47 = vld [vmem:[#allocation8 + $0x6e0] sm:$0xff] }
 0x260   :  { %9257 = vst [vmem:[#allocation63_spill] sm:$0xff] %v8377_v34  ;;  %v8381_v48 = vpop.f32.mrb[55].mxu1  ;;  %3716 = vmatmul.mubr.f32.vlgmr.msra.gmra.mrb[96].mxu0 %v2707_v59  ;;  %4666 = vmatmul.mubr.f32.vlgmr.msra.gmra.mrb[128].mxu1 %v2707_v59  ;;  %v7064_v34 = vadd.f32 %v9259_v23, %v8331_v7  ;;  %v7063_v23 = vadd.f32 %v9262_v21, %v8347_v26  ;;  %v2731_v18 = vmax.f32 %v7061_v44, 0.0  ;;  %v9263_v55 = vld [vmem:[#allocation19_spill] sm:$0xff]  ;;  %v3114_v6 = vld [vmem:[#allocation8 + $0x6c8] sm:$0xff]  ;;  %v3103_v44 = vld [vmem:[#allocation8 + $0x670] sm:$0xff] }
 0x261   :  { %9258 = vst [vmem:[#allocation64_spill] sm:$0xff] %v8381_v48  ;;  %3721 = vmatprep.mubr.f32.mxu0 %v2720_v14  ;;  %6580 = vmatpush1.bf16.msra.mxu0 %v6579_v58  ;;  %v3111_v58 = vld [vmem:[#allocation8 + $0x6b0] sm:$0xff] }
 0x262   :  { %4670 = vmatprep.mubr.f32.mxu1 %v2720_v14  ;;  %6900 = vmatpush3.bf16.msra.mxu1 %v6899_v46  ;;  %v8385_v17 = vpop.f32.mrb[56].mxu0  ;;  %v3154_v14 = vld [vmem:[#allocation8 + $0x808] sm:$0xff] }
 0x263   :  { %v8389_v59 = vpop.f32.mrb[56].mxu1  ;;  %v8391_v48 = vpop.f32.mrb[57].mxu0  ;;  %6582 = vmatprep.subr.bf16.mxu0 %v6581_v1  ;;  %6902 = vmatprep.subr.bf16.mxu1 %v6901_v37  ;;  %v6589_v1 = vpack.c.bf16 %v3111_v58, %v3108_v40  ;;  %v3107_v37 = vld [vmem:[#allocation8 + $0x690] sm:$0xff]  ;;  %v6905_v21 = vpack.c.bf16 %v3154_v14, %v3151_v32  ;;  %v3116_v32 = vld [vmem:[#allocation8 + $0x6d8] sm:$0xff] }
 0x264   :  { %9260 = vst [vmem:[#allocation17_spill] sm:$0xff] %v8389_v59  ;;  %v8393_v46 = vpop.f32.mrb[57].mxu1  ;;  %3722 = vmatmul.mubr.f32.gmra.mrb[98].mxu0 %v2719_v9  ;;  %4671 = vmatmul.mubr.f32.gmra.mrb[130].mxu1 %v2719_v9  ;;  %v6591_v40 = vpack.c.bf16 %v3110_v25, %v3107_v37  ;;  %v9266_v58 = vld [vmem:[#allocation18_spill] sm:$0xff]  ;;  %v9267_v14 = vld [vmem:[#allocation21_spill] sm:$0xff] }
 0x265   :  { %9261 = vst [vmem:[#allocation65_spill] sm:$0xff] %v8393_v46  ;;  %3727 = vmatprep.mubr.f32.mxu0 %v2732_v41  ;;  %6584 = vmatpush1.bf16.msra.mxu0 %v6583_v10  ;;  %v7066_v46 = vadd.f32 %v9263_v55, %v8331_v7  ;;  %v2744_v10 = vmax.f32 %v7064_v34, 0.0  ;;  %v7065_v55 = vadd.f32 %v9266_v58, %v8347_v26  ;;  %v2743_v34 = vmax.f32 %v7063_v23, 0.0  ;;  %v3120_v25 = vld [vmem:[#allocation8 + $0x6f8] sm:$0xff]  ;;  %v3123_v58 = vld [vmem:[#allocation8 + $0x710] sm:$0xff]  ;;  %v3157_v23 = vld [vmem:[#allocation8 + $0x820] sm:$0xff] }
 0x266   :  { %4675 = vmatprep.mubr.f32.mxu1 %v2732_v41  ;;  %v8397_v59 = vpop.f32.mrb[58].mxu0  ;;  %6586 = vmatprep.subr.bf16.mxu0 %v6585_v56  ;;  %v3106_v56 = vld [vmem:[#allocation8 + $0x688] sm:$0xff] }
 0x267   :  { %v8401_v9 = vpop.f32.mrb[58].mxu1  ;;  %v8403_v4 = vpop.f32.mrb[59].mxu0  ;;  %6904 = vmatpush3.bf16.msra.mxu1 %v6903_v60  ;;  %v6593_v60 = vpack.c.bf16 %v3117_v47, %v3114_v6  ;;  %v6907_v37 = vpack.c.bf16 %v3106_v56, %v3103_v44  ;;  %v6595_v6 = vpack.c.bf16 %v3116_v32, %v3113_v12  ;;  %v9270_v47 = vld [vmem:[#allocation20_spill] sm:$0xff]  ;;  %v3119_v44 = vld [vmem:[#allocation8 + $0x6f0] sm:$0xff] }
 0x268   :  { %9264 = vst [vmem:[#allocation16_spill] sm:$0xff] %v8401_v9  ;;  %v8405_v41 = vpop.f32.mrb[59].mxu1  ;;  %3728 = vmatmul.mubr.f32.gmra.mrb[100].mxu0 %v2731_v18  ;;  %4676 = vmatmul.mubr.f32.gmra.mrb[132].mxu1 %v2731_v18  ;;  %v3122_v56 = vld [vmem:[#allocation8 + $0x708] sm:$0xff]  ;;  %v3129_v32 = vld [vmem:[#allocation8 + $0x740] sm:$0xff] }
 0x269   :  { %9265 = vst [vmem:[#allocation19_spill] sm:$0xff] %v8405_v41  ;;  %3733 = vmatprep.mubr.f32.mxu0 %v2744_v10  ;;  %6588 = vmatpush1.bf16.msra.mxu0 %v6587_v29  ;;  %v7068_v41 = vadd.f32 %v9267_v14, %v8331_v7  ;;  %v2756_v29 = vmax.f32 %v7066_v46, 0.0  ;;  %v7067_v14 = vadd.f32 %v9270_v47, %v8347_v26  ;;  %v2755_v46 = vmax.f32 %v7065_v55, 0.0  ;;  %v3126_v12 = vld [vmem:[#allocation8 + $0x728] sm:$0xff]  ;;  %v3109_v55 = vld [vmem:[#allocation8 + $0x6a0] sm:$0xff] }
 0x26a   :  { %4680 = vmatprep.mubr.f32.mxu1 %v2744_v10  ;;  %v8409_v9 = vpop.f32.mrb[60].mxu0  ;;  %6590 = vmatprep.subr.bf16.mxu0 %v6589_v1  ;;  %v3160_v1 = vld [vmem:[#allocation8 + $0x838] sm:$0xff] }
 0x26b   :  { %v8413_v18 = vpop.f32.mrb[60].mxu1  ;;  %v8415_v62 = vpop.f32.mrb[61].mxu0  ;;  %6906 = vmatprep.subr.bf16.mxu1 %v6905_v21  ;;  %v6597_v21 = vpack.c.bf16 %v3123_v58, %v3120_v25  ;;  %v6909_v47 = vpack.c.bf16 %v3160_v1, %v3157_v23  ;;  %v6599_v25 = vpack.c.bf16 %v3122_v56, %v3119_v44  ;;  %v9274_v58 = vld [vmem:[#allocation22_spill] sm:$0xff]  ;;  %v9275_v23 = vld [vmem:[#allocation25_spill] sm:$0xff] }
 0x26c   :  { %9268 = vst [vmem:[#allocation18_spill] sm:$0xff] %v8413_v18  ;;  %v8417_v10 = vpop.f32.mrb[61].mxu1  ;;  %3734 = vmatmul.mubr.f32.gmra.mrb[102].mxu0 %v2743_v34  ;;  %4681 = vmatmul.mubr.f32.gmra.mrb[134].mxu1 %v2743_v34  ;;  %v7072_v1 = vadd.f32 %v9275_v23, %v8331_v7  ;;  %v3166_v44 = vld [vmem:[#allocation8 + $0x868] sm:$0xff] }
 0x26d   :  { %9269 = vst [vmem:[#allocation21_spill] sm:$0xff] %v8417_v10  ;;  %3739 = vmatprep.mubr.f32.mxu0 %v2756_v29  ;;  %6592 = vmatpush1.bf16.msra.mxu0 %v6591_v40  ;;  %v9271_v10 = vld [vmem:[#allocation23_spill] sm:$0xff]  ;;  %v2768_v40 = vmax.f32 %v7068_v41, 0.0  ;;  %v6601_v41 = vpack.c.bf16 %v3129_v32, %v3126_v12  ;;  %v6605_v12 = vpack.c.bf16 %v3135_v5, %v3132_v43  ;;  %v3131_v32 = vld [vmem:[#allocation8 + $0x750] sm:$0xff] }
 0x26e   :  { %4685 = vmatprep.mubr.f32.mxu1 %v2756_v29  ;;  %v8421_v18 = vpop.f32.mrb[62].mxu0  ;;  %6594 = vmatprep.subr.bf16.mxu0 %v6593_v60  ;;  %v7070_v2 = vadd.f32 %v9271_v10, %v8331_v7  ;;  %v3112_v60 = vld [vmem:[#allocation8 + $0x6b8] sm:$0xff]  ;;  %v7069_v10 = vadd.f32 %v9274_v58, %v8347_v26  ;;  %v3141_v58 = vld [vmem:[#allocation8 + $0x7a0] sm:$0xff] }
 0x26f   :  { %v8425_v34 = vpop.f32.mrb[62].mxu1  ;;  %v8427_v19 = vpop.f32.mrb[63].mxu0  ;;  %6908 = vmatpush3.bf16.msra.mxu1 %v6907_v37  ;;  %v3125_v37 = vld [vmem:[#allocation8 + $0x720] sm:$0xff] }
 0x270   :  { %9272 = vst [vmem:[#allocation20_spill] sm:$0xff] %v8425_v34  ;;  %v8429_v29 = vpop.f32.mrb[63].mxu1  ;;  %3740 = vmatmul.mubr.f32.gmra.mrb[104].mxu0 %v2755_v46  ;;  %4686 = vmatmul.mubr.f32.gmra.mrb[136].mxu1 %v2755_v46  ;;  %v2767_v34 = vmax.f32 %v7067_v14, 0.0  ;;  %v6911_v46 = vpack.c.bf16 %v3112_v60, %v3109_v55  ;;  %v6603_v56 = vpack.c.bf16 %v3128_v16, %v3125_v37  ;;  %v9276_v14 = vld [vmem:[#allocation24_spill] sm:$0xff]  ;;  %v2792_v60 = vmax.f32 %v7072_v1, 0.0  ;;  %v3115_v16 = vld [vmem:[#allocation8 + $0x6d0] sm:$0xff] }
 0x271   :  { %9273 = vst [vmem:[#allocation23_spill] sm:$0xff] %v8429_v29  ;;  %3745 = vmatprep.mubr.f32.mxu0 %v2768_v40  ;;  %6596 = vmatpush1.bf16.msra.mxu0 %v6595_v6  ;;  %v2780_v29 = vmax.f32 %v7070_v2, 0.0  ;;  %v3163_v6 = vld [vmem:[#allocation8 + $0x850] sm:$0xff]  ;;  %v3134_v2 = vld [vmem:[#allocation8 + $0x768] sm:$0xff]  ;;  %v3137_v37 = vld [vmem:[#allocation8 + $0x780] sm:$0xff] }
 0x272   :  { %4690 = vmatprep.mubr.f32.mxu1 %v2768_v40  ;;  %6598 = vmatprep.subr.bf16.mxu0 %v6597_v21  ;;  %v7071_v21 = vadd.f32 %v9276_v14, %v8347_v26  ;;  %v2779_v40 = vmax.f32 %v7069_v10, 0.0  ;;  %v6913_v23 = vpack.c.bf16 %v3166_v44, %v3163_v6  ;;  %v9278_v10 = vld [vmem:[#allocation26_spill] sm:$0xff] }
 0x273   :  { %6910 = vmatprep.subr.bf16.mxu1 %v6909_v47  ;;  %v9277_v47 = vld [vmem:[#allocation27_spill] sm:$0xff]  ;;  %v7073_v5 = vadd.f32 %v9278_v10, %v8347_v26  ;;  %v3150_v10 = vld [vmem:[#allocation8 + $0x7e8] sm:$0xff] }
 0x274   :  { %3746 = vmatmul.mubr.f32.gmra.mrb[106].mxu0 %v2767_v34  ;;  %4691 = vmatmul.mubr.f32.gmra.mrb[138].mxu1 %v2767_v34  ;;  %v7074_v55 = vadd.f32 %v9277_v47, %v8331_v7  ;;  %v3138_v34 = vld [vmem:[#allocation8 + $0x788] sm:$0xff]  ;;  %v2791_v43 = vmax.f32 %v7071_v21, 0.0  ;;  %v3140_v1 = vld [vmem:[#allocation8 + $0x798] sm:$0xff]  ;;  %v3147_v47 = vld [vmem:[#allocation8 + $0x7d0] sm:$0xff] }
 0x275   :  { %3751 = vmatprep.mubr.f32.mxu0 %v2780_v29  ;;  %6600 = vmatpush1.bf16.msra.mxu0 %v6599_v25  ;;  %v3118_v25 = vld [vmem:[#allocation8 + $0x6e8] sm:$0xff] }
 0x276   :  { %4695 = vmatprep.mubr.f32.mxu1 %v2780_v29  ;;  %6602 = vmatprep.subr.bf16.mxu0 %v6601_v41  ;;  %v6607_v29 = vpack.c.bf16 %v3134_v2, %v3131_v32  ;;  %v6609_v41 = vpack.c.bf16 %v3141_v58, %v3138_v34  ;;  %v2804_v6 = vmax.f32 %v7074_v55, 0.0  ;;  %v6915_v44 = vpack.c.bf16 %v3118_v25, %v3115_v16  ;;  %v3172_v32 = vld [vmem:[#allocation8 + $0x898] sm:$0xff]  ;;  %v9280_v21 = vld [vmem:[#allocation28_spill] sm:$0xff]  ;;  %v3143_v58 = vld [vmem:[#allocation8 + $0x7b0] sm:$0xff] }
 0x277   :  { %6912 = vmatpush3.bf16.msra.mxu1 %v6911_v46  ;;  %v9279_v46 = vld [vmem:[#allocation29_spill] sm:$0xff]  ;;  %v6611_v2 = vpack.c.bf16 %v3140_v1, %v3137_v37  ;;  %v3124_v37 = vld [vmem:[#allocation8 + $0x718] sm:$0xff] }
 0x278   :  { %3752 = vmatmul.mubr.f32.gmra.mrb[108].mxu0 %v2779_v40  ;;  %4696 = vmatmul.mubr.f32.gmra.mrb[140].mxu1 %v2779_v40  ;;  %v7076_v14 = vadd.f32 %v9279_v46, %v8331_v7  ;;  %v3144_v40 = vld [vmem:[#allocation8 + $0x7b8] sm:$0xff]  ;;  %v3146_v55 = vld [vmem:[#allocation8 + $0x7c8] sm:$0xff] }
 0x279   :  { %3757 = vmatprep.mubr.f32.mxu0 %v2792_v60  ;;  %6604 = vmatpush1.bf16.msra.mxu0 %v6603_v56  ;;  %v3169_v56 = vld [vmem:[#allocation8 + $0x880] sm:$0xff]  ;;  %v6613_v34 = vpack.c.bf16 %v3147_v47, %v3144_v40  ;;  %v6615_v1 = vpack.c.bf16 %v3146_v55, %v3143_v58  ;;  %v3178_v58 = vld [vmem:[#allocation8 + $0x8c8] sm:$0xff] }
 0x27a   :  { %4700 = vmatprep.mubr.f32.mxu1 %v2792_v60  ;;  %6606 = vmatprep.subr.bf16.mxu0 %v6605_v12  ;;  %v7075_v12 = vadd.f32 %v9280_v21, %v8347_v26  ;;  %v2803_v60 = vmax.f32 %v7073_v5, 0.0  ;;  %v2816_v25 = vmax.f32 %v7076_v14, 0.0  ;;  %v6917_v46 = vpack.c.bf16 %v3172_v32, %v3169_v56  ;;  %v9282_v5 = vld [vmem:[#allocation30_spill] sm:$0xff]  ;;  %v3149_v47 = vld [vmem:[#allocation8 + $0x7e0] sm:$0xff] }
 0x27b   :  { %6914 = vmatprep.subr.bf16.mxu1 %v6913_v23  ;;  %v9281_v23 = vld [vmem:[#allocation31_spill] sm:$0xff] }
 0x27c   :  { %3758 = vmatmul.mubr.f32.gmra.mrb[110].mxu0 %v2791_v43  ;;  %4701 = vmatmul.mubr.f32.gmra.mrb[142].mxu1 %v2791_v43  ;;  %v7078_v16 = vadd.f32 %v9281_v23, %v8331_v7  ;;  %v3153_v43 = vld [vmem:[#allocation8 + $0x800] sm:$0xff]  ;;  %v3152_v14 = vld [vmem:[#allocation8 + $0x7f8] sm:$0xff]  ;;  %v3159_v23 = vld [vmem:[#allocation8 + $0x830] sm:$0xff] }
 0x27d   :  { %3763 = vmatprep.mubr.f32.mxu0 %v2804_v6  ;;  %6608 = vmatpush1.bf16.msra.mxu0 %v6607_v29  ;;  %v3121_v29 = vld [vmem:[#allocation8 + $0x700] sm:$0xff]  ;;  %v6617_v40 = vpack.c.bf16 %v3153_v43, %v3150_v10  ;;  %v6619_v55 = vpack.c.bf16 %v3152_v14, %v3149_v47  ;;  %v3155_v43 = vld [vmem:[#allocation8 + $0x810] sm:$0xff]  ;;  %v3130_v47 = vld [vmem:[#allocation8 + $0x748] sm:$0xff] }
 0x27e   :  { %4705 = vmatprep.mubr.f32.mxu1 %v2804_v6  ;;  %6610 = vmatprep.subr.bf16.mxu0 %v6609_v41  ;;  %v7077_v41 = vadd.f32 %v9282_v5, %v8347_v26  ;;  %v2815_v6 = vmax.f32 %v7075_v12, 0.0  ;;  %v2828_v56 = vmax.f32 %v7078_v16, 0.0  ;;  %v6919_v32 = vpack.c.bf16 %v3124_v37, %v3121_v29  ;;  %v9284_v12 = vld [vmem:[#allocation32_spill] sm:$0xff] }
 0x27f   :  { %6916 = vmatpush3.bf16.msra.mxu1 %v6915_v44  ;;  %v9283_v44 = vld [vmem:[#allocation33_spill] sm:$0xff] }
 0x280   :  { %3764 = vmatmul.mubr.f32.gmra.mrb[112].mxu0 %v2803_v60  ;;  %4706 = vmatmul.mubr.f32.gmra.mrb[144].mxu1 %v2803_v60  ;;  %v7080_v21 = vadd.f32 %v9283_v44, %v8331_v7  ;;  %v3156_v60 = vld [vmem:[#allocation8 + $0x818] sm:$0xff]  ;;  %v3158_v16 = vld [vmem:[#allocation8 + $0x828] sm:$0xff] }
 0x281   :  { %3769 = vmatprep.mubr.f32.mxu0 %v2816_v25  ;;  %6612 = vmatpush1.bf16.msra.mxu0 %v6611_v2  ;;  %v3175_v2 = vld [vmem:[#allocation8 + $0x8b0] sm:$0xff]  ;;  %v6621_v10 = vpack.c.bf16 %v3159_v23, %v3156_v60  ;;  %v3162_v5 = vld [vmem:[#allocation8 + $0x848] sm:$0xff]  ;;  %v6623_v14 = vpack.c.bf16 %v3158_v16, %v3155_v43  ;;  %v3161_v23 = vld [vmem:[#allocation8 + $0x840] sm:$0xff] }
 0x282   :  { %4710 = vmatprep.mubr.f32.mxu1 %v2816_v25  ;;  %6614 = vmatprep.subr.bf16.mxu0 %v6613_v34  ;;  %v7079_v34 = vadd.f32 %v9284_v12, %v8347_v26  ;;  %v2827_v25 = vmax.f32 %v7077_v41, 0.0  ;;  %v2840_v37 = vmax.f32 %v7080_v21, 0.0  ;;  %v6921_v44 = vpack.c.bf16 %v3178_v58, %v3175_v2  ;;  %v9286_v41 = vld [vmem:[#allocation34_spill] sm:$0xff] }
 0x283   :  { %6918 = vmatprep.subr.bf16.mxu1 %v6917_v46  ;;  %v9285_v46 = vld [vmem:[#allocation35_spill] sm:$0xff] }
 0x284   :  { %3770 = vmatmul.mubr.f32.gmra.mrb[114].mxu0 %v2815_v6  ;;  %4711 = vmatmul.mubr.f32.gmra.mrb[146].mxu1 %v2815_v6  ;;  %v7082_v29 = vadd.f32 %v9285_v46, %v8331_v7  ;;  %v3165_v6 = vld [vmem:[#allocation8 + $0x860] sm:$0xff]  ;;  %v3164_v21 = vld [vmem:[#allocation8 + $0x858] sm:$0xff]  ;;  %v3171_v46 = vld [vmem:[#allocation8 + $0x890] sm:$0xff] }
 0x285   :  { %3775 = vmatprep.mubr.f32.mxu0 %v2828_v56  ;;  %6616 = vmatpush1.bf16.msra.mxu0 %v6615_v1  ;;  %v3127_v1 = vld [vmem:[#allocation8 + $0x730] sm:$0xff]  ;;  %v6625_v60 = vpack.c.bf16 %v3165_v6, %v3162_v5  ;;  %v3184_v43 = vld [vmem:[#allocation8 + $0x8f8] sm:$0xff]  ;;  %v6627_v16 = vpack.c.bf16 %v3164_v21, %v3161_v23  ;;  %v3133_v23 = vld [vmem:[#allocation8 + $0x760] sm:$0xff] }
 0x286   :  { %4715 = vmatprep.mubr.f32.mxu1 %v2828_v56  ;;  %6618 = vmatprep.subr.bf16.mxu0 %v6617_v40  ;;  %v7081_v40 = vadd.f32 %v9286_v41, %v8347_v26  ;;  %v2839_v56 = vmax.f32 %v7079_v34, 0.0  ;;  %v2852_v2 = vmax.f32 %v7082_v29, 0.0  ;;  %v6923_v58 = vpack.c.bf16 %v3130_v47, %v3127_v1  ;;  %v9288_v34 = vld [vmem:[#allocation36_spill] sm:$0xff]  ;;  %v3167_v6 = vld [vmem:[#allocation8 + $0x870] sm:$0xff]  ;;  %v3136_v21 = vld [vmem:[#allocation8 + $0x778] sm:$0xff] }
 0x287   :  { %6920 = vmatpush3.bf16.msra.mxu1 %v6919_v32  ;;  %v9287_v32 = vld [vmem:[#allocation37_spill] sm:$0xff]  ;;  %v735_v47 = vsub.s32 5, %v8174_v61 }
 0x288   :  { %3776 = vmatmul.mubr.f32.gmra.mrb[116].mxu0 %v2827_v25  ;;  %4716 = vmatmul.mubr.f32.gmra.mrb[148].mxu1 %v2827_v25  ;;  %v7084_v12 = vadd.f32 %v9287_v32, %v8331_v7  ;;  %v3168_v25 = vld [vmem:[#allocation8 + $0x878] sm:$0xff]  ;;  %v3170_v29 = vld [vmem:[#allocation8 + $0x888] sm:$0xff]  ;;  %v3177_v32 = vld [vmem:[#allocation8 + $0x8c0] sm:$0xff] }
 0x289   :  { %3781 = vmatprep.mubr.f32.mxu0 %v2840_v37  ;;  %6620 = vmatpush1.bf16.msra.mxu0 %v6619_v55  ;;  %v3181_v55 = vld [vmem:[#allocation8 + $0x8e0] sm:$0xff]  ;;  %v6629_v5 = vpack.c.bf16 %v3171_v46, %v3168_v25  ;;  %v731_v25 = vsub.s32 4, %v8174_v61 }
 0x28a   :  { %4720 = vmatprep.mubr.f32.mxu1 %v2840_v37  ;;  %6622 = vmatprep.subr.bf16.mxu0 %v6621_v10  ;;  %v7083_v10 = vadd.f32 %v9288_v34, %v8347_v26  ;;  %v2851_v37 = vmax.f32 %v7081_v40, 0.0  ;;  %v2864_v41 = vmax.f32 %v7084_v12, 0.0  ;;  %v6631_v40 = vpack.c.bf16 %v3170_v29, %v3167_v6  ;;  %v3176_v34 = vld [vmem:[#allocation8 + $0x8b8] sm:$0xff] }
 0x28b   :  { %6922 = vmatprep.subr.bf16.mxu1 %v6921_v44  ;;  %v9289_v44 = vld [vmem:[#allocation39_spill] sm:$0xff]  ;;  %v6927_v6 = vpack.c.bf16 %v3136_v21, %v3133_v23  ;;  %v3182_v23 = vld [vmem:[#allocation8 + $0x8e8] sm:$0xff] }
 0x28c   :  { %3782 = vmatmul.mubr.f32.gmra.mrb[118].mxu0 %v2839_v56  ;;  %4721 = vmatmul.mubr.f32.gmra.mrb[150].mxu1 %v2839_v56  ;;  %v7086_v1 = vadd.f32 %v9289_v44, %v8331_v7  ;;  %v3174_v56 = vld [vmem:[#allocation8 + $0x8a8] sm:$0xff]  ;;  %v2863_v46 = vmax.f32 %v7083_v10, 0.0  ;;  %v3180_v29 = vld [vmem:[#allocation8 + $0x8d8] sm:$0xff]  ;;  %v3235_v10 = vld [vmem:[#allocation8 + $0xa90] sm:$0xff] }
 0x28d   :  { %3787 = vmatprep.mubr.f32.mxu0 %v2852_v2  ;;  %6624 = vmatpush1.bf16.msra.mxu0 %v6623_v14  ;;  %v6925_v14 = vpack.c.bf16 %v3184_v43, %v3181_v55  ;;  %v6633_v12 = vpack.c.bf16 %v3177_v32, %v3174_v56  ;;  %v9291_v55 = vld [vmem:[#allocation41_spill] sm:$0xff]  ;;  %v9292_v56 = vld [vmem:[#allocation40_spill] sm:$0xff] }
 0x28e   :  { %4725 = vmatprep.mubr.f32.mxu1 %v2852_v2  ;;  %6626 = vmatprep.subr.bf16.mxu0 %v6625_v60  ;;  %v9290_v60 = vld [vmem:[#allocation38_spill] sm:$0xff]  ;;  %v7088_v43 = vadd.f32 %v9291_v55, %v8331_v7  ;;  %v7087_v7 = vadd.f32 %v9292_v56, %v8347_v26  ;;  %v3186_v55 = vld [vmem:[#allocation8 + $0x908] sm:$0xff] }
 0x28f   :  { %6924 = vmatpush3.bf16.msra.mxu1 %v6923_v58  ;;  %v7085_v2 = vadd.f32 %v9290_v60, %v8347_v26  ;;  %v3173_v58 = vld [vmem:[#allocation8 + $0x8a0] sm:$0xff]  ;;  %v3183_v60 = vld [vmem:[#allocation8 + $0x8f0] sm:$0xff] }
 0x290   :  { %3788 = vmatmul.mubr.f32.gmra.mrb[120].mxu0 %v2851_v37  ;;  %4726 = vmatmul.mubr.f32.gmra.mrb[152].mxu1 %v2851_v37  ;;  %v8469_v37 = vld [vmem:[#allocation7] sm:$0xff] }
 0x291   :  { %3793 = vmatprep.mubr.f32.mxu0 %v2864_v41  ;;  %6628 = vmatpush1.bf16.msra.mxu0 %v6627_v16  ;;  %v8472_v44 = vrot.slane %v8469_v37, %v735_v47  ;;  %v2876_v16 = vmax.f32 %v7086_v1, 0.0  ;;  %v8477_v32 = vrot.slane %v8469_v37, %v731_v25  ;;  %v2875_v47 = vmax.f32 %v7085_v2, 0.0 }
 0x292   :  { %4730 = vmatprep.mubr.f32.mxu1 %v2864_v41  ;;  %6630 = vmatprep.subr.bf16.mxu0 %v6629_v5  ;;  %v3238_v5 = vld [vmem:[#allocation8 + $0xaa8] sm:$0xff]  ;;  %v6635_v41 = vpack.c.bf16 %v3176_v34, %v3173_v58  ;;  %v6637_v1 = vpack.c.bf16 %v3183_v60, %v3180_v29  ;;  %v2887_v25 = vmax.f32 %v7087_v7, 0.0  ;;  %v3185_v34 = vld [vmem:[#allocation8 + $0x900] sm:$0xff]  ;;  %v3192_v60 = vld [vmem:[#allocation8 + $0x938] sm:$0xff] }
 0x293   :  { %6926 = vmatprep.subr.bf16.mxu1 %v6925_v14  ;;  %v3179_v14 = vld [vmem:[#allocation8 + $0x8d0] sm:$0xff]  ;;  %v7090_v21 = vadd.f32 %v8234_v30, %v8472_v44  ;;  %v6929_v58 = vpack.c.bf16 %v3238_v5, %v3235_v10  ;;  %v7089_v2 = vadd.f32 %v8230_v38, %v8477_v32  ;;  %v3190_v29 = vld [vmem:[#allocation8 + $0x928] sm:$0xff]  ;;  %v3241_v5 = vld [vmem:[#allocation8 + $0xac0] sm:$0xff]  ;;  %v7091_v7 = vadd.f32 %v8242_v63, %v8477_v32 }
 0x294   :  { %3794 = vmatmul.mubr.f32.gmra.mrb[122].mxu0 %v2863_v46  ;;  %4731 = vmatmul.mubr.f32.gmra.mrb[154].mxu1 %v2863_v46  ;;  %v2888_v46 = vmax.f32 %v7088_v43, 0.0  ;;  %v6639_v26 = vpack.c.bf16 %v3182_v23, %v3179_v14  ;;  %v7092_v43 = vadd.f32 %v8246_v39, %v8472_v44  ;;  %v3195_v10 = vld [vmem:[#allocation8 + $0x950] sm:$0xff]  ;;  %v7094_v23 = vadd.f32 %v8258_v45, %v8472_v44  ;;  %v3200_v45 = vld [vmem:[#allocation8 + $0x978] sm:$0xff] }
 0x295   :  { %3799 = vmatprep.mubr.f32.mxu0 %v2876_v16  ;;  %6632 = vmatpush1.bf16.msra.mxu0 %v6631_v40  ;;  %v3189_v40 = vld [vmem:[#allocation8 + $0x920] sm:$0xff]  ;;  %v2710_v30 = vmax.f32 %v7090_v21, 0.0  ;;  %v2709_v56 = vmax.f32 %v7089_v2, 0.0  ;;  %v3191_v39 = vld [vmem:[#allocation8 + $0x930] sm:$0xff]  ;;  %v6645_v21 = vpack.c.bf16 %v3195_v10, %v3192_v60  ;;  %v2721_v2 = vmax.f32 %v7091_v7, 0.0  ;;  %v3250_v10 = vld [vmem:[#allocation8 + $0xb08] sm:$0xff] }
 0x296   :  { %4735 = vmatprep.mubr.f32.mxu1 %v2876_v16  ;;  %6634 = vmatprep.subr.bf16.mxu0 %v6633_v12  ;;  %v6641_v12 = vpack.c.bf16 %v3189_v40, %v3186_v55  ;;  %v3188_v16 = vld [vmem:[#allocation8 + $0x918] sm:$0xff]  ;;  %v2722_v14 = vmax.f32 %v7092_v43, 0.0  ;;  %v3201_v55 = vld [vmem:[#allocation8 + $0x980] sm:$0xff]  ;;  %v3247_v60 = vld [vmem:[#allocation8 + $0xaf0] sm:$0xff] }
 0x297   :  { %6928 = vmatpush3.bf16.msra.mxu1 %v6927_v6  ;;  %v3187_v6 = vld [vmem:[#allocation8 + $0x910] sm:$0xff]  ;;  %v6643_v38 = vpack.c.bf16 %v3188_v16, %v3185_v34  ;;  %v3197_v34 = vld [vmem:[#allocation8 + $0x960] sm:$0xff]  ;;  %v2734_v16 = vmax.f32 %v7094_v23, 0.0 }
 0x298   :  { %3800 = vmatmul.mubr.f32.gmra.mrb[124].mxu0 %v2875_v47  ;;  %4736 = vmatmul.mubr.f32.gmra.mrb[156].mxu1 %v2875_v47  ;;  %v6931_v47 = vpack.c.bf16 %v3190_v29, %v3187_v6  ;;  %v3204_v6 = vld [vmem:[#allocation8 + $0x998] sm:$0xff]  ;;  %v3207_v29 = vld [vmem:[#allocation8 + $0x9b0] sm:$0xff] }
 0x299   :  { %3805 = vmatprep.mubr.f32.mxu0 %v2888_v46  ;;  %6636 = vmatpush1.bf16.msra.mxu0 %v6635_v41  ;;  %v3244_v41 = vld [vmem:[#allocation8 + $0xad8] sm:$0xff]  ;;  %v3199_v23 = vld [vmem:[#allocation8 + $0x970] sm:$0xff] }
 0x29a   :  { %4740 = vmatprep.mubr.f32.mxu1 %v2888_v46  ;;  %6638 = vmatprep.subr.bf16.mxu0 %v6637_v1  ;;  %v3194_v1 = vld [vmem:[#allocation8 + $0x948] sm:$0xff]  ;;  %v6933_v40 = vpack.c.bf16 %v3244_v41, %v3241_v5  ;;  %v7095_v41 = vadd.f32 %v8266_v51, %v8477_v32 }
 0x29b   :  { %6930 = vmatprep.subr.bf16.mxu1 %v6929_v58  ;;  %v3198_v46 = vld [vmem:[#allocation8 + $0x968] sm:$0xff]  ;;  %v3193_v58 = vld [vmem:[#allocation8 + $0x940] sm:$0xff]  ;;  %v6647_v63 = vpack.c.bf16 %v3194_v1, %v3191_v39 }
 0x29c   :  { %3806 = vmatmul.mubr.f32.gmra.mrb[126].mxu0 %v2887_v25  ;;  %4741 = vmatmul.mubr.f32.gmra.mrb[158].mxu1 %v2887_v25  ;;  %v7093_v25 = vadd.f32 %v8254_v53, %v8477_v32  ;;  %v6651_v53 = vpack.c.bf16 %v3200_v45, %v3197_v34  ;;  %v3210_v39 = vld [vmem:[#allocation8 + $0x9c8] sm:$0xff]  ;;  %v3213_v1 = vld [vmem:[#allocation8 + $0x9e0] sm:$0xff]  ;;  %v3256_v45 = vld [vmem:[#allocation8 + $0xb38] sm:$0xff] }
 0x29d   :  { %6640 = vmatpush1.bf16.msra.mxu0 %v6639_v26  ;;  %3876 = vmatprep.mubr.f32.mxu0 %v2710_v30  ;;  %v3196_v26 = vld [vmem:[#allocation8 + $0x958] sm:$0xff]  ;;  %v3253_v34 = vld [vmem:[#allocation8 + $0xb20] sm:$0xff] }
 0x29e   :  { %4810 = vmatprep.mubr.f32.mxu1 %v2710_v30  ;;  %6642 = vmatprep.subr.bf16.mxu0 %v6641_v12  ;;  %v6649_v12 = vpack.c.bf16 %v3201_v55, %v3198_v46  ;;  %v7096_v30 = vadd.f32 %v8270_v15, %v8472_v44  ;;  %v6935_v43 = vpack.c.bf16 %v3196_v26, %v3193_v58  ;;  %v2733_v5 = vmax.f32 %v7093_v25, 0.0  ;;  %v3203_v15 = vld [vmem:[#allocation8 + $0x990] sm:$0xff]  ;;  %v3209_v58 = vld [vmem:[#allocation8 + $0x9c0] sm:$0xff]  ;;  %v3216_v25 = vld [vmem:[#allocation8 + $0x9f8] sm:$0xff] }
 0x29f   :  { %v2745_v46 = vmax.f32 %v7095_v41, 0.0  ;;  %v7097_v55 = vadd.f32 %v8278_v3, %v8477_v32  ;;  %v6941_v41 = vpack.c.bf16 %v3256_v45, %v3253_v34  ;;  %v7103_v45 = vadd.f32 %v8315_v33, %v8477_v32 }
 0x2a0   :  { %3877 = vmatmul.mubr.f32.vlgmr.msra.gmra.mrb[96].mxu0 %v2709_v56  ;;  %4811 = vmatmul.mubr.f32.vlgmr.msra.gmra.mrb[160].mxu1 %v2709_v56  ;;  %v3206_v56 = vld [vmem:[#allocation8 + $0x9a8] sm:$0xff]  ;;  %v2746_v7 = vmax.f32 %v7096_v30, 0.0 }
 0x2a1   :  { %3882 = vmatprep.mubr.f32.mxu0 %v2722_v14  ;;  %6644 = vmatpush1.bf16.msra.mxu0 %v6643_v38  ;;  %v6653_v38 = vpack.c.bf16 %v3207_v29, %v3204_v6  ;;  %v6655_v51 = vpack.c.bf16 %v3206_v56, %v3203_v15  ;;  %v2757_v30 = vmax.f32 %v7097_v55, 0.0  ;;  %v3218_v29 = vld [vmem:[#allocation8 + $0xa08] sm:$0xff]  ;;  %v3205_v15 = vld [vmem:[#allocation8 + $0x9a0] sm:$0xff]  ;;  %v9293_v56 = vsub.s32 3, %v8174_v61 }
 0x2a2   :  { %4815 = vmatprep.mubr.f32.mxu1 %v2722_v14  ;;  %6932 = vmatpush3.bf16.msra.mxu1 %v6931_v47  ;;  %v7098_v47 = vadd.f32 %v8282_v22, %v8472_v44  ;;  %v6937_v14 = vpack.c.bf16 %v3250_v10, %v3247_v60  ;;  %v3212_v22 = vld [vmem:[#allocation8 + $0x9d8] sm:$0xff]  ;;  %v7102_v10 = vadd.f32 %v8306_v54, %v8472_v44 }
 0x2a3   :  { %6646 = vmatprep.subr.bf16.mxu0 %v6645_v21  ;;  %6934 = vmatprep.subr.bf16.mxu1 %v6933_v40  ;;  %v3202_v21 = vld [vmem:[#allocation8 + $0x988] sm:$0xff]  ;;  %v6657_v40 = vpack.c.bf16 %v3213_v1, %v3210_v39  ;;  %v6659_v3 = vpack.c.bf16 %v3212_v22, %v3209_v58  ;;  %v7101_v54 = vadd.f32 %v8302_v57, %v8477_v32  ;;  %v3228_v22 = vld [vmem:[#allocation8 + $0xa58] sm:$0xff] }
 0x2a4   :  { %3883 = vmatmul.mubr.f32.gmra.mrb[98].mxu0 %v2721_v2  ;;  %4816 = vmatmul.mubr.f32.gmra.mrb[162].mxu1 %v2721_v2  ;;  %v2758_v26 = vmax.f32 %v7098_v47, 0.0  ;;  %v6939_v2 = vpack.c.bf16 %v3202_v21, %v3199_v23  ;;  %v3221_v23 = vld [vmem:[#allocation8 + $0xa20] sm:$0xff]  ;;  %v3224_v21 = vld [vmem:[#allocation8 + $0xa38] sm:$0xff] }
 0x2a5   :  { %3888 = vmatprep.mubr.f32.mxu0 %v2734_v16  ;;  %6648 = vmatpush1.bf16.msra.mxu0 %v6647_v63  ;;  %v7100_v63 = vadd.f32 %v8294_v50, %v8472_v44  ;;  %v3215_v50 = vld [vmem:[#allocation8 + $0x9f0] sm:$0xff]  ;;  %v2781_v34 = vmax.f32 %v7101_v54, 0.0 }
 0x2a6   :  { %4820 = vmatprep.mubr.f32.mxu1 %v2734_v16  ;;  %6650 = vmatprep.subr.bf16.mxu0 %v6649_v12  ;;  %v3219_v12 = vld [vmem:[#allocation8 + $0xa10] sm:$0xff]  ;;  %v710_v16 = vld [vmem:[#allocation7 + $0x8] sm:$0xf]  ;;  %v6663_v47 = vpack.c.bf16 %v3218_v29, %v3215_v50  ;;  %v7106_v50 = vadd.f32 %v8339_v8, %v8472_v44 }
 0x2a7   :  { %6936 = vmatpush3.bf16.msra.mxu1 %v6935_v43  ;;  %v7099_v43 = vadd.f32 %v8290_v28, %v8477_v32  ;;  %v6661_v6 = vpack.c.bf16 %v3219_v12, %v3216_v25  ;;  %v2770_v60 = vmax.f32 %v7100_v63, 0.0  ;;  %v3208_v28 = vld [vmem:[#allocation8 + $0x9b8] sm:$0xff]  ;;  %v3262_v25 = vld [vmem:[#allocation8 + $0xb68] sm:$0xff] }
 0x2a8   :  { %3889 = vmatmul.mubr.f32.gmra.mrb[100].mxu0 %v2733_v5  ;;  %4821 = vmatmul.mubr.f32.gmra.mrb[164].mxu1 %v2733_v5  ;;  %v3225_v5 = vld [vmem:[#allocation8 + $0xa40] sm:$0xff]  ;;  %v6943_v58 = vpack.c.bf16 %v3208_v28, %v3205_v15  ;;  %v3211_v15 = vld [vmem:[#allocation8 + $0x9d0] sm:$0xff]  ;;  %v3214_v28 = vld [vmem:[#allocation8 + $0x9e8] sm:$0xff] }
 0x2a9   :  { %3894 = vmatprep.mubr.f32.mxu0 %v2746_v7  ;;  %6652 = vmatpush1.bf16.msra.mxu0 %v6651_v53  ;;  %v3222_v53 = vld [vmem:[#allocation8 + $0xa28] sm:$0xff]  ;;  %v2769_v39 = vmax.f32 %v7099_v43, 0.0 }
 0x2aa   :  { %4825 = vmatprep.mubr.f32.mxu1 %v2746_v7  ;;  %6654 = vmatprep.subr.bf16.mxu0 %v6653_v38  ;;  %v8506_v38 = vrot.slane %v710_v16, %v8324_v42  ;;  %v8510_v7 = vrot.slane %v710_v16, %v9293_v56  ;;  %v3230_v43 = vld [vmem:[#allocation8 + $0xa68] sm:$0xff] }
 0x2ab   :  { %6938 = vmatprep.subr.bf16.mxu1 %v6937_v14  ;;  %v6665_v14 = vpack.c.bf16 %v3225_v5, %v3222_v53  ;;  %v3237_v53 = vld [vmem:[#allocation8 + $0xaa0] sm:$0xff] }
 0x2ac   :  { %3895 = vmatmul.mubr.f32.gmra.mrb[102].mxu0 %v2745_v46  ;;  %4826 = vmatmul.mubr.f32.gmra.mrb[166].mxu1 %v2745_v46  ;;  %v7104_v46 = vadd.f32 %v8319_v24, %v8472_v44  ;;  %v6667_v24 = vpack.c.bf16 %v3224_v21, %v3221_v23  ;;  %v3233_v23 = vld [vmem:[#allocation8 + $0xa80] sm:$0xff]  ;;  %v3236_v21 = vld [vmem:[#allocation8 + $0xa98] sm:$0xff] }
 0x2ad   :  { %3900 = vmatprep.mubr.f32.mxu0 %v2758_v26  ;;  %6656 = vmatpush1.bf16.msra.mxu0 %v6655_v51  ;;  %v2782_v51 = vmax.f32 %v7102_v10, 0.0  ;;  %v3234_v10 = vld [vmem:[#allocation8 + $0xa88] sm:$0xff] }
 0x2ae   :  { %4830 = vmatprep.mubr.f32.mxu1 %v2758_v26  ;;  %6658 = vmatprep.subr.bf16.mxu0 %v6657_v40  ;;  %v3231_v26 = vld [vmem:[#allocation8 + $0xa70] sm:$0xff] }
 0x2af   :  { %6940 = vmatpush3.bf16.msra.mxu1 %v6939_v2  ;;  %v3259_v2 = vld [vmem:[#allocation8 + $0xb50] sm:$0xff]  ;;  %v6669_v16 = vpack.c.bf16 %v3231_v26, %v3228_v22  ;;  %v6947_v22 = vpack.c.bf16 %v3214_v28, %v3211_v15  ;;  %v3240_v26 = vld [vmem:[#allocation8 + $0xab8] sm:$0xff]  ;;  %v3249_v15 = vld [vmem:[#allocation8 + $0xb00] sm:$0xff] }
 0x2b0   :  { %3901 = vmatmul.mubr.f32.gmra.mrb[104].mxu0 %v2757_v30  ;;  %4831 = vmatmul.mubr.f32.gmra.mrb[168].mxu1 %v2757_v30  ;;  %v3227_v30 = vld [vmem:[#allocation8 + $0xa50] sm:$0xff]  ;;  %v6945_v5 = vpack.c.bf16 %v3262_v25, %v3259_v2  ;;  %v3265_v25 = vld [vmem:[#allocation8 + $0xb80] sm:$0xff] }
 0x2b1   :  { %3906 = vmatprep.mubr.f32.mxu0 %v2770_v60  ;;  %6660 = vmatpush1.bf16.msra.mxu0 %v6659_v3  ;;  %v6671_v8 = vpack.c.bf16 %v3230_v43, %v3227_v30 }
 0x2b2   :  { %4835 = vmatprep.mubr.f32.mxu1 %v2770_v60  ;;  %v8514_v1 = vpop.f32.mrb[64].mxu0  ;;  %6662 = vmatprep.subr.bf16.mxu0 %v6661_v6  ;;  %v2794_v6 = vmax.f32 %v7104_v46, 0.0  ;;  %v7108_v46 = vadd.f32 %v8355_v36, %v8472_v44  ;;  %v6675_v36 = vpack.c.bf16 %v3236_v21, %v3233_v23  ;;  %v7109_v21 = vadd.f32 %v8361_v49, %v8477_v32 }
 0x2b3   :  { %v2610_v55 = vpop.f32.mrb[64].mxu1  ;;  %v8518_v40 = vpop.f32.mrb[65].mxu0  ;;  %6942 = vmatprep.subr.bf16.mxu1 %v6941_v41 }
 0x2b4   :  { %v8521_v57 = vadd.f32 %v2610_v55, %v8506_v38  ;;  %v2612_v63 = vpop.f32.mrb[65].mxu1  ;;  %3907 = vmatmul.mubr.f32.gmra.mrb[106].mxu0 %v2769_v39  ;;  %4836 = vmatmul.mubr.f32.gmra.mrb[170].mxu1 %v2769_v39  ;;  %v7105_v39 = vadd.f32 %v8335_v27, %v8477_v32 }
 0x2b5   :  { %v8524_v12 = vadd.f32 %v2612_v63, %v8510_v7  ;;  %3912 = vmatprep.mubr.f32.mxu0 %v2782_v51  ;;  %6664 = vmatpush1.bf16.msra.mxu0 %v6663_v47  ;;  %v2793_v47 = vmax.f32 %v7103_v45, 0.0  ;;  %v3243_v63 = vld [vmem:[#allocation8 + $0xad0] sm:$0xff] }
 0x2b6   :  { %9294 = vst [vmem:[#allocation22_spill] sm:$0xff] %v8521_v57  ;;  %4840 = vmatprep.mubr.f32.mxu1 %v2782_v51  ;;  %v8528_v3 = vpop.f32.mrb[66].mxu0  ;;  %6666 = vmatprep.subr.bf16.mxu0 %v6665_v14  ;;  %v6673_v14 = vpack.c.bf16 %v3237_v53, %v3234_v10  ;;  %v2806_v51 = vmax.f32 %v7106_v50, 0.0  ;;  %v2805_v45 = vmax.f32 %v7105_v39, 0.0  ;;  %v6677_v43 = vpack.c.bf16 %v3243_v63, %v3240_v26  ;;  %v3242_v50 = vld [vmem:[#allocation8 + $0xac8] sm:$0xff]  ;;  %v3220_v39 = vld [vmem:[#allocation8 + $0xa18] sm:$0xff] }
 0x2b7   :  { %9295 = vst [vmem:[#allocation25_spill] sm:$0xff] %v8524_v12  ;;  %v2616_v29 = vpop.f32.mrb[66].mxu1  ;;  %v8532_v60 = vpop.f32.mrb[67].mxu0  ;;  %6944 = vmatpush3.bf16.msra.mxu1 %v6943_v58  ;;  %v7110_v10 = vadd.f32 %v8367_v52, %v8472_v44  ;;  %v7112_v63 = vadd.f32 %v8379_v35, %v8472_v44  ;;  %v3339_v57 = vld [vmem:[#allocation8 + $0xdd0] sm:$0xff] }
 0x2b8   :  { %v8535_v33 = vadd.f32 %v2616_v29, %v8506_v38  ;;  %v2618_v41 = vpop.f32.mrb[67].mxu1  ;;  %3913 = vmatmul.mubr.f32.gmra.mrb[108].mxu0 %v2781_v34  ;;  %4841 = vmatmul.mubr.f32.gmra.mrb[172].mxu1 %v2781_v34  ;;  %v2818_v29 = vmax.f32 %v7108_v46, 0.0 }
 0x2b9   :  { %v8538_v56 = vadd.f32 %v2618_v41, %v8510_v7  ;;  %3918 = vmatprep.mubr.f32.mxu0 %v2794_v6  ;;  %6668 = vmatpush1.bf16.msra.mxu0 %v6667_v24  ;;  %v3268_v24 = vld [vmem:[#allocation8 + $0xb98] sm:$0xff]  ;;  %v3246_v41 = vld [vmem:[#allocation8 + $0xae8] sm:$0xff]  ;;  %v2830_v26 = vmax.f32 %v7110_v10, 0.0  ;;  %v7111_v10 = vadd.f32 %v8373_v13, %v8477_v32 }
 0x2ba   :  { %9296 = vst [vmem:[#allocation24_spill] sm:$0xff] %v8535_v33  ;;  %4845 = vmatprep.mubr.f32.mxu1 %v2794_v6  ;;  %v8542_v54 = vpop.f32.mrb[68].mxu0  ;;  %6670 = vmatprep.subr.bf16.mxu0 %v6669_v16  ;;  %v7107_v16 = vadd.f32 %v8351_v31, %v8477_v32  ;;  %v3239_v6 = vld [vmem:[#allocation8 + $0xab0] sm:$0xff]  ;;  %v6949_v28 = vpack.c.bf16 %v3268_v24, %v3265_v25 }
 0x2bb   :  { %9297 = vst [vmem:[#allocation27_spill] sm:$0xff] %v8538_v56  ;;  %v2622_v55 = vpop.f32.mrb[68].mxu1  ;;  %v8546_v58 = vpop.f32.mrb[69].mxu0  ;;  %6946 = vmatprep.subr.bf16.mxu1 %v6945_v5  ;;  %v6679_v52 = vpack.c.bf16 %v3242_v50, %v3239_v6  ;;  %v6681_v46 = vpack.c.bf16 %v3249_v15, %v3246_v41  ;;  %v3274_v6 = vld [vmem:[#allocation8 + $0xbc8] sm:$0xff]  ;;  %v3251_v15 = vld [vmem:[#allocation8 + $0xb10] sm:$0xff] }
 0x2bc   :  { %v8549_v27 = vadd.f32 %v2622_v55, %v8506_v38  ;;  %v2624_v2 = vpop.f32.mrb[69].mxu1  ;;  %3919 = vmatmul.mubr.f32.gmra.mrb[110].mxu0 %v2793_v47  ;;  %4846 = vmatmul.mubr.f32.gmra.mrb[174].mxu1 %v2793_v47  ;;  %v3217_v47 = vld [vmem:[#allocation8 + $0xa00] sm:$0xff]  ;;  %v2817_v23 = vmax.f32 %v7107_v16, 0.0 }
 0x2bd   :  { %v8552_v34 = vadd.f32 %v2624_v2, %v8510_v7  ;;  %3924 = vmatprep.mubr.f32.mxu0 %v2806_v51  ;;  %6672 = vmatpush1.bf16.msra.mxu0 %v6671_v8  ;;  %v3245_v55 = vld [vmem:[#allocation8 + $0xae0] sm:$0xff]  ;;  %v6951_v24 = vpack.c.bf16 %v3220_v39, %v3217_v47  ;;  %v7114_v47 = vadd.f32 %v8391_v48, %v8472_v44 }
 0x2be   :  { %9298 = vst [vmem:[#allocation26_spill] sm:$0xff] %v8549_v27  ;;  %4850 = vmatprep.mubr.f32.mxu1 %v2806_v51  ;;  %v8556_v30 = vpop.f32.mrb[70].mxu0  ;;  %6674 = vmatprep.subr.bf16.mxu0 %v6673_v14  ;;  %v9337_v27 = vld [vmem:[#allocation54_spill] sm:$0xff] }
 0x2bf   :  { %9299 = vst [vmem:[#allocation29_spill] sm:$0xff] %v8552_v34  ;;  %v2628_v53 = vpop.f32.mrb[70].mxu1  ;;  %v8560_v5 = vpop.f32.mrb[71].mxu0  ;;  %6948 = vmatpush3.bf16.msra.mxu1 %v6947_v22  ;;  %v3248_v22 = vld [vmem:[#allocation8 + $0xaf8] sm:$0xff] }
 0x2c0   :  { %v8563_v31 = vadd.f32 %v2628_v53, %v8506_v38  ;;  %v2630_v8 = vpop.f32.mrb[71].mxu1  ;;  %3925 = vmatmul.mubr.f32.gmra.mrb[112].mxu0 %v2805_v45  ;;  %4851 = vmatmul.mubr.f32.gmra.mrb[176].mxu1 %v2805_v45  ;;  %v3255_v45 = vld [vmem:[#allocation8 + $0xb30] sm:$0xff]  ;;  %v6683_v35 = vpack.c.bf16 %v3248_v22, %v3245_v55 }
 0x2c1   :  { %v8566_v14 = vadd.f32 %v2630_v8, %v8510_v7  ;;  %3930 = vmatprep.mubr.f32.mxu0 %v2818_v29  ;;  %6676 = vmatpush1.bf16.msra.mxu0 %v6675_v36  ;;  %v3252_v36 = vld [vmem:[#allocation8 + $0xb18] sm:$0xff]  ;;  %v2842_v8 = vmax.f32 %v7112_v63, 0.0 }
 0x2c2   :  { %9300 = vst [vmem:[#allocation28_spill] sm:$0xff] %v8563_v31  ;;  %4855 = vmatprep.mubr.f32.mxu1 %v2818_v29  ;;  %v8570_v51 = vpop.f32.mrb[72].mxu0  ;;  %6678 = vmatprep.subr.bf16.mxu0 %v6677_v43  ;;  %v3271_v43 = vld [vmem:[#allocation8 + $0xbb0] sm:$0xff]  ;;  %v2829_v29 = vmax.f32 %v7109_v21, 0.0  ;;  %v6685_v41 = vpack.c.bf16 %v3255_v45, %v3252_v36  ;;  %v3261_v21 = vld [vmem:[#allocation8 + $0xb60] sm:$0xff] }
 0x2c3   :  { %9301 = vst [vmem:[#allocation31_spill] sm:$0xff] %v8566_v14  ;;  %v2634_v2 = vpop.f32.mrb[72].mxu1  ;;  %v8574_v25 = vpop.f32.mrb[73].mxu0  ;;  %6950 = vmatprep.subr.bf16.mxu1 %v6949_v28  ;;  %v3254_v28 = vld [vmem:[#allocation8 + $0xb28] sm:$0xff]  ;;  %v6953_v55 = vpack.c.bf16 %v3274_v6, %v3271_v43  ;;  %v3260_v43 = vld [vmem:[#allocation8 + $0xb58] sm:$0xff]  ;;  %v2854_v6 = vmax.f32 %v7114_v47, 0.0 }
 0x2c4   :  { %v8577_v49 = vadd.f32 %v2634_v2, %v8506_v38  ;;  %v2636_v16 = vpop.f32.mrb[73].mxu1  ;;  %3931 = vmatmul.mubr.f32.gmra.mrb[114].mxu0 %v2817_v23  ;;  %4856 = vmatmul.mubr.f32.gmra.mrb[178].mxu1 %v2817_v23  ;;  %v6687_v48 = vpack.c.bf16 %v3254_v28, %v3251_v15  ;;  %v2841_v2 = vmax.f32 %v7111_v10, 0.0  ;;  %v3264_v10 = vld [vmem:[#allocation8 + $0xb78] sm:$0xff]  ;;  %v3267_v15 = vld [vmem:[#allocation8 + $0xb90] sm:$0xff]  ;;  %v9331_v31 = vld [vmem:[#allocation52_spill] sm:$0xff] }
 0x2c5   :  { %v8580_v50 = vadd.f32 %v2636_v16, %v8510_v7  ;;  %3936 = vmatprep.mubr.f32.mxu0 %v2830_v26  ;;  %6680 = vmatpush1.bf16.msra.mxu0 %v6679_v52  ;;  %v3258_v52 = vld [vmem:[#allocation8 + $0xb48] sm:$0xff]  ;;  %v3257_v16 = vld [vmem:[#allocation8 + $0xb40] sm:$0xff] }
 0x2c6   :  { %9302 = vst [vmem:[#allocation30_spill] sm:$0xff] %v8577_v49  ;;  %4860 = vmatprep.mubr.f32.mxu1 %v2830_v26  ;;  %v8584_v53 = vpop.f32.mrb[74].mxu0  ;;  %6682 = vmatprep.subr.bf16.mxu0 %v6681_v46  ;;  %v3223_v46 = vld [vmem:[#allocation8 + $0xa30] sm:$0xff]  ;;  %v3226_v26 = vld [vmem:[#allocation8 + $0xa48] sm:$0xff]  ;;  %v6689_v45 = vpack.c.bf16 %v3261_v21, %v3258_v52  ;;  %v7115_v21 = vadd.f32 %v8397_v59, %v8477_v32 }
 0x2c7   :  { %9303 = vst [vmem:[#allocation33_spill] sm:$0xff] %v8580_v50  ;;  %v2640_v39 = vpop.f32.mrb[74].mxu1  ;;  %v8588_v23 = vpop.f32.mrb[75].mxu0  ;;  %6952 = vmatpush3.bf16.msra.mxu1 %v6951_v24  ;;  %v7113_v24 = vadd.f32 %v8385_v17, %v8477_v32 }
 0x2c8   :  { %v8591_v13 = vadd.f32 %v2640_v39, %v8506_v38  ;;  %v2642_v22 = vpop.f32.mrb[75].mxu1  ;;  %3937 = vmatmul.mubr.f32.gmra.mrb[116].mxu0 %v2829_v29  ;;  %4861 = vmatmul.mubr.f32.gmra.mrb[180].mxu1 %v2829_v29  ;;  %v7116_v29 = vadd.f32 %v8403_v4, %v8472_v44  ;;  %v6691_v4 = vpack.c.bf16 %v3260_v43, %v3257_v16  ;;  %v3273_v16 = vld [vmem:[#allocation8 + $0xbc0] sm:$0xff] }
 0x2c9   :  { %v8594_v63 = vadd.f32 %v2642_v22, %v8510_v7  ;;  %3942 = vmatprep.mubr.f32.mxu0 %v2842_v8  ;;  %6684 = vmatpush1.bf16.msra.mxu0 %v6683_v35  ;;  %v6955_v35 = vpack.c.bf16 %v3226_v26, %v3223_v46  ;;  %v2853_v52 = vmax.f32 %v7113_v24, 0.0  ;;  %v6693_v46 = vpack.c.bf16 %v3267_v15, %v3264_v10  ;;  %v3263_v26 = vld [vmem:[#allocation8 + $0xb70] sm:$0xff]  ;;  %v3270_v24 = vld [vmem:[#allocation8 + $0xba8] sm:$0xff]  ;;  %v3232_v10 = vld [vmem:[#allocation8 + $0xa78] sm:$0xff] }
 0x2ca   :  { %9304 = vst [vmem:[#allocation32_spill] sm:$0xff] %v8591_v13  ;;  %4865 = vmatprep.mubr.f32.mxu1 %v2842_v8  ;;  %v8598_v36 = vpop.f32.mrb[76].mxu0  ;;  %6686 = vmatprep.subr.bf16.mxu0 %v6685_v41  ;;  %v3277_v41 = vld [vmem:[#allocation8 + $0xbe0] sm:$0xff]  ;;  %v3280_v8 = vld [vmem:[#allocation8 + $0xbf8] sm:$0xff]  ;;  %v739_v15 = vsub.s32 6, %v8174_v61 }
 0x2cb   :  { %9305 = vst [vmem:[#allocation35_spill] sm:$0xff] %v8594_v63  ;;  %v2646_v39 = vpop.f32.mrb[76].mxu1  ;;  %v8602_v22 = vpop.f32.mrb[77].mxu0  ;;  %6954 = vmatprep.subr.bf16.mxu1 %v6953_v55  ;;  %v6957_v59 = vpack.c.bf16 %v3280_v8, %v3277_v41  ;;  %v7117_v41 = vadd.f32 %v8409_v9, %v8477_v32  ;;  %v3276_v9 = vld [vmem:[#allocation8 + $0xbd8] sm:$0xff]  ;;  %v9321_v63 = vld [vmem:[#allocation48_spill] sm:$0xff] }
 0x2cc   :  { %v8605_v17 = vadd.f32 %v2646_v39, %v8506_v38  ;;  %v2648_v28 = vpop.f32.mrb[77].mxu1  ;;  %3943 = vmatmul.mubr.f32.gmra.mrb[118].mxu0 %v2841_v2  ;;  %4866 = vmatmul.mubr.f32.gmra.mrb[182].mxu1 %v2841_v2  ;;  %v3266_v39 = vld [vmem:[#allocation8 + $0xb88] sm:$0xff]  ;;  %v743_v2 = vsub.s32 7, %v8174_v61 }
 0x2cd   :  { %v8608_v47 = vadd.f32 %v2648_v28, %v8510_v7  ;;  %3948 = vmatprep.mubr.f32.mxu0 %v2854_v6  ;;  %6688 = vmatpush1.bf16.msra.mxu0 %v6687_v48  ;;  %v7118_v28 = vadd.f32 %v8415_v62, %v8472_v44  ;;  %v6695_v62 = vpack.c.bf16 %v3266_v39, %v3263_v26 }
 0x2ce   :  { %9306 = vst [vmem:[#allocation34_spill] sm:$0xff] %v8605_v17  ;;  %4870 = vmatprep.mubr.f32.mxu1 %v2854_v6  ;;  %v8612_v55 = vpop.f32.mrb[78].mxu0  ;;  %6690 = vmatprep.subr.bf16.mxu0 %v6689_v45  ;;  %v2866_v17 = vmax.f32 %v7116_v29, 0.0  ;;  %v3229_v6 = vld [vmem:[#allocation8 + $0xa60] sm:$0xff]  ;;  %v8631_v13 = vrot.slane %v8469_v37, %v743_v2  ;;  %v3334_v2 = vld [vmem:[#allocation8 + $0xda8] sm:$0xff] }
 0x2cf   :  { %9307 = vst [vmem:[#allocation37_spill] sm:$0xff] %v8608_v47  ;;  %v2652_v47 = vpop.f32.mrb[78].mxu1  ;;  %v8617_v48 = vpop.f32.mrb[79].mxu0  ;;  %6956 = vmatpush3.bf16.msra.mxu1 %v6955_v35  ;;  %v2865_v35 = vmax.f32 %v7115_v21, 0.0  ;;  %v6959_v21 = vpack.c.bf16 %v3232_v10, %v3229_v6 }
 0x2d0   :  { %v8620_v43 = vadd.f32 %v2652_v47, %v8506_v38  ;;  %v2654_v45 = vpop.f32.mrb[79].mxu1  ;;  %3949 = vmatmul.mubr.f32.gmra.mrb[120].mxu0 %v2853_v52  ;;  %4871 = vmatmul.mubr.f32.gmra.mrb[184].mxu1 %v2853_v52  ;;  %v6697_v47 = vpack.c.bf16 %v3273_v16, %v3270_v24  ;;  %v3269_v52 = vld [vmem:[#allocation8 + $0xba0] sm:$0xff]  ;;  %v3331_v24 = vld [vmem:[#allocation8 + $0xd90] sm:$0xff]  ;;  %v2877_v16 = vmax.f32 %v7117_v41, 0.0  ;;  %v7128_v49 = vadd.f32 %v9321_v63, %v8631_v13 }
 0x2d1   :  { %v8623_v29 = vadd.f32 %v2654_v45, %v8510_v7  ;;  %3954 = vmatprep.mubr.f32.mxu0 %v2866_v17  ;;  %6692 = vmatpush1.bf16.msra.mxu0 %v6691_v4  ;;  %v2878_v45 = vmax.f32 %v7118_v28, 0.0  ;;  %v7120_v4 = vadd.f32 %v8427_v19, %v8472_v44  ;;  %v8644_v44 = vrot.slane %v8469_v37, %v739_v15  ;;  %v3282_v37 = vld [vmem:[#allocation8 + $0xc08] sm:$0xff]  ;;  %v3285_v15 = vld [vmem:[#allocation8 + $0xc20] sm:$0xff] }
 0x2d2   :  { %9308 = vst [vmem:[#allocation36_spill] sm:$0xff] %v8620_v43  ;;  %4875 = vmatprep.mubr.f32.mxu1 %v2866_v17  ;;  %v8628_v8 = vpop.f32.mrb[80].mxu0  ;;  %6694 = vmatprep.subr.bf16.mxu0 %v6693_v46  ;;  %v3272_v43 = vld [vmem:[#allocation8 + $0xbb8] sm:$0xff]  ;;  %v3279_v17 = vld [vmem:[#allocation8 + $0xbf0] sm:$0xff]  ;;  %v6961_v41 = vpack.c.bf16 %v3334_v2, %v3331_v24  ;;  %v7124_v2 = vadd.f32 %v8248_v20, %v8631_v13 }
 0x2d3   :  { %9309 = vst [vmem:[#allocation39_spill] sm:$0xff] %v8623_v29  ;;  %v2658_v26 = vpop.f32.mrb[80].mxu1  ;;  %v8635_v61 = vpop.f32.mrb[81].mxu0  ;;  %6958 = vmatprep.subr.bf16.mxu1 %v6957_v59  ;;  %v6699_v19 = vpack.c.bf16 %v3272_v43, %v3269_v52  ;;  %v7119_v59 = vadd.f32 %v8421_v18, %v8477_v32  ;;  %v6701_v10 = vpack.c.bf16 %v3279_v17, %v3276_v9  ;;  %v3281_v9 = vld [vmem:[#allocation8 + $0xc00] sm:$0xff]  ;;  %v3284_v17 = vld [vmem:[#allocation8 + $0xc18] sm:$0xff] }
 0x2d4   :  { %v8638_v39 = vadd.f32 %v2658_v26, %v8506_v38  ;;  %v2660_v46 = vpop.f32.mrb[81].mxu1  ;;  %3955 = vmatmul.mubr.f32.gmra.mrb[122].mxu0 %v2865_v35  ;;  %4876 = vmatmul.mubr.f32.gmra.mrb[186].mxu1 %v2865_v35  ;;  %v3275_v35 = vld [vmem:[#allocation8 + $0xbd0] sm:$0xff]  ;;  %v3278_v26 = vld [vmem:[#allocation8 + $0xbe8] sm:$0xff]  ;;  %v7121_v52 = vadd.f32 %v8232_v0, %v8644_v44  ;;  %v6707_v20 = vpack.c.bf16 %v3284_v17, %v3281_v9 }
 0x2d5   :  { %v8641_v28 = vadd.f32 %v2660_v46, %v8510_v7  ;;  %3960 = vmatprep.mubr.f32.mxu0 %v2878_v45  ;;  %6696 = vmatpush1.bf16.msra.mxu0 %v6695_v62  ;;  %v7122_v46 = vadd.f32 %v8236_v11, %v8631_v13  ;;  %v6703_v11 = vpack.c.bf16 %v3278_v26, %v3275_v35  ;;  %v3286_v35 = vld [vmem:[#allocation8 + $0xc28] sm:$0xff]  ;;  %v3288_v26 = vld [vmem:[#allocation8 + $0xc38] sm:$0xff] }
 0x2d6   :  { %9310 = vst [vmem:[#allocation38_spill] sm:$0xff] %v8638_v39  ;;  %4880 = vmatprep.mubr.f32.mxu1 %v2878_v45  ;;  %v8648_v6 = vpop.f32.mrb[82].mxu0  ;;  %6698 = vmatprep.subr.bf16.mxu0 %v6697_v47  ;;  %v2890_v39 = vmax.f32 %v7120_v4, 0.0  ;;  %v2889_v45 = vmax.f32 %v7119_v59, 0.0  ;;  %v3291_v59 = vld [vmem:[#allocation8 + $0xc50] sm:$0xff]  ;;  %v3294_v9 = vld [vmem:[#allocation8 + $0xc68] sm:$0xff]  ;;  %v7132_v14 = vadd.f32 %v9331_v31, %v8631_v13  ;;  %v7134_v34 = vadd.f32 %v9337_v27, %v8631_v13 }
 0x2d7   :  { %9311 = vst [vmem:[#allocation41_spill] sm:$0xff] %v8641_v28  ;;  %v2664_v62 = vpop.f32.mrb[82].mxu1  ;;  %v8652_v43 = vpop.f32.mrb[83].mxu0  ;;  %6960 = vmatpush3.bf16.msra.mxu1 %v6959_v21  ;;  %v6705_v21 = vpack.c.bf16 %v3285_v15, %v3282_v37  ;;  %v2712_v24 = vmax.f32 %v7122_v46, 0.0  ;;  %v3340_v37 = vld [vmem:[#allocation8 + $0xdd8] sm:$0xff]  ;;  %v2711_v15 = vmax.f32 %v7121_v52, 0.0 }
 0x2d8   :  { %v8655_v18 = vadd.f32 %v2664_v62, %v8506_v38  ;;  %v2666_v32 = vpop.f32.mrb[83].mxu1  ;;  %3961 = vmatmul.mubr.f32.gmra.mrb[124].mxu0 %v2877_v16  ;;  %4881 = vmatmul.mubr.f32.gmra.mrb[188].mxu1 %v2877_v16  ;;  %v9317_v28 = vld [vmem:[#allocation46_spill] sm:$0xff]  ;;  %v3297_v52 = vld [vmem:[#allocation8 + $0xc80] sm:$0xff] }
 0x2d9   :  { %v8658_v47 = vadd.f32 %v2666_v32, %v8510_v7  ;;  %3966 = vmatprep.mubr.f32.mxu0 %v2890_v39  ;;  %6700 = vmatpush1.bf16.msra.mxu0 %v6699_v19  ;;  %v3283_v19 = vld [vmem:[#allocation8 + $0xc10] sm:$0xff]  ;;  %v7126_v29 = vadd.f32 %v9317_v28, %v8631_v13 }
 0x2da   :  { %9312 = vst [vmem:[#allocation40_spill] sm:$0xff] %v8655_v18  ;;  %4885 = vmatprep.mubr.f32.mxu1 %v2890_v39  ;;  %v8662_v4 = vpop.f32.mrb[84].mxu0  ;;  %6702 = vmatprep.subr.bf16.mxu0 %v6701_v10  ;;  %v3337_v10 = vld [vmem:[#allocation8 + $0xdc0] sm:$0xff] }
 0x2db   :  { %9313 = vst [vmem:[#allocation66_spill] sm:$0xff] %v8658_v47  ;;  %v2670_v16 = vpop.f32.mrb[84].mxu1  ;;  %v8666_v62 = vpop.f32.mrb[85].mxu0  ;;  %6962 = vmatprep.subr.bf16.mxu1 %v6961_v41  ;;  %v9316_v41 = vld [vmem:[#allocation44_spill] sm:$0xff]  ;;  %v2724_v47 = vmax.f32 %v7124_v2, 0.0  ;;  %v6965_v17 = vpack.c.bf16 %v3340_v37, %v3337_v10  ;;  %v6713_v37 = vpack.c.bf16 %v3297_v52, %v3294_v9 }
 0x2dc   :  { %v8669_v0 = vadd.f32 %v2670_v16, %v8506_v38  ;;  %v2672_v39 = vpop.f32.mrb[85].mxu1  ;;  %3967 = vmatmul.mubr.f32.gmra.mrb[126].mxu0 %v2889_v45  ;;  %4886 = vmatmul.mubr.f32.gmra.mrb[190].mxu1 %v2889_v45  ;;  %v7123_v32 = vadd.f32 %v9316_v41, %v8644_v44  ;;  %v6963_v16 = vpack.c.bf16 %v3286_v35, %v3283_v19  ;;  %v3290_v45 = vld [vmem:[#allocation8 + $0xc48] sm:$0xff]  ;;  %v3292_v19 = vld [vmem:[#allocation8 + $0xc58] sm:$0xff] }
 0x2dd   :  { %v8672_v46 = vadd.f32 %v2672_v39, %v8510_v7  ;;  %6704 = vmatpush1.bf16.msra.mxu0 %v6703_v11  ;;  %4037 = vmatprep.mubr.f32.mxu0 %v2712_v24  ;;  %v6709_v11 = vpack.c.bf16 %v3291_v59, %v3288_v26  ;;  %v9320_v26 = vld [vmem:[#allocation45_spill] sm:$0xff] }
 0x2de   :  { %9314 = vst [vmem:[#allocation67_spill] sm:$0xff] %v8669_v0  ;;  %4955 = vmatprep.mubr.f32.mxu1 %v2712_v24  ;;  %v8676_v18 = vpop.f32.mrb[86].mxu0  ;;  %6706 = vmatprep.subr.bf16.mxu0 %v6705_v21  ;;  %v3287_v0 = vld [vmem:[#allocation8 + $0xc30] sm:$0xff]  ;;  %v3289_v21 = vld [vmem:[#allocation8 + $0xc40] sm:$0xff]  ;;  %v2723_v35 = vmax.f32 %v7123_v32, 0.0  ;;  %v7125_v59 = vadd.f32 %v9320_v26, %v8644_v44  ;;  %v3346_v9 = vld [vmem:[#allocation8 + $0xe08] sm:$0xff] }
 0x2df   :  { %9315 = vst [vmem:[#allocation68_spill] sm:$0xff] %v8672_v46  ;;  %v2676_v39 = vpop.f32.mrb[86].mxu1  ;;  %v8680_v46 = vpop.f32.mrb[87].mxu0  ;;  %v6711_v28 = vpack.c.bf16 %v3290_v45, %v3287_v0  ;;  %v6967_v0 = vpack.c.bf16 %v3292_v19, %v3289_v21  ;;  %v3303_v32 = vld [vmem:[#allocation8 + $0xcb0] sm:$0xff] }
 0x2e0   :  { %v8683_v41 = vadd.f32 %v2676_v39, %v8506_v38  ;;  %v2678_v24 = vpop.f32.mrb[87].mxu1  ;;  %4038 = vmatmul.mubr.f32.vlgmr.msra.gmra.mrb[96].mxu0 %v2711_v15  ;;  %4956 = vmatmul.mubr.f32.vlgmr.msra.gmra.mrb[192].mxu1 %v2711_v15  ;;  %v3293_v39 = vld [vmem:[#allocation8 + $0xc60] sm:$0xff]  ;;  %v2736_v15 = vmax.f32 %v7126_v29, 0.0  ;;  %v3343_v45 = vld [vmem:[#allocation8 + $0xdf0] sm:$0xff]  ;;  %v2735_v52 = vmax.f32 %v7125_v59, 0.0 }
 0x2e1   :  { %v8686_v2 = vadd.f32 %v2678_v24, %v8510_v7  ;;  %4043 = vmatprep.mubr.f32.mxu0 %v2724_v47  ;;  %6708 = vmatpush1.bf16.msra.mxu0 %v6707_v20  ;;  %v3300_v20 = vld [vmem:[#allocation8 + $0xc98] sm:$0xff]  ;;  %v3299_v26 = vld [vmem:[#allocation8 + $0xc90] sm:$0xff]  ;;  %v6969_v59 = vpack.c.bf16 %v3346_v9, %v3343_v45 }
 0x2e2   :  { %9318 = vst [vmem:[#allocation44_spill] sm:$0xff] %v8683_v41  ;;  %4960 = vmatprep.mubr.f32.mxu1 %v2724_v47  ;;  %6964 = vmatpush3.bf16.msra.mxu1 %v6963_v16  ;;  %v8690_v10 = vpop.f32.mrb[88].mxu0  ;;  %v3296_v41 = vld [vmem:[#allocation8 + $0xc78] sm:$0xff]  ;;  %v6717_v19 = vpack.c.bf16 %v3303_v32, %v3300_v20  ;;  %v3298_v20 = vld [vmem:[#allocation8 + $0xc88] sm:$0xff] }
 0x2e3   :  { %9319 = vst [vmem:[#allocation46_spill] sm:$0xff] %v8686_v2  ;;  %v2682_v24 = vpop.f32.mrb[88].mxu1  ;;  %v8694_v2 = vpop.f32.mrb[89].mxu0  ;;  %6710 = vmatprep.subr.bf16.mxu0 %v6709_v11  ;;  %6966 = vmatprep.subr.bf16.mxu1 %v6965_v17  ;;  %v6715_v63 = vpack.c.bf16 %v3296_v41, %v3293_v39  ;;  %v9324_v11 = vld [vmem:[#allocation47_spill] sm:$0xff]  ;;  %v3306_v41 = vld [vmem:[#allocation8 + $0xcc8] sm:$0xff] }
 0x2e4   :  { %v8697_v47 = vadd.f32 %v2682_v24, %v8506_v38  ;;  %v2684_v16 = vpop.f32.mrb[89].mxu1  ;;  %4044 = vmatmul.mubr.f32.gmra.mrb[98].mxu0 %v2723_v35  ;;  %4961 = vmatmul.mubr.f32.gmra.mrb[194].mxu1 %v2723_v35  ;;  %v7127_v17 = vadd.f32 %v9324_v11, %v8644_v44  ;;  %v3302_v24 = vld [vmem:[#allocation8 + $0xca8] sm:$0xff]  ;;  %v2748_v35 = vmax.f32 %v7128_v49, 0.0 }
 0x2e5   :  { %v8700_v29 = vadd.f32 %v2684_v16, %v8510_v7  ;;  %4049 = vmatprep.mubr.f32.mxu0 %v2736_v15  ;;  %6712 = vmatpush1.bf16.msra.mxu0 %v6711_v28  ;;  %v3309_v28 = vld [vmem:[#allocation8 + $0xce0] sm:$0xff]  ;;  %v6719_v32 = vpack.c.bf16 %v3302_v24, %v3299_v26  ;;  %v3315_v26 = vld [vmem:[#allocation8 + $0xd10] sm:$0xff] }
 0x2e6   :  { %9322 = vst [vmem:[#allocation45_spill] sm:$0xff] %v8697_v47  ;;  %4965 = vmatprep.mubr.f32.mxu1 %v2736_v15  ;;  %v8704_v21 = vpop.f32.mrb[90].mxu0  ;;  %6714 = vmatprep.subr.bf16.mxu0 %v6713_v37  ;;  %v9326_v47 = vld [vmem:[#allocation50_spill] sm:$0xff]  ;;  %v6721_v9 = vpack.c.bf16 %v3309_v28, %v3306_v41 }
 0x2e7   :  { %9323 = vst [vmem:[#allocation48_spill] sm:$0xff] %v8700_v29  ;;  %9325 = vst [vmem:[#allocation47_spill] sm:$0xff] %v8704_v21  ;;  %v7130_v50 = vadd.f32 %v9326_v47, %v8631_v13  ;;  %v2688_v16 = vpop.f32.mrb[90].mxu1  ;;  %v8708_v29 = vpop.f32.mrb[91].mxu0  ;;  %6968 = vmatpush3.bf16.msra.mxu1 %v6967_v0  ;;  %v3295_v37 = vld [vmem:[#allocation8 + $0xc70] sm:$0xff]  ;;  %v2747_v47 = vmax.f32 %v7127_v17, 0.0 }
 0x2e8   :  { %v8711_v39 = vadd.f32 %v2688_v16, %v8506_v38  ;;  %v2690_v15 = vpop.f32.mrb[91].mxu1  ;;  %4050 = vmatmul.mubr.f32.gmra.mrb[100].mxu0 %v2735_v52  ;;  %4966 = vmatmul.mubr.f32.gmra.mrb[196].mxu1 %v2735_v52  ;;  %v9329_v0 = vld [vmem:[#allocation49_spill] sm:$0xff]  ;;  %v3305_v16 = vld [vmem:[#allocation8 + $0xcc0] sm:$0xff]  ;;  %v3312_v17 = vld [vmem:[#allocation8 + $0xcf8] sm:$0xff] }
 0x2e9   :  { %v8714_v49 = vadd.f32 %v2690_v15, %v8510_v7  ;;  %4055 = vmatprep.mubr.f32.mxu0 %v2748_v35  ;;  %6716 = vmatpush1.bf16.msra.mxu0 %v6715_v63  ;;  %v7129_v11 = vadd.f32 %v9329_v0, %v8644_v44  ;;  %v2760_v52 = vmax.f32 %v7130_v50, 0.0  ;;  %v6971_v63 = vpack.c.bf16 %v3298_v20, %v3295_v37  ;;  %v3352_v41 = vld [vmem:[#allocation8 + $0xe38] sm:$0xff] }
 0x2ea   :  { %9327 = vst [vmem:[#allocation50_spill] sm:$0xff] %v8711_v39  ;;  %4970 = vmatprep.mubr.f32.mxu1 %v2748_v35  ;;  %v8718_v45 = vpop.f32.mrb[92].mxu0  ;;  %6718 = vmatprep.subr.bf16.mxu0 %v6717_v19  ;;  %v3308_v39 = vld [vmem:[#allocation8 + $0xcd8] sm:$0xff]  ;;  %v3349_v19 = vld [vmem:[#allocation8 + $0xe20] sm:$0xff]  ;;  %v6725_v0 = vpack.c.bf16 %v3315_v26, %v3312_v17 }
 0x2eb   :  { %9328 = vst [vmem:[#allocation69_spill] sm:$0xff] %v8714_v49  ;;  %9330 = vst [vmem:[#allocation49_spill] sm:$0xff] %v8718_v45  ;;  %v2694_v15 = vpop.f32.mrb[92].mxu1  ;;  %v8722_v49 = vpop.f32.mrb[93].mxu0  ;;  %6970 = vmatprep.subr.bf16.mxu1 %v6969_v59  ;;  %v6723_v31 = vpack.c.bf16 %v3308_v39, %v3305_v16  ;;  %v2759_v28 = vmax.f32 %v7129_v11, 0.0  ;;  %v9335_v59 = vld [vmem:[#allocation51_spill] sm:$0xff]  ;;  %v6973_v11 = vpack.c.bf16 %v3352_v41, %v3349_v19 }
 0x2ec   :  { %9332 = vst [vmem:[#allocation52_spill] sm:$0xff] %v8722_v49  ;;  %v8725_v24 = vadd.f32 %v2694_v15, %v8506_v38  ;;  %v2696_v35 = vpop.f32.mrb[93].mxu1  ;;  %4056 = vmatmul.mubr.f32.gmra.mrb[102].mxu0 %v2747_v47  ;;  %4971 = vmatmul.mubr.f32.gmra.mrb[198].mxu1 %v2747_v47  ;;  %v7131_v37 = vadd.f32 %v9335_v59, %v8644_v44  ;;  %v3311_v15 = vld [vmem:[#allocation8 + $0xcf0] sm:$0xff]  ;;  %v2772_v47 = vmax.f32 %v7132_v14, 0.0  ;;  %v3318_v39 = vld [vmem:[#allocation8 + $0xd28] sm:$0xff]  ;;  %v3304_v17 = vld [vmem:[#allocation8 + $0xcb8] sm:$0xff] }
 0x2ed   :  { %v8728_v50 = vadd.f32 %v2696_v35, %v8510_v7  ;;  %4061 = vmatprep.mubr.f32.mxu0 %v2760_v52  ;;  %6720 = vmatpush1.bf16.msra.mxu0 %v6719_v32  ;;  %v3321_v32 = vld [vmem:[#allocation8 + $0xd40] sm:$0xff]  ;;  %v3320_v41 = vld [vmem:[#allocation8 + $0xd38] sm:$0xff]  ;;  %v3363_v45 = vld [vmem:[#allocation8 + $0xe90] sm:$0xff] }
 0x2ee   :  { %9333 = vst [vmem:[#allocation70_spill] sm:$0xff] %v8725_v24  ;;  %4975 = vmatprep.mubr.f32.mxu1 %v2760_v52  ;;  %v8732_v20 = vpop.f32.mrb[94].mxu0  ;;  %6722 = vmatprep.subr.bf16.mxu0 %v6721_v9  ;;  %v3314_v24 = vld [vmem:[#allocation8 + $0xd08] sm:$0xff]  ;;  %v3301_v9 = vld [vmem:[#allocation8 + $0xca0] sm:$0xff]  ;;  %v2771_v26 = vmax.f32 %v7131_v37, 0.0  ;;  %v6729_v19 = vpack.c.bf16 %v3321_v32, %v3318_v39  ;;  %v9359_v21 = vld [vmem:[#allocation42_spill] sm:$0xff] }
 0x2ef   :  { %9334 = vst [vmem:[#allocation71_spill] sm:$0xff] %v8728_v50  ;;  %9336 = vst [vmem:[#allocation51_spill] sm:$0xff] %v8732_v20  ;;  %v2700_v35 = vpop.f32.mrb[94].mxu1  ;;  %v8736_v50 = vpop.f32.mrb[95].mxu0  ;;  %6972 = vmatpush3.bf16.msra.mxu1 %v6971_v63  ;;  %v6727_v27 = vpack.c.bf16 %v3314_v24, %v3311_v15  ;;  %v9341_v63 = vld [vmem:[#allocation53_spill] sm:$0xff] }
 0x2f0   :  { %9338 = vst [vmem:[#allocation54_spill] sm:$0xff] %v8736_v50  ;;  %v8739_v16 = vadd.f32 %v2700_v35, %v8506_v38  ;;  %v2702_v52 = vpop.f32.mrb[95].mxu1  ;;  %4062 = vmatmul.mubr.f32.gmra.mrb[104].mxu0 %v2759_v28  ;;  %4976 = vmatmul.mubr.f32.gmra.mrb[200].mxu1 %v2759_v28  ;;  %v7133_v59 = vadd.f32 %v9341_v63, %v8644_v44  ;;  %v3317_v38 = vld [vmem:[#allocation8 + $0xd20] sm:$0xff]  ;;  %v2784_v35 = vmax.f32 %v7134_v34, 0.0  ;;  %v3358_v37 = vld [vmem:[#allocation8 + $0xe68] sm:$0xff]  ;;  %v9344_v63 = vld [vmem:[#allocation58_spill] sm:$0xff] }
 0x2f1   :  { %v8742_v14 = vadd.f32 %v2702_v52, %v8510_v7  ;;  %4067 = vmatprep.mubr.f32.mxu0 %v2772_v47  ;;  %6724 = vmatpush1.bf16.msra.mxu0 %v6723_v31  ;;  %v9342_v28 = vld [vmem:[#allocation56_spill] sm:$0xff]  ;;  %v6975_v7 = vpack.c.bf16 %v3304_v17, %v3301_v9  ;;  %v3324_v52 = vld [vmem:[#allocation8 + $0xd58] sm:$0xff]  ;;  %v3355_v31 = vld [vmem:[#allocation8 + $0xe50] sm:$0xff] }
 0x2f2   :  { %9339 = vst [vmem:[#allocation72_spill] sm:$0xff] %v8739_v16  ;;  %4980 = vmatprep.mubr.f32.mxu1 %v2772_v47  ;;  %6726 = vmatprep.subr.bf16.mxu0 %v6725_v0  ;;  %v7136_v16 = vadd.f32 %v9342_v28, %v8631_v13  ;;  %v6731_v0 = vpack.c.bf16 %v3320_v41, %v3317_v38  ;;  %v2783_v47 = vmax.f32 %v7133_v59, 0.0  ;;  %v9343_v34 = vld [vmem:[#allocation55_spill] sm:$0xff]  ;;  %v3326_v9 = vld [vmem:[#allocation8 + $0xd68] sm:$0xff]  ;;  %v3307_v59 = vld [vmem:[#allocation8 + $0xcd0] sm:$0xff] }
 0x2f3   :  { %9340 = vst [vmem:[#allocation73_spill] sm:$0xff] %v8742_v14  ;;  %v5425_v33 = vpop.f32.mrb[96].mxu1  ;;  %6974 = vmatprep.subr.bf16.mxu1 %v6973_v11  ;;  %v3327_v14 = vld [vmem:[#allocation8 + $0xd70] sm:$0xff]  ;;  %v7135_v39 = vadd.f32 %v9343_v34, %v8644_v44  ;;  %v6977_v56 = vpack.c.bf16 %v3358_v37, %v3355_v31  ;;  %v3310_v38 = vld [vmem:[#allocation8 + $0xce8] sm:$0xff]  ;;  %v3332_v34 = vld [vmem:[#allocation8 + $0xd98] sm:$0xff] }
 0x2f4   :  { %4068 = vmatmul.mubr.f32.gmra.mrb[106].mxu0 %v2771_v26  ;;  %v5426_v24 = vpop.f32.mrb[97].mxu1  ;;  %4981 = vmatmul.mubr.f32.gmra.mrb[202].mxu1 %v2771_v26  ;;  %v6733_v32 = vpack.c.bf16 %v3327_v14, %v3324_v52  ;;  %v3323_v11 = vld [vmem:[#allocation8 + $0xd50] sm:$0xff]  ;;  %v2796_v17 = vmax.f32 %v7136_v16, 0.0  ;;  %v7138_v26 = vadd.f32 %v9344_v63, %v8631_v13  ;;  %v3329_v52 = vld [vmem:[#allocation8 + $0xd80] sm:$0xff] }
 0x2f5   :  { %v8748_v15 = vadd.f32 %v5426_v24, %v5425_v33  ;;  %4073 = vmatprep.mubr.f32.mxu0 %v2784_v35  ;;  %6728 = vmatpush1.bf16.msra.mxu0 %v6727_v27  ;;  %v3330_v33 = vld [vmem:[#allocation8 + $0xd88] sm:$0xff]  ;;  %v3333_v24 = vld [vmem:[#allocation8 + $0xda0] sm:$0xff]  ;;  %v6735_v14 = vpack.c.bf16 %v3326_v9, %v3323_v11  ;;  %v3364_v11 = vld [vmem:[#allocation8 + $0xe98] sm:$0xff] }
 0x2f6   :  { %4985 = vmatprep.mubr.f32.mxu1 %v2784_v35  ;;  %6730 = vmatprep.subr.bf16.mxu0 %v6729_v19  ;;  %v2795_v19 = vmax.f32 %v7135_v39, 0.0  ;;  %v9345_v16 = vld [vmem:[#allocation57_spill] sm:$0xff]  ;;  %v2808_v31 = vmax.f32 %v7138_v26, 0.0  ;;  %v9346_v37 = vld [vmem:[#allocation60_spill] sm:$0xff]  ;;  %v9347_v26 = vld [vmem:[#allocation59_spill] sm:$0xff] }
 0x2f7   :  { %v5428_v28 = vpop.f32.mrb[98].mxu1  ;;  %6976 = vmatpush3.bf16.msra.mxu1 %v6975_v7  ;;  %v7137_v35 = vadd.f32 %v9345_v16, %v8644_v44  ;;  %v6737_v7 = vpack.c.bf16 %v3333_v24, %v3330_v33  ;;  %v3361_v39 = vld [vmem:[#allocation8 + $0xe80] sm:$0xff]  ;;  %v7139_v33 = vadd.f32 %v9347_v26, %v8644_v44  ;;  %v3335_v24 = vld [vmem:[#allocation8 + $0xdb0] sm:$0xff]  ;;  %v3344_v26 = vld [vmem:[#allocation8 + $0xdf8] sm:$0xff] }
 0x2f8   :  { %4074 = vmatmul.mubr.f32.gmra.mrb[108].mxu0 %v2783_v47  ;;  %v5429_v27 = vpop.f32.mrb[99].mxu1  ;;  %4986 = vmatmul.mubr.f32.gmra.mrb[204].mxu1 %v2783_v47  ;;  %v7140_v47 = vadd.f32 %v9346_v37, %v8631_v13  ;;  %v9348_v16 = vld [vmem:[#allocation62_spill] sm:$0xff]  ;;  %v6981_v12 = vpack.c.bf16 %v3364_v11, %v3361_v39  ;;  %v9350_v11 = vld [vmem:[#allocation64_spill] sm:$0xff] }
 0x2f9   :  { %v8754_v41 = vadd.f32 %v5429_v27, %v5428_v28  ;;  %4079 = vmatprep.mubr.f32.mxu0 %v2796_v17  ;;  %6732 = vmatpush1.bf16.msra.mxu0 %v6731_v0  ;;  %v6979_v28 = vpack.c.bf16 %v3310_v38, %v3307_v59  ;;  %v3336_v27 = vld [vmem:[#allocation8 + $0xdb8] sm:$0xff]  ;;  %v3338_v59 = vld [vmem:[#allocation8 + $0xdc8] sm:$0xff]  ;;  %v3351_v20 = vld [vmem:[#allocation8 + $0xe30] sm:$0xff] }
 0x2fa   :  { %4990 = vmatprep.mubr.f32.mxu1 %v2796_v17  ;;  %6734 = vmatprep.subr.bf16.mxu0 %v6733_v32  ;;  %v6739_v32 = vpack.c.bf16 %v3332_v34, %v3329_v52  ;;  %v2807_v17 = vmax.f32 %v7137_v35, 0.0  ;;  %v2820_v38 = vmax.f32 %v7140_v47, 0.0  ;;  %v3313_v35 = vld [vmem:[#allocation8 + $0xd00] sm:$0xff]  ;;  %v3316_v52 = vld [vmem:[#allocation8 + $0xd18] sm:$0xff] }
 0x2fb   :  { %v5431_v63 = vpop.f32.mrb[100].mxu1  ;;  %6978 = vmatprep.subr.bf16.mxu1 %v6977_v56  ;;  %v6741_v56 = vpack.c.bf16 %v3339_v57, %v3336_v27  ;;  %v6743_v57 = vpack.c.bf16 %v3338_v59, %v3335_v24  ;;  %v3341_v27 = vld [vmem:[#allocation8 + $0xde0] sm:$0xff]  ;;  %v3370_v24 = vld [vmem:[#allocation8 + $0xec8] sm:$0xff] }
 0x2fc   :  { %4080 = vmatmul.mubr.f32.gmra.mrb[110].mxu0 %v2795_v19  ;;  %v5432_v0 = vpop.f32.mrb[101].mxu1  ;;  %4991 = vmatmul.mubr.f32.gmra.mrb[206].mxu1 %v2795_v19  ;;  %v7142_v19 = vadd.f32 %v9348_v16, %v8631_v13 }
 0x2fd   :  { %v8760_v9 = vadd.f32 %v5432_v0, %v5431_v63  ;;  %4085 = vmatprep.mubr.f32.mxu0 %v2808_v31  ;;  %6736 = vmatpush1.bf16.msra.mxu0 %v6735_v14  ;;  %v3342_v63 = vld [vmem:[#allocation8 + $0xde8] sm:$0xff]  ;;  %v3345_v0 = vld [vmem:[#allocation8 + $0xe00] sm:$0xff] }
 0x2fe   :  { %4995 = vmatprep.mubr.f32.mxu1 %v2808_v31  ;;  %6738 = vmatprep.subr.bf16.mxu0 %v6737_v7  ;;  %v2819_v7 = vmax.f32 %v7139_v33, 0.0  ;;  %v9349_v31 = vld [vmem:[#allocation61_spill] sm:$0xff]  ;;  %v2832_v39 = vmax.f32 %v7142_v19, 0.0  ;;  %v9351_v19 = vld [vmem:[#allocation63_spill] sm:$0xff] }
 0x2ff   :  { %v5434_v37 = vpop.f32.mrb[102].mxu1  ;;  %6980 = vmatpush3.bf16.msra.mxu1 %v6979_v28  ;;  %v7141_v47 = vadd.f32 %v9349_v31, %v8644_v44  ;;  %v6745_v28 = vpack.c.bf16 %v3345_v0, %v3342_v63  ;;  %v3367_v33 = vld [vmem:[#allocation8 + $0xeb0] sm:$0xff]  ;;  %v7143_v63 = vadd.f32 %v9351_v19, %v8644_v44  ;;  %v3356_v19 = vld [vmem:[#allocation8 + $0xe58] sm:$0xff] }
 0x300   :  { %4086 = vmatmul.mubr.f32.gmra.mrb[112].mxu0 %v2807_v17  ;;  %v5435_v14 = vpop.f32.mrb[103].mxu1  ;;  %4996 = vmatmul.mubr.f32.gmra.mrb[208].mxu1 %v2807_v17  ;;  %v7144_v17 = vadd.f32 %v9350_v11, %v8631_v13  ;;  %v3347_v0 = vld [vmem:[#allocation8 + $0xe10] sm:$0xff]  ;;  %v6985_v50 = vpack.c.bf16 %v3370_v24, %v3367_v33  ;;  %v9354_v24 = vld [vmem:[#allocation19_spill] sm:$0xff] }
 0x301   :  { %v8766_v34 = vadd.f32 %v5435_v14, %v5434_v37  ;;  %4091 = vmatprep.mubr.f32.mxu0 %v2820_v38  ;;  %6740 = vmatpush1.bf16.msra.mxu0 %v6739_v32  ;;  %v6983_v37 = vpack.c.bf16 %v3316_v52, %v3313_v35  ;;  %v3348_v14 = vld [vmem:[#allocation8 + $0xe18] sm:$0xff]  ;;  %v3350_v35 = vld [vmem:[#allocation8 + $0xe28] sm:$0xff] }
 0x302   :  { %5000 = vmatprep.mubr.f32.mxu1 %v2820_v38  ;;  %6742 = vmatprep.subr.bf16.mxu0 %v6741_v56  ;;  %v6747_v56 = vpack.c.bf16 %v3344_v26, %v3341_v27  ;;  %v2831_v38 = vmax.f32 %v7141_v47, 0.0  ;;  %v2844_v52 = vmax.f32 %v7144_v17, 0.0  ;;  %v9352_v31 = vld [vmem:[#allocation65_spill] sm:$0xff] }
 0x303   :  { %v5437_v16 = vpop.f32.mrb[104].mxu1  ;;  %6982 = vmatprep.subr.bf16.mxu1 %v6981_v12  ;;  %v6749_v12 = vpack.c.bf16 %v3351_v20, %v3348_v14  ;;  %v3319_v47 = vld [vmem:[#allocation8 + $0xd30] sm:$0xff]  ;;  %v3322_v27 = vld [vmem:[#allocation8 + $0xd48] sm:$0xff]  ;;  %v6751_v20 = vpack.c.bf16 %v3350_v35, %v3347_v0  ;;  %v3353_v14 = vld [vmem:[#allocation8 + $0xe40] sm:$0xff] }
 0x304   :  { %4092 = vmatmul.mubr.f32.gmra.mrb[114].mxu0 %v2819_v7  ;;  %v5438_v32 = vpop.f32.mrb[105].mxu1  ;;  %5001 = vmatmul.mubr.f32.gmra.mrb[210].mxu1 %v2819_v7  ;;  %v7146_v7 = vadd.f32 %v9352_v31, %v8631_v13  ;;  %v3376_v0 = vld [vmem:[#allocation8 + $0xef8] sm:$0xff] }
 0x305   :  { %v8772_v59 = vadd.f32 %v5438_v32, %v5437_v16  ;;  %4097 = vmatprep.mubr.f32.mxu0 %v2832_v39  ;;  %6744 = vmatpush1.bf16.msra.mxu0 %v6743_v57  ;;  %v3354_v16 = vld [vmem:[#allocation8 + $0xe48] sm:$0xff]  ;;  %v3357_v32 = vld [vmem:[#allocation8 + $0xe60] sm:$0xff] }
 0x306   :  { %5005 = vmatprep.mubr.f32.mxu1 %v2832_v39  ;;  %6746 = vmatprep.subr.bf16.mxu0 %v6745_v28  ;;  %v2843_v28 = vmax.f32 %v7143_v63, 0.0  ;;  %v9353_v39 = vld [vmem:[#allocation17_spill] sm:$0xff]  ;;  %v2856_v33 = vmax.f32 %v7146_v7, 0.0  ;;  %v3373_v63 = vld [vmem:[#allocation8 + $0xee0] sm:$0xff] }
 0x307   :  { %v5440_v11 = vpop.f32.mrb[106].mxu1  ;;  %6984 = vmatpush3.bf16.msra.mxu1 %v6983_v37  ;;  %v7145_v17 = vadd.f32 %v9353_v39, %v8644_v44  ;;  %v6753_v37 = vpack.c.bf16 %v3357_v32, %v3354_v16  ;;  %v9355_v7 = vld [vmem:[#allocation16_spill] sm:$0xff]  ;;  %v3359_v32 = vld [vmem:[#allocation8 + $0xe70] sm:$0xff]  ;;  %v6989_v49 = vpack.c.bf16 %v3376_v0, %v3373_v63  ;;  %v9358_v0 = vld [vmem:[#allocation23_spill] sm:$0xff] }
 0x308   :  { %4098 = vmatmul.mubr.f32.gmra.mrb[116].mxu0 %v2831_v38  ;;  %v5441_v57 = vpop.f32.mrb[107].mxu1  ;;  %5006 = vmatmul.mubr.f32.gmra.mrb[212].mxu1 %v2831_v38  ;;  %v7148_v38 = vadd.f32 %v9354_v24, %v8631_v13  ;;  %v7147_v16 = vadd.f32 %v9355_v7, %v8644_v44  ;;  %v9356_v39 = vld [vmem:[#allocation21_spill] sm:$0xff]  ;;  %v3368_v7 = vld [vmem:[#allocation8 + $0xeb8] sm:$0xff] }
 0x309   :  { %v8778_v26 = vadd.f32 %v5441_v57, %v5440_v11  ;;  %4103 = vmatprep.mubr.f32.mxu0 %v2844_v52  ;;  %6748 = vmatpush1.bf16.msra.mxu0 %v6747_v56  ;;  %v6987_v11 = vpack.c.bf16 %v3322_v27, %v3319_v47  ;;  %v3360_v57 = vld [vmem:[#allocation8 + $0xe78] sm:$0xff]  ;;  %v3362_v47 = vld [vmem:[#allocation8 + $0xe88] sm:$0xff] }
 0x30a   :  { %5010 = vmatprep.mubr.f32.mxu1 %v2844_v52  ;;  %6750 = vmatprep.subr.bf16.mxu0 %v6749_v12  ;;  %v6755_v12 = vpack.c.bf16 %v3356_v19, %v3353_v14  ;;  %v2855_v52 = vmax.f32 %v7145_v17, 0.0  ;;  %v2868_v27 = vmax.f32 %v7148_v38, 0.0  ;;  %v3325_v17 = vld [vmem:[#allocation8 + $0xd60] sm:$0xff]  ;;  %v3328_v14 = vld [vmem:[#allocation8 + $0xd78] sm:$0xff] }
 0x30b   :  { %v5443_v31 = vpop.f32.mrb[108].mxu1  ;;  %6986 = vmatprep.subr.bf16.mxu1 %v6985_v50  ;;  %v6757_v50 = vpack.c.bf16 %v3363_v45, %v3360_v57  ;;  %v6759_v45 = vpack.c.bf16 %v3362_v47, %v3359_v32  ;;  %v3365_v57 = vld [vmem:[#allocation8 + $0xea0] sm:$0xff]  ;;  %v3375_v32 = vld [vmem:[#allocation8 + $0xef0] sm:$0xff] }
 0x30c   :  { %4104 = vmatmul.mubr.f32.gmra.mrb[118].mxu0 %v2843_v28  ;;  %v5444_v56 = vpop.f32.mrb[109].mxu1  ;;  %5011 = vmatmul.mubr.f32.gmra.mrb[214].mxu1 %v2843_v28  ;;  %v7150_v28 = vadd.f32 %v9356_v39, %v8631_v13  ;;  %v7709_v39 = vld [vmem:[#allocation7 + $0x8] sm:$0xf] }
 0x30d   :  { %v8784_v35 = vadd.f32 %v5444_v56, %v5443_v31  ;;  %4109 = vmatprep.mubr.f32.mxu0 %v2856_v33  ;;  %6752 = vmatpush1.bf16.msra.mxu0 %v6751_v20  ;;  %v3366_v31 = vld [vmem:[#allocation8 + $0xea8] sm:$0xff]  ;;  %v3369_v56 = vld [vmem:[#allocation8 + $0xec0] sm:$0xff] }
 0x30e   :  { %5015 = vmatprep.mubr.f32.mxu1 %v2856_v33  ;;  %6754 = vmatprep.subr.bf16.mxu0 %v6753_v37  ;;  %v2867_v37 = vmax.f32 %v7147_v16, 0.0  ;;  %v9357_v33 = vld [vmem:[#allocation18_spill] sm:$0xff]  ;;  %v2880_v63 = vmax.f32 %v7150_v28, 0.0  ;;  %v6763_v28 = vpack.c.bf16 %v3368_v7, %v3365_v57  ;;  %v3381_v57 = vld [vmem:[#allocation8 + $0xf20] sm:$0xff] }
 0x30f   :  { %v5446_v24 = vpop.f32.mrb[110].mxu1  ;;  %6988 = vmatpush3.bf16.msra.mxu1 %v6987_v11  ;;  %v7149_v38 = vadd.f32 %v9357_v33, %v8644_v44  ;;  %v6761_v11 = vpack.c.bf16 %v3369_v56, %v3366_v31  ;;  %v3372_v16 = vld [vmem:[#allocation8 + $0xed8] sm:$0xff]  ;;  %v9360_v56 = vld [vmem:[#allocation20_spill] sm:$0xff] }
 0x310   :  { %4110 = vmatmul.mubr.f32.gmra.mrb[120].mxu0 %v2855_v52  ;;  %v5447_v20 = vpop.f32.mrb[111].mxu1  ;;  %5016 = vmatmul.mubr.f32.gmra.mrb[216].mxu1 %v2855_v52  ;;  %v7152_v52 = vadd.f32 %v9358_v0, %v8631_v13  ;;  %v7151_v33 = vadd.f32 %v9360_v56, %v8644_v44  ;;  %v9361_v0 = vld [vmem:[#allocation43_spill] sm:$0xff] }
 0x311   :  { %v8790_v19 = vadd.f32 %v5447_v20, %v5446_v24  ;;  %4115 = vmatprep.mubr.f32.mxu0 %v2868_v27  ;;  %6756 = vmatpush1.bf16.msra.mxu0 %v6755_v12  ;;  %v8797_v24 = vrot.slane %v7709_v39, %v9359_v21  ;;  %v6991_v12 = vpack.c.bf16 %v3328_v14, %v3325_v17  ;;  %v2879_v13 = vmax.f32 %v7149_v38, 0.0  ;;  %v3371_v17 = vld [vmem:[#allocation8 + $0xed0] sm:$0xff]  ;;  %v3374_v14 = vld [vmem:[#allocation8 + $0xee8] sm:$0xff]  ;;  %v3384_v56 = vld [vmem:[#allocation8 + $0xf38] sm:$0xff] }
 0x312   :  { %5020 = vmatprep.mubr.f32.mxu1 %v2868_v27  ;;  %6758 = vmatprep.subr.bf16.mxu0 %v6757_v50  ;;  %v3427_v50 = vld [vmem:[#allocation8 + $0x1090] sm:$0xff]  ;;  %v3430_v27 = vld [vmem:[#allocation8 + $0x10a8] sm:$0xff]  ;;  %v8804_v21 = vrot.slane %v7709_v39, %v9361_v0  ;;  %v3377_v39 = vld [vmem:[#allocation8 + $0xf00] sm:$0xff] }
 0x313   :  { %v5449_v20 = vpop.f32.mrb[112].mxu1  ;;  %6990 = vmatprep.subr.bf16.mxu1 %v6989_v49  ;;  %v6765_v49 = vpack.c.bf16 %v3375_v32, %v3372_v16  ;;  %v6993_v38 = vpack.c.bf16 %v3430_v27, %v3427_v50  ;;  %v7156_v32 = vadd.f32 %v8532_v60, %v8797_v24  ;;  %v3379_v27 = vld [vmem:[#allocation8 + $0xf10] sm:$0xff] }
 0x314   :  { %4116 = vmatmul.mubr.f32.gmra.mrb[122].mxu0 %v2867_v37  ;;  %v5450_v47 = vpop.f32.mrb[113].mxu1  ;;  %5021 = vmatmul.mubr.f32.gmra.mrb[218].mxu1 %v2867_v37  ;;  %v2892_v37 = vmax.f32 %v7152_v52, 0.0  ;;  %v7153_v52 = vadd.f32 %v8514_v1, %v8804_v21  ;;  %v3436_v1 = vld [vmem:[#allocation8 + $0x10d8] sm:$0xff]  ;;  %v7155_v60 = vadd.f32 %v8528_v3, %v8804_v21 }
 0x315   :  { %v8799_v31 = vadd.f32 %v5450_v47, %v5449_v20  ;;  %4121 = vmatprep.mubr.f32.mxu0 %v2880_v63  ;;  %6760 = vmatpush1.bf16.msra.mxu0 %v6759_v45  ;;  %v7154_v20 = vadd.f32 %v8518_v40, %v8797_v24  ;;  %v3378_v45 = vld [vmem:[#allocation8 + $0xf08] sm:$0xff] }
 0x316   :  { %5025 = vmatprep.mubr.f32.mxu1 %v2880_v63  ;;  %6762 = vmatprep.subr.bf16.mxu0 %v6761_v11  ;;  %v6767_v11 = vpack.c.bf16 %v3374_v14, %v3371_v17  ;;  %v2891_v63 = vmax.f32 %v7151_v33, 0.0  ;;  %v6769_v40 = vpack.c.bf16 %v3381_v57, %v3378_v45  ;;  %v3387_v33 = vld [vmem:[#allocation8 + $0xf50] sm:$0xff]  ;;  %v3433_v17 = vld [vmem:[#allocation8 + $0x10c0] sm:$0xff]  ;;  %v3386_v45 = vld [vmem:[#allocation8 + $0xf48] sm:$0xff]  ;;  %v2726_v57 = vmax.f32 %v7156_v32, 0.0 }
 0x317   :  { %v5452_v47 = vpop.f32.mrb[114].mxu1  ;;  %6992 = vmatpush3.bf16.msra.mxu1 %v6991_v12  ;;  %v3380_v12 = vld [vmem:[#allocation8 + $0xf18] sm:$0xff]  ;;  %v2714_v16 = vmax.f32 %v7154_v20, 0.0  ;;  %v7157_v32 = vadd.f32 %v8542_v54, %v8804_v21  ;;  %v3442_v54 = vld [vmem:[#allocation8 + $0x1108] sm:$0xff] }
 0x318   :  { %4122 = vmatmul.mubr.f32.gmra.mrb[124].mxu0 %v2879_v13  ;;  %v5453_v7 = vpop.f32.mrb[115].mxu1  ;;  %5026 = vmatmul.mubr.f32.gmra.mrb[220].mxu1 %v2879_v13  ;;  %v3382_v13 = vld [vmem:[#allocation8 + $0xf28] sm:$0xff] }
 0x319   :  { %v8808_v44 = vadd.f32 %v5453_v7, %v5452_v47  ;;  %4127 = vmatprep.mubr.f32.mxu0 %v2892_v37  ;;  %6764 = vmatpush1.bf16.msra.mxu0 %v6763_v28  ;;  %v6995_v20 = vpack.c.bf16 %v3382_v13, %v3379_v27  ;;  %v3383_v47 = vld [vmem:[#allocation8 + $0xf30] sm:$0xff]  ;;  %v3389_v27 = vld [vmem:[#allocation8 + $0xf60] sm:$0xff]  ;;  %v3392_v13 = vld [vmem:[#allocation8 + $0xf78] sm:$0xff] }
 0x31a   :  { %5030 = vmatprep.mubr.f32.mxu1 %v2892_v37  ;;  %6766 = vmatprep.subr.bf16.mxu0 %v6765_v49  ;;  %v6771_v49 = vpack.c.bf16 %v3380_v12, %v3377_v39  ;;  %v2713_v37 = vmax.f32 %v7153_v52, 0.0  ;;  %v3385_v52 = vld [vmem:[#allocation8 + $0xf40] sm:$0xff]  ;;  %v3388_v12 = vld [vmem:[#allocation8 + $0xf58] sm:$0xff] }
 0x31b   :  { %v5455_v50 = vpop.f32.mrb[116].mxu1  ;;  %6994 = vmatprep.subr.bf16.mxu1 %v6993_v38  ;;  %v7158_v38 = vadd.f32 %v8546_v58, %v8797_v24 }
 0x31c   :  { %4128 = vmatmul.mubr.f32.gmra.mrb[126].mxu0 %v2891_v63  ;;  %v5456_v28 = vpop.f32.mrb[117].mxu1  ;;  %5031 = vmatmul.mubr.f32.gmra.mrb[222].mxu1 %v2891_v63  ;;  %v6773_v63 = vpack.c.bf16 %v3387_v33, %v3384_v56  ;;  %v7160_v33 = vadd.f32 %v8560_v5, %v8797_v24  ;;  %v7159_v5 = vadd.f32 %v8556_v30, %v8804_v21 }
 0x31d   :  { %v8814_v14 = vadd.f32 %v5456_v28, %v5455_v50  ;;  %6768 = vmatpush1.bf16.msra.mxu0 %v6767_v11  ;;  %4198 = vmatprep.mubr.f32.mxu0 %v2714_v16  ;;  %v3390_v50 = vld [vmem:[#allocation8 + $0xf68] sm:$0xff]  ;;  %v3393_v28 = vld [vmem:[#allocation8 + $0xf80] sm:$0xff]  ;;  %v6997_v11 = vpack.c.bf16 %v3436_v1, %v3433_v17  ;;  %v2738_v56 = vmax.f32 %v7158_v38, 0.0  ;;  %v6999_v1 = vpack.c.bf16 %v3388_v12, %v3385_v52 }
 0x31e   :  { %5100 = vmatprep.mubr.f32.mxu1 %v2714_v16  ;;  %6770 = vmatprep.subr.bf16.mxu0 %v6769_v40  ;;  %v6775_v40 = vpack.c.bf16 %v3386_v45, %v3383_v47  ;;  %v2725_v16 = vmax.f32 %v7155_v60, 0.0  ;;  %v6777_v58 = vpack.c.bf16 %v3393_v28, %v3390_v50  ;;  %v3439_v47 = vld [vmem:[#allocation8 + $0x10f0] sm:$0xff]  ;;  %v2750_v50 = vmax.f32 %v7160_v33, 0.0  ;;  %v3405_v52 = vld [vmem:[#allocation8 + $0xfe0] sm:$0xff]  ;;  %v3404_v33 = vld [vmem:[#allocation8 + $0xfd8] sm:$0xff] }
 0x31f   :  { %v5458_v7 = vpop.f32.mrb[118].mxu1  ;;  %v7162_v28 = vadd.f32 %v8574_v25, %v8797_v24  ;;  %v7001_v12 = vpack.c.bf16 %v3442_v54, %v3439_v47  ;;  %v3411_v47 = vld [vmem:[#allocation8 + $0x1010] sm:$0xff] }
 0x320   :  { %4199 = vmatmul.mubr.f32.vlgmr.msra.gmra.mrb[96].mxu0 %v2713_v37  ;;  %v5459_v39 = vpop.f32.mrb[119].mxu1  ;;  %5101 = vmatmul.mubr.f32.vlgmr.msra.gmra.mrb[224].mxu1 %v2713_v37  ;;  %v3396_v37 = vld [vmem:[#allocation8 + $0xf98] sm:$0xff] }
 0x321   :  { %v8820_v3 = vadd.f32 %v5459_v39, %v5458_v7  ;;  %4204 = vmatprep.mubr.f32.mxu0 %v2726_v57  ;;  %6772 = vmatpush1.bf16.msra.mxu0 %v6771_v49  ;;  %v3399_v49 = vld [vmem:[#allocation8 + $0xfb0] sm:$0xff]  ;;  %v3402_v39 = vld [vmem:[#allocation8 + $0xfc8] sm:$0xff] }
 0x322   :  { %5105 = vmatprep.mubr.f32.mxu1 %v2726_v57  ;;  %6996 = vmatpush3.bf16.msra.mxu1 %v6995_v20  ;;  %v6779_v20 = vpack.c.bf16 %v3392_v13, %v3389_v27  ;;  %v2737_v57 = vmax.f32 %v7157_v32, 0.0  ;;  %v6781_v38 = vpack.c.bf16 %v3399_v49, %v3396_v37  ;;  %v3395_v7 = vld [vmem:[#allocation8 + $0xf90] sm:$0xff]  ;;  %v3394_v32 = vld [vmem:[#allocation8 + $0xf88] sm:$0xff]  ;;  %v2749_v27 = vmax.f32 %v7159_v5, 0.0 }
 0x323   :  { %v5461_v17 = vpop.f32.mrb[120].mxu1  ;;  %6774 = vmatprep.subr.bf16.mxu0 %v6773_v63  ;;  %6998 = vmatprep.subr.bf16.mxu1 %v6997_v11  ;;  %v3398_v63 = vld [vmem:[#allocation8 + $0xfa8] sm:$0xff]  ;;  %v7161_v13 = vadd.f32 %v8570_v51, %v8804_v21  ;;  %v6785_v25 = vpack.c.bf16 %v3405_v52, %v3402_v39  ;;  %v7166_v39 = vadd.f32 %v8602_v22, %v8797_v24 }
 0x324   :  { %4205 = vmatmul.mubr.f32.gmra.mrb[98].mxu0 %v2725_v16  ;;  %v5462_v60 = vpop.f32.mrb[121].mxu1  ;;  %5106 = vmatmul.mubr.f32.gmra.mrb[226].mxu1 %v2725_v16  ;;  %v3391_v16 = vld [vmem:[#allocation8 + $0xf70] sm:$0xff]  ;;  %v7165_v22 = vadd.f32 %v8598_v36, %v8804_v21 }
 0x325   :  { %v8826_v45 = vadd.f32 %v5462_v60, %v5461_v17  ;;  %4210 = vmatprep.mubr.f32.mxu0 %v2738_v56  ;;  %6776 = vmatpush1.bf16.msra.mxu0 %v6775_v40  ;;  %v2762_v17 = vmax.f32 %v7162_v28, 0.0  ;;  %v7003_v49 = vpack.c.bf16 %v3394_v32, %v3391_v16  ;;  %v3408_v60 = vld [vmem:[#allocation8 + $0xff8] sm:$0xff]  ;;  %v3410_v28 = vld [vmem:[#allocation8 + $0x1008] sm:$0xff] }
 0x326   :  { %5110 = vmatprep.mubr.f32.mxu1 %v2738_v56  ;;  %6778 = vmatprep.subr.bf16.mxu0 %v6777_v58  ;;  %v6783_v58 = vpack.c.bf16 %v3398_v63, %v3395_v7  ;;  %v3401_v56 = vld [vmem:[#allocation8 + $0xfc0] sm:$0xff]  ;;  %v7163_v7 = vadd.f32 %v8584_v53, %v8804_v21  ;;  %v6789_v63 = vpack.c.bf16 %v3411_v47, %v3408_v60  ;;  %v3400_v53 = vld [vmem:[#allocation8 + $0xfb8] sm:$0xff] }
 0x327   :  { %v5464_v11 = vpop.f32.mrb[122].mxu1  ;;  %7000 = vmatpush3.bf16.msra.mxu1 %v6999_v1  ;;  %v7164_v1 = vadd.f32 %v8588_v23, %v8797_v24  ;;  %v6787_v5 = vpack.c.bf16 %v3404_v33, %v3401_v56  ;;  %v3473_v23 = vld [vmem:[#allocation10] sm:$0x7]  ;;  %v3420_v47 = vld [vmem:[#allocation8 + $0x1058] sm:$0xff] }
 0x328   :  { %4211 = vmatmul.mubr.f32.gmra.mrb[100].mxu0 %v2737_v57  ;;  %v5465_v40 = vpop.f32.mrb[123].mxu1  ;;  %5111 = vmatmul.mubr.f32.gmra.mrb[228].mxu1 %v2737_v57  ;;  %v3448_v57 = vld [vmem:[#allocation8 + $0x1138] sm:$0xff]  ;;  %v2773_v56 = vmax.f32 %v7163_v7, 0.0 }
 0x329   :  { %v8832_v30 = vadd.f32 %v5465_v40, %v5464_v11  ;;  %4216 = vmatprep.mubr.f32.mxu0 %v2750_v50  ;;  %6780 = vmatpush1.bf16.msra.mxu0 %v6779_v20  ;;  %v3445_v20 = vld [vmem:[#allocation8 + $0x1120] sm:$0xff]  ;;  %v2774_v11 = vmax.f32 %v7164_v1, 0.0  ;;  %v3416_v1 = vld [vmem:[#allocation8 + $0x1038] sm:$0xff] }
 0x32a   :  { %5115 = vmatprep.mubr.f32.mxu1 %v2750_v50  ;;  %6782 = vmatprep.subr.bf16.mxu0 %v6781_v38  ;;  %v2761_v38 = vmax.f32 %v7161_v13, 0.0  ;;  %v3407_v50 = vld [vmem:[#allocation8 + $0xff0] sm:$0xff]  ;;  %v3417_v40 = vld [vmem:[#allocation8 + $0x1040] sm:$0xff]  ;;  %v7005_v16 = vpack.c.bf16 %v3448_v57, %v3445_v20 }
 0x32b   :  { %v5467_v37 = vpop.f32.mrb[124].mxu1  ;;  %7002 = vmatprep.subr.bf16.mxu1 %v7001_v12  ;;  %v3414_v12 = vld [vmem:[#allocation8 + $0x1028] sm:$0xff]  ;;  %v3451_v57 = vld [vmem:[#allocation8 + $0x1150] sm:$0xff] }
 0x32c   :  { %4217 = vmatmul.mubr.f32.gmra.mrb[102].mxu0 %v2749_v27  ;;  %v5468_v54 = vpop.f32.mrb[125].mxu1  ;;  %5116 = vmatmul.mubr.f32.gmra.mrb[230].mxu1 %v2749_v27  ;;  %v8845_v27 = vrot.slane %v3473_v23, %v8324_v42  ;;  %v6793_v33 = vpack.c.bf16 %v3417_v40, %v3414_v12  ;;  %v2785_v23 = vmax.f32 %v7165_v22, 0.0  ;;  %v3426_v12 = vld [vmem:[#allocation8 + $0x1088] sm:$0xff]  ;;  %v3429_v40 = vld [vmem:[#allocation8 + $0x10a0] sm:$0xff]  ;;  %v7169_v22 = vadd.f32 %v8628_v8, %v8804_v21 }
 0x32d   :  { %v8838_v51 = vadd.f32 %v5468_v54, %v5467_v37  ;;  %4222 = vmatprep.mubr.f32.mxu0 %v2762_v17  ;;  %6784 = vmatpush1.bf16.msra.mxu0 %v6783_v58  ;;  %v3397_v58 = vld [vmem:[#allocation8 + $0xfa0] sm:$0xff]  ;;  %v2786_v37 = vmax.f32 %v7166_v39, 0.0  ;;  %v3423_v54 = vld [vmem:[#allocation8 + $0x1070] sm:$0xff]  ;;  %v7170_v39 = vadd.f32 %v8635_v61, %v8797_v24 }
 0x32e   :  { %5120 = vmatprep.mubr.f32.mxu1 %v2762_v17  ;;  %6786 = vmatprep.subr.bf16.mxu0 %v6785_v25  ;;  %v6791_v25 = vpack.c.bf16 %v3410_v28, %v3407_v50  ;;  %v3413_v17 = vld [vmem:[#allocation8 + $0x1020] sm:$0xff]  ;;  %v7007_v60 = vpack.c.bf16 %v3400_v53, %v3397_v58  ;;  %v4523_v36 = vadd.f32 %v8748_v15, %v8845_v27  ;;  %v3419_v50 = vld [vmem:[#allocation8 + $0x1050] sm:$0xff]  ;;  %v3422_v28 = vld [vmem:[#allocation8 + $0x1068] sm:$0xff] }
 0x32f   :  { %v5470_v52 = vpop.f32.mrb[126].mxu1  ;;  %7004 = vmatpush3.bf16.msra.mxu1 %v7003_v49  ;;  %v7168_v49 = vadd.f32 %v8617_v48, %v8797_v24  ;;  %v6795_v7 = vpack.c.bf16 %v3416_v1, %v3413_v17  ;;  %v7167_v48 = vadd.f32 %v8612_v55, %v8804_v21  ;;  %v3403_v55 = vld [vmem:[#allocation8 + $0xfd0] sm:$0xff]  ;;  %v3406_v58 = vld [vmem:[#allocation8 + $0xfe8] sm:$0xff]  ;;  %v4528_v53 = vadd.f32 %v8754_v41, %v8845_v27  ;;  %v3425_v17 = vld [vmem:[#allocation8 + $0x1080] sm:$0xff] }
 0x330   :  { %4223 = vmatmul.mubr.f32.gmra.mrb[104].mxu0 %v2761_v38  ;;  %v5471_v32 = vpop.f32.mrb[127].mxu1  ;;  %5121 = vmatmul.mubr.f32.gmra.mrb[232].mxu1 %v2761_v38  ;;  %v3428_v1 = vld [vmem:[#allocation8 + $0x1098] sm:$0xff]  ;;  %v3457_v8 = vld [vmem:[#allocation8 + $0x1180] sm:$0xff] }
 0x331   :  { %v8847_v13 = vadd.f32 %v5471_v32, %v5470_v52  ;;  %4228 = vmatprep.mubr.f32.mxu0 %v2774_v11  ;;  %6788 = vmatpush1.bf16.msra.mxu0 %v6787_v5  ;;  %v3454_v5 = vld [vmem:[#allocation8 + $0x1168] sm:$0xff]  ;;  %v2797_v61 = vmax.f32 %v7167_v48, 0.0  ;;  %v3431_v48 = vld [vmem:[#allocation8 + $0x10b0] sm:$0xff] }
 0x332   :  { %5125 = vmatprep.mubr.f32.mxu1 %v2774_v11  ;;  %6790 = vmatprep.subr.bf16.mxu0 %v6789_v63  ;;  %v6797_v63 = vpack.c.bf16 %v3423_v54, %v3420_v47  ;;  %v2798_v11 = vmax.f32 %v7168_v49, 0.0  ;;  %v7172_v49 = vadd.f32 %v8652_v43, %v8797_v24  ;;  %v3432_v47 = vld [vmem:[#allocation8 + $0x10b8] sm:$0xff]  ;;  %v3435_v54 = vld [vmem:[#allocation8 + $0x10d0] sm:$0xff]  ;;  %v2809_v43 = vmax.f32 %v7169_v22, 0.0 }
 0x333   :  { %v5505_v42 = vpop.f32.mrb[128].mxu1  ;;  %7006 = vmatprep.subr.bf16.mxu1 %v7005_v16  ;;  %v7009_v16 = vpack.c.bf16 %v3454_v5, %v3451_v57  ;;  %v3460_v57 = vld [vmem:[#allocation8 + $0x1198] sm:$0xff]  ;;  %v4533_v5 = vadd.f32 %v8760_v9, %v8845_v27 }
 0x334   :  { %4229 = vmatmul.mubr.f32.gmra.mrb[106].mxu0 %v2773_v56  ;;  %v5506_v20 = vpop.f32.mrb[129].mxu1  ;;  %5126 = vmatmul.mubr.f32.gmra.mrb[234].mxu1 %v2773_v56  ;;  %v6799_v56 = vpack.c.bf16 %v3422_v28, %v3419_v50  ;;  %v2822_v50 = vmax.f32 %v7172_v49, 0.0  ;;  %v7174_v28 = vadd.f32 %v8666_v62, %v8797_v24  ;;  %v3447_v49 = vld [vmem:[#allocation8 + $0x1130] sm:$0xff] }
 0x335   :  { %v5507_v38 = vadd.f32 %v5506_v20, %v5505_v42  ;;  %4234 = vmatprep.mubr.f32.mxu0 %v2786_v37  ;;  %6792 = vmatpush1.bf16.msra.mxu0 %v6791_v25 }
 0x336   :  { %5130 = vmatprep.mubr.f32.mxu1 %v2786_v37  ;;  %6794 = vmatprep.subr.bf16.mxu0 %v6793_v33  ;;  %v6801_v33 = vpack.c.bf16 %v3429_v40, %v3426_v12  ;;  %v2810_v37 = vmax.f32 %v7170_v39, 0.0  ;;  %v3438_v39 = vld [vmem:[#allocation8 + $0x10e8] sm:$0xff]  ;;  %v7013_v12 = vpack.c.bf16 %v3460_v57, %v3457_v8  ;;  %v2834_v22 = vmax.f32 %v7174_v28, 0.0 }
 0x337   :  { %v8859_v52 = vadd.f32 %v5507_v38, %v4523_v36  ;;  %v5508_v15 = vpop.f32.mrb[130].mxu1  ;;  %7008 = vmatpush3.bf16.msra.mxu1 %v7007_v60  ;;  %v7011_v60 = vpack.c.bf16 %v3406_v58, %v3403_v55  ;;  %v6803_v38 = vpack.c.bf16 %v3428_v1, %v3425_v17  ;;  %v7175_v8 = vadd.f32 %v8676_v18, %v8804_v21  ;;  %v3415_v18 = vld [vmem:[#allocation8 + $0x1030] sm:$0xff]  ;;  %v3418_v28 = vld [vmem:[#allocation8 + $0x1048] sm:$0xff] }
 0x338   :  { %4235 = vmatmul.mubr.f32.gmra.mrb[108].mxu0 %v2785_v23  ;;  %v5509_v32 = vpop.f32.mrb[131].mxu1  ;;  %5131 = vmatmul.mubr.f32.gmra.mrb[236].mxu1 %v2785_v23  ;;  %v6805_v23 = vpack.c.bf16 %v3435_v54, %v3432_v47  ;;  %v4543_v47 = vadd.f32 %v8772_v59, %v8845_v27 }
 0x339   :  { %v5510_v25 = vadd.f32 %v5509_v32, %v5508_v15  ;;  %4240 = vmatprep.mubr.f32.mxu0 %v2798_v11  ;;  %6796 = vmatpush1.bf16.msra.mxu0 %v6795_v7  ;;  %v7171_v7 = vadd.f32 %v8648_v6, %v8804_v21  ;;  %v3441_v15 = vld [vmem:[#allocation8 + $0x1100] sm:$0xff]  ;;  %v4538_v32 = vadd.f32 %v8766_v34, %v8845_v27 }
 0x33a   :  { %5135 = vmatprep.mubr.f32.mxu1 %v2798_v11  ;;  %6798 = vmatprep.subr.bf16.mxu0 %v6797_v63  ;;  %v3434_v63 = vld [vmem:[#allocation8 + $0x10c8] sm:$0xff]  ;;  %v3409_v6 = vld [vmem:[#allocation8 + $0x1000] sm:$0xff] }
 0x33b   :  { %v8867_v42 = vadd.f32 %v5510_v25, %v4528_v53  ;;  %v5511_v41 = vpop.f32.mrb[132].mxu1  ;;  %7010 = vmatprep.subr.bf16.mxu1 %v7009_v16  ;;  %v3412_v16 = vld [vmem:[#allocation8 + $0x1018] sm:$0xff]  ;;  %v6807_v58 = vpack.c.bf16 %v3434_v63, %v3431_v48  ;;  %v2821_v62 = vmax.f32 %v7171_v7, 0.0  ;;  %v7173_v53 = vadd.f32 %v8662_v4, %v8804_v21  ;;  %v3463_v4 = vld [vmem:[#allocation8 + $0x11b0] sm:$0xff]  ;;  %v3453_v48 = vld [vmem:[#allocation8 + $0x1160] sm:$0xff] }
 0x33c   :  { %4241 = vmatmul.mubr.f32.gmra.mrb[110].mxu0 %v2797_v61  ;;  %v5512_v20 = vpop.f32.mrb[133].mxu1  ;;  %5136 = vmatmul.mubr.f32.gmra.mrb[238].mxu1 %v2797_v61  ;;  %v6809_v25 = vpack.c.bf16 %v3441_v15, %v3438_v39  ;;  %v3440_v61 = vld [vmem:[#allocation8 + $0x10f8] sm:$0xff]  ;;  %v7015_v1 = vpack.c.bf16 %v3412_v16, %v3409_v6  ;;  %v3449_v6 = vld [vmem:[#allocation8 + $0x1140] sm:$0xff] }
 0x33d   :  { %v5513_v36 = vadd.f32 %v5512_v20, %v5511_v41  ;;  %4246 = vmatprep.mubr.f32.mxu0 %v2810_v37  ;;  %6800 = vmatpush1.bf16.msra.mxu0 %v6799_v56  ;;  %v3437_v56 = vld [vmem:[#allocation8 + $0x10e0] sm:$0xff]  ;;  %v3452_v16 = vld [vmem:[#allocation8 + $0x1158] sm:$0xff] }
 0x33e   :  { %5140 = vmatprep.mubr.f32.mxu1 %v2810_v37  ;;  %6802 = vmatprep.subr.bf16.mxu0 %v6801_v33  ;;  %v7176_v33 = vadd.f32 %v8680_v46, %v8797_v24  ;;  %v3444_v37 = vld [vmem:[#allocation8 + $0x1118] sm:$0xff]  ;;  %v6811_v20 = vpack.c.bf16 %v3440_v61, %v3437_v56  ;;  %v2833_v46 = vmax.f32 %v7173_v53, 0.0 }
 0x33f   :  { %v8875_v11 = vadd.f32 %v5513_v36, %v4533_v5  ;;  %v5514_v9 = vpop.f32.mrb[134].mxu1  ;;  %7012 = vmatpush3.bf16.msra.mxu1 %v7011_v60  ;;  %v3466_v60 = vld [vmem:[#allocation8 + $0x11c8] sm:$0xff]  ;;  %v6813_v57 = vpack.c.bf16 %v3447_v49, %v3444_v37  ;;  %v3443_v5 = vld [vmem:[#allocation8 + $0x1110] sm:$0xff]  ;;  %v3456_v53 = vld [vmem:[#allocation8 + $0x1178] sm:$0xff] }
 0x340   :  { %4247 = vmatmul.mubr.f32.gmra.mrb[112].mxu0 %v2809_v43  ;;  %v5515_v40 = vpop.f32.mrb[135].mxu1  ;;  %5141 = vmatmul.mubr.f32.gmra.mrb[240].mxu1 %v2809_v43  ;;  %v3446_v36 = vld [vmem:[#allocation8 + $0x1128] sm:$0xff]  ;;  %v7178_v43 = vadd.f32 %v8694_v2, %v8797_v24  ;;  %v7017_v63 = vpack.c.bf16 %v3466_v60, %v3463_v4  ;;  %v2845_v2 = vmax.f32 %v7175_v8, 0.0  ;;  %v3472_v61 = vld [vmem:[#allocation8 + $0x11f8] sm:$0xff]  ;;  %v3465_v8 = vld [vmem:[#allocation8 + $0x11c0] sm:$0xff] }
 0x341   :  { %v5516_v55 = vadd.f32 %v5515_v40, %v5514_v9  ;;  %4252 = vmatprep.mubr.f32.mxu0 %v2822_v50  ;;  %6804 = vmatpush1.bf16.msra.mxu0 %v6803_v38  ;;  %v2846_v38 = vmax.f32 %v7176_v33, 0.0  ;;  %v4548_v9 = vadd.f32 %v8778_v26, %v8845_v27  ;;  %v6815_v15 = vpack.c.bf16 %v3446_v36, %v3443_v5  ;;  %v3458_v4 = vld [vmem:[#allocation8 + $0x1188] sm:$0xff]  ;;  %v3421_v36 = vld [vmem:[#allocation8 + $0x1060] sm:$0xff] }
 0x342   :  { %5145 = vmatprep.mubr.f32.mxu1 %v2822_v50  ;;  %6806 = vmatprep.subr.bf16.mxu0 %v6805_v23  ;;  %v3450_v23 = vld [vmem:[#allocation8 + $0x1148] sm:$0xff] }
 0x343   :  { %v8883_v17 = vadd.f32 %v5516_v55, %v4538_v32  ;;  %v5517_v34 = vpop.f32.mrb[136].mxu1  ;;  %7014 = vmatprep.subr.bf16.mxu1 %v7013_v12  ;;  %v7177_v12 = vadd.f32 %v8690_v10, %v8804_v21  ;;  %v6817_v40 = vpack.c.bf16 %v3453_v48, %v3450_v23  ;;  %v2858_v32 = vmax.f32 %v7178_v43, 0.0  ;;  %v3469_v10 = vld [vmem:[#allocation8 + $0x11e0] sm:$0xff] }
 0x344   :  { %4253 = vmatmul.mubr.f32.gmra.mrb[114].mxu0 %v2821_v62  ;;  %v5518_v41 = vpop.f32.mrb[137].mxu1  ;;  %5146 = vmatmul.mubr.f32.gmra.mrb[242].mxu1 %v2821_v62  ;;  %v7180_v55 = vadd.f32 %v8708_v29, %v8797_v24  ;;  %v7019_v62 = vpack.c.bf16 %v3418_v28, %v3415_v18  ;;  %v4558_v43 = vadd.f32 %v8790_v19, %v8845_v27  ;;  %v3461_v28 = vld [vmem:[#allocation8 + $0x11a0] sm:$0xff] }
 0x345   :  { %v5519_v54 = vadd.f32 %v5518_v41, %v5517_v34  ;;  %4258 = vmatprep.mubr.f32.mxu0 %v2834_v22  ;;  %6808 = vmatpush1.bf16.msra.mxu0 %v6807_v58  ;;  %v6819_v34 = vpack.c.bf16 %v3452_v16, %v3449_v6  ;;  %v2857_v29 = vmax.f32 %v7177_v12, 0.0  ;;  %v3455_v41 = vld [vmem:[#allocation8 + $0x1170] sm:$0xff]  ;;  %v3468_v6 = vld [vmem:[#allocation8 + $0x11d8] sm:$0xff] }
 0x346   :  { %5150 = vmatprep.mubr.f32.mxu1 %v2834_v22  ;;  %6810 = vmatprep.subr.bf16.mxu0 %v6809_v25  ;;  %v3459_v25 = vld [vmem:[#allocation8 + $0x1190] sm:$0xff]  ;;  %v4553_v22 = vadd.f32 %v8784_v35, %v8845_v27  ;;  %v2870_v60 = vmax.f32 %v7180_v55, 0.0  ;;  %v6823_v23 = vpack.c.bf16 %v3458_v4, %v3455_v41  ;;  %v4563_v55 = vadd.f32 %v8799_v31, %v8845_v27 }
 0x347   :  { %v8891_v7 = vadd.f32 %v5519_v54, %v4543_v47  ;;  %v5520_v59 = vpop.f32.mrb[138].mxu1  ;;  %7016 = vmatpush3.bf16.msra.mxu1 %v7015_v1  ;;  %v9362_v1 = vld [vmem:[#allocation47_spill] sm:$0xff]  ;;  %v6821_v49 = vpack.c.bf16 %v3459_v25, %v3456_v53  ;;  %v9363_v47 = vld [vmem:[#allocation52_spill] sm:$0xff]  ;;  %v3471_v16 = vld [vmem:[#allocation8 + $0x11f0] sm:$0xff] }
 0x348   :  { %4259 = vmatmul.mubr.f32.gmra.mrb[116].mxu0 %v2833_v46  ;;  %v5521_v50 = vpop.f32.mrb[139].mxu1  ;;  %5151 = vmatmul.mubr.f32.gmra.mrb[244].mxu1 %v2833_v46  ;;  %v7179_v37 = vadd.f32 %v9362_v1, %v8804_v21  ;;  %v7182_v54 = vadd.f32 %v9363_v47, %v8797_v24  ;;  %v3462_v46 = vld [vmem:[#allocation8 + $0x11a8] sm:$0xff] }
 0x349   :  { %v5522_v39 = vadd.f32 %v5521_v50, %v5520_v59  ;;  %4264 = vmatprep.mubr.f32.mxu0 %v2846_v38  ;;  %6812 = vmatpush1.bf16.msra.mxu0 %v6811_v20  ;;  %v6825_v18 = vpack.c.bf16 %v3465_v8, %v3462_v46  ;;  %v9369_v8 = vld [vmem:[#allocation27_spill] sm:$0xff] }
 0x34a   :  { %5155 = vmatprep.mubr.f32.mxu1 %v2846_v38  ;;  %6814 = vmatprep.subr.bf16.mxu0 %v6813_v57  ;;  %v7021_v57 = vpack.c.bf16 %v3472_v61, %v3469_v10  ;;  %v3424_v38 = vld [vmem:[#allocation8 + $0x1078] sm:$0xff]  ;;  %v2869_v48 = vmax.f32 %v7179_v37, 0.0  ;;  %v3467_v10 = vld [vmem:[#allocation8 + $0x11d0] sm:$0xff]  ;;  %v3470_v61 = vld [vmem:[#allocation8 + $0x11e8] sm:$0xff] }
 0x34b   :  { %v8899_v58 = vadd.f32 %v5522_v39, %v4548_v9  ;;  %v5523_v26 = vpop.f32.mrb[140].mxu1  ;;  %7018 = vmatprep.subr.bf16.mxu1 %v7017_v63  ;;  %v9364_v63 = vld [vmem:[#allocation49_spill] sm:$0xff]  ;;  %v3464_v9 = vld [vmem:[#allocation8 + $0x11b8] sm:$0xff]  ;;  %v2882_v39 = vmax.f32 %v7182_v54, 0.0  ;;  %v4573_v54 = vadd.f32 %v8814_v14, %v8845_v27  ;;  %v9370_v14 = vld [vmem:[#allocation24_spill] sm:$0xff] }
 0x34c   :  { %4265 = vmatmul.mubr.f32.gmra.mrb[118].mxu0 %v2845_v2  ;;  %v5524_v56 = vpop.f32.mrb[141].mxu1  ;;  %5156 = vmatmul.mubr.f32.gmra.mrb[246].mxu1 %v2845_v2  ;;  %v7181_v50 = vadd.f32 %v9364_v63, %v8804_v21 }
 0x34d   :  { %v5525_v33 = vadd.f32 %v5524_v56, %v5523_v26  ;;  %4270 = vmatprep.mubr.f32.mxu0 %v2858_v32  ;;  %6816 = vmatpush1.bf16.msra.mxu0 %v6815_v15  ;;  %v9365_v15 = vld [vmem:[#allocation54_spill] sm:$0xff]  ;;  %v6829_v56 = vpack.c.bf16 %v3471_v16, %v3468_v6 }
 0x34e   :  { %5160 = vmatprep.mubr.f32.mxu1 %v2858_v32  ;;  %6818 = vmatprep.subr.bf16.mxu0 %v6817_v40  ;;  %v7184_v2 = vadd.f32 %v9365_v15, %v8797_v24  ;;  %v7023_v40 = vpack.c.bf16 %v3424_v38, %v3421_v36  ;;  %v2881_v53 = vmax.f32 %v7181_v50, 0.0  ;;  %v9366_v24 = vld [vmem:[#allocation51_spill] sm:$0xff] }
 0x34f   :  { %v8907_v20 = vadd.f32 %v5525_v33, %v4553_v22  ;;  %v5526_v35 = vpop.f32.mrb[142].mxu1  ;;  %7020 = vmatpush3.bf16.msra.mxu1 %v7019_v62  ;;  %v6827_v62 = vpack.c.bf16 %v3464_v9, %v3461_v28  ;;  %v7183_v25 = vadd.f32 %v9366_v24, %v8804_v21  ;;  %v6831_v21 = vpack.c.bf16 %v3470_v61, %v3467_v10 }
 0x350   :  { %4271 = vmatmul.mubr.f32.gmra.mrb[120].mxu0 %v2857_v29  ;;  %v5527_v5 = vpop.f32.mrb[143].mxu1  ;;  %5161 = vmatmul.mubr.f32.gmra.mrb[248].mxu1 %v2857_v29  ;;  %v2894_v22 = vmax.f32 %v7184_v2, 0.0  ;;  %v4568_v29 = vadd.f32 %v8808_v44, %v8845_v27  ;;  %v9368_v44 = vld [vmem:[#allocation22_spill] sm:$0xff]  ;;  %v4583_v9 = vadd.f32 %v8826_v45, %v8845_v27  ;;  %v9373_v2 = vld [vmem:[#allocation31_spill] sm:$0xff]  ;;  %v9374_v45 = vld [vmem:[#allocation28_spill] sm:$0xff]  ;;  %v4593_v10 = vadd.f32 %v8838_v51, %v8845_v27 }
 0x351   :  { %v5528_v59 = vadd.f32 %v5527_v5, %v5526_v35  ;;  %4276 = vmatprep.mubr.f32.mxu0 %v2870_v60  ;;  %6820 = vmatpush1.bf16.msra.mxu0 %v6819_v34  ;;  %v2893_v37 = vmax.f32 %v7183_v25, 0.0  ;;  %v2715_v46 = vmax.f32 %v9368_v44, 0.0  ;;  %v9378_v51 = vld [vmem:[#allocation32_spill] sm:$0xff] }
 0x352   :  { %5165 = vmatprep.mubr.f32.mxu1 %v2870_v60  ;;  %6822 = vmatprep.subr.bf16.mxu0 %v6821_v49  ;;  %v9367_v49 = vld [vmem:[#allocation25_spill] sm:$0xff] }
 0x353   :  { %v8915_v12 = vadd.f32 %v5528_v59, %v4558_v43  ;;  %v5529_v19 = vpop.f32.mrb[144].mxu1  ;;  %7022 = vmatprep.subr.bf16.mxu1 %v7021_v57  ;;  %v2716_v41 = vmax.f32 %v9367_v49, 0.0  ;;  %v2728_v57 = vmax.f32 %v9369_v8, 0.0  ;;  %v4578_v43 = vadd.f32 %v8820_v3, %v8845_v27  ;;  %v9372_v3 = vld [vmem:[#allocation26_spill] sm:$0xff] }
 0x354   :  { %4277 = vmatmul.mubr.f32.gmra.mrb[122].mxu0 %v2869_v48  ;;  %v5530_v32 = vpop.f32.mrb[145].mxu1  ;;  %5166 = vmatmul.mubr.f32.gmra.mrb[250].mxu1 %v2869_v48  ;;  %v9371_v48 = vld [vmem:[#allocation29_spill] sm:$0xff]  ;;  %v2739_v15 = vmax.f32 %v9372_v3, 0.0  ;;  %v9380_v8 = vld [vmem:[#allocation34_spill] sm:$0xff] }
 0x355   :  { %v5531_v26 = vadd.f32 %v5530_v32, %v5529_v19  ;;  %4282 = vmatprep.mubr.f32.mxu0 %v2882_v39  ;;  %6824 = vmatpush1.bf16.msra.mxu0 %v6823_v23  ;;  %v2727_v23 = vmax.f32 %v9370_v14, 0.0  ;;  %v2740_v63 = vmax.f32 %v9371_v48, 0.0  ;;  %v2752_v19 = vmax.f32 %v9373_v2, 0.0  ;;  %v9382_v14 = vld [vmem:[#allocation36_spill] sm:$0xff]  ;;  %v9383_v48 = vld [vmem:[#allocation41_spill] sm:$0xff] }
 0x356   :  { %5170 = vmatprep.mubr.f32.mxu1 %v2882_v39  ;;  %6826 = vmatprep.subr.bf16.mxu0 %v6825_v18  ;;  %v4588_v32 = vadd.f32 %v8832_v30, %v8845_v27  ;;  %v9376_v30 = vld [vmem:[#allocation30_spill] sm:$0xff] }
 0x357   :  { %v8921_v33 = vadd.f32 %v5531_v26, %v4563_v55  ;;  %v5532_v34 = vpop.f32.mrb[146].mxu1  ;;  %7024 = vmatpush3.bf16.msra.mxu1 %v7023_v40  ;;  %v2751_v26 = vmax.f32 %v9374_v45, 0.0  ;;  %v9387_v45 = vld [vmem:[#allocation68_spill] sm:$0xff] }
 0x358   :  { %4283 = vmatmul.mubr.f32.gmra.mrb[124].mxu0 %v2881_v53  ;;  %v5533_v31 = vpop.f32.mrb[147].mxu1  ;;  %5171 = vmatmul.mubr.f32.gmra.mrb[252].mxu1 %v2881_v53 }
 0x359   :  { %v5534_v1 = vadd.f32 %v5533_v31, %v5532_v34  ;;  %4288 = vmatprep.mubr.f32.mxu0 %v2894_v22  ;;  %6828 = vmatpush1.bf16.msra.mxu0 %v6827_v62  ;;  %v9375_v62 = vld [vmem:[#allocation33_spill] sm:$0xff]  ;;  %v9377_v34 = vld [vmem:[#allocation35_spill] sm:$0xff] }
 0x35a   :  { %5175 = vmatprep.mubr.f32.mxu1 %v2894_v22  ;;  %6830 = vmatprep.subr.bf16.mxu0 %v6829_v56  ;;  %v2764_v53 = vmax.f32 %v9375_v62, 0.0  ;;  %v2763_v22 = vmax.f32 %v9376_v30, 0.0  ;;  %v2776_v31 = vmax.f32 %v9377_v34, 0.0 }
 0x35b   :  { %v8926_v4 = vadd.f32 %v5534_v1, %v4568_v29  ;;  %v5535_v60 = vpop.f32.mrb[148].mxu1 }
 0x35c   :  { %4289 = vmatmul.mubr.f32.gmra.mrb[126].mxu0 %v2893_v37  ;;  %v5536_v47 = vpop.f32.mrb[149].mxu1  ;;  %5176 = vmatmul.mubr.f32.gmra.mrb[254].mxu1 %v2893_v37  ;;  %v4598_v37 = vadd.f32 %v8847_v13, %v8845_v27 }
 0x35d   :  { %v5537_v35 = vadd.f32 %v5536_v47, %v5535_v60  ;;  %6832 = vmatpush1.bf16.msra.mxu0 %v6831_v21  ;;  %4359 = vmatprep.mubr.f32.mxu0 %v2716_v41  ;;  %v9379_v60 = vld [vmem:[#allocation37_spill] sm:$0xff] }
 0x35e   :  { %5245 = vmatprep.mubr.f32.mxu1 %v2716_v41  ;;  %v2775_v41 = vmax.f32 %v9378_v51, 0.0  ;;  %v2788_v47 = vmax.f32 %v9379_v60, 0.0 }
 0x35f   :  { %v8932_v5 = vadd.f32 %v5537_v35, %v4573_v54  ;;  %v5538_v36 = vpop.f32.mrb[150].mxu1 }
 0x360   :  { %4360 = vmatmul.mubr.f32.vlgmr.msra.gmra.mrb[96].mxu0 %v2715_v46  ;;  %v5539_v38 = vpop.f32.mrb[151].mxu1  ;;  %5246 = vmatmul.mubr.f32.vlgmr.msra.gmra.mrb[0].mxu1 %v2715_v46 }
 0x361   :  { %v5540_v59 = vadd.f32 %v5539_v38, %v5538_v36  ;;  %4365 = vmatprep.mubr.f32.mxu0 %v2728_v57  ;;  %5250 = vmatprep.mubr.f32.mxu1 %v2728_v57  ;;  %v2787_v57 = vmax.f32 %v9380_v8, 0.0  ;;  %v9381_v36 = vld [vmem:[#allocation39_spill] sm:$0xff] }
 0x362   :  { %v2800_v27 = vmax.f32 %v9381_v36, 0.0 }
 0x363   :  { %v8938_v50 = vadd.f32 %v5540_v59, %v4578_v43  ;;  %v5541_v18 = vpop.f32.mrb[152].mxu1 }
 0x364   :  { %4366 = vmatmul.mubr.f32.gmra.mrb[98].mxu0 %v2727_v23  ;;  %v5542_v28 = vpop.f32.mrb[153].mxu1  ;;  %5251 = vmatmul.mubr.f32.gmra.mrb[2].mxu1 %v2727_v23  ;;  %v2799_v23 = vmax.f32 %v9382_v14, 0.0 }
 0x365   :  { %v5543_v39 = vadd.f32 %v5542_v28, %v5541_v18  ;;  %4371 = vmatprep.mubr.f32.mxu0 %v2740_v63  ;;  %5255 = vmatprep.mubr.f32.mxu1 %v2740_v63  ;;  %v2812_v63 = vmax.f32 %v9383_v48, 0.0 }
 0x367   :  { %v8944_v40 = vadd.f32 %v5543_v39, %v4583_v9  ;;  %v5544_v6 = vpop.f32.mrb[154].mxu1  ;;  %v9384_v39 = vld [vmem:[#allocation38_spill] sm:$0xff] }
 0x368   :  { %4372 = vmatmul.mubr.f32.gmra.mrb[100].mxu0 %v2739_v15  ;;  %v5545_v16 = vpop.f32.mrb[155].mxu1  ;;  %5256 = vmatmul.mubr.f32.gmra.mrb[4].mxu1 %v2739_v15  ;;  %v2811_v3 = vmax.f32 %v9384_v39, 0.0  ;;  %v9385_v15 = vld [vmem:[#allocation66_spill] sm:$0xff] }
 0x369   :  { %v5546_v55 = vadd.f32 %v5545_v16, %v5544_v6  ;;  %4377 = vmatprep.mubr.f32.mxu0 %v2752_v19  ;;  %5260 = vmatprep.mubr.f32.mxu1 %v2752_v19  ;;  %v2824_v2 = vmax.f32 %v9385_v15, 0.0 }
 0x36b   :  { %v8950_v24 = vadd.f32 %v5546_v55, %v4588_v32  ;;  %v5547_v25 = vpop.f32.mrb[156].mxu1  ;;  %v9386_v32 = vld [vmem:[#allocation40_spill] sm:$0xff] }
 0x36c   :  { %4378 = vmatmul.mubr.f32.gmra.mrb[102].mxu0 %v2751_v26  ;;  %v5548_v56 = vpop.f32.mrb[157].mxu1  ;;  %5261 = vmatmul.mubr.f32.gmra.mrb[6].mxu1 %v2751_v26  ;;  %v2823_v55 = vmax.f32 %v9386_v32, 0.0  ;;  %v2836_v26 = vmax.f32 %v9387_v45, 0.0 }
 0x36d   :  { %v5549_v61 = vadd.f32 %v5548_v56, %v5547_v25  ;;  %4383 = vmatprep.mubr.f32.mxu0 %v2764_v53  ;;  %5265 = vmatprep.mubr.f32.mxu1 %v2764_v53  ;;  %v9388_v56 = vld [vmem:[#allocation67_spill] sm:$0xff] }
 0x36f   :  { %v8956_v29 = vadd.f32 %v5549_v61, %v4593_v10  ;;  %v5550_v1 = vpop.f32.mrb[158].mxu1  ;;  %v2835_v10 = vmax.f32 %v9388_v56, 0.0  ;;  %v9389_v61 = vld [vmem:[#allocation46_spill] sm:$0xff] }
 0x370   :  { %4384 = vmatmul.mubr.f32.gmra.mrb[104].mxu0 %v2763_v22  ;;  %v5551_v21 = vpop.f32.mrb[159].mxu1  ;;  %5266 = vmatmul.mubr.f32.gmra.mrb[8].mxu1 %v2763_v22  ;;  %v2848_v30 = vmax.f32 %v9389_v61, 0.0 }
 0x371   :  { %v5552_v49 = vadd.f32 %v5551_v21, %v5550_v1  ;;  %4389 = vmatprep.mubr.f32.mxu0 %v2776_v31  ;;  %5270 = vmatprep.mubr.f32.mxu1 %v2776_v31  ;;  %v9390_v1 = vld [vmem:[#allocation44_spill] sm:$0xff] }
 0x372   :  { %v2847_v21 = vmax.f32 %v9390_v1, 0.0 }
 0x373   :  { %v8962_v54 = vadd.f32 %v5552_v49, %v4598_v37  ;;  %v5585_v35 = vpop.f32.mrb[160].mxu1  ;;  %v9391_v37 = vld [vmem:[#allocation48_spill] sm:$0xff] }
 0x374   :  { %4390 = vmatmul.mubr.f32.gmra.mrb[106].mxu0 %v2775_v41  ;;  %v5586_v44 = vpop.f32.mrb[161].mxu1  ;;  %5271 = vmatmul.mubr.f32.gmra.mrb[10].mxu1 %v2775_v41  ;;  %v2860_v49 = vmax.f32 %v9391_v37, 0.0 }
 0x375   :  { %v5587_v46 = vadd.f32 %v5586_v44, %v5585_v35  ;;  %4395 = vmatprep.mubr.f32.mxu0 %v2788_v47  ;;  %5275 = vmatprep.mubr.f32.mxu1 %v2788_v47  ;;  %v9392_v47 = vld [vmem:[#allocation45_spill] sm:$0xff] }
 0x376   :  { %v2859_v35 = vmax.f32 %v9392_v47, 0.0  ;;  %v9393_v44 = vld [vmem:[#allocation69_spill] sm:$0xff] }
 0x377   :  { %v8967_v13 = vadd.f32 %v5587_v46, %v8859_v52  ;;  %v5588_v38 = vpop.f32.mrb[162].mxu1  ;;  %v2872_v46 = vmax.f32 %v9393_v44, 0.0 }
 0x378   :  { %4396 = vmatmul.mubr.f32.gmra.mrb[108].mxu0 %v2787_v57  ;;  %v5589_v43 = vpop.f32.mrb[163].mxu1  ;;  %5276 = vmatmul.mubr.f32.gmra.mrb[12].mxu1 %v2787_v57 }
 0x379   :  { %v5590_v59 = vadd.f32 %v5589_v43, %v5588_v38  ;;  %4401 = vmatprep.mubr.f32.mxu0 %v2800_v27  ;;  %5280 = vmatprep.mubr.f32.mxu1 %v2800_v27  ;;  %v9394_v27 = vld [vmem:[#allocation50_spill] sm:$0xff]  ;;  %v9395_v43 = vld [vmem:[#allocation71_spill] sm:$0xff] }
 0x37a   :  { %v2871_v38 = vmax.f32 %v9394_v27, 0.0 }
 0x37b   :  { %v8972_v18 = vadd.f32 %v5590_v59, %v8867_v42  ;;  %v5591_v28 = vpop.f32.mrb[164].mxu1  ;;  %v2884_v59 = vmax.f32 %v9395_v43, 0.0 }
 0x37c   :  { %4402 = vmatmul.mubr.f32.gmra.mrb[110].mxu0 %v2799_v23  ;;  %v5592_v9 = vpop.f32.mrb[165].mxu1  ;;  %5281 = vmatmul.mubr.f32.gmra.mrb[14].mxu1 %v2799_v23 }
 0x37d   :  { %v5593_v52 = vadd.f32 %v5592_v9, %v5591_v28  ;;  %4407 = vmatprep.mubr.f32.mxu0 %v2812_v63  ;;  %5285 = vmatprep.mubr.f32.mxu1 %v2812_v63  ;;  %v9396_v63 = vld [vmem:[#allocation70_spill] sm:$0xff]  ;;  %v9397_v9 = vld [vmem:[#allocation73_spill] sm:$0xff] }
 0x37e   :  { %v2883_v28 = vmax.f32 %v9396_v63, 0.0 }
 0x37f   :  { %v8977_v19 = vadd.f32 %v5593_v52, %v8875_v11  ;;  %v5594_v6 = vpop.f32.mrb[166].mxu1  ;;  %v2896_v52 = vmax.f32 %v9397_v9, 0.0 }
 0x380   :  { %4408 = vmatmul.mubr.f32.gmra.mrb[112].mxu0 %v2811_v3  ;;  %v5595_v16 = vpop.f32.mrb[167].mxu1  ;;  %5286 = vmatmul.mubr.f32.gmra.mrb[16].mxu1 %v2811_v3 }
 0x381   :  { %v5596_v42 = vadd.f32 %v5595_v16, %v5594_v6  ;;  %4413 = vmatprep.mubr.f32.mxu0 %v2824_v2  ;;  %5290 = vmatprep.mubr.f32.mxu1 %v2824_v2  ;;  %v9398_v2 = vld [vmem:[#allocation72_spill] sm:$0xff] }
 0x382   :  { %v2895_v6 = vmax.f32 %v9398_v2, 0.0 }
 0x383   :  { %v8982_v62 = vadd.f32 %v5596_v42, %v8883_v17  ;;  %v5597_v53 = vpop.f32.mrb[168].mxu1 }
 0x384   :  { %4414 = vmatmul.mubr.f32.gmra.mrb[114].mxu0 %v2823_v55  ;;  %v5598_v25 = vpop.f32.mrb[169].mxu1  ;;  %5291 = vmatmul.mubr.f32.gmra.mrb[18].mxu1 %v2823_v55 }
 0x385   :  { %v5599_v11 = vadd.f32 %v5598_v25, %v5597_v53  ;;  %4419 = vmatprep.mubr.f32.mxu0 %v2836_v26  ;;  %5295 = vmatprep.mubr.f32.mxu1 %v2836_v26 }
 0x387   :  { %v8987_v22 = vadd.f32 %v5599_v11, %v8891_v7  ;;  %v5600_v34 = vpop.f32.mrb[170].mxu1 }
 0x388   :  { %4420 = vmatmul.mubr.f32.gmra.mrb[116].mxu0 %v2835_v10  ;;  %v5601_v31 = vpop.f32.mrb[171].mxu1  ;;  %5296 = vmatmul.mubr.f32.gmra.mrb[20].mxu1 %v2835_v10 }
 0x389   :  { %v5602_v17 = vadd.f32 %v5601_v31, %v5600_v34  ;;  %4425 = vmatprep.mubr.f32.mxu0 %v2848_v30  ;;  %5300 = vmatprep.mubr.f32.mxu1 %v2848_v30 }
 0x38b   :  { %v8992_v51 = vadd.f32 %v5602_v17, %v8899_v58  ;;  %v5603_v41 = vpop.f32.mrb[172].mxu1 }
 0x38c   :  { %4426 = vmatmul.mubr.f32.gmra.mrb[118].mxu0 %v2847_v21  ;;  %v5604_v60 = vpop.f32.mrb[173].mxu1  ;;  %5301 = vmatmul.mubr.f32.gmra.mrb[22].mxu1 %v2847_v21 }
 0x38d   :  { %v5605_v7 = vadd.f32 %v5604_v60, %v5603_v41  ;;  %4431 = vmatprep.mubr.f32.mxu0 %v2860_v49  ;;  %5305 = vmatprep.mubr.f32.mxu1 %v2860_v49 }
 0x38f   :  { %v8997_v8 = vadd.f32 %v5605_v7, %v8907_v20  ;;  %v5606_v57 = vpop.f32.mrb[174].mxu1 }
 0x390   :  { %4432 = vmatmul.mubr.f32.gmra.mrb[120].mxu0 %v2859_v35  ;;  %v5607_v36 = vpop.f32.mrb[175].mxu1  ;;  %5306 = vmatmul.mubr.f32.gmra.mrb[24].mxu1 %v2859_v35 }
 0x391   :  { %v5608_v58 = vadd.f32 %v5607_v36, %v5606_v57  ;;  %4437 = vmatprep.mubr.f32.mxu0 %v2872_v46  ;;  %5310 = vmatprep.mubr.f32.mxu1 %v2872_v46 }
 0x393   :  { %v9002_v14 = vadd.f32 %v5608_v58, %v8915_v12  ;;  %v5609_v23 = vpop.f32.mrb[176].mxu1 }
 0x394   :  { %4438 = vmatmul.mubr.f32.gmra.mrb[122].mxu0 %v2871_v38  ;;  %v5610_v48 = vpop.f32.mrb[177].mxu1  ;;  %5311 = vmatmul.mubr.f32.gmra.mrb[26].mxu1 %v2871_v38 }
 0x395   :  { %v5611_v20 = vadd.f32 %v5610_v48, %v5609_v23  ;;  %4443 = vmatprep.mubr.f32.mxu0 %v2884_v59  ;;  %5315 = vmatprep.mubr.f32.mxu1 %v2884_v59 }
 0x397   :  { %v9007_v39 = vadd.f32 %v5611_v20, %v8921_v33  ;;  %v5612_v3 = vpop.f32.mrb[178].mxu1 }
 0x398   :  { %4444 = vmatmul.mubr.f32.gmra.mrb[124].mxu0 %v2883_v28  ;;  %v5613_v15 = vpop.f32.mrb[179].mxu1  ;;  %5316 = vmatmul.mubr.f32.gmra.mrb[28].mxu1 %v2883_v28 }
 0x399   :  { %v5614_v12 = vadd.f32 %v5613_v15, %v5612_v3  ;;  %4449 = vmatprep.mubr.f32.mxu0 %v2896_v52  ;;  %5320 = vmatprep.mubr.f32.mxu1 %v2896_v52 }
 0x39b   :  { %v9011_v16 = vadd.f32 %v5614_v12, %v8926_v4  ;;  %v5615_v42 = vpop.f32.mrb[180].mxu1 }
 0x39c   :  { %4450 = vmatmul.mubr.f32.gmra.mrb[126].mxu0 %v2895_v6  ;;  %v5616_v32 = vpop.f32.mrb[181].mxu1  ;;  %5321 = vmatmul.mubr.f32.gmra.mrb[30].mxu1 %v2895_v6 }
 0x39d   :  { %v5617_v55 = vadd.f32 %v5616_v32, %v5615_v42 }
 0x39f   :  { %v9014_v33 = vadd.f32 %v5617_v55, %v8932_v5  ;;  %v5618_v45 = vpop.f32.mrb[182].mxu1 }
 0x3a0   :  { %v5619_v26 = vpop.f32.mrb[183].mxu1 }
 0x3a1   :  { %v5620_v53 = vadd.f32 %v5619_v26, %v5618_v45 }
 0x3a3   :  { %v9017_v25 = vadd.f32 %v5620_v53, %v8938_v50  ;;  %v5621_v11 = vpop.f32.mrb[184].mxu1 }
 0x3a4   :  { %v5622_v56 = vpop.f32.mrb[185].mxu1 }
 0x3a5   :  { %v5623_v10 = vadd.f32 %v5622_v56, %v5621_v11 }
 0x3a7   :  { %v9020_v4 = vadd.f32 %v5623_v10, %v8944_v40  ;;  %v5624_v61 = vpop.f32.mrb[186].mxu1 }
 0x3a8   :  { %v5625_v30 = vpop.f32.mrb[187].mxu1 }
 0x3a9   :  { %v5626_v34 = vadd.f32 %v5625_v30, %v5624_v61 }
 0x3ab   :  { %v9023_v31 = vadd.f32 %v5626_v34, %v8950_v24  ;;  %v5627_v5 = vpop.f32.mrb[188].mxu1 }
 0x3ac   :  { %v5628_v17 = vpop.f32.mrb[189].mxu1 }
 0x3ad   :  { %v5629_v1 = vadd.f32 %v5628_v17, %v5627_v5 }
 0x3af   :  { %v9026_v21 = vadd.f32 %v5629_v1, %v8956_v29  ;;  %v5630_v50 = vpop.f32.mrb[190].mxu1 }
 0x3b0   :  { %v5631_v37 = vpop.f32.mrb[191].mxu1 }
 0x3b1   :  { %v5632_v49 = vadd.f32 %v5631_v37, %v5630_v50 }
 0x3b3   :  { %v9029_v41 = vadd.f32 %v5632_v49, %v8962_v54  ;;  %v5665_v40 = vpop.f32.mrb[192].mxu1 }
 0x3b4   :  { %v5666_v60 = vpop.f32.mrb[193].mxu1 }
 0x3b5   :  { %v5667_v7 = vadd.f32 %v5666_v60, %v5665_v40 }
 0x3b7   :  { %v9032_v47 = vadd.f32 %v5667_v7, %v8967_v13  ;;  %v5668_v24 = vpop.f32.mrb[194].mxu1 }
 0x3b8   :  { %v5669_v35 = vpop.f32.mrb[195].mxu1 }
 0x3b9   :  { %v5670_v44 = vadd.f32 %v5669_v35, %v5668_v24 }
 0x3bb   :  { %v9035_v46 = vadd.f32 %v5670_v44, %v8972_v18  ;;  %v5671_v29 = vpop.f32.mrb[196].mxu1 }
 0x3bc   :  { %v5672_v57 = vpop.f32.mrb[197].mxu1 }
 0x3bd   :  { %v5673_v36 = vadd.f32 %v5672_v57, %v5671_v29 }
 0x3bf   :  { %v9038_v58 = vadd.f32 %v5673_v36, %v8977_v19  ;;  %v5674_v54 = vpop.f32.mrb[198].mxu1 }
 0x3c0   :  { %v5675_v27 = vpop.f32.mrb[199].mxu1 }
 0x3c1   :  { %v5676_v38 = vadd.f32 %v5675_v27, %v5674_v54 }
 0x3c3   :  { %v9041_v43 = vadd.f32 %v5676_v38, %v8982_v62  ;;  %v5677_v13 = vpop.f32.mrb[200].mxu1 }
 0x3c4   :  { %v5678_v59 = vpop.f32.mrb[201].mxu1 }
 0x3c5   :  { %v5679_v23 = vadd.f32 %v5678_v59, %v5677_v13 }
 0x3c7   :  { %v9044_v48 = vadd.f32 %v5679_v23, %v8987_v22  ;;  %v5680_v18 = vpop.f32.mrb[202].mxu1 }
 0x3c8   :  { %v5681_v20 = vpop.f32.mrb[203].mxu1 }
 0x3c9   :  { %v5682_v63 = vadd.f32 %v5681_v20, %v5680_v18 }
 0x3cb   :  { %v9047_v28 = vadd.f32 %v5682_v63, %v8992_v51  ;;  %v5683_v19 = vpop.f32.mrb[204].mxu1 }
 0x3cc   :  { %v5684_v9 = vpop.f32.mrb[205].mxu1 }
 0x3cd   :  { %v5685_v52 = vadd.f32 %v5684_v9, %v5683_v19 }
 0x3cf   :  { %v9050_v3 = vadd.f32 %v5685_v52, %v8997_v8  ;;  %v5686_v62 = vpop.f32.mrb[206].mxu1 }
 0x3d0   :  { %v5687_v15 = vpop.f32.mrb[207].mxu1 }
 0x3d1   :  { %v5688_v12 = vadd.f32 %v5687_v15, %v5686_v62 }
 0x3d3   :  { %v9053_v2 = vadd.f32 %v5688_v12, %v9002_v14  ;;  %v5689_v22 = vpop.f32.mrb[208].mxu1 }
 0x3d4   :  { %v5690_v6 = vpop.f32.mrb[209].mxu1 }
 0x3d5   :  { %v5691_v42 = vadd.f32 %v5690_v6, %v5689_v22 }
 0x3d7   :  { %v9056_v32 = vadd.f32 %v5691_v42, %v9007_v39  ;;  %v5692_v51 = vpop.f32.mrb[210].mxu1 }
 0x3d8   :  { %v5693_v55 = vpop.f32.mrb[211].mxu1 }
 0x3d9   :  { %v5694_v45 = vadd.f32 %v5693_v55, %v5692_v51 }
 0x3db   :  { %v9059_v26 = vadd.f32 %v5694_v45, %v9011_v16  ;;  %v5695_v8 = vpop.f32.mrb[212].mxu1 }
 0x3dc   :  { %v5696_v53 = vpop.f32.mrb[213].mxu1 }
 0x3dd   :  { %v5697_v11 = vadd.f32 %v5696_v53, %v5695_v8 }
 0x3df   :  { %v9062_v56 = vadd.f32 %v5697_v11, %v9014_v33  ;;  %v5698_v14 = vpop.f32.mrb[214].mxu1 }
 0x3e0   :  { %v5699_v10 = vpop.f32.mrb[215].mxu1 }
 0x3e1   :  { %v5700_v61 = vadd.f32 %v5699_v10, %v5698_v14 }
 0x3e3   :  { %v9065_v30 = vadd.f32 %v5700_v61, %v9017_v25  ;;  %v5701_v39 = vpop.f32.mrb[216].mxu1 }
 0x3e4   :  { %v5702_v34 = vpop.f32.mrb[217].mxu1 }
 0x3e5   :  { %v5703_v5 = vadd.f32 %v5702_v34, %v5701_v39 }
 0x3e7   :  { %v9068_v17 = vadd.f32 %v5703_v5, %v9020_v4  ;;  %v5704_v16 = vpop.f32.mrb[218].mxu1 }
 0x3e8   :  { %v5705_v1 = vpop.f32.mrb[219].mxu1 }
 0x3e9   :  { %v5706_v50 = vadd.f32 %v5705_v1, %v5704_v16 }
 0x3eb   :  { %v9071_v37 = vadd.f32 %v5706_v50, %v9023_v31  ;;  %v5707_v33 = vpop.f32.mrb[220].mxu1 }
 0x3ec   :  { %v5708_v49 = vpop.f32.mrb[221].mxu1 }
 0x3ed   :  { %v5709_v40 = vadd.f32 %v5708_v49, %v5707_v33 }
 0x3ef   :  { %v9074_v60 = vadd.f32 %v5709_v40, %v9026_v21  ;;  %v5710_v25 = vpop.f32.mrb[222].mxu1 }
 0x3f0   :  { %v5711_v7 = vpop.f32.mrb[223].mxu1 }
 0x3f1   :  { %v5712_v24 = vadd.f32 %v5711_v7, %v5710_v25 }
 0x3f3   :  { %v9077_v35 = vadd.f32 %v5712_v24, %v9029_v41  ;;  %v5745_v4 = vpop.f32.mrb[224].mxu1 }
 0x3f4   :  { %v5746_v44 = vpop.f32.mrb[225].mxu1 }
 0x3f5   :  { %v5747_v29 = vadd.f32 %v5746_v44, %v5745_v4 }
 0x3f7   :  { %v9080_v57 = vadd.f32 %v5747_v29, %v9032_v47  ;;  %v5748_v31 = vpop.f32.mrb[226].mxu1 }
 0x3f8   :  { %v5749_v36 = vpop.f32.mrb[227].mxu1 }
 0x3f9   :  { %v5750_v54 = vadd.f32 %v5749_v36, %v5748_v31  ;;  %v7710_v31 = vld [vmem:[#allocation10] sm:$0x7] }
 0x3fa   :  { %v9125_v36 = vrot.slane %v7710_v31, %v9361_v0 }
 0x3fb   :  { %v9083_v27 = vadd.f32 %v5750_v54, %v9035_v46  ;;  %v5751_v21 = vpop.f32.mrb[228].mxu1  ;;  %v9399_v54 = vld [vmem:[#allocation42_spill] sm:$0xff] }
 0x3fc   :  { %v5752_v38 = vpop.f32.mrb[229].mxu1 }
 0x3fd   :  { %v5753_v13 = vadd.f32 %v5752_v38, %v5751_v21  ;;  %v9128_v21 = vrot.slane %v7710_v31, %v9399_v54 }
 0x3ff   :  { %v9086_v59 = vadd.f32 %v5753_v13, %v9038_v58  ;;  %v5754_v41 = vpop.f32.mrb[230].mxu1 }
 0x400   :  { %v5755_v23 = vpop.f32.mrb[231].mxu1 }
 0x401   :  { %v5756_v18 = vadd.f32 %v5755_v23, %v5754_v41 }
 0x403   :  { %v9089_v20 = vadd.f32 %v5756_v18, %v9041_v43  ;;  %v5757_v47 = vpop.f32.mrb[232].mxu1 }
 0x404   :  { %v5758_v63 = vpop.f32.mrb[233].mxu1 }
 0x405   :  { %v5759_v19 = vadd.f32 %v5758_v63, %v5757_v47 }
 0x407   :  { %v9092_v9 = vadd.f32 %v5759_v19, %v9044_v48  ;;  %v5760_v46 = vpop.f32.mrb[234].mxu1 }
 0x408   :  { %v5761_v52 = vpop.f32.mrb[235].mxu1 }
 0x409   :  { %v5762_v62 = vadd.f32 %v5761_v52, %v5760_v46 }
 0x40b   :  { %v9095_v15 = vadd.f32 %v5762_v62, %v9047_v28  ;;  %v5763_v58 = vpop.f32.mrb[236].mxu1 }
 0x40c   :  { %v5764_v12 = vpop.f32.mrb[237].mxu1 }
 0x40d   :  { %v5765_v22 = vadd.f32 %v5764_v12, %v5763_v58 }
 0x40f   :  { %v9098_v6 = vadd.f32 %v5765_v22, %v9050_v3  ;;  %v5766_v43 = vpop.f32.mrb[238].mxu1 }
 0x410   :  { %v5767_v42 = vpop.f32.mrb[239].mxu1 }
 0x411   :  { %v5768_v51 = vadd.f32 %v5767_v42, %v5766_v43 }
 0x413   :  { %v9101_v55 = vadd.f32 %v5768_v51, %v9053_v2  ;;  %v5769_v48 = vpop.f32.mrb[240].mxu1 }
 0x414   :  { %v5770_v45 = vpop.f32.mrb[241].mxu1 }
 0x415   :  { %v5771_v8 = vadd.f32 %v5770_v45, %v5769_v48 }
 0x417   :  { %v9104_v53 = vadd.f32 %v5771_v8, %v9056_v32  ;;  %v5772_v28 = vpop.f32.mrb[242].mxu1 }
 0x418   :  { %v5773_v11 = vpop.f32.mrb[243].mxu1 }
 0x419   :  { %v5774_v14 = vadd.f32 %v5773_v11, %v5772_v28 }
 0x41b   :  { %v9107_v10 = vadd.f32 %v5774_v14, %v9059_v26  ;;  %v5775_v3 = vpop.f32.mrb[244].mxu1 }
 0x41c   :  { %v5776_v61 = vpop.f32.mrb[245].mxu1 }
 0x41d   :  { %v5777_v39 = vadd.f32 %v5776_v61, %v5775_v3 }
 0x41f   :  { %v9110_v34 = vadd.f32 %v5777_v39, %v9062_v56  ;;  %v5778_v2 = vpop.f32.mrb[246].mxu1 }
 0x420   :  { %v5779_v5 = vpop.f32.mrb[247].mxu1 }
 0x421   :  { %v5780_v16 = vadd.f32 %v5779_v5, %v5778_v2 }
 0x423   :  { %v9113_v1 = vadd.f32 %v5780_v16, %v9065_v30  ;;  %v5781_v32 = vpop.f32.mrb[248].mxu1 }
 0x424   :  { %v5782_v50 = vpop.f32.mrb[249].mxu1 }
 0x425   :  { %v5783_v33 = vadd.f32 %v5782_v50, %v5781_v32 }
 0x427   :  { %v9116_v49 = vadd.f32 %v5783_v33, %v9068_v17  ;;  %v5784_v26 = vpop.f32.mrb[250].mxu1 }
 0x428   :  { %v5785_v40 = vpop.f32.mrb[251].mxu1 }
 0x429   :  { %v5786_v25 = vadd.f32 %v5785_v40, %v5784_v26 }
 0x42b   :  { %v9119_v7 = vadd.f32 %v5786_v25, %v9071_v37  ;;  %v5787_v56 = vpop.f32.mrb[252].mxu1 }
 0x42c   :  { %v5788_v24 = vpop.f32.mrb[253].mxu1 }
 0x42d   :  { %v5789_v4 = vadd.f32 %v5788_v24, %v5787_v56 }
 0x42f   :  { %v9122_v44 = vadd.f32 %v5789_v4, %v9074_v60  ;;  %v5790_v30 = vpop.f32.mrb[254].mxu1 }
 0x430   :  { %v5791_v29 = vpop.f32.mrb[255].mxu1 }
 0x431   :  { %v5792_v17 = vadd.f32 %v5791_v29, %v5790_v30 }
 0x433   :  { %v9131_v38 = vadd.f32 %v5792_v17, %v9077_v35  ;;  %v4361_v37 = vpop.f32.mrb[96].mxu0  ;;  %v5825_v13 = vpop.f32.mrb[0].mxu1 }
 0x434   :  { %v7217_v41 = vadd.f32 %v4361_v37, %v9125_v36  ;;  %v4363_v23 = vpop.f32.mrb[97].mxu0  ;;  %v5826_v60 = vpop.f32.mrb[1].mxu1 }
 0x435   :  { %v7218_v18 = vadd.f32 %v4363_v23, %v9128_v21  ;;  %v5827_v47 = vadd.f32 %v5826_v60, %v5825_v13 }
 0x436   :  { %5326 = vst [vmem:[#allocation11] sm:$0xff] %v7217_v41 }
 0x437   :  { %5327 = vst [vmem:[#allocation11 + $0x8] sm:$0xff] %v7218_v18  ;;  %v5248_v0 = vadd.f32 %v5827_v47, %v9080_v57  ;;  %v4367_v63 = vpop.f32.mrb[98].mxu0  ;;  %v5828_v19 = vpop.f32.mrb[2].mxu1 }
 0x438   :  { %v7219_v46 = vadd.f32 %v4367_v63, %v9125_v36  ;;  %v4369_v52 = vpop.f32.mrb[99].mxu0  ;;  %v5829_v35 = vpop.f32.mrb[3].mxu1 }
 0x439   :  { %5328 = vst [vmem:[#allocation11 + $0x10] sm:$0xff] %v5248_v0  ;;  %v7220_v62 = vadd.f32 %v4369_v52, %v9128_v21  ;;  %v5830_v58 = vadd.f32 %v5829_v35, %v5828_v19 }
 0x43a   :  { %5329 = vst [vmem:[#allocation11 + $0x18] sm:$0xff] %v7219_v46 }
 0x43b   :  { %5330 = vst [vmem:[#allocation11 + $0x20] sm:$0xff] %v7220_v62  ;;  %v5253_v12 = vadd.f32 %v5830_v58, %v9083_v27  ;;  %v4373_v22 = vpop.f32.mrb[100].mxu0  ;;  %v5831_v43 = vpop.f32.mrb[4].mxu1 }
 0x43c   :  { %v7221_v42 = vadd.f32 %v4373_v22, %v9125_v36  ;;  %v4375_v51 = vpop.f32.mrb[101].mxu0  ;;  %v5832_v57 = vpop.f32.mrb[5].mxu1 }
 0x43d   :  { %5331 = vst [vmem:[#allocation11 + $0x28] sm:$0xff] %v5253_v12  ;;  %v7222_v48 = vadd.f32 %v4375_v51, %v9128_v21  ;;  %v5833_v45 = vadd.f32 %v5832_v57, %v5831_v43 }
 0x43e   :  { %5332 = vst [vmem:[#allocation11 + $0x30] sm:$0xff] %v7221_v42 }
 0x43f   :  { %5333 = vst [vmem:[#allocation11 + $0x38] sm:$0xff] %v7222_v48  ;;  %v5258_v8 = vadd.f32 %v5833_v45, %v9086_v59  ;;  %v4379_v28 = vpop.f32.mrb[102].mxu0  ;;  %v5834_v11 = vpop.f32.mrb[6].mxu1 }
 0x440   :  { %v7223_v14 = vadd.f32 %v4379_v28, %v9125_v36  ;;  %v4381_v3 = vpop.f32.mrb[103].mxu0  ;;  %v5835_v27 = vpop.f32.mrb[7].mxu1 }
 0x441   :  { %5334 = vst [vmem:[#allocation11 + $0x40] sm:$0xff] %v5258_v8  ;;  %v7224_v61 = vadd.f32 %v4381_v3, %v9128_v21  ;;  %v5836_v39 = vadd.f32 %v5835_v27, %v5834_v11 }
 0x442   :  { %5335 = vst [vmem:[#allocation11 + $0x48] sm:$0xff] %v7223_v14 }
 0x443   :  { %5336 = vst [vmem:[#allocation11 + $0x50] sm:$0xff] %v7224_v61  ;;  %v5263_v2 = vadd.f32 %v5836_v39, %v9089_v20  ;;  %v4385_v5 = vpop.f32.mrb[104].mxu0  ;;  %v5837_v16 = vpop.f32.mrb[8].mxu1 }
 0x444   :  { %v7225_v32 = vadd.f32 %v4385_v5, %v9125_v36  ;;  %v4387_v50 = vpop.f32.mrb[105].mxu0  ;;  %v5838_v59 = vpop.f32.mrb[9].mxu1 }
 0x445   :  { %5337 = vst [vmem:[#allocation11 + $0x58] sm:$0xff] %v5263_v2  ;;  %v7226_v33 = vadd.f32 %v4387_v50, %v9128_v21  ;;  %v5839_v26 = vadd.f32 %v5838_v59, %v5837_v16 }
 0x446   :  { %5338 = vst [vmem:[#allocation11 + $0x60] sm:$0xff] %v7225_v32 }
 0x447   :  { %5339 = vst [vmem:[#allocation11 + $0x68] sm:$0xff] %v7226_v33  ;;  %v5268_v40 = vadd.f32 %v5839_v26, %v9092_v9  ;;  %v4391_v25 = vpop.f32.mrb[106].mxu0  ;;  %v5840_v56 = vpop.f32.mrb[10].mxu1 }
 0x448   :  { %v7227_v24 = vadd.f32 %v4391_v25, %v9125_v36  ;;  %v4393_v4 = vpop.f32.mrb[107].mxu0  ;;  %v5841_v20 = vpop.f32.mrb[11].mxu1 }
 0x449   :  { %5340 = vst [vmem:[#allocation11 + $0x70] sm:$0xff] %v5268_v40  ;;  %v7228_v30 = vadd.f32 %v4393_v4, %v9128_v21  ;;  %v5842_v29 = vadd.f32 %v5841_v20, %v5840_v56 }
 0x44a   :  { %5341 = vst [vmem:[#allocation11 + $0x78] sm:$0xff] %v7227_v24 }
 0x44b   :  { %5342 = vst [vmem:[#allocation11 + $0x80] sm:$0xff] %v7228_v30  ;;  %v5273_v31 = vadd.f32 %v5842_v29, %v9095_v15  ;;  %v4397_v17 = vpop.f32.mrb[108].mxu0  ;;  %v5843_v54 = vpop.f32.mrb[12].mxu1 }
 0x44c   :  { %v7229_v37 = vadd.f32 %v4397_v17, %v9125_v36  ;;  %v4399_v13 = vpop.f32.mrb[109].mxu0  ;;  %v5844_v9 = vpop.f32.mrb[13].mxu1 }
 0x44d   :  { %5343 = vst [vmem:[#allocation11 + $0x88] sm:$0xff] %v5273_v31  ;;  %v7230_v41 = vadd.f32 %v4399_v13, %v9128_v21  ;;  %v5845_v23 = vadd.f32 %v5844_v9, %v5843_v54 }
 0x44e   :  { %5344 = vst [vmem:[#allocation11 + $0x90] sm:$0xff] %v7229_v37 }
 0x44f   :  { %5345 = vst [vmem:[#allocation11 + $0x98] sm:$0xff] %v7230_v41  ;;  %v5278_v60 = vadd.f32 %v5845_v23, %v9098_v6  ;;  %v4403_v18 = vpop.f32.mrb[110].mxu0  ;;  %v5846_v47 = vpop.f32.mrb[14].mxu1 }
 0x450   :  { %v7231_v0 = vadd.f32 %v4403_v18, %v9125_v36  ;;  %v4405_v63 = vpop.f32.mrb[111].mxu0  ;;  %v5847_v15 = vpop.f32.mrb[15].mxu1 }
 0x451   :  { %5346 = vst [vmem:[#allocation11 + $0xa0] sm:$0xff] %v5278_v60  ;;  %v7232_v19 = vadd.f32 %v4405_v63, %v9128_v21  ;;  %v5848_v46 = vadd.f32 %v5847_v15, %v5846_v47 }
 0x452   :  { %5347 = vst [vmem:[#allocation11 + $0xa8] sm:$0xff] %v7231_v0 }
 0x453   :  { %5348 = vst [vmem:[#allocation11 + $0xb0] sm:$0xff] %v7232_v19  ;;  %v5283_v52 = vadd.f32 %v5848_v46, %v9101_v55  ;;  %v4409_v35 = vpop.f32.mrb[112].mxu0  ;;  %v5849_v62 = vpop.f32.mrb[16].mxu1 }
 0x454   :  { %v7233_v58 = vadd.f32 %v4409_v35, %v9125_v36  ;;  %v4411_v12 = vpop.f32.mrb[113].mxu0  ;;  %v5850_v6 = vpop.f32.mrb[17].mxu1 }
 0x455   :  { %5349 = vst [vmem:[#allocation11 + $0xb8] sm:$0xff] %v5283_v52  ;;  %v7234_v22 = vadd.f32 %v4411_v12, %v9128_v21  ;;  %v5851_v43 = vadd.f32 %v5850_v6, %v5849_v62 }
 0x456   :  { %5350 = vst [vmem:[#allocation11 + $0xc0] sm:$0xff] %v7233_v58 }
 0x457   :  { %5351 = vst [vmem:[#allocation11 + $0xc8] sm:$0xff] %v7234_v22  ;;  %v5288_v42 = vadd.f32 %v5851_v43, %v9104_v53  ;;  %v4415_v51 = vpop.f32.mrb[114].mxu0  ;;  %v5852_v57 = vpop.f32.mrb[18].mxu1 }
 0x458   :  { %v7235_v48 = vadd.f32 %v4415_v51, %v9125_v36  ;;  %v4417_v45 = vpop.f32.mrb[115].mxu0  ;;  %v5853_v55 = vpop.f32.mrb[19].mxu1 }
 0x459   :  { %5352 = vst [vmem:[#allocation11 + $0xd0] sm:$0xff] %v5288_v42  ;;  %v7236_v8 = vadd.f32 %v4417_v45, %v9128_v21  ;;  %v5854_v28 = vadd.f32 %v5853_v55, %v5852_v57 }
 0x45a   :  { %5353 = vst [vmem:[#allocation11 + $0xd8] sm:$0xff] %v7235_v48 }
 0x45b   :  { %5354 = vst [vmem:[#allocation11 + $0xe0] sm:$0xff] %v7236_v8  ;;  %v5293_v11 = vadd.f32 %v5854_v28, %v9107_v10  ;;  %v4421_v14 = vpop.f32.mrb[116].mxu0  ;;  %v5855_v3 = vpop.f32.mrb[20].mxu1 }
 0x45c   :  { %v7237_v27 = vadd.f32 %v4421_v14, %v9125_v36  ;;  %v4423_v61 = vpop.f32.mrb[117].mxu0  ;;  %v5856_v53 = vpop.f32.mrb[21].mxu1 }
 0x45d   :  { %5355 = vst [vmem:[#allocation11 + $0xe8] sm:$0xff] %v5293_v11  ;;  %v7238_v39 = vadd.f32 %v4423_v61, %v9128_v21  ;;  %v5857_v2 = vadd.f32 %v5856_v53, %v5855_v3 }
 0x45e   :  { %5356 = vst [vmem:[#allocation11 + $0xf0] sm:$0xff] %v7237_v27 }
 0x45f   :  { %5357 = vst [vmem:[#allocation11 + $0xf8] sm:$0xff] %v7238_v39  ;;  %v5298_v5 = vadd.f32 %v5857_v2, %v9110_v34  ;;  %v4427_v16 = vpop.f32.mrb[118].mxu0  ;;  %v5858_v32 = vpop.f32.mrb[22].mxu1 }
 0x460   :  { %v7239_v50 = vadd.f32 %v4427_v16, %v9125_v36  ;;  %v4429_v59 = vpop.f32.mrb[119].mxu0  ;;  %v5859_v10 = vpop.f32.mrb[23].mxu1 }
 0x461   :  { %5358 = vst [vmem:[#allocation11 + $0x100] sm:$0xff] %v5298_v5  ;;  %v7240_v33 = vadd.f32 %v4429_v59, %v9128_v21  ;;  %v5860_v26 = vadd.f32 %v5859_v10, %v5858_v32 }
 0x462   :  { %5359 = vst [vmem:[#allocation11 + $0x108] sm:$0xff] %v7239_v50 }
 0x463   :  { %5360 = vst [vmem:[#allocation11 + $0x110] sm:$0xff] %v7240_v33  ;;  %v5303_v40 = vadd.f32 %v5860_v26, %v9113_v1  ;;  %v4433_v25 = vpop.f32.mrb[120].mxu0  ;;  %v5861_v56 = vpop.f32.mrb[24].mxu1 }
 0x464   :  { %v7241_v24 = vadd.f32 %v4433_v25, %v9125_v36  ;;  %v4435_v4 = vpop.f32.mrb[121].mxu0  ;;  %v5862_v34 = vpop.f32.mrb[25].mxu1 }
 0x465   :  { %5361 = vst [vmem:[#allocation11 + $0x118] sm:$0xff] %v5303_v40  ;;  %v7242_v20 = vadd.f32 %v4435_v4, %v9128_v21  ;;  %v5863_v30 = vadd.f32 %v5862_v34, %v5861_v56 }
 0x466   :  { %5362 = vst [vmem:[#allocation11 + $0x120] sm:$0xff] %v7241_v24 }
 0x467   :  { %5363 = vst [vmem:[#allocation11 + $0x128] sm:$0xff] %v7242_v20  ;;  %v5308_v29 = vadd.f32 %v5863_v30, %v9116_v49  ;;  %v4439_v31 = vpop.f32.mrb[122].mxu0  ;;  %v5864_v17 = vpop.f32.mrb[26].mxu1 }
 0x468   :  { %v7243_v54 = vadd.f32 %v4439_v31, %v9125_v36  ;;  %v4441_v37 = vpop.f32.mrb[123].mxu0  ;;  %v5865_v1 = vpop.f32.mrb[27].mxu1 }
 0x469   :  { %5364 = vst [vmem:[#allocation11 + $0x130] sm:$0xff] %v5308_v29  ;;  %v7244_v13 = vadd.f32 %v4441_v37, %v9128_v21  ;;  %v5866_v9 = vadd.f32 %v5865_v1, %v5864_v17 }
 0x46a   :  { %5365 = vst [vmem:[#allocation11 + $0x138] sm:$0xff] %v7243_v54 }
 0x46b   :  { %5366 = vst [vmem:[#allocation11 + $0x140] sm:$0xff] %v7244_v13  ;;  %v5313_v41 = vadd.f32 %v5866_v9, %v9119_v7  ;;  %v4445_v23 = vpop.f32.mrb[124].mxu0  ;;  %v5867_v60 = vpop.f32.mrb[28].mxu1 }
 0x46c   :  { %v7245_v18 = vadd.f32 %v4445_v23, %v9125_v36  ;;  %v4447_v47 = vpop.f32.mrb[125].mxu0  ;;  %v5868_v49 = vpop.f32.mrb[29].mxu1 }
 0x46d   :  { %5367 = vst [vmem:[#allocation11 + $0x148] sm:$0xff] %v5313_v41  ;;  %v7246_v0 = vadd.f32 %v4447_v47, %v9128_v21  ;;  %v5869_v63 = vadd.f32 %v5868_v49, %v5867_v60 }
 0x46e   :  { %5368 = vst [vmem:[#allocation11 + $0x150] sm:$0xff] %v7245_v18 }
 0x46f   :  { %5369 = vst [vmem:[#allocation11 + $0x158] sm:$0xff] %v7246_v0  ;;  %v5318_v15 = vadd.f32 %v5869_v63, %v9122_v44  ;;  %v4451_v19 = vpop.f32.mrb[126].mxu0  ;;  %v5870_v46 = vpop.f32.mrb[30].mxu1 }
 0x470   :  { %v7247_v52 = vadd.f32 %v4451_v19, %v9125_v36  ;;  %v4453_v35 = vpop.f32.mrb[127].mxu0  ;;  %v5871_v7 = vpop.f32.mrb[31].mxu1 }
 0x471   :  { %5370 = vst [vmem:[#allocation11 + $0x160] sm:$0xff] %v5318_v15  ;;  %v7248_v62 = vadd.f32 %v4453_v35, %v9128_v21  ;;  %v5872_v58 = vadd.f32 %v5871_v7, %v5870_v46 }
 0x472   :  { %5371 = vst [vmem:[#allocation11 + $0x168] sm:$0xff] %v7247_v52 }
 0x473   :  { %5372 = vst [vmem:[#allocation11 + $0x170] sm:$0xff] %v7248_v62  ;;  %v5323_v12 = vadd.f32 %v5872_v58, %v9131_v38 }
 0x475   :  { %5373 = vst [vmem:[#allocation11 + $0x178] sm:$0xff] %v5323_v12 }
 0x476   :  { %7832 = shalt.err (!%p7829_p2)
}
 0x477   :  { %s7833_s8 = scalar_lea.hbm %s9201_s5, 6144 }
 0x478   :  { %p7834_p3 = scmp.ne.s32.totalorder %s9201_s5, %s7833_s8  ;;  %p7837_p4 = scmp.lt.u32.totalorder %s7833_s8, %s9201_s5 }
 0x47a   :  { %p7839_p5 = pnand %p7837_p4, %p7834_p3 }
 0x47c   :  { %7842 = shalt.err (!%p7839_p5)
}
 0x47d   :  { %5385 = dma.vmem_to_hbm [thread:$0]  %s5380_s3, 6144, %s9201_s5, [#allocation4], %s7856_s18, %s7856_s18, %s7857_s19  }
 0x47e   :  { %7849 = dma.done.wait [#allocation4], 6144  }
 0x47f   :  { %7850 = vsyncadd [#allocation4], 4294961152 }
 0x480   :  { %5389 = vsyncpa [#allocation3], 1 }
 0x481   :  { %5390 = vsyncpa [#allocation6], 1 }
 0x482   :  { %5391 = vsyncpa [#allocation9], 1 }
 0x483   :  { %5392 = vsyncpa [#allocation4], 1 }

</bundles_post_ra>
